<compile_context>
chip_gen: v6e
topology: v6e:2x2x1
jax: 0.10.0
libtpu: 0.0.40
codegen_flags: <defaults>
</compile_context>

<pallas_src>
import functools

import jax
import jax.numpy as jnp
from jax.experimental import pallas as pl
from jax.experimental.pallas import tpu as pltpu

LEAKY = 0.1
WN = 16                       # WeightNet output channels (weightnet=16)
H = 8                         # WeightNet hidden units (hidden_unit=[8, 8])
BIG = 1e30                    # mask value for already-selected neighbors
BN_EPS = 1e-5


def _vmem_limit_and_tq_target():
    """Generation-aware scoped-VMEM limit and query-row-block target.

    v7x: 64 MiB/TC  -> 48 MiB limit, TQ target 256.
    v5e/v6e: 128 MiB -> ~100 MiB limit, TQ target 512 (bigger row blocks
    amortize per-step overhead; v5e's 128-wide MXU is also fine with 256/512
    and v5e/v6e cannot be cheaply told apart by VMEM size alone).
    """
    vmem = 64 * 1024 * 1024
    try:
        vmem = int(getattr(pltpu.get_tpu_info(), "vmem_capacity_bytes", vmem))
    except Exception:
        pass
    if vmem >= 96 * 1024 * 1024:
        return 100 * 1024 * 1024, 512
    return 48 * 1024 * 1024, 256


VMEM_LIMIT, TQ_TARGET = _vmem_limit_and_tq_target()


def _pick_block(n, target):
    """Largest block size that divides n, is a lane multiple (128) and is
    <= target; falls back to the full extent for small / awkward n."""
    if n <= target:
        return n
    t = (target // 128) * 128
    while t >= 128:
        if n % t == 0:
            return t
        t -= 128
    return n   # TODO(synk): pad N to a multiple of 128 instead.


# --------------------------------------------------------------------------
# PointConv kernel: one grid step == one batch element x one query-row block.
# --------------------------------------------------------------------------
def make_pointconv_kernel(K, apply_act):
    def kernel(xyz_nl_ref, xyz_cm_ref, xyz_q_ref, pts_ref, scale_ref, shift_ref,
               w1_ref, b1_ref, w2_ref, b2_ref, w3_ref, b3_ref,
               wl_ref, bl_ref, out_ref):
        xyz_nl = xyz_nl_ref[0]                        # (N, 3)  channel-last
        xyzT = xyz_cm_ref[0]                          # (3, N)  channel-major
        qT = xyz_q_ref[0]                             # (3, TQ) query block
        ptsT = pts_ref[0]                             # (D, N)  pre-BN features
        N = xyz_nl.shape[0]
        D = ptsT.shape[0]
        TQ = qT.shape[1]
        c_all = D + 3

        # Fused BatchNorm-affine + LeakyReLU of the *previous* layer's output.
        if apply_act:
            y = ptsT * scale_ref[...] + shift_ref[...]
            ptsT = jnp.maximum(y, LEAKY * y)

        # Reduced pairwise squared distances, (N points) x (TQ queries):
        #   d[m, n] = ||x_m||^2 - 2 x_m . q_n
        # The per-query constant ||q_n||^2 is dropped (the per-column argmin is
        # invariant to it) and the -2 is folded into the tiny (3, TQ) operand,
        # saving two full (N, TQ) VPU passes.
        sqm = jnp.sum(xyz_nl * xyz_nl, axis=1, keepdims=True)            # (N, 1)
        d = jnp.dot(xyz_nl, qT * (-2.0),
                    preferred_element_type=jnp.float32) + sqm            # (N, TQ)

        XPT = jnp.concatenate([xyzT, ptsT], axis=0)                      # (c_all, N)
        XZq = jnp.concatenate([qT, jnp.zeros((D, TQ), jnp.float32)], axis=0)
        rr = jax.lax.broadcasted_iota(jnp.int32, (N, TQ), 0)             # point idx

        acc3 = jnp.zeros((c_all, WN, TQ), jnp.float32)
        for _ in range(K):
            # Exact kNN step: smallest distance, smallest-index tie-break.
            colmin = jnp.min(d, axis=0, keepdims=True)                   # (1, TQ)
            cand = jnp.where(d == colmin, rr, N)                         # (N, TQ)
            amin = jnp.min(cand, axis=0, keepdims=True)                  # (1, TQ)
            pred = cand == amin            # exact one-hot column mask (reused 3x)
            onehot = jnp.where(pred, 1.0, 0.0)                           # (N, TQ)

            # Fused gather of [neigh_xyz - query_xyz | neigh_feats] per query.
            gT = jnp.dot(XPT, onehot,
                         preferred_element_type=jnp.float32) - XZq       # (c_all, TQ)

            # WeightNet (3 -> 8 -> 8 -> WN, ReLU) on this iteration's offsets.
            h = jnp.maximum(jnp.dot(w1_ref[...], gT[:3, :],
                                    preferred_element_type=jnp.float32) + b1_ref[...], 0.0)
            h = jnp.maximum(jnp.dot(w2_ref[...], h,
                                    preferred_element_type=jnp.float32) + b2_ref[...], 0.0)
            wk = jnp.maximum(jnp.dot(w3_ref[...], h,
                                     preferred_element_type=jnp.float32) + b3_ref[...], 0.0)  # (WN, TQ)

            # Per-point contraction R[c, w, n] += g[c, n] * w[w, n] — lane-dense
            # on TQ (full VPU lanes), no per-iteration relayout.
            acc3 = acc3 + gT[:, None, :] * wk[None, :, :]

            # Exclude the chosen neighbor for the next iteration.
            d = jnp.where(pred, BIG, d)

        # Final linear as ONE wide matmul (torch nn.Linear layout:
        # wlT[c_out, c*WN + w]) straight into a channel-major, lane-dense store.
        R = acc3.reshape(c_all * WN, TQ)
        out_ref[0] = jnp.dot(wl_ref[...], R,
                             preferred_element_type=jnp.float32) + bl_ref[...]
    return kernel


def pointconv_pallas(xyz_nl, xyz_cm, ptsT, scale, shift, p, apply_act):
    B, N, _ = xyz_nl.shape
    D = ptsT.shape[1]
    K = p['K']
    assert K <= N, "neighbors (K) must not exceed the number of points"
    c_all = D + 3
    cout = p['wlT'].shape[0]
    TQ = _pick_block(N, TQ_TARGET)
    kernel = make_pointconv_kernel(K, apply_act)

    def const(shape):
        return pl.BlockSpec(shape, lambda b, q: (0,) * len(shape))

    return pl.pallas_call(
        kernel,
        out_shape=jax.ShapeDtypeStruct((B, cout, N), jnp.float32),
        # (batch, query-row-block) grid; both axes independent -> "parallel"
        # so v7x's two TensorCores split B * (N // TQ) steps.
        grid=(B, N // TQ),
        in_specs=[
            pl.BlockSpec((1, N, 3), lambda b, q: (b, 0, 0)),   # all points (channel-last)
            pl.BlockSpec((1, 3, N), lambda b, q: (b, 0, 0)),   # all points (channel-major)
            pl.BlockSpec((1, 3, TQ), lambda b, q: (b, 0, q)),  # query block
            pl.BlockSpec((1, D, N), lambda b, q: (b, 0, 0)),   # features (channel-major)
            const((D, 1)), const((D, 1)),
            const((H, 3)), const((H, 1)),
            const((H, H)), const((H, 1)),
            const((WN, H)), const((WN, 1)),
            const((cout, c_all * WN)), const((cout, 1)),
        ],
        out_specs=pl.BlockSpec((1, cout, TQ), lambda b, q: (b, 0, q)),
        compiler_params=pltpu.CompilerParams(
            dimension_semantics=("parallel", "parallel"),
            vmem_limit_bytes=VMEM_LIMIT),
    )(xyz_nl, xyz_cm, xyz_cm, ptsT, scale, shift,
      p['w1T'], p['b1'], p['w2T'], p['b2'], p['w3T'], p['b3'],
      p['wlT'], p['blT'])


# --------------------------------------------------------------------------
# Fused head: BN-affine+Leaky of the last PointConv, all mlp Conv1d+Leaky
# layers, the final fc, residual add with coarse_flow and clamp — one
# pallas_call, channel-major (C, N) throughout (no transposes), tiled over N.
# --------------------------------------------------------------------------
def make_head_kernel(num_mlp, clamp_lo, clamp_hi):
    def kernel(*refs):
        x_ref, scale_ref, shift_ref, cf_ref = refs[:4]
        w_refs = refs[4:4 + 2 * (num_mlp + 1)]
        np_ref, flow_ref = refs[-2:]

        x = x_ref[0]                                           # (C0, TN) pre-BN
        y = x * scale_ref[...] + shift_ref[...]
        x = jnp.maximum(y, LEAKY * y)

        for i in range(num_mlp):
            wT = w_refs[2 * i][...]                            # (Cout, Cin)
            b = w_refs[2 * i + 1][...]                         # (Cout, 1)
            y = jnp.dot(wT, x, preferred_element_type=jnp.float32) + b
            x = jnp.maximum(y, LEAKY * y)
        np_ref[0] = x                                          # (C_last, TN)

        wT = w_refs[2 * num_mlp][...]                          # (3, C_last)
        b = w_refs[2 * num_mlp + 1][...]                       # (3, 1)
        res = jnp.dot(wT, x, preferred_element_type=jnp.float32) + b
        flow_ref[0] = jnp.clip(res + cf_ref[0], clamp_lo, clamp_hi)
    return kernel


def head_pallas(x, scale, shift, coarse_flow, mlps, fc, clamp):
    B, c0, N = x.shape
    num_mlp = len(mlps)
    c_last = mlps[-1]['wT'].shape[0] if num_mlp else c0
    TN = _pick_block(N, TQ_TARGET)
    kernel = make_head_kernel(num_mlp, float(clamp[0]), float(clamp[1]))

    in_specs = [
        pl.BlockSpec((1, c0, TN), lambda b, q: (b, 0, q)),
        pl.BlockSpec((c0, 1), lambda b, q: (0, 0)),
        pl.BlockSpec((c0, 1), lambda b, q: (0, 0)),
        pl.BlockSpec((1, 3, TN), lambda b, q: (b, 0, q)),
    ]
    args = [x, scale, shift, coarse_flow]
    for p in mlps + [fc]:
        args += [p['wT'], p['b']]
        in_specs += [pl.BlockSpec(p['wT'].shape, lambda b, q: (0, 0)),
                     pl.BlockSpec(p['b'].shape, lambda b, q: (0, 0))]

    return pl.pallas_call(
        kernel,
        out_shape=(jax.ShapeDtypeStruct((B, c_last, N), jnp.float32),
                   jax.ShapeDtypeStruct((B, 3, N), jnp.float32)),
        grid=(B, N // TN),
        in_specs=in_specs,
        out_specs=(pl.BlockSpec((1, c_last, TN), lambda b, q: (b, 0, q)),
                   pl.BlockSpec((1, 3, TN), lambda b, q: (b, 0, q))),
        compiler_params=pltpu.CompilerParams(
            dimension_semantics=("parallel", "parallel"),
            vmem_limit_bytes=VMEM_LIMIT),
    )(*args)


# --------------------------------------------------------------------------
# Full forward (matches SceneFlowEstimation.forward)
# --------------------------------------------------------------------------
def forward(xyz_bcn, feats_bcn, coarse_flow_bcn, up_flow_bcn, params,
            clamp=(-200.0, 200.0)):
    xyz_nl = jnp.transpose(xyz_bcn, (0, 2, 1))                 # (B, N, 3) channel-last
    parts = [xyz_bcn, feats_bcn, coarse_flow_bcn]
    if up_flow_bcn is not None:
        parts.append(up_flow_bcn)
    x = jnp.concatenate(parts, axis=1)                         # (B, D0, N) channel-major

    # Per-channel affine folded into the consumer kernel (identity for layer 0).
    scale = jnp.ones((x.shape[1], 1), jnp.float32)
    shift = jnp.zeros((x.shape[1], 1), jnp.float32)
    for li, p in enumerate(params['pointconvs']):
        pre = pointconv_pallas(xyz_nl, xyz_bcn, x, scale, shift, p,
                               apply_act=(li > 0))
        # Training-mode BatchNorm1d statistics over (B, N): tiny cross-batch
        # reduction kept in XLA; the affine + LeakyReLU is applied inside the
        # NEXT kernel, so the normalized activations never round-trip HBM.
        # TODO(synk): eval-mode running-stats variant if required for parity.
        mean = jnp.mean(pre, axis=(0, 2))
        var = jnp.mean(jnp.square(pre - mean[None, :, None]), axis=(0, 2))
        s = p['bn_gamma'] * jax.lax.rsqrt(var + BN_EPS)
        scale = s[:, None]
        shift = (p['bn_beta'] - mean * s)[:, None]
        x = pre

    new_points, flow = head_pallas(x, scale, shift, coarse_flow_bcn,
                                   params['mlps'], params['fc'], clamp)
    return new_points, flow


# --------------------------------------------------------------------------
# Deterministic parameter construction (shapes follow the torch __init__;
# weights are stored pre-transposed / channel-major for the kernels:
# wlT matches torch nn.Linear.weight (cout, c_all*WN) directly).
# --------------------------------------------------------------------------
def _init(key, shape, scale=0.1):
    return scale * jax.random.normal(key, shape, jnp.float32)


def init_params(key, feat_ch, up_flow_ch, coarse_flow_ch, channels, mlp, K):
    params = {'pointconvs': [], 'mlps': [], 'fc': None}
    last = feat_ch + coarse_flow_ch + up_flow_ch + 3
    keys = iter(jax.random.split(key, 128))
    for ch_out in channels:
        c_all = last + 3
        params['pointconvs'].append({
            'K': K,
            'w1T': _init(next(keys), (H, 3)),   'b1': _init(next(keys), (H, 1)),
            'w2T': _init(next(keys), (H, H)),   'b2': _init(next(keys), (H, 1)),
            'w3T': _init(next(keys), (WN, H)),  'b3': _init(next(keys), (WN, 1)),
            'wlT': _init(next(keys), (ch_out, c_all * WN)),
            'blT': _init(next(keys), (ch_out, 1)),
            'bn_gamma': jnp.ones((ch_out,), jnp.float32),
            'bn_beta': jnp.zeros((ch_out,), jnp.float32),
        })
        last = ch_out
    for ch_out in mlp:
        params['mlps'].append({'wT': _init(next(keys), (ch_out, last)),
                               'b': _init(next(keys), (ch_out, 1))})
        last = ch_out
    params['fc'] = {'wT': _init(next(keys), (3, last)),
                    'b': _init(next(keys), (3, 1))}
    return params


if __name__ == "__main__":
    key = jax.random.PRNGKey(0)
    B, N = 2, 16
    feat_ch, up_flow_ch, coarse_flow_ch = 4, 3, 3
    channels = [16, 16]
    mlp = [16, 8]
    neighbors = 8
    clamp = (-200.0, 200.0)

    kp, kx, kf, kc, ku = jax.random.split(key, 5)
    params = init_params(kp, feat_ch, up_flow_ch, coarse_flow_ch,
                         channels, mlp, neighbors)

    xyz = jax.random.normal(kx, (B, 3, N), jnp.float32)                 # [B, 3, N]
    feats = jax.random.normal(kf, (B, feat_ch, N), jnp.float32)         # [B, C1, N]
    coarse_flow = jax.random.normal(kc, (B, 3, N), jnp.float32)         # [B, 3, N]
    up_flow = jax.random.normal(ku, (B, up_flow_ch, N), jnp.float32)    # [B, 3, N]

    fwd = jax.jit(functools.partial(forward, params=params, clamp=clamp))
    new_points, flow = fwd(xyz, feats, coarse_flow, up_flow)
    jax.block_until_ready((new_points, flow))

    assert new_points.shape == (B, mlp[-1], N), new_points.shape
    assert flow.shape == (B, 3, N), flow.shape
    assert bool(jnp.all(jnp.isfinite(new_points)))
    assert bool(jnp.all(jnp.isfinite(flow)))
    assert bool(jnp.all(flow >= clamp[0])) and bool(jnp.all(flow <= clamp[1]))
    print("KERNEL_OK")
</pallas_src>

<mosaic_0001>
module attributes {stable_mosaic.version = 11 : i64} {
  func.func @kernel(%arg0: i32, %arg1: i32, %arg2: memref<1x16x16xf32, #tpu.memory_space<vmem>>, %arg3: memref<16x1xf32, #tpu.memory_space<vmem>>, %arg4: memref<16x1xf32, #tpu.memory_space<vmem>>, %arg5: memref<1x3x16xf32, #tpu.memory_space<vmem>>, %arg6: memref<16x16xf32, #tpu.memory_space<vmem>>, %arg7: memref<16x1xf32, #tpu.memory_space<vmem>>, %arg8: memref<8x16xf32, #tpu.memory_space<vmem>>, %arg9: memref<8x1xf32, #tpu.memory_space<vmem>>, %arg10: memref<3x8xf32, #tpu.memory_space<vmem>>, %arg11: memref<3x1xf32, #tpu.memory_space<vmem>>, %arg12: memref<1x8x16xf32, #tpu.memory_space<vmem>>, %arg13: memref<1x3x16xf32, #tpu.memory_space<vmem>>) attributes {dimension_semantics = [#tpu.dimension_semantics<parallel>, #tpu.dimension_semantics<parallel>], iteration_bounds = array<i64: 2, 1>, scalar_prefetch = 0 : i64, scratch_operands = 0 : i64, tpu.core_type = #tpu.core_type<tc>, window_params = [{transform_indices = @transform_0, window_bounds = array<i64: 1, 16, 16>}, {pipeline_mode = #tpu.pipeline_mode<synchronous>, transform_indices = @transform_1, window_bounds = array<i64: 16, 1>}, {pipeline_mode = #tpu.pipeline_mode<synchronous>, transform_indices = @transform_2, window_bounds = array<i64: 16, 1>}, {transform_indices = @transform_3, window_bounds = array<i64: 1, 3, 16>}, {pipeline_mode = #tpu.pipeline_mode<synchronous>, transform_indices = @transform_4, window_bounds = array<i64: 16, 16>}, {pipeline_mode = #tpu.pipeline_mode<synchronous>, transform_indices = @transform_5, window_bounds = array<i64: 16, 1>}, {pipeline_mode = #tpu.pipeline_mode<synchronous>, transform_indices = @transform_6, window_bounds = array<i64: 8, 16>}, {pipeline_mode = #tpu.pipeline_mode<synchronous>, transform_indices = @transform_7, window_bounds = array<i64: 8, 1>}, {pipeline_mode = #tpu.pipeline_mode<synchronous>, transform_indices = @transform_8, window_bounds = array<i64: 3, 8>}, {pipeline_mode = #tpu.pipeline_mode<synchronous>, transform_indices = @transform_9, window_bounds = array<i64: 3, 1>}, {transform_indices = @transform_10, window_bounds = array<i64: 1, 8, 16>}, {transform_indices = @transform_11, window_bounds = array<i64: 1, 3, 16>}]} {
    %c0 = arith.constant 0 : index
    %c0_0 = arith.constant 0 : index
    %c0_1 = arith.constant 0 : index
    %0 = vector.load %arg2[%c0, %c0_0, %c0_1] : memref<1x16x16xf32, #tpu.memory_space<vmem>>, vector<1x16x16xf32>
    %1 = vector.shape_cast %0 : vector<1x16x16xf32> to vector<16x16xf32>
    %c0_2 = arith.constant 0 : index
    %c0_3 = arith.constant 0 : index
    %2 = vector.load %arg3[%c0_2, %c0_3] : memref<16x1xf32, #tpu.memory_space<vmem>>, vector<16x1xf32>
    %3 = vector.broadcast %2 : vector<16x1xf32> to vector<16x16xf32>
    %4 = arith.mulf %1, %3 : vector<16x16xf32>
    %c0_4 = arith.constant 0 : index
    %c0_5 = arith.constant 0 : index
    %5 = vector.load %arg4[%c0_4, %c0_5] : memref<16x1xf32, #tpu.memory_space<vmem>>, vector<16x1xf32>
    %6 = vector.broadcast %5 : vector<16x1xf32> to vector<16x16xf32>
    %7 = arith.addf %4, %6 : vector<16x16xf32>
    %cst = arith.constant 1.000000e-01 : f32
    %8 = vector.broadcast %cst : f32 to vector<16x16xf32>
    %9 = arith.mulf %8, %7 : vector<16x16xf32>
    %10 = arith.maximumf %7, %9 : vector<16x16xf32>
    %c0_6 = arith.constant 0 : index
    %c0_7 = arith.constant 0 : index
    %11 = vector.load %arg6[%c0_6, %c0_7] : memref<16x16xf32, #tpu.memory_space<vmem>>, vector<16x16xf32>
    %c0_8 = arith.constant 0 : index
    %c0_9 = arith.constant 0 : index
    %12 = vector.load %arg7[%c0_8, %c0_9] : memref<16x1xf32, #tpu.memory_space<vmem>>, vector<16x1xf32>
    %cst_10 = arith.constant dense<0.000000e+00> : vector<16x16xf32>
    %13 = tpu.matmul %11, %10, %cst_10 {dimension_numbers = #tpu.dot_dimension_numbers<[1], [0], [0], [1], [0, 0, 1, 1], [], []>} : vector<16x16xf32>, vector<16x16xf32>, vector<16x16xf32> -> vector<16x16xf32>
    %14 = vector.broadcast %12 : vector<16x1xf32> to vector<16x16xf32>
    %15 = arith.addf %13, %14 : vector<16x16xf32>
    %cst_11 = arith.constant 1.000000e-01 : f32
    %16 = vector.broadcast %cst_11 : f32 to vector<16x16xf32>
    %17 = arith.mulf %16, %15 : vector<16x16xf32>
    %18 = arith.maximumf %15, %17 : vector<16x16xf32>
    %c0_12 = arith.constant 0 : index
    %c0_13 = arith.constant 0 : index
    %19 = vector.load %arg8[%c0_12, %c0_13] : memref<8x16xf32, #tpu.memory_space<vmem>>, vector<8x16xf32>
    %c0_14 = arith.constant 0 : index
    %c0_15 = arith.constant 0 : index
    %20 = vector.load %arg9[%c0_14, %c0_15] : memref<8x1xf32, #tpu.memory_space<vmem>>, vector<8x1xf32>
    %cst_16 = arith.constant dense<0.000000e+00> : vector<8x16xf32>
    %21 = tpu.matmul %19, %18, %cst_16 {dimension_numbers = #tpu.dot_dimension_numbers<[1], [0], [0], [1], [0, 0, 1, 1], [], []>} : vector<8x16xf32>, vector<16x16xf32>, vector<8x16xf32> -> vector<8x16xf32>
    %22 = vector.broadcast %20 : vector<8x1xf32> to vector<8x16xf32>
    %23 = arith.addf %21, %22 : vector<8x16xf32>
    %cst_17 = arith.constant 1.000000e-01 : f32
    %24 = vector.broadcast %cst_17 : f32 to vector<8x16xf32>
    %25 = arith.mulf %24, %23 : vector<8x16xf32>
    %26 = arith.maximumf %23, %25 : vector<8x16xf32>
    %c0_18 = arith.constant 0 : index
    %c0_19 = arith.constant 0 : index
    %c0_20 = arith.constant 0 : index
    %27 = vector.load %arg12[%c0_18, %c0_19, %c0_20] : memref<1x8x16xf32, #tpu.memory_space<vmem>>, vector<1x8x16xf32>
    %28 = vector.shape_cast %27 : vector<1x8x16xf32> to vector<8x16xf32>
    %29 = vector.shape_cast %26 : vector<8x16xf32> to vector<1x8x16xf32>
    tpu.vector_store %arg12[%c0_18, %c0_19, %c0_20], %29 {strides = array<i32>} : memref<1x8x16xf32, #tpu.memory_space<vmem>>, vector<1x8x16xf32>,
    %c0_21 = arith.constant 0 : index
    %c0_22 = arith.constant 0 : index
    %30 = vector.load %arg10[%c0_21, %c0_22] : memref<3x8xf32, #tpu.memory_space<vmem>>, vector<3x8xf32>
    %c0_23 = arith.constant 0 : index
    %c0_24 = arith.constant 0 : index
    %31 = vector.load %arg11[%c0_23, %c0_24] : memref<3x1xf32, #tpu.memory_space<vmem>>, vector<3x1xf32>
    %cst_25 = arith.constant dense<0.000000e+00> : vector<3x16xf32>
    %32 = tpu.matmul %30, %26, %cst_25 {dimension_numbers = #tpu.dot_dimension_numbers<[1], [0], [0], [1], [0, 0, 1, 1], [], []>} : vector<3x8xf32>, vector<8x16xf32>, vector<3x16xf32> -> vector<3x16xf32>
    %33 = vector.broadcast %31 : vector<3x1xf32> to vector<3x16xf32>
    %34 = arith.addf %32, %33 : vector<3x16xf32>
    %c0_26 = arith.constant 0 : index
    %c0_27 = arith.constant 0 : index
    %c0_28 = arith.constant 0 : index
    %35 = vector.load %arg5[%c0_26, %c0_27, %c0_28] : memref<1x3x16xf32, #tpu.memory_space<vmem>>, vector<1x3x16xf32>
    %36 = vector.shape_cast %35 : vector<1x3x16xf32> to vector<3x16xf32>
    %37 = arith.addf %34, %36 : vector<3x16xf32>
    %cst_29 = arith.constant -2.000000e+02 : f32
    %cst_30 = arith.constant 2.000000e+02 : f32
    %38 = vector.broadcast %cst_29 : f32 to vector<3x16xf32>
    %39 = arith.maximumf %38, %37 : vector<3x16xf32>
    %40 = vector.broadcast %cst_30 : f32 to vector<3x16xf32>
    %41 = arith.minimumf %40, %39 : vector<3x16xf32>
    %c0_31 = arith.constant 0 : index
    %c0_32 = arith.constant 0 : index
    %c0_33 = arith.constant 0 : index
    %42 = vector.load %arg13[%c0_31, %c0_32, %c0_33] : memref<1x3x16xf32, #tpu.memory_space<vmem>>, vector<1x3x16xf32>
    %43 = vector.shape_cast %42 : vector<1x3x16xf32> to vector<3x16xf32>
    %44 = vector.shape_cast %41 : vector<3x16xf32> to vector<1x3x16xf32>
    tpu.vector_store %arg13[%c0_31, %c0_32, %c0_33], %44 {strides = array<i32>} : memref<1x3x16xf32, #tpu.memory_space<vmem>>, vector<1x3x16xf32>,
    return
  }
  func.func @transform_0(%arg0: i32, %arg1: i32) -> (i32, i32, i32) {
    %c0_i32 = arith.constant 0 : i32
    %c0_i32_0 = arith.constant 0 : i32
    return %arg0, %c0_i32, %arg1 : i32, i32, i32
  }
  func.func @transform_1(%arg0: i32, %arg1: i32) -> (i32, i32) {
    %c0_i32 = arith.constant 0 : i32
    %c0_i32_0 = arith.constant 0 : i32
    %c0_i32_1 = arith.constant 0 : i32
    return %c0_i32, %c0_i32_0 : i32, i32
  }
  func.func @transform_2(%arg0: i32, %arg1: i32) -> (i32, i32) {
    %c0_i32 = arith.constant 0 : i32
    %c0_i32_0 = arith.constant 0 : i32
    %c0_i32_1 = arith.constant 0 : i32
    return %c0_i32, %c0_i32_0 : i32, i32
  }
  func.func @transform_3(%arg0: i32, %arg1: i32) -> (i32, i32, i32) {
    %c0_i32 = arith.constant 0 : i32
    %c0_i32_0 = arith.constant 0 : i32
    return %arg0, %c0_i32, %arg1 : i32, i32, i32
  }
  func.func @transform_4(%arg0: i32, %arg1: i32) -> (i32, i32) {
    %c0_i32 = arith.constant 0 : i32
    %c0_i32_0 = arith.constant 0 : i32
    %c0_i32_1 = arith.constant 0 : i32
    return %c0_i32, %c0_i32_0 : i32, i32
  }
  func.func @transform_5(%arg0: i32, %arg1: i32) -> (i32, i32) {
    %c0_i32 = arith.constant 0 : i32
    %c0_i32_0 = arith.constant 0 : i32
    %c0_i32_1 = arith.constant 0 : i32
    return %c0_i32, %c0_i32_0 : i32, i32
  }
  func.func @transform_6(%arg0: i32, %arg1: i32) -> (i32, i32) {
    %c0_i32 = arith.constant 0 : i32
    %c0_i32_0 = arith.constant 0 : i32
    %c0_i32_1 = arith.constant 0 : i32
    return %c0_i32, %c0_i32_0 : i32, i32
  }
  func.func @transform_7(%arg0: i32, %arg1: i32) -> (i32, i32) {
    %c0_i32 = arith.constant 0 : i32
    %c0_i32_0 = arith.constant 0 : i32
    %c0_i32_1 = arith.constant 0 : i32
    return %c0_i32, %c0_i32_0 : i32, i32
  }
  func.func @transform_8(%arg0: i32, %arg1: i32) -> (i32, i32) {
    %c0_i32 = arith.constant 0 : i32
    %c0_i32_0 = arith.constant 0 : i32
    %c0_i32_1 = arith.constant 0 : i32
    return %c0_i32, %c0_i32_0 : i32, i32
  }
  func.func @transform_9(%arg0: i32, %arg1: i32) -> (i32, i32) {
    %c0_i32 = arith.constant 0 : i32
    %c0_i32_0 = arith.constant 0 : i32
    %c0_i32_1 = arith.constant 0 : i32
    return %c0_i32, %c0_i32_0 : i32, i32
  }
  func.func @transform_10(%arg0: i32, %arg1: i32) -> (i32, i32, i32) {
    %c0_i32 = arith.constant 0 : i32
    %c0_i32_0 = arith.constant 0 : i32
    return %arg0, %c0_i32, %arg1 : i32, i32, i32
  }
  func.func @transform_11(%arg0: i32, %arg1: i32) -> (i32, i32, i32) {
    %c0_i32 = arith.constant 0 : i32
    %c0_i32_0 = arith.constant 0 : i32
    return %arg0, %c0_i32, %arg1 : i32, i32, i32
  }
}

module attributes {stable_mosaic.version = 11 : i64} {
  func.func @kernel(%arg0: i32, %arg1: i32, %arg2: memref<1x16x3xf32, #tpu.memory_space<vmem>>, %arg3: memref<1x3x16xf32, #tpu.memory_space<vmem>>, %arg4: memref<1x3x16xf32, #tpu.memory_space<vmem>>, %arg5: memref<1x16x16xf32, #tpu.memory_space<vmem>>, %arg6: memref<16x1xf32, #tpu.memory_space<vmem>>, %arg7: memref<16x1xf32, #tpu.memory_space<vmem>>, %arg8: memref<8x3xf32, #tpu.memory_space<vmem>>, %arg9: memref<8x1xf32, #tpu.memory_space<vmem>>, %arg10: memref<8x8xf32, #tpu.memory_space<vmem>>, %arg11: memref<8x1xf32, #tpu.memory_space<vmem>>, %arg12: memref<16x8xf32, #tpu.memory_space<vmem>>, %arg13: memref<16x1xf32, #tpu.memory_space<vmem>>, %arg14: memref<16x304xf32, #tpu.memory_space<vmem>>, %arg15: memref<16x1xf32, #tpu.memory_space<vmem>>, %arg16: memref<1x16x16xf32, #tpu.memory_space<vmem>>) attributes {dimension_semantics = [#tpu.dimension_semantics<parallel>, #tpu.dimension_semantics<parallel>], iteration_bounds = array<i64: 2, 1>, scalar_prefetch = 0 : i64, scratch_operands = 0 : i64, tpu.core_type = #tpu.core_type<tc>, window_params = [{transform_indices = @transform_0, window_bounds = array<i64: 1, 16, 3>}, {transform_indices = @transform_1, window_bounds = array<i64: 1, 3, 16>}, {transform_indices = @transform_2, window_bounds = array<i64: 1, 3, 16>}, {transform_indices = @transform_3, window_bounds = array<i64: 1, 16, 16>}, {pipeline_mode = #tpu.pipeline_mode<synchronous>, transform_indices = @transform_4, window_bounds = array<i64: 16, 1>}, {pipeline_mode = #tpu.pipeline_mode<synchronous>, transform_indices = @transform_5, window_bounds = array<i64: 16, 1>}, {pipeline_mode = #tpu.pipeline_mode<synchronous>, transform_indices = @transform_6, window_bounds = array<i64: 8, 3>}, {pipeline_mode = #tpu.pipeline_mode<synchronous>, transform_indices = @transform_7, window_bounds = array<i64: 8, 1>}, {pipeline_mode = #tpu.pipeline_mode<synchronous>, transform_indices = @transform_8, window_bounds = array<i64: 8, 8>}, {pipeline_mode = #tpu.pipeline_mode<synchronous>, transform_indices = @transform_9, window_bounds = array<i64: 8, 1>}, {pipeline_mode = #tpu.pipeline_mode<synchronous>, transform_indices = @transform_10, window_bounds = array<i64: 16, 8>}, {pipeline_mode = #tpu.pipeline_mode<synchronous>, transform_indices = @transform_11, window_bounds = array<i64: 16, 1>}, {pipeline_mode = #tpu.pipeline_mode<synchronous>, transform_indices = @transform_12, window_bounds = array<i64: 16, 304>}, {pipeline_mode = #tpu.pipeline_mode<synchronous>, transform_indices = @transform_13, window_bounds = array<i64: 16, 1>}, {transform_indices = @transform_14, window_bounds = array<i64: 1, 16, 16>}]} {
    %c0 = arith.constant 0 : index
    %c0_0 = arith.constant 0 : index
    %c0_1 = arith.constant 0 : index
    %0 = vector.load %arg2[%c0, %c0_0, %c0_1] : memref<1x16x3xf32, #tpu.memory_space<vmem>>, vector<1x16x3xf32>
    %1 = vector.shape_cast %0 : vector<1x16x3xf32> to vector<16x3xf32>
    %c0_2 = arith.constant 0 : index
    %c0_3 = arith.constant 0 : index
    %c0_4 = arith.constant 0 : index
    %2 = vector.load %arg3[%c0_2, %c0_3, %c0_4] : memref<1x3x16xf32, #tpu.memory_space<vmem>>, vector<1x3x16xf32>
    %3 = vector.shape_cast %2 : vector<1x3x16xf32> to vector<3x16xf32>
    %c0_5 = arith.constant 0 : index
    %c0_6 = arith.constant 0 : index
    %c0_7 = arith.constant 0 : index
    %4 = vector.load %arg4[%c0_5, %c0_6, %c0_7] : memref<1x3x16xf32, #tpu.memory_space<vmem>>, vector<1x3x16xf32>
    %5 = vector.shape_cast %4 : vector<1x3x16xf32> to vector<3x16xf32>
    %c0_8 = arith.constant 0 : index
    %c0_9 = arith.constant 0 : index
    %c0_10 = arith.constant 0 : index
    %6 = vector.load %arg5[%c0_8, %c0_9, %c0_10] : memref<1x16x16xf32, #tpu.memory_space<vmem>>, vector<1x16x16xf32>
    %7 = vector.shape_cast %6 : vector<1x16x16xf32> to vector<16x16xf32>
    %c0_11 = arith.constant 0 : index
    %c0_12 = arith.constant 0 : index
    %8 = vector.load %arg6[%c0_11, %c0_12] : memref<16x1xf32, #tpu.memory_space<vmem>>, vector<16x1xf32>
    %9 = vector.broadcast %8 : vector<16x1xf32> to vector<16x16xf32>
    %10 = arith.mulf %7, %9 : vector<16x16xf32>
    %c0_13 = arith.constant 0 : index
    %c0_14 = arith.constant 0 : index
    %11 = vector.load %arg7[%c0_13, %c0_14] : memref<16x1xf32, #tpu.memory_space<vmem>>, vector<16x1xf32>
    %12 = vector.broadcast %11 : vector<16x1xf32> to vector<16x16xf32>
    %13 = arith.addf %10, %12 : vector<16x16xf32>
    %cst = arith.constant 1.000000e-01 : f32
    %14 = vector.broadcast %cst : f32 to vector<16x16xf32>
    %15 = arith.mulf %14, %13 : vector<16x16xf32>
    %16 = arith.maximumf %13, %15 : vector<16x16xf32>
    %17 = arith.mulf %1, %1 : vector<16x3xf32>
    %cst_15 = arith.constant dense<0.000000e+00> : vector<16xf32>
    %18 = vector.multi_reduction <add>, %17, %cst_15 [1] : vector<16x3xf32> to vector<16xf32>
    %19 = vector.shape_cast %18 : vector<16xf32> to vector<16x1xf32>
    %cst_16 = arith.constant -2.000000e+00 : f32
    %20 = vector.broadcast %cst_16 : f32 to vector<3x16xf32>
    %21 = arith.mulf %5, %20 : vector<3x16xf32>
    %cst_17 = arith.constant dense<0.000000e+00> : vector<16x16xf32>
    %22 = tpu.matmul %1, %21, %cst_17 {dimension_numbers = #tpu.dot_dimension_numbers<[1], [0], [0], [1], [0, 0, 1, 1], [], []>} : vector<16x3xf32>, vector<3x16xf32>, vector<16x16xf32> -> vector<16x16xf32>
    %23 = vector.broadcast %19 : vector<16x1xf32> to vector<16x16xf32>
    %24 = arith.addf %22, %23 : vector<16x16xf32>
    %25 = tpu.concatenate %3, %16 in 0 : vector<3x16xf32>, vector<16x16xf32> -> vector<19x16xf32>
    %cst_18 = arith.constant 0.000000e+00 : f32
    %26 = vector.broadcast %cst_18 : f32 to vector<16x16xf32>
    %27 = tpu.concatenate %5, %26 in 0 : vector<3x16xf32>, vector<16x16xf32> -> vector<19x16xf32>
    %28 = tpu.iota {dimensions = array<i32: 0>} : vector<16x16xi32>
    %cst_19 = arith.constant 0.000000e+00 : f32
    %29 = vector.broadcast %cst_19 : f32 to vector<19x16x16xf32>
    %cst_20 = arith.constant dense<0x7F800000> : vector<16xf32>
    %30 = vector.multi_reduction <minimumf>, %24, %cst_20 [0] : vector<16x16xf32> to vector<16xf32>
    %31 = vector.shape_cast %30 : vector<16xf32> to vector<1x16xf32>
    %32 = vector.broadcast %31 : vector<1x16xf32> to vector<16x16xf32>
    %33 = arith.cmpf oeq, %24, %32 : vector<16x16xf32>
    %c16_i32 = arith.constant 16 : i32
    %34 = vector.broadcast %c16_i32 : i32 to vector<16x16xi32>
    %35 = arith.select %33, %28, %34 : vector<16x16xi1>, vector<16x16xi32>
    %cst_21 = arith.constant dense<2147483647> : vector<16xi32>
    %36 = vector.multi_reduction <minsi>, %35, %cst_21 [0] : vector<16x16xi32> to vector<16xi32>
    %37 = vector.shape_cast %36 : vector<16xi32> to vector<1x16xi32>
    %38 = vector.broadcast %37 : vector<1x16xi32> to vector<16x16xi32>
    %39 = arith.cmpi eq, %35, %38 : vector<16x16xi32>
    %cst_22 = arith.constant 1.000000e+00 : f32
    %cst_23 = arith.constant 0.000000e+00 : f32
    %40 = vector.broadcast %cst_22 : f32 to vector<16x16xf32>
    %41 = vector.broadcast %cst_23 : f32 to vector<16x16xf32>
    %42 = arith.select %39, %40, %41 : vector<16x16xi1>, vector<16x16xf32>
    %cst_24 = arith.constant dense<0.000000e+00> : vector<19x16xf32>
    %43 = tpu.matmul %25, %42, %cst_24 {dimension_numbers = #tpu.dot_dimension_numbers<[1], [0], [0], [1], [0, 0, 1, 1], [], []>} : vector<19x16xf32>, vector<16x16xf32>, vector<19x16xf32> -> vector<19x16xf32>
    %44 = arith.subf %43, %27 : vector<19x16xf32>
    %c0_25 = arith.constant 0 : index
    %c0_26 = arith.constant 0 : index
    %45 = vector.load %arg8[%c0_25, %c0_26] : memref<8x3xf32, #tpu.memory_space<vmem>>, vector<8x3xf32>
    %46 = vector.extract_strided_slice %44 {offsets = [0, 0], sizes = [3, 16], strides = [1, 1]} : vector<19x16xf32> to vector<3x16xf32>
    %cst_27 = arith.constant dense<0.000000e+00> : vector<8x16xf32>
    %47 = tpu.matmul %45, %46, %cst_27 {dimension_numbers = #tpu.dot_dimension_numbers<[1], [0], [0], [1], [0, 0, 1, 1], [], []>} : vector<8x3xf32>, vector<3x16xf32>, vector<8x16xf32> -> vector<8x16xf32>
    %c0_28 = arith.constant 0 : index
    %c0_29 = arith.constant 0 : index
    %48 = vector.load %arg9[%c0_28, %c0_29] : memref<8x1xf32, #tpu.memory_space<vmem>>, vector<8x1xf32>
    %49 = vector.broadcast %48 : vector<8x1xf32> to vector<8x16xf32>
    %50 = arith.addf %47, %49 : vector<8x16xf32>
    %cst_30 = arith.constant 0.000000e+00 : f32
    %51 = vector.broadcast %cst_30 : f32 to vector<8x16xf32>
    %52 = arith.maximumf %50, %51 : vector<8x16xf32>
    %c0_31 = arith.constant 0 : index
    %c0_32 = arith.constant 0 : index
    %53 = vector.load %arg10[%c0_31, %c0_32] : memref<8x8xf32, #tpu.memory_space<vmem>>, vector<8x8xf32>
    %cst_33 = arith.constant dense<0.000000e+00> : vector<8x16xf32>
    %54 = tpu.matmul %53, %52, %cst_33 {dimension_numbers = #tpu.dot_dimension_numbers<[1], [0], [0], [1], [0, 0, 1, 1], [], []>} : vector<8x8xf32>, vector<8x16xf32>, vector<8x16xf32> -> vector<8x16xf32>
    %c0_34 = arith.constant 0 : index
    %c0_35 = arith.constant 0 : index
    %55 = vector.load %arg11[%c0_34, %c0_35] : memref<8x1xf32, #tpu.memory_space<vmem>>, vector<8x1xf32>
    %56 = vector.broadcast %55 : vector<8x1xf32> to vector<8x16xf32>
    %57 = arith.addf %54, %56 : vector<8x16xf32>
    %cst_36 = arith.constant 0.000000e+00 : f32
    %58 = vector.broadcast %cst_36 : f32 to vector<8x16xf32>
    %59 = arith.maximumf %57, %58 : vector<8x16xf32>
    %c0_37 = arith.constant 0 : index
    %c0_38 = arith.constant 0 : index
    %60 = vector.load %arg12[%c0_37, %c0_38] : memref<16x8xf32, #tpu.memory_space<vmem>>, vector<16x8xf32>
    %cst_39 = arith.constant dense<0.000000e+00> : vector<16x16xf32>
    %61 = tpu.matmul %60, %59, %cst_39 {dimension_numbers = #tpu.dot_dimension_numbers<[1], [0], [0], [1], [0, 0, 1, 1], [], []>} : vector<16x8xf32>, vector<8x16xf32>, vector<16x16xf32> -> vector<16x16xf32>
    %c0_40 = arith.constant 0 : index
    %c0_41 = arith.constant 0 : index
    %62 = vector.load %arg13[%c0_40, %c0_41] : memref<16x1xf32, #tpu.memory_space<vmem>>, vector<16x1xf32>
    %63 = vector.broadcast %62 : vector<16x1xf32> to vector<16x16xf32>
    %64 = arith.addf %61, %63 : vector<16x16xf32>
    %cst_42 = arith.constant 0.000000e+00 : f32
    %65 = vector.broadcast %cst_42 : f32 to vector<16x16xf32>
    %66 = arith.maximumf %64, %65 : vector<16x16xf32>
    %67 = vector.shape_cast %44 : vector<19x16xf32> to vector<19x1x16xf32>
    %68 = vector.shape_cast %66 : vector<16x16xf32> to vector<1x16x16xf32>
    %69 = vector.broadcast %67 : vector<19x1x16xf32> to vector<19x16x16xf32>
    %70 = vector.broadcast %68 : vector<1x16x16xf32> to vector<19x16x16xf32>
    %71 = arith.mulf %69, %70 : vector<19x16x16xf32>
    %72 = arith.addf %29, %71 : vector<19x16x16xf32>
    %cst_43 = arith.constant 1.000000e+30 : f32
    %73 = vector.broadcast %cst_43 : f32 to vector<16x16xf32>
    %74 = arith.select %39, %73, %24 : vector<16x16xi1>, vector<16x16xf32>
    %cst_44 = arith.constant dense<0x7F800000> : vector<16xf32>
    %75 = vector.multi_reduction <minimumf>, %74, %cst_44 [0] : vector<16x16xf32> to vector<16xf32>
    %76 = vector.shape_cast %75 : vector<16xf32> to vector<1x16xf32>
    %77 = vector.broadcast %76 : vector<1x16xf32> to vector<16x16xf32>
    %78 = arith.cmpf oeq, %74, %77 : vector<16x16xf32>
    %c16_i32_45 = arith.constant 16 : i32
    %79 = vector.broadcast %c16_i32_45 : i32 to vector<16x16xi32>
    %80 = arith.select %78, %28, %79 : vector<16x16xi1>, vector<16x16xi32>
    %cst_46 = arith.constant dense<2147483647> : vector<16xi32>
    %81 = vector.multi_reduction <minsi>, %80, %cst_46 [0] : vector<16x16xi32> to vector<16xi32>
    %82 = vector.shape_cast %81 : vector<16xi32> to vector<1x16xi32>
    %83 = vector.broadcast %82 : vector<1x16xi32> to vector<16x16xi32>
    %84 = arith.cmpi eq, %80, %83 : vector<16x16xi32>
    %cst_47 = arith.constant 1.000000e+00 : f32
    %cst_48 = arith.constant 0.000000e+00 : f32
    %85 = vector.broadcast %cst_47 : f32 to vector<16x16xf32>
    %86 = vector.broadcast %cst_48 : f32 to vector<16x16xf32>
    %87 = arith.select %84, %85, %86 : vector<16x16xi1>, vector<16x16xf32>
    %cst_49 = arith.constant dense<0.000000e+00> : vector<19x16xf32>
    %88 = tpu.matmul %25, %87, %cst_49 {dimension_numbers = #tpu.dot_dimension_numbers<[1], [0], [0], [1], [0, 0, 1, 1], [], []>} : vector<19x16xf32>, vector<16x16xf32>, vector<19x16xf32> -> vector<19x16xf32>
    %89 = arith.subf %88, %27 : vector<19x16xf32>
    %c0_50 = arith.constant 0 : index
    %c0_51 = arith.constant 0 : index
    %90 = vector.load %arg8[%c0_50, %c0_51] : memref<8x3xf32, #tpu.memory_space<vmem>>, vector<8x3xf32>
    %91 = vector.extract_strided_slice %89 {offsets = [0, 0], sizes = [3, 16], strides = [1, 1]} : vector<19x16xf32> to vector<3x16xf32>
    %cst_52 = arith.constant dense<0.000000e+00> : vector<8x16xf32>
    %92 = tpu.matmul %90, %91, %cst_52 {dimension_numbers = #tpu.dot_dimension_numbers<[1], [0], [0], [1], [0, 0, 1, 1], [], []>} : vector<8x3xf32>, vector<3x16xf32>, vector<8x16xf32> -> vector<8x16xf32>
    %c0_53 = arith.constant 0 : index
    %c0_54 = arith.constant 0 : index
    %93 = vector.load %arg9[%c0_53, %c0_54] : memref<8x1xf32, #tpu.memory_space<vmem>>, vector<8x1xf32>
    %94 = vector.broadcast %93 : vector<8x1xf32> to vector<8x16xf32>
    %95 = arith.addf %92, %94 : vector<8x16xf32>
    %cst_55 = arith.constant 0.000000e+00 : f32
    %96 = vector.broadcast %cst_55 : f32 to vector<8x16xf32>
    %97 = arith.maximumf %95, %96 : vector<8x16xf32>
    %c0_56 = arith.constant 0 : index
    %c0_57 = arith.constant 0 : index
    %98 = vector.load %arg10[%c0_56, %c0_57] : memref<8x8xf32, #tpu.memory_space<vmem>>, vector<8x8xf32>
    %cst_58 = arith.constant dense<0.000000e+00> : vector<8x16xf32>
    %99 = tpu.matmul %98, %97, %cst_58 {dimension_numbers = #tpu.dot_dimension_numbers<[1], [0], [0], [1], [0, 0, 1, 1], [], []>} : vector<8x8xf32>, vector<8x16xf32>, vector<8x16xf32> -> vector<8x16xf32>
    %c0_59 = arith.constant 0 : index
    %c0_60 = arith.constant 0 : index
    %100 = vector.load %arg11[%c0_59, %c0_60] : memref<8x1xf32, #tpu.memory_space<vmem>>, vector<8x1xf32>
    %101 = vector.broadcast %100 : vector<8x1xf32> to vector<8x16xf32>
    %102 = arith.addf %99, %101 : vector<8x16xf32>
    %cst_61 = arith.constant 0.000000e+00 : f32
    %103 = vector.broadcast %cst_61 : f32 to vector<8x16xf32>
    %104 = arith.maximumf %102, %103 : vector<8x16xf32>
    %c0_62 = arith.constant 0 : index
    %c0_63 = arith.constant 0 : index
    %105 = vector.load %arg12[%c0_62, %c0_63] : memref<16x8xf32, #tpu.memory_space<vmem>>, vector<16x8xf32>
    %cst_64 = arith.constant dense<0.000000e+00> : vector<16x16xf32>
    %106 = tpu.matmul %105, %104, %cst_64 {dimension_numbers = #tpu.dot_dimension_numbers<[1], [0], [0], [1], [0, 0, 1, 1], [], []>} : vector<16x8xf32>, vector<8x16xf32>, vector<16x16xf32> -> vector<16x16xf32>
    %c0_65 = arith.constant 0 : index
    %c0_66 = arith.constant 0 : index
    %107 = vector.load %arg13[%c0_65, %c0_66] : memref<16x1xf32, #tpu.memory_space<vmem>>, vector<16x1xf32>
    %108 = vector.broadcast %107 : vector<16x1xf32> to vector<16x16xf32>
    %109 = arith.addf %106, %108 : vector<16x16xf32>
    %cst_67 = arith.constant 0.000000e+00 : f32
    %110 = vector.broadcast %cst_67 : f32 to vector<16x16xf32>
    %111 = arith.maximumf %109, %110 : vector<16x16xf32>
    %112 = vector.shape_cast %89 : vector<19x16xf32> to vector<19x1x16xf32>
    %113 = vector.shape_cast %111 : vector<16x16xf32> to vector<1x16x16xf32>
    %114 = vector.broadcast %112 : vector<19x1x16xf32> to vector<19x16x16xf32>
    %115 = vector.broadcast %113 : vector<1x16x16xf32> to vector<19x16x16xf32>
    %116 = arith.mulf %114, %115 : vector<19x16x16xf32>
    %117 = arith.addf %72, %116 : vector<19x16x16xf32>
    %cst_68 = arith.constant 1.000000e+30 : f32
    %118 = vector.broadcast %cst_68 : f32 to vector<16x16xf32>
    %119 = arith.select %84, %118, %74 : vector<16x16xi1>, vector<16x16xf32>
    %cst_69 = arith.constant dense<0x7F800000> : vector<16xf32>
    %120 = vector.multi_reduction <minimumf>, %119, %cst_69 [0] : vector<16x16xf32> to vector<16xf32>
    %121 = vector.shape_cast %120 : vector<16xf32> to vector<1x16xf32>
    %122 = vector.broadcast %121 : vector<1x16xf32> to vector<16x16xf32>
    %123 = arith.cmpf oeq, %119, %122 : vector<16x16xf32>
    %c16_i32_70 = arith.constant 16 : i32
    %124 = vector.broadcast %c16_i32_70 : i32 to vector<16x16xi32>
    %125 = arith.select %123, %28, %124 : vector<16x16xi1>, vector<16x16xi32>
    %cst_71 = arith.constant dense<2147483647> : vector<16xi32>
    %126 = vector.multi_reduction <minsi>, %125, %cst_71 [0] : vector<16x16xi32> to vector<16xi32>
    %127 = vector.shape_cast %126 : vector<16xi32> to vector<1x16xi32>
    %128 = vector.broadcast %127 : vector<1x16xi32> to vector<16x16xi32>
    %129 = arith.cmpi eq, %125, %128 : vector<16x16xi32>
    %cst_72 = arith.constant 1.000000e+00 : f32
    %cst_73 = arith.constant 0.000000e+00 : f32
    %130 = vector.broadcast %cst_72 : f32 to vector<16x16xf32>
    %131 = vector.broadcast %cst_73 : f32 to vector<16x16xf32>
    %132 = arith.select %129, %130, %131 : vector<16x16xi1>, vector<16x16xf32>
    %cst_74 = arith.constant dense<0.000000e+00> : vector<19x16xf32>
    %133 = tpu.matmul %25, %132, %cst_74 {dimension_numbers = #tpu.dot_dimension_numbers<[1], [0], [0], [1], [0, 0, 1, 1], [], []>} : vector<19x16xf32>, vector<16x16xf32>, vector<19x16xf32> -> vector<19x16xf32>
    %134 = arith.subf %133, %27 : vector<19x16xf32>
    %c0_75 = arith.constant 0 : index
    %c0_76 = arith.constant 0 : index
    %135 = vector.load %arg8[%c0_75, %c0_76] : memref<8x3xf32, #tpu.memory_space<vmem>>, vector<8x3xf32>
    %136 = vector.extract_strided_slice %134 {offsets = [0, 0], sizes = [3, 16], strides = [1, 1]} : vector<19x16xf32> to vector<3x16xf32>
    %cst_77 = arith.constant dense<0.000000e+00> : vector<8x16xf32>
    %137 = tpu.matmul %135, %136, %cst_77 {dimension_numbers = #tpu.dot_dimension_numbers<[1], [0], [0], [1], [0, 0, 1, 1], [], []>} : vector<8x3xf32>, vector<3x16xf32>, vector<8x16xf32> -> vector<8x16xf32>
    %c0_78 = arith.constant 0 : index
    %c0_79 = arith.constant 0 : index
    %138 = vector.load %arg9[%c0_78, %c0_79] : memref<8x1xf32, #tpu.memory_space<vmem>>, vector<8x1xf32>
    %139 = vector.broadcast %138 : vector<8x1xf32> to vector<8x16xf32>
    %140 = arith.addf %137, %139 : vector<8x16xf32>
    %cst_80 = arith.constant 0.000000e+00 : f32
    %141 = vector.broadcast %cst_80 : f32 to vector<8x16xf32>
    %142 = arith.maximumf %140, %141 : vector<8x16xf32>
    %c0_81 = arith.constant 0 : index
    %c0_82 = arith.constant 0 : index
    %143 = vector.load %arg10[%c0_81, %c0_82] : memref<8x8xf32, #tpu.memory_space<vmem>>, vector<8x8xf32>
    %cst_83 = arith.constant dense<0.000000e+00> : vector<8x16xf32>
    %144 = tpu.matmul %143, %142, %cst_83 {dimension_numbers = #tpu.dot_dimension_numbers<[1], [0], [0], [1], [0, 0, 1, 1], [], []>} : vector<8x8xf32>, vector<8x16xf32>, vector<8x16xf32> -> vector<8x16xf32>
    %c0_84 = arith.constant 0 : index
    %c0_85 = arith.constant 0 : index
    %145 = vector.load %arg11[%c0_84, %c0_85] : memref<8x1xf32, #tpu.memory_space<vmem>>, vector<8x1xf32>
    %146 = vector.broadcast %145 : vector<8x1xf32> to vector<8x16xf32>
    %147 = arith.addf %144, %146 : vector<8x16xf32>
    %cst_86 = arith.constant 0.000000e+00 : f32
    %148 = vector.broadcast %cst_86 : f32 to vector<8x16xf32>
    %149 = arith.maximumf %147, %148 : vector<8x16xf32>
    %c0_87 = arith.constant 0 : index
    %c0_88 = arith.constant 0 : index
    %150 = vector.load %arg12[%c0_87, %c0_88] : memref<16x8xf32, #tpu.memory_space<vmem>>, vector<16x8xf32>
    %cst_89 = arith.constant dense<0.000000e+00> : vector<16x16xf32>
    %151 = tpu.matmul %150, %149, %cst_89 {dimension_numbers = #tpu.dot_dimension_numbers<[1], [0], [0], [1], [0, 0, 1, 1], [], []>} : vector<16x8xf32>, vector<8x16xf32>, vector<16x16xf32> -> vector<16x16xf32>
    %c0_90 = arith.constant 0 : index
    %c0_91 = arith.constant 0 : index
    %152 = vector.load %arg13[%c0_90, %c0_91] : memref<16x1xf32, #tpu.memory_space<vmem>>, vector<16x1xf32>
    %153 = vector.broadcast %152 : vector<16x1xf32> to vector<16x16xf32>
    %154 = arith.addf %151, %153 : vector<16x16xf32>
    %cst_92 = arith.constant 0.000000e+00 : f32
    %155 = vector.broadcast %cst_92 : f32 to vector<16x16xf32>
    %156 = arith.maximumf %154, %155 : vector<16x16xf32>
    %157 = vector.shape_cast %134 : vector<19x16xf32> to vector<19x1x16xf32>
    %158 = vector.shape_cast %156 : vector<16x16xf32> to vector<1x16x16xf32>
    %159 = vector.broadcast %157 : vector<19x1x16xf32> to vector<19x16x16xf32>
    %160 = vector.broadcast %158 : vector<1x16x16xf32> to vector<19x16x16xf32>
    %161 = arith.mulf %159, %160 : vector<19x16x16xf32>
    %162 = arith.addf %117, %161 : vector<19x16x16xf32>
    %cst_93 = arith.constant 1.000000e+30 : f32
    %163 = vector.broadcast %cst_93 : f32 to vector<16x16xf32>
    %164 = arith.select %129, %163, %119 : vector<16x16xi1>, vector<16x16xf32>
    %cst_94 = arith.constant dense<0x7F800000> : vector<16xf32>
    %165 = vector.multi_reduction <minimumf>, %164, %cst_94 [0] : vector<16x16xf32> to vector<16xf32>
    %166 = vector.shape_cast %165 : vector<16xf32> to vector<1x16xf32>
    %167 = vector.broadcast %166 : vector<1x16xf32> to vector<16x16xf32>
    %168 = arith.cmpf oeq, %164, %167 : vector<16x16xf32>
    %c16_i32_95 = arith.constant 16 : i32
    %169 = vector.broadcast %c16_i32_95 : i32 to vector<16x16xi32>
    %170 = arith.select %168, %28, %169 : vector<16x16xi1>, vector<16x16xi32>
    %cst_96 = arith.constant dense<2147483647> : vector<16xi32>
    %171 = vector.multi_reduction <minsi>, %170, %cst_96 [0] : vector<16x16xi32> to vector<16xi32>
    %172 = vector.shape_cast %171 : vector<16xi32> to vector<1x16xi32>
    %173 = vector.broadcast %172 : vector<1x16xi32> to vector<16x16xi32>
    %174 = arith.cmpi eq, %170, %173 : vector<16x16xi32>
    %cst_97 = arith.constant 1.000000e+00 : f32
    %cst_98 = arith.constant 0.000000e+00 : f32
    %175 = vector.broadcast %cst_97 : f32 to vector<16x16xf32>
    %176 = vector.broadcast %cst_98 : f32 to vector<16x16xf32>
    %177 = arith.select %174, %175, %176 : vector<16x16xi1>, vector<16x16xf32>
    %cst_99 = arith.constant dense<0.000000e+00> : vector<19x16xf32>
    %178 = tpu.matmul %25, %177, %cst_99 {dimension_numbers = #tpu.dot_dimension_numbers<[1], [0], [0], [1], [0, 0, 1, 1], [], []>} : vector<19x16xf32>, vector<16x16xf32>, vector<19x16xf32> -> vector<19x16xf32>
    %179 = arith.subf %178, %27 : vector<19x16xf32>
    %c0_100 = arith.constant 0 : index
    %c0_101 = arith.constant 0 : index
    %180 = vector.load %arg8[%c0_100, %c0_101] : memref<8x3xf32, #tpu.memory_space<vmem>>, vector<8x3xf32>
    %181 = vector.extract_strided_slice %179 {offsets = [0, 0], sizes = [3, 16], strides = [1, 1]} : vector<19x16xf32> to vector<3x16xf32>
    %cst_102 = arith.constant dense<0.000000e+00> : vector<8x16xf32>
    %182 = tpu.matmul %180, %181, %cst_102 {dimension_numbers = #tpu.dot_dimension_numbers<[1], [0], [0], [1], [0, 0, 1, 1], [], []>} : vector<8x3xf32>, vector<3x16xf32>, vector<8x16xf32> -> vector<8x16xf32>
    %c0_103 = arith.constant 0 : index
    %c0_104 = arith.constant 0 : index
    %183 = vector.load %arg9[%c0_103, %c0_104] : memref<8x1xf32, #tpu.memory_space<vmem>>, vector<8x1xf32>
    %184 = vector.broadcast %183 : vector<8x1xf32> to vector<8x16xf32>
    %185 = arith.addf %182, %184 : vector<8x16xf32>
    %cst_105 = arith.constant 0.000000e+00 : f32
    %186 = vector.broadcast %cst_105 : f32 to vector<8x16xf32>
    %187 = arith.maximumf %185, %186 : vector<8x16xf32>
    %c0_106 = arith.constant 0 : index
    %c0_107 = arith.constant 0 : index
    %188 = vector.load %arg10[%c0_106, %c0_107] : memref<8x8xf32, #tpu.memory_space<vmem>>, vector<8x8xf32>
    %cst_108 = arith.constant dense<0.000000e+00> : vector<8x16xf32>
    %189 = tpu.matmul %188, %187, %cst_108 {dimension_numbers = #tpu.dot_dimension_numbers<[1], [0], [0], [1], [0, 0, 1, 1], [], []>} : vector<8x8xf32>, vector<8x16xf32>, vector<8x16xf32> -> vector<8x16xf32>
    %c0_109 = arith.constant 0 : index
    %c0_110 = arith.constant 0 : index
    %190 = vector.load %arg11[%c0_109, %c0_110] : memref<8x1xf32, #tpu.memory_space<vmem>>, vector<8x1xf32>
    %191 = vector.broadcast %190 : vector<8x1xf32> to vector<8x16xf32>
    %192 = arith.addf %189, %191 : vector<8x16xf32>
    %cst_111 = arith.constant 0.000000e+00 : f32
    %193 = vector.broadcast %cst_111 : f32 to vector<8x16xf32>
    %194 = arith.maximumf %192, %193 : vector<8x16xf32>
    %c0_112 = arith.constant 0 : index
    %c0_113 = arith.constant 0 : index
    %195 = vector.load %arg12[%c0_112, %c0_113] : memref<16x8xf32, #tpu.memory_space<vmem>>, vector<16x8xf32>
    %cst_114 = arith.constant dense<0.000000e+00> : vector<16x16xf32>
    %196 = tpu.matmul %195, %194, %cst_114 {dimension_numbers = #tpu.dot_dimension_numbers<[1], [0], [0], [1], [0, 0, 1, 1], [], []>} : vector<16x8xf32>, vector<8x16xf32>, vector<16x16xf32> -> vector<16x16xf32>
    %c0_115 = arith.constant 0 : index
    %c0_116 = arith.constant 0 : index
    %197 = vector.load %arg13[%c0_115, %c0_116] : memref<16x1xf32, #tpu.memory_space<vmem>>, vector<16x1xf32>
    %198 = vector.broadcast %197 : vector<16x1xf32> to vector<16x16xf32>
    %199 = arith.addf %196, %198 : vector<16x16xf32>
    %cst_117 = arith.constant 0.000000e+00 : f32
    %200 = vector.broadcast %cst_117 : f32 to vector<16x16xf32>
    %201 = arith.maximumf %199, %200 : vector<16x16xf32>
    %202 = vector.shape_cast %179 : vector<19x16xf32> to vector<19x1x16xf32>
    %203 = vector.shape_cast %201 : vector<16x16xf32> to vector<1x16x16xf32>
    %204 = vector.broadcast %202 : vector<19x1x16xf32> to vector<19x16x16xf32>
    %205 = vector.broadcast %203 : vector<1x16x16xf32> to vector<19x16x16xf32>
    %206 = arith.mulf %204, %205 : vector<19x16x16xf32>
    %207 = arith.addf %162, %206 : vector<19x16x16xf32>
    %cst_118 = arith.constant 1.000000e+30 : f32
    %208 = vector.broadcast %cst_118 : f32 to vector<16x16xf32>
    %209 = arith.select %174, %208, %164 : vector<16x16xi1>, vector<16x16xf32>
    %cst_119 = arith.constant dense<0x7F800000> : vector<16xf32>
    %210 = vector.multi_reduction <minimumf>, %209, %cst_119 [0] : vector<16x16xf32> to vector<16xf32>
    %211 = vector.shape_cast %210 : vector<16xf32> to vector<1x16xf32>
    %212 = vector.broadcast %211 : vector<1x16xf32> to vector<16x16xf32>
    %213 = arith.cmpf oeq, %209, %212 : vector<16x16xf32>
    %c16_i32_120 = arith.constant 16 : i32
    %214 = vector.broadcast %c16_i32_120 : i32 to vector<16x16xi32>
    %215 = arith.select %213, %28, %214 : vector<16x16xi1>, vector<16x16xi32>
    %cst_121 = arith.constant dense<2147483647> : vector<16xi32>
    %216 = vector.multi_reduction <minsi>, %215, %cst_121 [0] : vector<16x16xi32> to vector<16xi32>
    %217 = vector.shape_cast %216 : vector<16xi32> to vector<1x16xi32>
    %218 = vector.broadcast %217 : vector<1x16xi32> to vector<16x16xi32>
    %219 = arith.cmpi eq, %215, %218 : vector<16x16xi32>
    %cst_122 = arith.constant 1.000000e+00 : f32
    %cst_123 = arith.constant 0.000000e+00 : f32
    %220 = vector.broadcast %cst_122 : f32 to vector<16x16xf32>
    %221 = vector.broadcast %cst_123 : f32 to vector<16x16xf32>
    %222 = arith.select %219, %220, %221 : vector<16x16xi1>, vector<16x16xf32>
    %cst_124 = arith.constant dense<0.000000e+00> : vector<19x16xf32>
    %223 = tpu.matmul %25, %222, %cst_124 {dimension_numbers = #tpu.dot_dimension_numbers<[1], [0], [0], [1], [0, 0, 1, 1], [], []>} : vector<19x16xf32>, vector<16x16xf32>, vector<19x16xf32> -> vector<19x16xf32>
    %224 = arith.subf %223, %27 : vector<19x16xf32>
    %c0_125 = arith.constant 0 : index
    %c0_126 = arith.constant 0 : index
    %225 = vector.load %arg8[%c0_125, %c0_126] : memref<8x3xf32, #tpu.memory_space<vmem>>, vector<8x3xf32>
    %226 = vector.extract_strided_slice %224 {offsets = [0, 0], sizes = [3, 16], strides = [1, 1]} : vector<19x16xf32> to vector<3x16xf32>
    %cst_127 = arith.constant dense<0.000000e+00> : vector<8x16xf32>
    %227 = tpu.matmul %225, %226, %cst_127 {dimension_numbers = #tpu.dot_dimension_numbers<[1], [0], [0], [1], [0, 0, 1, 1], [], []>} : vector<8x3xf32>, vector<3x16xf32>, vector<8x16xf32> -> vector<8x16xf32>
    %c0_128 = arith.constant 0 : index
    %c0_129 = arith.constant 0 : index
    %228 = vector.load %arg9[%c0_128, %c0_129] : memref<8x1xf32, #tpu.memory_space<vmem>>, vector<8x1xf32>
    %229 = vector.broadcast %228 : vector<8x1xf32> to vector<8x16xf32>
    %230 = arith.addf %227, %229 : vector<8x16xf32>
    %cst_130 = arith.constant 0.000000e+00 : f32
    %231 = vector.broadcast %cst_130 : f32 to vector<8x16xf32>
    %232 = arith.maximumf %230, %231 : vector<8x16xf32>
    %c0_131 = arith.constant 0 : index
    %c0_132 = arith.constant 0 : index
    %233 = vector.load %arg10[%c0_131, %c0_132] : memref<8x8xf32, #tpu.memory_space<vmem>>, vector<8x8xf32>
    %cst_133 = arith.constant dense<0.000000e+00> : vector<8x16xf32>
    %234 = tpu.matmul %233, %232, %cst_133 {dimension_numbers = #tpu.dot_dimension_numbers<[1], [0], [0], [1], [0, 0, 1, 1], [], []>} : vector<8x8xf32>, vector<8x16xf32>, vector<8x16xf32> -> vector<8x16xf32>
    %c0_134 = arith.constant 0 : index
    %c0_135 = arith.constant 0 : index
    %235 = vector.load %arg11[%c0_134, %c0_135] : memref<8x1xf32, #tpu.memory_space<vmem>>, vector<8x1xf32>
    %236 = vector.broadcast %235 : vector<8x1xf32> to vector<8x16xf32>
    %237 = arith.addf %234, %236 : vector<8x16xf32>
    %cst_136 = arith.constant 0.000000e+00 : f32
    %238 = vector.broadcast %cst_136 : f32 to vector<8x16xf32>
    %239 = arith.maximumf %237, %238 : vector<8x16xf32>
    %c0_137 = arith.constant 0 : index
    %c0_138 = arith.constant 0 : index
    %240 = vector.load %arg12[%c0_137, %c0_138] : memref<16x8xf32, #tpu.memory_space<vmem>>, vector<16x8xf32>
    %cst_139 = arith.constant dense<0.000000e+00> : vector<16x16xf32>
    %241 = tpu.matmul %240, %239, %cst_139 {dimension_numbers = #tpu.dot_dimension_numbers<[1], [0], [0], [1], [0, 0, 1, 1], [], []>} : vector<16x8xf32>, vector<8x16xf32>, vector<16x16xf32> -> vector<16x16xf32>
    %c0_140 = arith.constant 0 : index
    %c0_141 = arith.constant 0 : index
    %242 = vector.load %arg13[%c0_140, %c0_141] : memref<16x1xf32, #tpu.memory_space<vmem>>, vector<16x1xf32>
    %243 = vector.broadcast %242 : vector<16x1xf32> to vector<16x16xf32>
    %244 = arith.addf %241, %243 : vector<16x16xf32>
    %cst_142 = arith.constant 0.000000e+00 : f32
    %245 = vector.broadcast %cst_142 : f32 to vector<16x16xf32>
    %246 = arith.maximumf %244, %245 : vector<16x16xf32>
    %247 = vector.shape_cast %224 : vector<19x16xf32> to vector<19x1x16xf32>
    %248 = vector.shape_cast %246 : vector<16x16xf32> to vector<1x16x16xf32>
    %249 = vector.broadcast %247 : vector<19x1x16xf32> to vector<19x16x16xf32>
    %250 = vector.broadcast %248 : vector<1x16x16xf32> to vector<19x16x16xf32>
    %251 = arith.mulf %249, %250 : vector<19x16x16xf32>
    %252 = arith.addf %207, %251 : vector<19x16x16xf32>
    %cst_143 = arith.constant 1.000000e+30 : f32
    %253 = vector.broadcast %cst_143 : f32 to vector<16x16xf32>
    %254 = arith.select %219, %253, %209 : vector<16x16xi1>, vector<16x16xf32>
    %cst_144 = arith.constant dense<0x7F800000> : vector<16xf32>
    %255 = vector.multi_reduction <minimumf>, %254, %cst_144 [0] : vector<16x16xf32> to vector<16xf32>
    %256 = vector.shape_cast %255 : vector<16xf32> to vector<1x16xf32>
    %257 = vector.broadcast %256 : vector<1x16xf32> to vector<16x16xf32>
    %258 = arith.cmpf oeq, %254, %257 : vector<16x16xf32>
    %c16_i32_145 = arith.constant 16 : i32
    %259 = vector.broadcast %c16_i32_145 : i32 to vector<16x16xi32>
    %260 = arith.select %258, %28, %259 : vector<16x16xi1>, vector<16x16xi32>
    %cst_146 = arith.constant dense<2147483647> : vector<16xi32>
    %261 = vector.multi_reduction <minsi>, %260, %cst_146 [0] : vector<16x16xi32> to vector<16xi32>
    %262 = vector.shape_cast %261 : vector<16xi32> to vector<1x16xi32>
    %263 = vector.broadcast %262 : vector<1x16xi32> to vector<16x16xi32>
    %264 = arith.cmpi eq, %260, %263 : vector<16x16xi32>
    %cst_147 = arith.constant 1.000000e+00 : f32
    %cst_148 = arith.constant 0.000000e+00 : f32
    %265 = vector.broadcast %cst_147 : f32 to vector<16x16xf32>
    %266 = vector.broadcast %cst_148 : f32 to vector<16x16xf32>
    %267 = arith.select %264, %265, %266 : vector<16x16xi1>, vector<16x16xf32>
    %cst_149 = arith.constant dense<0.000000e+00> : vector<19x16xf32>
    %268 = tpu.matmul %25, %267, %cst_149 {dimension_numbers = #tpu.dot_dimension_numbers<[1], [0], [0], [1], [0, 0, 1, 1], [], []>} : vector<19x16xf32>, vector<16x16xf32>, vector<19x16xf32> -> vector<19x16xf32>
    %269 = arith.subf %268, %27 : vector<19x16xf32>
    %c0_150 = arith.constant 0 : index
    %c0_151 = arith.constant 0 : index
    %270 = vector.load %arg8[%c0_150, %c0_151] : memref<8x3xf32, #tpu.memory_space<vmem>>, vector<8x3xf32>
    %271 = vector.extract_strided_slice %269 {offsets = [0, 0], sizes = [3, 16], strides = [1, 1]} : vector<19x16xf32> to vector<3x16xf32>
    %cst_152 = arith.constant dense<0.000000e+00> : vector<8x16xf32>
    %272 = tpu.matmul %270, %271, %cst_152 {dimension_numbers = #tpu.dot_dimension_numbers<[1], [0], [0], [1], [0, 0, 1, 1], [], []>} : vector<8x3xf32>, vector<3x16xf32>, vector<8x16xf32> -> vector<8x16xf32>
    %c0_153 = arith.constant 0 : index
    %c0_154 = arith.constant 0 : index
    %273 = vector.load %arg9[%c0_153, %c0_154] : memref<8x1xf32, #tpu.memory_space<vmem>>, vector<8x1xf32>
    %274 = vector.broadcast %273 : vector<8x1xf32> to vector<8x16xf32>
    %275 = arith.addf %272, %274 : vector<8x16xf32>
    %cst_155 = arith.constant 0.000000e+00 : f32
    %276 = vector.broadcast %cst_155 : f32 to vector<8x16xf32>
    %277 = arith.maximumf %275, %276 : vector<8x16xf32>
    %c0_156 = arith.constant 0 : index
    %c0_157 = arith.constant 0 : index
    %278 = vector.load %arg10[%c0_156, %c0_157] : memref<8x8xf32, #tpu.memory_space<vmem>>, vector<8x8xf32>
    %cst_158 = arith.constant dense<0.000000e+00> : vector<8x16xf32>
    %279 = tpu.matmul %278, %277, %cst_158 {dimension_numbers = #tpu.dot_dimension_numbers<[1], [0], [0], [1], [0, 0, 1, 1], [], []>} : vector<8x8xf32>, vector<8x16xf32>, vector<8x16xf32> -> vector<8x16xf32>
    %c0_159 = arith.constant 0 : index
    %c0_160 = arith.constant 0 : index
    %280 = vector.load %arg11[%c0_159, %c0_160] : memref<8x1xf32, #tpu.memory_space<vmem>>, vector<8x1xf32>
    %281 = vector.broadcast %280 : vector<8x1xf32> to vector<8x16xf32>
    %282 = arith.addf %279, %281 : vector<8x16xf32>
    %cst_161 = arith.constant 0.000000e+00 : f32
    %283 = vector.broadcast %cst_161 : f32 to vector<8x16xf32>
    %284 = arith.maximumf %282, %283 : vector<8x16xf32>
    %c0_162 = arith.constant 0 : index
    %c0_163 = arith.constant 0 : index
    %285 = vector.load %arg12[%c0_162, %c0_163] : memref<16x8xf32, #tpu.memory_space<vmem>>, vector<16x8xf32>
    %cst_164 = arith.constant dense<0.000000e+00> : vector<16x16xf32>
    %286 = tpu.matmul %285, %284, %cst_164 {dimension_numbers = #tpu.dot_dimension_numbers<[1], [0], [0], [1], [0, 0, 1, 1], [], []>} : vector<16x8xf32>, vector<8x16xf32>, vector<16x16xf32> -> vector<16x16xf32>
    %c0_165 = arith.constant 0 : index
    %c0_166 = arith.constant 0 : index
    %287 = vector.load %arg13[%c0_165, %c0_166] : memref<16x1xf32, #tpu.memory_space<vmem>>, vector<16x1xf32>
    %288 = vector.broadcast %287 : vector<16x1xf32> to vector<16x16xf32>
    %289 = arith.addf %286, %288 : vector<16x16xf32>
    %cst_167 = arith.constant 0.000000e+00 : f32
    %290 = vector.broadcast %cst_167 : f32 to vector<16x16xf32>
    %291 = arith.maximumf %289, %290 : vector<16x16xf32>
    %292 = vector.shape_cast %269 : vector<19x16xf32> to vector<19x1x16xf32>
    %293 = vector.shape_cast %291 : vector<16x16xf32> to vector<1x16x16xf32>
    %294 = vector.broadcast %292 : vector<19x1x16xf32> to vector<19x16x16xf32>
    %295 = vector.broadcast %293 : vector<1x16x16xf32> to vector<19x16x16xf32>
    %296 = arith.mulf %294, %295 : vector<19x16x16xf32>
    %297 = arith.addf %252, %296 : vector<19x16x16xf32>
    %cst_168 = arith.constant 1.000000e+30 : f32
    %298 = vector.broadcast %cst_168 : f32 to vector<16x16xf32>
    %299 = arith.select %264, %298, %254 : vector<16x16xi1>, vector<16x16xf32>
    %cst_169 = arith.constant dense<0x7F800000> : vector<16xf32>
    %300 = vector.multi_reduction <minimumf>, %299, %cst_169 [0] : vector<16x16xf32> to vector<16xf32>
    %301 = vector.shape_cast %300 : vector<16xf32> to vector<1x16xf32>
    %302 = vector.broadcast %301 : vector<1x16xf32> to vector<16x16xf32>
    %303 = arith.cmpf oeq, %299, %302 : vector<16x16xf32>
    %c16_i32_170 = arith.constant 16 : i32
    %304 = vector.broadcast %c16_i32_170 : i32 to vector<16x16xi32>
    %305 = arith.select %303, %28, %304 : vector<16x16xi1>, vector<16x16xi32>
    %cst_171 = arith.constant dense<2147483647> : vector<16xi32>
    %306 = vector.multi_reduction <minsi>, %305, %cst_171 [0] : vector<16x16xi32> to vector<16xi32>
    %307 = vector.shape_cast %306 : vector<16xi32> to vector<1x16xi32>
    %308 = vector.broadcast %307 : vector<1x16xi32> to vector<16x16xi32>
    %309 = arith.cmpi eq, %305, %308 : vector<16x16xi32>
    %cst_172 = arith.constant 1.000000e+00 : f32
    %cst_173 = arith.constant 0.000000e+00 : f32
    %310 = vector.broadcast %cst_172 : f32 to vector<16x16xf32>
    %311 = vector.broadcast %cst_173 : f32 to vector<16x16xf32>
    %312 = arith.select %309, %310, %311 : vector<16x16xi1>, vector<16x16xf32>
    %cst_174 = arith.constant dense<0.000000e+00> : vector<19x16xf32>
    %313 = tpu.matmul %25, %312, %cst_174 {dimension_numbers = #tpu.dot_dimension_numbers<[1], [0], [0], [1], [0, 0, 1, 1], [], []>} : vector<19x16xf32>, vector<16x16xf32>, vector<19x16xf32> -> vector<19x16xf32>
    %314 = arith.subf %313, %27 : vector<19x16xf32>
    %c0_175 = arith.constant 0 : index
    %c0_176 = arith.constant 0 : index
    %315 = vector.load %arg8[%c0_175, %c0_176] : memref<8x3xf32, #tpu.memory_space<vmem>>, vector<8x3xf32>
    %316 = vector.extract_strided_slice %314 {offsets = [0, 0], sizes = [3, 16], strides = [1, 1]} : vector<19x16xf32> to vector<3x16xf32>
    %cst_177 = arith.constant dense<0.000000e+00> : vector<8x16xf32>
    %317 = tpu.matmul %315, %316, %cst_177 {dimension_numbers = #tpu.dot_dimension_numbers<[1], [0], [0], [1], [0, 0, 1, 1], [], []>} : vector<8x3xf32>, vector<3x16xf32>, vector<8x16xf32> -> vector<8x16xf32>
    %c0_178 = arith.constant 0 : index
    %c0_179 = arith.constant 0 : index
    %318 = vector.load %arg9[%c0_178, %c0_179] : memref<8x1xf32, #tpu.memory_space<vmem>>, vector<8x1xf32>
    %319 = vector.broadcast %318 : vector<8x1xf32> to vector<8x16xf32>
    %320 = arith.addf %317, %319 : vector<8x16xf32>
    %cst_180 = arith.constant 0.000000e+00 : f32
    %321 = vector.broadcast %cst_180 : f32 to vector<8x16xf32>
    %322 = arith.maximumf %320, %321 : vector<8x16xf32>
    %c0_181 = arith.constant 0 : index
    %c0_182 = arith.constant 0 : index
    %323 = vector.load %arg10[%c0_181, %c0_182] : memref<8x8xf32, #tpu.memory_space<vmem>>, vector<8x8xf32>
    %cst_183 = arith.constant dense<0.000000e+00> : vector<8x16xf32>
    %324 = tpu.matmul %323, %322, %cst_183 {dimension_numbers = #tpu.dot_dimension_numbers<[1], [0], [0], [1], [0, 0, 1, 1], [], []>} : vector<8x8xf32>, vector<8x16xf32>, vector<8x16xf32> -> vector<8x16xf32>
    %c0_184 = arith.constant 0 : index
    %c0_185 = arith.constant 0 : index
    %325 = vector.load %arg11[%c0_184, %c0_185] : memref<8x1xf32, #tpu.memory_space<vmem>>, vector<8x1xf32>
    %326 = vector.broadcast %325 : vector<8x1xf32> to vector<8x16xf32>
    %327 = arith.addf %324, %326 : vector<8x16xf32>
    %cst_186 = arith.constant 0.000000e+00 : f32
    %328 = vector.broadcast %cst_186 : f32 to vector<8x16xf32>
    %329 = arith.maximumf %327, %328 : vector<8x16xf32>
    %c0_187 = arith.constant 0 : index
    %c0_188 = arith.constant 0 : index
    %330 = vector.load %arg12[%c0_187, %c0_188] : memref<16x8xf32, #tpu.memory_space<vmem>>, vector<16x8xf32>
    %cst_189 = arith.constant dense<0.000000e+00> : vector<16x16xf32>
    %331 = tpu.matmul %330, %329, %cst_189 {dimension_numbers = #tpu.dot_dimension_numbers<[1], [0], [0], [1], [0, 0, 1, 1], [], []>} : vector<16x8xf32>, vector<8x16xf32>, vector<16x16xf32> -> vector<16x16xf32>
    %c0_190 = arith.constant 0 : index
    %c0_191 = arith.constant 0 : index
    %332 = vector.load %arg13[%c0_190, %c0_191] : memref<16x1xf32, #tpu.memory_space<vmem>>, vector<16x1xf32>
    %333 = vector.broadcast %332 : vector<16x1xf32> to vector<16x16xf32>
    %334 = arith.addf %331, %333 : vector<16x16xf32>
    %cst_192 = arith.constant 0.000000e+00 : f32
    %335 = vector.broadcast %cst_192 : f32 to vector<16x16xf32>
    %336 = arith.maximumf %334, %335 : vector<16x16xf32>
    %337 = vector.shape_cast %314 : vector<19x16xf32> to vector<19x1x16xf32>
    %338 = vector.shape_cast %336 : vector<16x16xf32> to vector<1x16x16xf32>
    %339 = vector.broadcast %337 : vector<19x1x16xf32> to vector<19x16x16xf32>
    %340 = vector.broadcast %338 : vector<1x16x16xf32> to vector<19x16x16xf32>
    %341 = arith.mulf %339, %340 : vector<19x16x16xf32>
    %342 = arith.addf %297, %341 : vector<19x16x16xf32>
    %cst_193 = arith.constant 1.000000e+30 : f32
    %343 = vector.broadcast %cst_193 : f32 to vector<16x16xf32>
    %344 = arith.select %309, %343, %299 : vector<16x16xi1>, vector<16x16xf32>
    %cst_194 = arith.constant dense<0x7F800000> : vector<16xf32>
    %345 = vector.multi_reduction <minimumf>, %344, %cst_194 [0] : vector<16x16xf32> to vector<16xf32>
    %346 = vector.shape_cast %345 : vector<16xf32> to vector<1x16xf32>
    %347 = vector.broadcast %346 : vector<1x16xf32> to vector<16x16xf32>
    %348 = arith.cmpf oeq, %344, %347 : vector<16x16xf32>
    %c16_i32_195 = arith.constant 16 : i32
    %349 = vector.broadcast %c16_i32_195 : i32 to vector<16x16xi32>
    %350 = arith.select %348, %28, %349 : vector<16x16xi1>, vector<16x16xi32>
    %cst_196 = arith.constant dense<2147483647> : vector<16xi32>
    %351 = vector.multi_reduction <minsi>, %350, %cst_196 [0] : vector<16x16xi32> to vector<16xi32>
    %352 = vector.shape_cast %351 : vector<16xi32> to vector<1x16xi32>
    %353 = vector.broadcast %352 : vector<1x16xi32> to vector<16x16xi32>
    %354 = arith.cmpi eq, %350, %353 : vector<16x16xi32>
    %cst_197 = arith.constant 1.000000e+00 : f32
    %cst_198 = arith.constant 0.000000e+00 : f32
    %355 = vector.broadcast %cst_197 : f32 to vector<16x16xf32>
    %356 = vector.broadcast %cst_198 : f32 to vector<16x16xf32>
    %357 = arith.select %354, %355, %356 : vector<16x16xi1>, vector<16x16xf32>
    %cst_199 = arith.constant dense<0.000000e+00> : vector<19x16xf32>
    %358 = tpu.matmul %25, %357, %cst_199 {dimension_numbers = #tpu.dot_dimension_numbers<[1], [0], [0], [1], [0, 0, 1, 1], [], []>} : vector<19x16xf32>, vector<16x16xf32>, vector<19x16xf32> -> vector<19x16xf32>
    %359 = arith.subf %358, %27 : vector<19x16xf32>
    %c0_200 = arith.constant 0 : index
    %c0_201 = arith.constant 0 : index
    %360 = vector.load %arg8[%c0_200, %c0_201] : memref<8x3xf32, #tpu.memory_space<vmem>>, vector<8x3xf32>
    %361 = vector.extract_strided_slice %359 {offsets = [0, 0], sizes = [3, 16], strides = [1, 1]} : vector<19x16xf32> to vector<3x16xf32>
    %cst_202 = arith.constant dense<0.000000e+00> : vector<8x16xf32>
    %362 = tpu.matmul %360, %361, %cst_202 {dimension_numbers = #tpu.dot_dimension_numbers<[1], [0], [0], [1], [0, 0, 1, 1], [], []>} : vector<8x3xf32>, vector<3x16xf32>, vector<8x16xf32> -> vector<8x16xf32>
    %c0_203 = arith.constant 0 : index
    %c0_204 = arith.constant 0 : index
    %363 = vector.load %arg9[%c0_203, %c0_204] : memref<8x1xf32, #tpu.memory_space<vmem>>, vector<8x1xf32>
    %364 = vector.broadcast %363 : vector<8x1xf32> to vector<8x16xf32>
    %365 = arith.addf %362, %364 : vector<8x16xf32>
    %cst_205 = arith.constant 0.000000e+00 : f32
    %366 = vector.broadcast %cst_205 : f32 to vector<8x16xf32>
    %367 = arith.maximumf %365, %366 : vector<8x16xf32>
    %c0_206 = arith.constant 0 : index
    %c0_207 = arith.constant 0 : index
    %368 = vector.load %arg10[%c0_206, %c0_207] : memref<8x8xf32, #tpu.memory_space<vmem>>, vector<8x8xf32>
    %cst_208 = arith.constant dense<0.000000e+00> : vector<8x16xf32>
    %369 = tpu.matmul %368, %367, %cst_208 {dimension_numbers = #tpu.dot_dimension_numbers<[1], [0], [0], [1], [0, 0, 1, 1], [], []>} : vector<8x8xf32>, vector<8x16xf32>, vector<8x16xf32> -> vector<8x16xf32>
    %c0_209 = arith.constant 0 : index
    %c0_210 = arith.constant 0 : index
    %370 = vector.load %arg11[%c0_209, %c0_210] : memref<8x1xf32, #tpu.memory_space<vmem>>, vector<8x1xf32>
    %371 = vector.broadcast %370 : vector<8x1xf32> to vector<8x16xf32>
    %372 = arith.addf %369, %371 : vector<8x16xf32>
    %cst_211 = arith.constant 0.000000e+00 : f32
    %373 = vector.broadcast %cst_211 : f32 to vector<8x16xf32>
    %374 = arith.maximumf %372, %373 : vector<8x16xf32>
    %c0_212 = arith.constant 0 : index
    %c0_213 = arith.constant 0 : index
    %375 = vector.load %arg12[%c0_212, %c0_213] : memref<16x8xf32, #tpu.memory_space<vmem>>, vector<16x8xf32>
    %cst_214 = arith.constant dense<0.000000e+00> : vector<16x16xf32>
    %376 = tpu.matmul %375, %374, %cst_214 {dimension_numbers = #tpu.dot_dimension_numbers<[1], [0], [0], [1], [0, 0, 1, 1], [], []>} : vector<16x8xf32>, vector<8x16xf32>, vector<16x16xf32> -> vector<16x16xf32>
    %c0_215 = arith.constant 0 : index
    %c0_216 = arith.constant 0 : index
    %377 = vector.load %arg13[%c0_215, %c0_216] : memref<16x1xf32, #tpu.memory_space<vmem>>, vector<16x1xf32>
    %378 = vector.broadcast %377 : vector<16x1xf32> to vector<16x16xf32>
    %379 = arith.addf %376, %378 : vector<16x16xf32>
    %cst_217 = arith.constant 0.000000e+00 : f32
    %380 = vector.broadcast %cst_217 : f32 to vector<16x16xf32>
    %381 = arith.maximumf %379, %380 : vector<16x16xf32>
    %382 = vector.shape_cast %359 : vector<19x16xf32> to vector<19x1x16xf32>
    %383 = vector.shape_cast %381 : vector<16x16xf32> to vector<1x16x16xf32>
    %384 = vector.broadcast %382 : vector<19x1x16xf32> to vector<19x16x16xf32>
    %385 = vector.broadcast %383 : vector<1x16x16xf32> to vector<19x16x16xf32>
    %386 = arith.mulf %384, %385 : vector<19x16x16xf32>
    %387 = arith.addf %342, %386 : vector<19x16x16xf32>
    %388 = vector.shape_cast %387 : vector<19x16x16xf32> to vector<304x16xf32>
    %c0_218 = arith.constant 0 : index
    %c0_219 = arith.constant 0 : index
    %389 = vector.load %arg14[%c0_218, %c0_219] : memref<16x304xf32, #tpu.memory_space<vmem>>, vector<16x304xf32>
    %cst_220 = arith.constant dense<0.000000e+00> : vector<16x16xf32>
    %390 = tpu.matmul %389, %388, %cst_220 {dimension_numbers = #tpu.dot_dimension_numbers<[1], [0], [0], [1], [0, 0, 1, 1], [], []>} : vector<16x304xf32>, vector<304x16xf32>, vector<16x16xf32> -> vector<16x16xf32>
    %c0_221 = arith.constant 0 : index
    %c0_222 = arith.constant 0 : index
    %391 = vector.load %arg15[%c0_221, %c0_222] : memref<16x1xf32, #tpu.memory_space<vmem>>, vector<16x1xf32>
    %392 = vector.broadcast %391 : vector<16x1xf32> to vector<16x16xf32>
    %393 = arith.addf %390, %392 : vector<16x16xf32>
    %c0_223 = arith.constant 0 : index
    %c0_224 = arith.constant 0 : index
    %c0_225 = arith.constant 0 : index
    %394 = vector.load %arg16[%c0_223, %c0_224, %c0_225] : memref<1x16x16xf32, #tpu.memory_space<vmem>>, vector<1x16x16xf32>
    %395 = vector.shape_cast %394 : vector<1x16x16xf32> to vector<16x16xf32>
    %396 = vector.shape_cast %393 : vector<16x16xf32> to vector<1x16x16xf32>
    tpu.vector_store %arg16[%c0_223, %c0_224, %c0_225], %396 {strides = array<i32>} : memref<1x16x16xf32, #tpu.memory_space<vmem>>, vector<1x16x16xf32>,
    return
  }
  func.func @transform_0(%arg0: i32, %arg1: i32) -> (i32, i32, i32) {
    %c0_i32 = arith.constant 0 : i32
    %c0_i32_0 = arith.constant 0 : i32
    %c0_i32_1 = arith.constant 0 : i32
    return %arg0, %c0_i32, %c0_i32_0 : i32, i32, i32
  }
  func.func @transform_1(%arg0: i32, %arg1: i32) -> (i32, i32, i32) {
    %c0_i32 = arith.constant 0 : i32
    %c0_i32_0 = arith.constant 0 : i32
    %c0_i32_1 = arith.constant 0 : i32
    return %arg0, %c0_i32, %c0_i32_0 : i32, i32, i32
  }
  func.func @transform_2(%arg0: i32, %arg1: i32) -> (i32, i32, i32) {
    %c0_i32 = arith.constant 0 : i32
    %c0_i32_0 = arith.constant 0 : i32
    return %arg0, %c0_i32, %arg1 : i32, i32, i32
  }
  func.func @transform_3(%arg0: i32, %arg1: i32) -> (i32, i32, i32) {
    %c0_i32 = arith.constant 0 : i32
    %c0_i32_0 = arith.constant 0 : i32
    %c0_i32_1 = arith.constant 0 : i32
    return %arg0, %c0_i32, %c0_i32_0 : i32, i32, i32
  }
  func.func @transform_4(%arg0: i32, %arg1: i32) -> (i32, i32) {
    %c0_i32 = arith.constant 0 : i32
    %c0_i32_0 = arith.constant 0 : i32
    %c0_i32_1 = arith.constant 0 : i32
    return %c0_i32, %c0_i32_0 : i32, i32
  }
  func.func @transform_5(%arg0: i32, %arg1: i32) -> (i32, i32) {
    %c0_i32 = arith.constant 0 : i32
    %c0_i32_0 = arith.constant 0 : i32
    %c0_i32_1 = arith.constant 0 : i32
    return %c0_i32, %c0_i32_0 : i32, i32
  }
  func.func @transform_6(%arg0: i32, %arg1: i32) -> (i32, i32) {
    %c0_i32 = arith.constant 0 : i32
    %c0_i32_0 = arith.constant 0 : i32
    %c0_i32_1 = arith.constant 0 : i32
    return %c0_i32, %c0_i32_0 : i32, i32
  }
  func.func @transform_7(%arg0: i32, %arg1: i32) -> (i32, i32) {
    %c0_i32 = arith.constant 0 : i32
    %c0_i32_0 = arith.constant 0 : i32
    %c0_i32_1 = arith.constant 0 : i32
    return %c0_i32, %c0_i32_0 : i32, i32
  }
  func.func @transform_8(%arg0: i32, %arg1: i32) -> (i32, i32) {
    %c0_i32 = arith.constant 0 : i32
    %c0_i32_0 = arith.constant 0 : i32
    %c0_i32_1 = arith.constant 0 : i32
    return %c0_i32, %c0_i32_0 : i32, i32
  }
  func.func @transform_9(%arg0: i32, %arg1: i32) -> (i32, i32) {
    %c0_i32 = arith.constant 0 : i32
    %c0_i32_0 = arith.constant 0 : i32
    %c0_i32_1 = arith.constant 0 : i32
    return %c0_i32, %c0_i32_0 : i32, i32
  }
  func.func @transform_10(%arg0: i32, %arg1: i32) -> (i32, i32) {
    %c0_i32 = arith.constant 0 : i32
    %c0_i32_0 = arith.constant 0 : i32
    %c0_i32_1 = arith.constant 0 : i32
    return %c0_i32, %c0_i32_0 : i32, i32
  }
  func.func @transform_11(%arg0: i32, %arg1: i32) -> (i32, i32) {
    %c0_i32 = arith.constant 0 : i32
    %c0_i32_0 = arith.constant 0 : i32
    %c0_i32_1 = arith.constant 0 : i32
    return %c0_i32, %c0_i32_0 : i32, i32
  }
  func.func @transform_12(%arg0: i32, %arg1: i32) -> (i32, i32) {
    %c0_i32 = arith.constant 0 : i32
    %c0_i32_0 = arith.constant 0 : i32
    %c0_i32_1 = arith.constant 0 : i32
    return %c0_i32, %c0_i32_0 : i32, i32
  }
  func.func @transform_13(%arg0: i32, %arg1: i32) -> (i32, i32) {
    %c0_i32 = arith.constant 0 : i32
    %c0_i32_0 = arith.constant 0 : i32
    %c0_i32_1 = arith.constant 0 : i32
    return %c0_i32, %c0_i32_0 : i32, i32
  }
  func.func @transform_14(%arg0: i32, %arg1: i32) -> (i32, i32, i32) {
    %c0_i32 = arith.constant 0 : i32
    %c0_i32_0 = arith.constant 0 : i32
    return %arg0, %c0_i32, %arg1 : i32, i32, i32
  }
}

module attributes {stable_mosaic.version = 11 : i64} {
  func.func @kernel(%arg0: i32, %arg1: i32, %arg2: memref<1x16x3xf32, #tpu.memory_space<vmem>>, %arg3: memref<1x3x16xf32, #tpu.memory_space<vmem>>, %arg4: memref<1x3x16xf32, #tpu.memory_space<vmem>>, %arg5: memref<1x13x16xf32, #tpu.memory_space<vmem>>, %arg6: memref<13x1xf32, #tpu.memory_space<vmem>>, %arg7: memref<13x1xf32, #tpu.memory_space<vmem>>, %arg8: memref<8x3xf32, #tpu.memory_space<vmem>>, %arg9: memref<8x1xf32, #tpu.memory_space<vmem>>, %arg10: memref<8x8xf32, #tpu.memory_space<vmem>>, %arg11: memref<8x1xf32, #tpu.memory_space<vmem>>, %arg12: memref<16x8xf32, #tpu.memory_space<vmem>>, %arg13: memref<16x1xf32, #tpu.memory_space<vmem>>, %arg14: memref<16x256xf32, #tpu.memory_space<vmem>>, %arg15: memref<16x1xf32, #tpu.memory_space<vmem>>, %arg16: memref<1x16x16xf32, #tpu.memory_space<vmem>>) attributes {dimension_semantics = [#tpu.dimension_semantics<parallel>, #tpu.dimension_semantics<parallel>], iteration_bounds = array<i64: 2, 1>, scalar_prefetch = 0 : i64, scratch_operands = 0 : i64, tpu.core_type = #tpu.core_type<tc>, window_params = [{transform_indices = @transform_0, window_bounds = array<i64: 1, 16, 3>}, {transform_indices = @transform_1, window_bounds = array<i64: 1, 3, 16>}, {transform_indices = @transform_2, window_bounds = array<i64: 1, 3, 16>}, {transform_indices = @transform_3, window_bounds = array<i64: 1, 13, 16>}, {pipeline_mode = #tpu.pipeline_mode<synchronous>, transform_indices = @transform_4, window_bounds = array<i64: 13, 1>}, {pipeline_mode = #tpu.pipeline_mode<synchronous>, transform_indices = @transform_5, window_bounds = array<i64: 13, 1>}, {pipeline_mode = #tpu.pipeline_mode<synchronous>, transform_indices = @transform_6, window_bounds = array<i64: 8, 3>}, {pipeline_mode = #tpu.pipeline_mode<synchronous>, transform_indices = @transform_7, window_bounds = array<i64: 8, 1>}, {pipeline_mode = #tpu.pipeline_mode<synchronous>, transform_indices = @transform_8, window_bounds = array<i64: 8, 8>}, {pipeline_mode = #tpu.pipeline_mode<synchronous>, transform_indices = @transform_9, window_bounds = array<i64: 8, 1>}, {pipeline_mode = #tpu.pipeline_mode<synchronous>, transform_indices = @transform_10, window_bounds = array<i64: 16, 8>}, {pipeline_mode = #tpu.pipeline_mode<synchronous>, transform_indices = @transform_11, window_bounds = array<i64: 16, 1>}, {pipeline_mode = #tpu.pipeline_mode<synchronous>, transform_indices = @transform_12, window_bounds = array<i64: 16, 256>}, {pipeline_mode = #tpu.pipeline_mode<synchronous>, transform_indices = @transform_13, window_bounds = array<i64: 16, 1>}, {transform_indices = @transform_14, window_bounds = array<i64: 1, 16, 16>}]} {
    %c0 = arith.constant 0 : index
    %c0_0 = arith.constant 0 : index
    %c0_1 = arith.constant 0 : index
    %0 = vector.load %arg2[%c0, %c0_0, %c0_1] : memref<1x16x3xf32, #tpu.memory_space<vmem>>, vector<1x16x3xf32>
    %1 = vector.shape_cast %0 : vector<1x16x3xf32> to vector<16x3xf32>
    %c0_2 = arith.constant 0 : index
    %c0_3 = arith.constant 0 : index
    %c0_4 = arith.constant 0 : index
    %2 = vector.load %arg3[%c0_2, %c0_3, %c0_4] : memref<1x3x16xf32, #tpu.memory_space<vmem>>, vector<1x3x16xf32>
    %3 = vector.shape_cast %2 : vector<1x3x16xf32> to vector<3x16xf32>
    %c0_5 = arith.constant 0 : index
    %c0_6 = arith.constant 0 : index
    %c0_7 = arith.constant 0 : index
    %4 = vector.load %arg4[%c0_5, %c0_6, %c0_7] : memref<1x3x16xf32, #tpu.memory_space<vmem>>, vector<1x3x16xf32>
    %5 = vector.shape_cast %4 : vector<1x3x16xf32> to vector<3x16xf32>
    %c0_8 = arith.constant 0 : index
    %c0_9 = arith.constant 0 : index
    %c0_10 = arith.constant 0 : index
    %6 = vector.load %arg5[%c0_8, %c0_9, %c0_10] : memref<1x13x16xf32, #tpu.memory_space<vmem>>, vector<1x13x16xf32>
    %7 = vector.shape_cast %6 : vector<1x13x16xf32> to vector<13x16xf32>
    %8 = arith.mulf %1, %1 : vector<16x3xf32>
    %cst = arith.constant dense<0.000000e+00> : vector<16xf32>
    %9 = vector.multi_reduction <add>, %8, %cst [1] : vector<16x3xf32> to vector<16xf32>
    %10 = vector.shape_cast %9 : vector<16xf32> to vector<16x1xf32>
    %cst_11 = arith.constant -2.000000e+00 : f32
    %11 = vector.broadcast %cst_11 : f32 to vector<3x16xf32>
    %12 = arith.mulf %5, %11 : vector<3x16xf32>
    %cst_12 = arith.constant dense<0.000000e+00> : vector<16x16xf32>
    %13 = tpu.matmul %1, %12, %cst_12 {dimension_numbers = #tpu.dot_dimension_numbers<[1], [0], [0], [1], [0, 0, 1, 1], [], []>} : vector<16x3xf32>, vector<3x16xf32>, vector<16x16xf32> -> vector<16x16xf32>
    %14 = vector.broadcast %10 : vector<16x1xf32> to vector<16x16xf32>
    %15 = arith.addf %13, %14 : vector<16x16xf32>
    %16 = tpu.concatenate %3, %7 in 0 : vector<3x16xf32>, vector<13x16xf32> -> vector<16x16xf32>
    %cst_13 = arith.constant 0.000000e+00 : f32
    %17 = vector.broadcast %cst_13 : f32 to vector<13x16xf32>
    %18 = tpu.concatenate %5, %17 in 0 : vector<3x16xf32>, vector<13x16xf32> -> vector<16x16xf32>
    %19 = tpu.iota {dimensions = array<i32: 0>} : vector<16x16xi32>
    %cst_14 = arith.constant 0.000000e+00 : f32
    %20 = vector.broadcast %cst_14 : f32 to vector<16x16x16xf32>
    %cst_15 = arith.constant dense<0x7F800000> : vector<16xf32>
    %21 = vector.multi_reduction <minimumf>, %15, %cst_15 [0] : vector<16x16xf32> to vector<16xf32>
    %22 = vector.shape_cast %21 : vector<16xf32> to vector<1x16xf32>
    %23 = vector.broadcast %22 : vector<1x16xf32> to vector<16x16xf32>
    %24 = arith.cmpf oeq, %15, %23 : vector<16x16xf32>
    %c16_i32 = arith.constant 16 : i32
    %25 = vector.broadcast %c16_i32 : i32 to vector<16x16xi32>
    %26 = arith.select %24, %19, %25 : vector<16x16xi1>, vector<16x16xi32>
    %cst_16 = arith.constant dense<2147483647> : vector<16xi32>
    %27 = vector.multi_reduction <minsi>, %26, %cst_16 [0] : vector<16x16xi32> to vector<16xi32>
    %28 = vector.shape_cast %27 : vector<16xi32> to vector<1x16xi32>
    %29 = vector.broadcast %28 : vector<1x16xi32> to vector<16x16xi32>
    %30 = arith.cmpi eq, %26, %29 : vector<16x16xi32>
    %cst_17 = arith.constant 1.000000e+00 : f32
    %cst_18 = arith.constant 0.000000e+00 : f32
    %31 = vector.broadcast %cst_17 : f32 to vector<16x16xf32>
    %32 = vector.broadcast %cst_18 : f32 to vector<16x16xf32>
    %33 = arith.select %30, %31, %32 : vector<16x16xi1>, vector<16x16xf32>
    %cst_19 = arith.constant dense<0.000000e+00> : vector<16x16xf32>
    %34 = tpu.matmul %16, %33, %cst_19 {dimension_numbers = #tpu.dot_dimension_numbers<[1], [0], [0], [1], [0, 0, 1, 1], [], []>} : vector<16x16xf32>, vector<16x16xf32>, vector<16x16xf32> -> vector<16x16xf32>
    %35 = arith.subf %34, %18 : vector<16x16xf32>
    %c0_20 = arith.constant 0 : index
    %c0_21 = arith.constant 0 : index
    %36 = vector.load %arg8[%c0_20, %c0_21] : memref<8x3xf32, #tpu.memory_space<vmem>>, vector<8x3xf32>
    %37 = vector.extract_strided_slice %35 {offsets = [0, 0], sizes = [3, 16], strides = [1, 1]} : vector<16x16xf32> to vector<3x16xf32>
    %cst_22 = arith.constant dense<0.000000e+00> : vector<8x16xf32>
    %38 = tpu.matmul %36, %37, %cst_22 {dimension_numbers = #tpu.dot_dimension_numbers<[1], [0], [0], [1], [0, 0, 1, 1], [], []>} : vector<8x3xf32>, vector<3x16xf32>, vector<8x16xf32> -> vector<8x16xf32>
    %c0_23 = arith.constant 0 : index
    %c0_24 = arith.constant 0 : index
    %39 = vector.load %arg9[%c0_23, %c0_24] : memref<8x1xf32, #tpu.memory_space<vmem>>, vector<8x1xf32>
    %40 = vector.broadcast %39 : vector<8x1xf32> to vector<8x16xf32>
    %41 = arith.addf %38, %40 : vector<8x16xf32>
    %cst_25 = arith.constant 0.000000e+00 : f32
    %42 = vector.broadcast %cst_25 : f32 to vector<8x16xf32>
    %43 = arith.maximumf %41, %42 : vector<8x16xf32>
    %c0_26 = arith.constant 0 : index
    %c0_27 = arith.constant 0 : index
    %44 = vector.load %arg10[%c0_26, %c0_27] : memref<8x8xf32, #tpu.memory_space<vmem>>, vector<8x8xf32>
    %cst_28 = arith.constant dense<0.000000e+00> : vector<8x16xf32>
    %45 = tpu.matmul %44, %43, %cst_28 {dimension_numbers = #tpu.dot_dimension_numbers<[1], [0], [0], [1], [0, 0, 1, 1], [], []>} : vector<8x8xf32>, vector<8x16xf32>, vector<8x16xf32> -> vector<8x16xf32>
    %c0_29 = arith.constant 0 : index
    %c0_30 = arith.constant 0 : index
    %46 = vector.load %arg11[%c0_29, %c0_30] : memref<8x1xf32, #tpu.memory_space<vmem>>, vector<8x1xf32>
    %47 = vector.broadcast %46 : vector<8x1xf32> to vector<8x16xf32>
    %48 = arith.addf %45, %47 : vector<8x16xf32>
    %cst_31 = arith.constant 0.000000e+00 : f32
    %49 = vector.broadcast %cst_31 : f32 to vector<8x16xf32>
    %50 = arith.maximumf %48, %49 : vector<8x16xf32>
    %c0_32 = arith.constant 0 : index
    %c0_33 = arith.constant 0 : index
    %51 = vector.load %arg12[%c0_32, %c0_33] : memref<16x8xf32, #tpu.memory_space<vmem>>, vector<16x8xf32>
    %cst_34 = arith.constant dense<0.000000e+00> : vector<16x16xf32>
    %52 = tpu.matmul %51, %50, %cst_34 {dimension_numbers = #tpu.dot_dimension_numbers<[1], [0], [0], [1], [0, 0, 1, 1], [], []>} : vector<16x8xf32>, vector<8x16xf32>, vector<16x16xf32> -> vector<16x16xf32>
    %c0_35 = arith.constant 0 : index
    %c0_36 = arith.constant 0 : index
    %53 = vector.load %arg13[%c0_35, %c0_36] : memref<16x1xf32, #tpu.memory_space<vmem>>, vector<16x1xf32>
    %54 = vector.broadcast %53 : vector<16x1xf32> to vector<16x16xf32>
    %55 = arith.addf %52, %54 : vector<16x16xf32>
    %cst_37 = arith.constant 0.000000e+00 : f32
    %56 = vector.broadcast %cst_37 : f32 to vector<16x16xf32>
    %57 = arith.maximumf %55, %56 : vector<16x16xf32>
    %58 = vector.shape_cast %35 : vector<16x16xf32> to vector<16x1x16xf32>
    %59 = vector.shape_cast %57 : vector<16x16xf32> to vector<1x16x16xf32>
    %60 = vector.broadcast %58 : vector<16x1x16xf32> to vector<16x16x16xf32>
    %61 = vector.broadcast %59 : vector<1x16x16xf32> to vector<16x16x16xf32>
    %62 = arith.mulf %60, %61 : vector<16x16x16xf32>
    %63 = arith.addf %20, %62 : vector<16x16x16xf32>
    %cst_38 = arith.constant 1.000000e+30 : f32
    %64 = vector.broadcast %cst_38 : f32 to vector<16x16xf32>
    %65 = arith.select %30, %64, %15 : vector<16x16xi1>, vector<16x16xf32>
    %cst_39 = arith.constant dense<0x7F800000> : vector<16xf32>
    %66 = vector.multi_reduction <minimumf>, %65, %cst_39 [0] : vector<16x16xf32> to vector<16xf32>
    %67 = vector.shape_cast %66 : vector<16xf32> to vector<1x16xf32>
    %68 = vector.broadcast %67 : vector<1x16xf32> to vector<16x16xf32>
    %69 = arith.cmpf oeq, %65, %68 : vector<16x16xf32>
    %c16_i32_40 = arith.constant 16 : i32
    %70 = vector.broadcast %c16_i32_40 : i32 to vector<16x16xi32>
    %71 = arith.select %69, %19, %70 : vector<16x16xi1>, vector<16x16xi32>
    %cst_41 = arith.constant dense<2147483647> : vector<16xi32>
    %72 = vector.multi_reduction <minsi>, %71, %cst_41 [0] : vector<16x16xi32> to vector<16xi32>
    %73 = vector.shape_cast %72 : vector<16xi32> to vector<1x16xi32>
    %74 = vector.broadcast %73 : vector<1x16xi32> to vector<16x16xi32>
    %75 = arith.cmpi eq, %71, %74 : vector<16x16xi32>
    %cst_42 = arith.constant 1.000000e+00 : f32
    %cst_43 = arith.constant 0.000000e+00 : f32
    %76 = vector.broadcast %cst_42 : f32 to vector<16x16xf32>
    %77 = vector.broadcast %cst_43 : f32 to vector<16x16xf32>
    %78 = arith.select %75, %76, %77 : vector<16x16xi1>, vector<16x16xf32>
    %cst_44 = arith.constant dense<0.000000e+00> : vector<16x16xf32>
    %79 = tpu.matmul %16, %78, %cst_44 {dimension_numbers = #tpu.dot_dimension_numbers<[1], [0], [0], [1], [0, 0, 1, 1], [], []>} : vector<16x16xf32>, vector<16x16xf32>, vector<16x16xf32> -> vector<16x16xf32>
    %80 = arith.subf %79, %18 : vector<16x16xf32>
    %c0_45 = arith.constant 0 : index
    %c0_46 = arith.constant 0 : index
    %81 = vector.load %arg8[%c0_45, %c0_46] : memref<8x3xf32, #tpu.memory_space<vmem>>, vector<8x3xf32>
    %82 = vector.extract_strided_slice %80 {offsets = [0, 0], sizes = [3, 16], strides = [1, 1]} : vector<16x16xf32> to vector<3x16xf32>
    %cst_47 = arith.constant dense<0.000000e+00> : vector<8x16xf32>
    %83 = tpu.matmul %81, %82, %cst_47 {dimension_numbers = #tpu.dot_dimension_numbers<[1], [0], [0], [1], [0, 0, 1, 1], [], []>} : vector<8x3xf32>, vector<3x16xf32>, vector<8x16xf32> -> vector<8x16xf32>
    %c0_48 = arith.constant 0 : index
    %c0_49 = arith.constant 0 : index
    %84 = vector.load %arg9[%c0_48, %c0_49] : memref<8x1xf32, #tpu.memory_space<vmem>>, vector<8x1xf32>
    %85 = vector.broadcast %84 : vector<8x1xf32> to vector<8x16xf32>
    %86 = arith.addf %83, %85 : vector<8x16xf32>
    %cst_50 = arith.constant 0.000000e+00 : f32
    %87 = vector.broadcast %cst_50 : f32 to vector<8x16xf32>
    %88 = arith.maximumf %86, %87 : vector<8x16xf32>
    %c0_51 = arith.constant 0 : index
    %c0_52 = arith.constant 0 : index
    %89 = vector.load %arg10[%c0_51, %c0_52] : memref<8x8xf32, #tpu.memory_space<vmem>>, vector<8x8xf32>
    %cst_53 = arith.constant dense<0.000000e+00> : vector<8x16xf32>
    %90 = tpu.matmul %89, %88, %cst_53 {dimension_numbers = #tpu.dot_dimension_numbers<[1], [0], [0], [1], [0, 0, 1, 1], [], []>} : vector<8x8xf32>, vector<8x16xf32>, vector<8x16xf32> -> vector<8x16xf32>
    %c0_54 = arith.constant 0 : index
    %c0_55 = arith.constant 0 : index
    %91 = vector.load %arg11[%c0_54, %c0_55] : memref<8x1xf32, #tpu.memory_space<vmem>>, vector<8x1xf32>
    %92 = vector.broadcast %91 : vector<8x1xf32> to vector<8x16xf32>
    %93 = arith.addf %90, %92 : vector<8x16xf32>
    %cst_56 = arith.constant 0.000000e+00 : f32
    %94 = vector.broadcast %cst_56 : f32 to vector<8x16xf32>
    %95 = arith.maximumf %93, %94 : vector<8x16xf32>
    %c0_57 = arith.constant 0 : index
    %c0_58 = arith.constant 0 : index
    %96 = vector.load %arg12[%c0_57, %c0_58] : memref<16x8xf32, #tpu.memory_space<vmem>>, vector<16x8xf32>
    %cst_59 = arith.constant dense<0.000000e+00> : vector<16x16xf32>
    %97 = tpu.matmul %96, %95, %cst_59 {dimension_numbers = #tpu.dot_dimension_numbers<[1], [0], [0], [1], [0, 0, 1, 1], [], []>} : vector<16x8xf32>, vector<8x16xf32>, vector<16x16xf32> -> vector<16x16xf32>
    %c0_60 = arith.constant 0 : index
    %c0_61 = arith.constant 0 : index
    %98 = vector.load %arg13[%c0_60, %c0_61] : memref<16x1xf32, #tpu.memory_space<vmem>>, vector<16x1xf32>
    %99 = vector.broadcast %98 : vector<16x1xf32> to vector<16x16xf32>
    %100 = arith.addf %97, %99 : vector<16x16xf32>
    %cst_62 = arith.constant 0.000000e+00 : f32
    %101 = vector.broadcast %cst_62 : f32 to vector<16x16xf32>
    %102 = arith.maximumf %100, %101 : vector<16x16xf32>
    %103 = vector.shape_cast %80 : vector<16x16xf32> to vector<16x1x16xf32>
    %104 = vector.shape_cast %102 : vector<16x16xf32> to vector<1x16x16xf32>
    %105 = vector.broadcast %103 : vector<16x1x16xf32> to vector<16x16x16xf32>
    %106 = vector.broadcast %104 : vector<1x16x16xf32> to vector<16x16x16xf32>
    %107 = arith.mulf %105, %106 : vector<16x16x16xf32>
    %108 = arith.addf %63, %107 : vector<16x16x16xf32>
    %cst_63 = arith.constant 1.000000e+30 : f32
    %109 = vector.broadcast %cst_63 : f32 to vector<16x16xf32>
    %110 = arith.select %75, %109, %65 : vector<16x16xi1>, vector<16x16xf32>
    %cst_64 = arith.constant dense<0x7F800000> : vector<16xf32>
    %111 = vector.multi_reduction <minimumf>, %110, %cst_64 [0] : vector<16x16xf32> to vector<16xf32>
    %112 = vector.shape_cast %111 : vector<16xf32> to vector<1x16xf32>
    %113 = vector.broadcast %112 : vector<1x16xf32> to vector<16x16xf32>
    %114 = arith.cmpf oeq, %110, %113 : vector<16x16xf32>
    %c16_i32_65 = arith.constant 16 : i32
    %115 = vector.broadcast %c16_i32_65 : i32 to vector<16x16xi32>
    %116 = arith.select %114, %19, %115 : vector<16x16xi1>, vector<16x16xi32>
    %cst_66 = arith.constant dense<2147483647> : vector<16xi32>
    %117 = vector.multi_reduction <minsi>, %116, %cst_66 [0] : vector<16x16xi32> to vector<16xi32>
    %118 = vector.shape_cast %117 : vector<16xi32> to vector<1x16xi32>
    %119 = vector.broadcast %118 : vector<1x16xi32> to vector<16x16xi32>
    %120 = arith.cmpi eq, %116, %119 : vector<16x16xi32>
    %cst_67 = arith.constant 1.000000e+00 : f32
    %cst_68 = arith.constant 0.000000e+00 : f32
    %121 = vector.broadcast %cst_67 : f32 to vector<16x16xf32>
    %122 = vector.broadcast %cst_68 : f32 to vector<16x16xf32>
    %123 = arith.select %120, %121, %122 : vector<16x16xi1>, vector<16x16xf32>
    %cst_69 = arith.constant dense<0.000000e+00> : vector<16x16xf32>
    %124 = tpu.matmul %16, %123, %cst_69 {dimension_numbers = #tpu.dot_dimension_numbers<[1], [0], [0], [1], [0, 0, 1, 1], [], []>} : vector<16x16xf32>, vector<16x16xf32>, vector<16x16xf32> -> vector<16x16xf32>
    %125 = arith.subf %124, %18 : vector<16x16xf32>
    %c0_70 = arith.constant 0 : index
    %c0_71 = arith.constant 0 : index
    %126 = vector.load %arg8[%c0_70, %c0_71] : memref<8x3xf32, #tpu.memory_space<vmem>>, vector<8x3xf32>
    %127 = vector.extract_strided_slice %125 {offsets = [0, 0], sizes = [3, 16], strides = [1, 1]} : vector<16x16xf32> to vector<3x16xf32>
    %cst_72 = arith.constant dense<0.000000e+00> : vector<8x16xf32>
    %128 = tpu.matmul %126, %127, %cst_72 {dimension_numbers = #tpu.dot_dimension_numbers<[1], [0], [0], [1], [0, 0, 1, 1], [], []>} : vector<8x3xf32>, vector<3x16xf32>, vector<8x16xf32> -> vector<8x16xf32>
    %c0_73 = arith.constant 0 : index
    %c0_74 = arith.constant 0 : index
    %129 = vector.load %arg9[%c0_73, %c0_74] : memref<8x1xf32, #tpu.memory_space<vmem>>, vector<8x1xf32>
    %130 = vector.broadcast %129 : vector<8x1xf32> to vector<8x16xf32>
    %131 = arith.addf %128, %130 : vector<8x16xf32>
    %cst_75 = arith.constant 0.000000e+00 : f32
    %132 = vector.broadcast %cst_75 : f32 to vector<8x16xf32>
    %133 = arith.maximumf %131, %132 : vector<8x16xf32>
    %c0_76 = arith.constant 0 : index
    %c0_77 = arith.constant 0 : index
    %134 = vector.load %arg10[%c0_76, %c0_77] : memref<8x8xf32, #tpu.memory_space<vmem>>, vector<8x8xf32>
    %cst_78 = arith.constant dense<0.000000e+00> : vector<8x16xf32>
    %135 = tpu.matmul %134, %133, %cst_78 {dimension_numbers = #tpu.dot_dimension_numbers<[1], [0], [0], [1], [0, 0, 1, 1], [], []>} : vector<8x8xf32>, vector<8x16xf32>, vector<8x16xf32> -> vector<8x16xf32>
    %c0_79 = arith.constant 0 : index
    %c0_80 = arith.constant 0 : index
    %136 = vector.load %arg11[%c0_79, %c0_80] : memref<8x1xf32, #tpu.memory_space<vmem>>, vector<8x1xf32>
    %137 = vector.broadcast %136 : vector<8x1xf32> to vector<8x16xf32>
    %138 = arith.addf %135, %137 : vector<8x16xf32>
    %cst_81 = arith.constant 0.000000e+00 : f32
    %139 = vector.broadcast %cst_81 : f32 to vector<8x16xf32>
    %140 = arith.maximumf %138, %139 : vector<8x16xf32>
    %c0_82 = arith.constant 0 : index
    %c0_83 = arith.constant 0 : index
    %141 = vector.load %arg12[%c0_82, %c0_83] : memref<16x8xf32, #tpu.memory_space<vmem>>, vector<16x8xf32>
    %cst_84 = arith.constant dense<0.000000e+00> : vector<16x16xf32>
    %142 = tpu.matmul %141, %140, %cst_84 {dimension_numbers = #tpu.dot_dimension_numbers<[1], [0], [0], [1], [0, 0, 1, 1], [], []>} : vector<16x8xf32>, vector<8x16xf32>, vector<16x16xf32> -> vector<16x16xf32>
    %c0_85 = arith.constant 0 : index
    %c0_86 = arith.constant 0 : index
    %143 = vector.load %arg13[%c0_85, %c0_86] : memref<16x1xf32, #tpu.memory_space<vmem>>, vector<16x1xf32>
    %144 = vector.broadcast %143 : vector<16x1xf32> to vector<16x16xf32>
    %145 = arith.addf %142, %144 : vector<16x16xf32>
    %cst_87 = arith.constant 0.000000e+00 : f32
    %146 = vector.broadcast %cst_87 : f32 to vector<16x16xf32>
    %147 = arith.maximumf %145, %146 : vector<16x16xf32>
    %148 = vector.shape_cast %125 : vector<16x16xf32> to vector<16x1x16xf32>
    %149 = vector.shape_cast %147 : vector<16x16xf32> to vector<1x16x16xf32>
    %150 = vector.broadcast %148 : vector<16x1x16xf32> to vector<16x16x16xf32>
    %151 = vector.broadcast %149 : vector<1x16x16xf32> to vector<16x16x16xf32>
    %152 = arith.mulf %150, %151 : vector<16x16x16xf32>
    %153 = arith.addf %108, %152 : vector<16x16x16xf32>
    %cst_88 = arith.constant 1.000000e+30 : f32
    %154 = vector.broadcast %cst_88 : f32 to vector<16x16xf32>
    %155 = arith.select %120, %154, %110 : vector<16x16xi1>, vector<16x16xf32>
    %cst_89 = arith.constant dense<0x7F800000> : vector<16xf32>
    %156 = vector.multi_reduction <minimumf>, %155, %cst_89 [0] : vector<16x16xf32> to vector<16xf32>
    %157 = vector.shape_cast %156 : vector<16xf32> to vector<1x16xf32>
    %158 = vector.broadcast %157 : vector<1x16xf32> to vector<16x16xf32>
    %159 = arith.cmpf oeq, %155, %158 : vector<16x16xf32>
    %c16_i32_90 = arith.constant 16 : i32
    %160 = vector.broadcast %c16_i32_90 : i32 to vector<16x16xi32>
    %161 = arith.select %159, %19, %160 : vector<16x16xi1>, vector<16x16xi32>
    %cst_91 = arith.constant dense<2147483647> : vector<16xi32>
    %162 = vector.multi_reduction <minsi>, %161, %cst_91 [0] : vector<16x16xi32> to vector<16xi32>
    %163 = vector.shape_cast %162 : vector<16xi32> to vector<1x16xi32>
    %164 = vector.broadcast %163 : vector<1x16xi32> to vector<16x16xi32>
    %165 = arith.cmpi eq, %161, %164 : vector<16x16xi32>
    %cst_92 = arith.constant 1.000000e+00 : f32
    %cst_93 = arith.constant 0.000000e+00 : f32
    %166 = vector.broadcast %cst_92 : f32 to vector<16x16xf32>
    %167 = vector.broadcast %cst_93 : f32 to vector<16x16xf32>
    %168 = arith.select %165, %166, %167 : vector<16x16xi1>, vector<16x16xf32>
    %cst_94 = arith.constant dense<0.000000e+00> : vector<16x16xf32>
    %169 = tpu.matmul %16, %168, %cst_94 {dimension_numbers = #tpu.dot_dimension_numbers<[1], [0], [0], [1], [0, 0, 1, 1], [], []>} : vector<16x16xf32>, vector<16x16xf32>, vector<16x16xf32> -> vector<16x16xf32>
    %170 = arith.subf %169, %18 : vector<16x16xf32>
    %c0_95 = arith.constant 0 : index
    %c0_96 = arith.constant 0 : index
    %171 = vector.load %arg8[%c0_95, %c0_96] : memref<8x3xf32, #tpu.memory_space<vmem>>, vector<8x3xf32>
    %172 = vector.extract_strided_slice %170 {offsets = [0, 0], sizes = [3, 16], strides = [1, 1]} : vector<16x16xf32> to vector<3x16xf32>
    %cst_97 = arith.constant dense<0.000000e+00> : vector<8x16xf32>
    %173 = tpu.matmul %171, %172, %cst_97 {dimension_numbers = #tpu.dot_dimension_numbers<[1], [0], [0], [1], [0, 0, 1, 1], [], []>} : vector<8x3xf32>, vector<3x16xf32>, vector<8x16xf32> -> vector<8x16xf32>
    %c0_98 = arith.constant 0 : index
    %c0_99 = arith.constant 0 : index
    %174 = vector.load %arg9[%c0_98, %c0_99] : memref<8x1xf32, #tpu.memory_space<vmem>>, vector<8x1xf32>
    %175 = vector.broadcast %174 : vector<8x1xf32> to vector<8x16xf32>
    %176 = arith.addf %173, %175 : vector<8x16xf32>
    %cst_100 = arith.constant 0.000000e+00 : f32
    %177 = vector.broadcast %cst_100 : f32 to vector<8x16xf32>
    %178 = arith.maximumf %176, %177 : vector<8x16xf32>
    %c0_101 = arith.constant 0 : index
    %c0_102 = arith.constant 0 : index
    %179 = vector.load %arg10[%c0_101, %c0_102] : memref<8x8xf32, #tpu.memory_space<vmem>>, vector<8x8xf32>
    %cst_103 = arith.constant dense<0.000000e+00> : vector<8x16xf32>
    %180 = tpu.matmul %179, %178, %cst_103 {dimension_numbers = #tpu.dot_dimension_numbers<[1], [0], [0], [1], [0, 0, 1, 1], [], []>} : vector<8x8xf32>, vector<8x16xf32>, vector<8x16xf32> -> vector<8x16xf32>
    %c0_104 = arith.constant 0 : index
    %c0_105 = arith.constant 0 : index
    %181 = vector.load %arg11[%c0_104, %c0_105] : memref<8x1xf32, #tpu.memory_space<vmem>>, vector<8x1xf32>
    %182 = vector.broadcast %181 : vector<8x1xf32> to vector<8x16xf32>
    %183 = arith.addf %180, %182 : vector<8x16xf32>
    %cst_106 = arith.constant 0.000000e+00 : f32
    %184 = vector.broadcast %cst_106 : f32 to vector<8x16xf32>
    %185 = arith.maximumf %183, %184 : vector<8x16xf32>
    %c0_107 = arith.constant 0 : index
    %c0_108 = arith.constant 0 : index
    %186 = vector.load %arg12[%c0_107, %c0_108] : memref<16x8xf32, #tpu.memory_space<vmem>>, vector<16x8xf32>
    %cst_109 = arith.constant dense<0.000000e+00> : vector<16x16xf32>
    %187 = tpu.matmul %186, %185, %cst_109 {dimension_numbers = #tpu.dot_dimension_numbers<[1], [0], [0], [1], [0, 0, 1, 1], [], []>} : vector<16x8xf32>, vector<8x16xf32>, vector<16x16xf32> -> vector<16x16xf32>
    %c0_110 = arith.constant 0 : index
    %c0_111 = arith.constant 0 : index
    %188 = vector.load %arg13[%c0_110, %c0_111] : memref<16x1xf32, #tpu.memory_space<vmem>>, vector<16x1xf32>
    %189 = vector.broadcast %188 : vector<16x1xf32> to vector<16x16xf32>
    %190 = arith.addf %187, %189 : vector<16x16xf32>
    %cst_112 = arith.constant 0.000000e+00 : f32
    %191 = vector.broadcast %cst_112 : f32 to vector<16x16xf32>
    %192 = arith.maximumf %190, %191 : vector<16x16xf32>
    %193 = vector.shape_cast %170 : vector<16x16xf32> to vector<16x1x16xf32>
    %194 = vector.shape_cast %192 : vector<16x16xf32> to vector<1x16x16xf32>
    %195 = vector.broadcast %193 : vector<16x1x16xf32> to vector<16x16x16xf32>
    %196 = vector.broadcast %194 : vector<1x16x16xf32> to vector<16x16x16xf32>
    %197 = arith.mulf %195, %196 : vector<16x16x16xf32>
    %198 = arith.addf %153, %197 : vector<16x16x16xf32>
    %cst_113 = arith.constant 1.000000e+30 : f32
    %199 = vector.broadcast %cst_113 : f32 to vector<16x16xf32>
    %200 = arith.select %165, %199, %155 : vector<16x16xi1>, vector<16x16xf32>
    %cst_114 = arith.constant dense<0x7F800000> : vector<16xf32>
    %201 = vector.multi_reduction <minimumf>, %200, %cst_114 [0] : vector<16x16xf32> to vector<16xf32>
    %202 = vector.shape_cast %201 : vector<16xf32> to vector<1x16xf32>
    %203 = vector.broadcast %202 : vector<1x16xf32> to vector<16x16xf32>
    %204 = arith.cmpf oeq, %200, %203 : vector<16x16xf32>
    %c16_i32_115 = arith.constant 16 : i32
    %205 = vector.broadcast %c16_i32_115 : i32 to vector<16x16xi32>
    %206 = arith.select %204, %19, %205 : vector<16x16xi1>, vector<16x16xi32>
    %cst_116 = arith.constant dense<2147483647> : vector<16xi32>
    %207 = vector.multi_reduction <minsi>, %206, %cst_116 [0] : vector<16x16xi32> to vector<16xi32>
    %208 = vector.shape_cast %207 : vector<16xi32> to vector<1x16xi32>
    %209 = vector.broadcast %208 : vector<1x16xi32> to vector<16x16xi32>
    %210 = arith.cmpi eq, %206, %209 : vector<16x16xi32>
    %cst_117 = arith.constant 1.000000e+00 : f32
    %cst_118 = arith.constant 0.000000e+00 : f32
    %211 = vector.broadcast %cst_117 : f32 to vector<16x16xf32>
    %212 = vector.broadcast %cst_118 : f32 to vector<16x16xf32>
    %213 = arith.select %210, %211, %212 : vector<16x16xi1>, vector<16x16xf32>
    %cst_119 = arith.constant dense<0.000000e+00> : vector<16x16xf32>
    %214 = tpu.matmul %16, %213, %cst_119 {dimension_numbers = #tpu.dot_dimension_numbers<[1], [0], [0], [1], [0, 0, 1, 1], [], []>} : vector<16x16xf32>, vector<16x16xf32>, vector<16x16xf32> -> vector<16x16xf32>
    %215 = arith.subf %214, %18 : vector<16x16xf32>
    %c0_120 = arith.constant 0 : index
    %c0_121 = arith.constant 0 : index
    %216 = vector.load %arg8[%c0_120, %c0_121] : memref<8x3xf32, #tpu.memory_space<vmem>>, vector<8x3xf32>
    %217 = vector.extract_strided_slice %215 {offsets = [0, 0], sizes = [3, 16], strides = [1, 1]} : vector<16x16xf32> to vector<3x16xf32>
    %cst_122 = arith.constant dense<0.000000e+00> : vector<8x16xf32>
    %218 = tpu.matmul %216, %217, %cst_122 {dimension_numbers = #tpu.dot_dimension_numbers<[1], [0], [0], [1], [0, 0, 1, 1], [], []>} : vector<8x3xf32>, vector<3x16xf32>, vector<8x16xf32> -> vector<8x16xf32>
    %c0_123 = arith.constant 0 : index
    %c0_124 = arith.constant 0 : index
    %219 = vector.load %arg9[%c0_123, %c0_124] : memref<8x1xf32, #tpu.memory_space<vmem>>, vector<8x1xf32>
    %220 = vector.broadcast %219 : vector<8x1xf32> to vector<8x16xf32>
    %221 = arith.addf %218, %220 : vector<8x16xf32>
    %cst_125 = arith.constant 0.000000e+00 : f32
    %222 = vector.broadcast %cst_125 : f32 to vector<8x16xf32>
    %223 = arith.maximumf %221, %222 : vector<8x16xf32>
    %c0_126 = arith.constant 0 : index
    %c0_127 = arith.constant 0 : index
    %224 = vector.load %arg10[%c0_126, %c0_127] : memref<8x8xf32, #tpu.memory_space<vmem>>, vector<8x8xf32>
    %cst_128 = arith.constant dense<0.000000e+00> : vector<8x16xf32>
    %225 = tpu.matmul %224, %223, %cst_128 {dimension_numbers = #tpu.dot_dimension_numbers<[1], [0], [0], [1], [0, 0, 1, 1], [], []>} : vector<8x8xf32>, vector<8x16xf32>, vector<8x16xf32> -> vector<8x16xf32>
    %c0_129 = arith.constant 0 : index
    %c0_130 = arith.constant 0 : index
    %226 = vector.load %arg11[%c0_129, %c0_130] : memref<8x1xf32, #tpu.memory_space<vmem>>, vector<8x1xf32>
    %227 = vector.broadcast %226 : vector<8x1xf32> to vector<8x16xf32>
    %228 = arith.addf %225, %227 : vector<8x16xf32>
    %cst_131 = arith.constant 0.000000e+00 : f32
    %229 = vector.broadcast %cst_131 : f32 to vector<8x16xf32>
    %230 = arith.maximumf %228, %229 : vector<8x16xf32>
    %c0_132 = arith.constant 0 : index
    %c0_133 = arith.constant 0 : index
    %231 = vector.load %arg12[%c0_132, %c0_133] : memref<16x8xf32, #tpu.memory_space<vmem>>, vector<16x8xf32>
    %cst_134 = arith.constant dense<0.000000e+00> : vector<16x16xf32>
    %232 = tpu.matmul %231, %230, %cst_134 {dimension_numbers = #tpu.dot_dimension_numbers<[1], [0], [0], [1], [0, 0, 1, 1], [], []>} : vector<16x8xf32>, vector<8x16xf32>, vector<16x16xf32> -> vector<16x16xf32>
    %c0_135 = arith.constant 0 : index
    %c0_136 = arith.constant 0 : index
    %233 = vector.load %arg13[%c0_135, %c0_136] : memref<16x1xf32, #tpu.memory_space<vmem>>, vector<16x1xf32>
    %234 = vector.broadcast %233 : vector<16x1xf32> to vector<16x16xf32>
    %235 = arith.addf %232, %234 : vector<16x16xf32>
    %cst_137 = arith.constant 0.000000e+00 : f32
    %236 = vector.broadcast %cst_137 : f32 to vector<16x16xf32>
    %237 = arith.maximumf %235, %236 : vector<16x16xf32>
    %238 = vector.shape_cast %215 : vector<16x16xf32> to vector<16x1x16xf32>
    %239 = vector.shape_cast %237 : vector<16x16xf32> to vector<1x16x16xf32>
    %240 = vector.broadcast %238 : vector<16x1x16xf32> to vector<16x16x16xf32>
    %241 = vector.broadcast %239 : vector<1x16x16xf32> to vector<16x16x16xf32>
    %242 = arith.mulf %240, %241 : vector<16x16x16xf32>
    %243 = arith.addf %198, %242 : vector<16x16x16xf32>
    %cst_138 = arith.constant 1.000000e+30 : f32
    %244 = vector.broadcast %cst_138 : f32 to vector<16x16xf32>
    %245 = arith.select %210, %244, %200 : vector<16x16xi1>, vector<16x16xf32>
    %cst_139 = arith.constant dense<0x7F800000> : vector<16xf32>
    %246 = vector.multi_reduction <minimumf>, %245, %cst_139 [0] : vector<16x16xf32> to vector<16xf32>
    %247 = vector.shape_cast %246 : vector<16xf32> to vector<1x16xf32>
    %248 = vector.broadcast %247 : vector<1x16xf32> to vector<16x16xf32>
    %249 = arith.cmpf oeq, %245, %248 : vector<16x16xf32>
    %c16_i32_140 = arith.constant 16 : i32
    %250 = vector.broadcast %c16_i32_140 : i32 to vector<16x16xi32>
    %251 = arith.select %249, %19, %250 : vector<16x16xi1>, vector<16x16xi32>
    %cst_141 = arith.constant dense<2147483647> : vector<16xi32>
    %252 = vector.multi_reduction <minsi>, %251, %cst_141 [0] : vector<16x16xi32> to vector<16xi32>
    %253 = vector.shape_cast %252 : vector<16xi32> to vector<1x16xi32>
    %254 = vector.broadcast %253 : vector<1x16xi32> to vector<16x16xi32>
    %255 = arith.cmpi eq, %251, %254 : vector<16x16xi32>
    %cst_142 = arith.constant 1.000000e+00 : f32
    %cst_143 = arith.constant 0.000000e+00 : f32
    %256 = vector.broadcast %cst_142 : f32 to vector<16x16xf32>
    %257 = vector.broadcast %cst_143 : f32 to vector<16x16xf32>
    %258 = arith.select %255, %256, %257 : vector<16x16xi1>, vector<16x16xf32>
    %cst_144 = arith.constant dense<0.000000e+00> : vector<16x16xf32>
    %259 = tpu.matmul %16, %258, %cst_144 {dimension_numbers = #tpu.dot_dimension_numbers<[1], [0], [0], [1], [0, 0, 1, 1], [], []>} : vector<16x16xf32>, vector<16x16xf32>, vector<16x16xf32> -> vector<16x16xf32>
    %260 = arith.subf %259, %18 : vector<16x16xf32>
    %c0_145 = arith.constant 0 : index
    %c0_146 = arith.constant 0 : index
    %261 = vector.load %arg8[%c0_145, %c0_146] : memref<8x3xf32, #tpu.memory_space<vmem>>, vector<8x3xf32>
    %262 = vector.extract_strided_slice %260 {offsets = [0, 0], sizes = [3, 16], strides = [1, 1]} : vector<16x16xf32> to vector<3x16xf32>
    %cst_147 = arith.constant dense<0.000000e+00> : vector<8x16xf32>
    %263 = tpu.matmul %261, %262, %cst_147 {dimension_numbers = #tpu.dot_dimension_numbers<[1], [0], [0], [1], [0, 0, 1, 1], [], []>} : vector<8x3xf32>, vector<3x16xf32>, vector<8x16xf32> -> vector<8x16xf32>
    %c0_148 = arith.constant 0 : index
    %c0_149 = arith.constant 0 : index
    %264 = vector.load %arg9[%c0_148, %c0_149] : memref<8x1xf32, #tpu.memory_space<vmem>>, vector<8x1xf32>
    %265 = vector.broadcast %264 : vector<8x1xf32> to vector<8x16xf32>
    %266 = arith.addf %263, %265 : vector<8x16xf32>
    %cst_150 = arith.constant 0.000000e+00 : f32
    %267 = vector.broadcast %cst_150 : f32 to vector<8x16xf32>
    %268 = arith.maximumf %266, %267 : vector<8x16xf32>
    %c0_151 = arith.constant 0 : index
    %c0_152 = arith.constant 0 : index
    %269 = vector.load %arg10[%c0_151, %c0_152] : memref<8x8xf32, #tpu.memory_space<vmem>>, vector<8x8xf32>
    %cst_153 = arith.constant dense<0.000000e+00> : vector<8x16xf32>
    %270 = tpu.matmul %269, %268, %cst_153 {dimension_numbers = #tpu.dot_dimension_numbers<[1], [0], [0], [1], [0, 0, 1, 1], [], []>} : vector<8x8xf32>, vector<8x16xf32>, vector<8x16xf32> -> vector<8x16xf32>
    %c0_154 = arith.constant 0 : index
    %c0_155 = arith.constant 0 : index
    %271 = vector.load %arg11[%c0_154, %c0_155] : memref<8x1xf32, #tpu.memory_space<vmem>>, vector<8x1xf32>
    %272 = vector.broadcast %271 : vector<8x1xf32> to vector<8x16xf32>
    %273 = arith.addf %270, %272 : vector<8x16xf32>
    %cst_156 = arith.constant 0.000000e+00 : f32
    %274 = vector.broadcast %cst_156 : f32 to vector<8x16xf32>
    %275 = arith.maximumf %273, %274 : vector<8x16xf32>
    %c0_157 = arith.constant 0 : index
    %c0_158 = arith.constant 0 : index
    %276 = vector.load %arg12[%c0_157, %c0_158] : memref<16x8xf32, #tpu.memory_space<vmem>>, vector<16x8xf32>
    %cst_159 = arith.constant dense<0.000000e+00> : vector<16x16xf32>
    %277 = tpu.matmul %276, %275, %cst_159 {dimension_numbers = #tpu.dot_dimension_numbers<[1], [0], [0], [1], [0, 0, 1, 1], [], []>} : vector<16x8xf32>, vector<8x16xf32>, vector<16x16xf32> -> vector<16x16xf32>
    %c0_160 = arith.constant 0 : index
    %c0_161 = arith.constant 0 : index
    %278 = vector.load %arg13[%c0_160, %c0_161] : memref<16x1xf32, #tpu.memory_space<vmem>>, vector<16x1xf32>
    %279 = vector.broadcast %278 : vector<16x1xf32> to vector<16x16xf32>
    %280 = arith.addf %277, %279 : vector<16x16xf32>
    %cst_162 = arith.constant 0.000000e+00 : f32
    %281 = vector.broadcast %cst_162 : f32 to vector<16x16xf32>
    %282 = arith.maximumf %280, %281 : vector<16x16xf32>
    %283 = vector.shape_cast %260 : vector<16x16xf32> to vector<16x1x16xf32>
    %284 = vector.shape_cast %282 : vector<16x16xf32> to vector<1x16x16xf32>
    %285 = vector.broadcast %283 : vector<16x1x16xf32> to vector<16x16x16xf32>
    %286 = vector.broadcast %284 : vector<1x16x16xf32> to vector<16x16x16xf32>
    %287 = arith.mulf %285, %286 : vector<16x16x16xf32>
    %288 = arith.addf %243, %287 : vector<16x16x16xf32>
    %cst_163 = arith.constant 1.000000e+30 : f32
    %289 = vector.broadcast %cst_163 : f32 to vector<16x16xf32>
    %290 = arith.select %255, %289, %245 : vector<16x16xi1>, vector<16x16xf32>
    %cst_164 = arith.constant dense<0x7F800000> : vector<16xf32>
    %291 = vector.multi_reduction <minimumf>, %290, %cst_164 [0] : vector<16x16xf32> to vector<16xf32>
    %292 = vector.shape_cast %291 : vector<16xf32> to vector<1x16xf32>
    %293 = vector.broadcast %292 : vector<1x16xf32> to vector<16x16xf32>
    %294 = arith.cmpf oeq, %290, %293 : vector<16x16xf32>
    %c16_i32_165 = arith.constant 16 : i32
    %295 = vector.broadcast %c16_i32_165 : i32 to vector<16x16xi32>
    %296 = arith.select %294, %19, %295 : vector<16x16xi1>, vector<16x16xi32>
    %cst_166 = arith.constant dense<2147483647> : vector<16xi32>
    %297 = vector.multi_reduction <minsi>, %296, %cst_166 [0] : vector<16x16xi32> to vector<16xi32>
    %298 = vector.shape_cast %297 : vector<16xi32> to vector<1x16xi32>
    %299 = vector.broadcast %298 : vector<1x16xi32> to vector<16x16xi32>
    %300 = arith.cmpi eq, %296, %299 : vector<16x16xi32>
    %cst_167 = arith.constant 1.000000e+00 : f32
    %cst_168 = arith.constant 0.000000e+00 : f32
    %301 = vector.broadcast %cst_167 : f32 to vector<16x16xf32>
    %302 = vector.broadcast %cst_168 : f32 to vector<16x16xf32>
    %303 = arith.select %300, %301, %302 : vector<16x16xi1>, vector<16x16xf32>
    %cst_169 = arith.constant dense<0.000000e+00> : vector<16x16xf32>
    %304 = tpu.matmul %16, %303, %cst_169 {dimension_numbers = #tpu.dot_dimension_numbers<[1], [0], [0], [1], [0, 0, 1, 1], [], []>} : vector<16x16xf32>, vector<16x16xf32>, vector<16x16xf32> -> vector<16x16xf32>
    %305 = arith.subf %304, %18 : vector<16x16xf32>
    %c0_170 = arith.constant 0 : index
    %c0_171 = arith.constant 0 : index
    %306 = vector.load %arg8[%c0_170, %c0_171] : memref<8x3xf32, #tpu.memory_space<vmem>>, vector<8x3xf32>
    %307 = vector.extract_strided_slice %305 {offsets = [0, 0], sizes = [3, 16], strides = [1, 1]} : vector<16x16xf32> to vector<3x16xf32>
    %cst_172 = arith.constant dense<0.000000e+00> : vector<8x16xf32>
    %308 = tpu.matmul %306, %307, %cst_172 {dimension_numbers = #tpu.dot_dimension_numbers<[1], [0], [0], [1], [0, 0, 1, 1], [], []>} : vector<8x3xf32>, vector<3x16xf32>, vector<8x16xf32> -> vector<8x16xf32>
    %c0_173 = arith.constant 0 : index
    %c0_174 = arith.constant 0 : index
    %309 = vector.load %arg9[%c0_173, %c0_174] : memref<8x1xf32, #tpu.memory_space<vmem>>, vector<8x1xf32>
    %310 = vector.broadcast %309 : vector<8x1xf32> to vector<8x16xf32>
    %311 = arith.addf %308, %310 : vector<8x16xf32>
    %cst_175 = arith.constant 0.000000e+00 : f32
    %312 = vector.broadcast %cst_175 : f32 to vector<8x16xf32>
    %313 = arith.maximumf %311, %312 : vector<8x16xf32>
    %c0_176 = arith.constant 0 : index
    %c0_177 = arith.constant 0 : index
    %314 = vector.load %arg10[%c0_176, %c0_177] : memref<8x8xf32, #tpu.memory_space<vmem>>, vector<8x8xf32>
    %cst_178 = arith.constant dense<0.000000e+00> : vector<8x16xf32>
    %315 = tpu.matmul %314, %313, %cst_178 {dimension_numbers = #tpu.dot_dimension_numbers<[1], [0], [0], [1], [0, 0, 1, 1], [], []>} : vector<8x8xf32>, vector<8x16xf32>, vector<8x16xf32> -> vector<8x16xf32>
    %c0_179 = arith.constant 0 : index
    %c0_180 = arith.constant 0 : index
    %316 = vector.load %arg11[%c0_179, %c0_180] : memref<8x1xf32, #tpu.memory_space<vmem>>, vector<8x1xf32>
    %317 = vector.broadcast %316 : vector<8x1xf32> to vector<8x16xf32>
    %318 = arith.addf %315, %317 : vector<8x16xf32>
    %cst_181 = arith.constant 0.000000e+00 : f32
    %319 = vector.broadcast %cst_181 : f32 to vector<8x16xf32>
    %320 = arith.maximumf %318, %319 : vector<8x16xf32>
    %c0_182 = arith.constant 0 : index
    %c0_183 = arith.constant 0 : index
    %321 = vector.load %arg12[%c0_182, %c0_183] : memref<16x8xf32, #tpu.memory_space<vmem>>, vector<16x8xf32>
    %cst_184 = arith.constant dense<0.000000e+00> : vector<16x16xf32>
    %322 = tpu.matmul %321, %320, %cst_184 {dimension_numbers = #tpu.dot_dimension_numbers<[1], [0], [0], [1], [0, 0, 1, 1], [], []>} : vector<16x8xf32>, vector<8x16xf32>, vector<16x16xf32> -> vector<16x16xf32>
    %c0_185 = arith.constant 0 : index
    %c0_186 = arith.constant 0 : index
    %323 = vector.load %arg13[%c0_185, %c0_186] : memref<16x1xf32, #tpu.memory_space<vmem>>, vector<16x1xf32>
    %324 = vector.broadcast %323 : vector<16x1xf32> to vector<16x16xf32>
    %325 = arith.addf %322, %324 : vector<16x16xf32>
    %cst_187 = arith.constant 0.000000e+00 : f32
    %326 = vector.broadcast %cst_187 : f32 to vector<16x16xf32>
    %327 = arith.maximumf %325, %326 : vector<16x16xf32>
    %328 = vector.shape_cast %305 : vector<16x16xf32> to vector<16x1x16xf32>
    %329 = vector.shape_cast %327 : vector<16x16xf32> to vector<1x16x16xf32>
    %330 = vector.broadcast %328 : vector<16x1x16xf32> to vector<16x16x16xf32>
    %331 = vector.broadcast %329 : vector<1x16x16xf32> to vector<16x16x16xf32>
    %332 = arith.mulf %330, %331 : vector<16x16x16xf32>
    %333 = arith.addf %288, %332 : vector<16x16x16xf32>
    %cst_188 = arith.constant 1.000000e+30 : f32
    %334 = vector.broadcast %cst_188 : f32 to vector<16x16xf32>
    %335 = arith.select %300, %334, %290 : vector<16x16xi1>, vector<16x16xf32>
    %cst_189 = arith.constant dense<0x7F800000> : vector<16xf32>
    %336 = vector.multi_reduction <minimumf>, %335, %cst_189 [0] : vector<16x16xf32> to vector<16xf32>
    %337 = vector.shape_cast %336 : vector<16xf32> to vector<1x16xf32>
    %338 = vector.broadcast %337 : vector<1x16xf32> to vector<16x16xf32>
    %339 = arith.cmpf oeq, %335, %338 : vector<16x16xf32>
    %c16_i32_190 = arith.constant 16 : i32
    %340 = vector.broadcast %c16_i32_190 : i32 to vector<16x16xi32>
    %341 = arith.select %339, %19, %340 : vector<16x16xi1>, vector<16x16xi32>
    %cst_191 = arith.constant dense<2147483647> : vector<16xi32>
    %342 = vector.multi_reduction <minsi>, %341, %cst_191 [0] : vector<16x16xi32> to vector<16xi32>
    %343 = vector.shape_cast %342 : vector<16xi32> to vector<1x16xi32>
    %344 = vector.broadcast %343 : vector<1x16xi32> to vector<16x16xi32>
    %345 = arith.cmpi eq, %341, %344 : vector<16x16xi32>
    %cst_192 = arith.constant 1.000000e+00 : f32
    %cst_193 = arith.constant 0.000000e+00 : f32
    %346 = vector.broadcast %cst_192 : f32 to vector<16x16xf32>
    %347 = vector.broadcast %cst_193 : f32 to vector<16x16xf32>
    %348 = arith.select %345, %346, %347 : vector<16x16xi1>, vector<16x16xf32>
    %cst_194 = arith.constant dense<0.000000e+00> : vector<16x16xf32>
    %349 = tpu.matmul %16, %348, %cst_194 {dimension_numbers = #tpu.dot_dimension_numbers<[1], [0], [0], [1], [0, 0, 1, 1], [], []>} : vector<16x16xf32>, vector<16x16xf32>, vector<16x16xf32> -> vector<16x16xf32>
    %350 = arith.subf %349, %18 : vector<16x16xf32>
    %c0_195 = arith.constant 0 : index
    %c0_196 = arith.constant 0 : index
    %351 = vector.load %arg8[%c0_195, %c0_196] : memref<8x3xf32, #tpu.memory_space<vmem>>, vector<8x3xf32>
    %352 = vector.extract_strided_slice %350 {offsets = [0, 0], sizes = [3, 16], strides = [1, 1]} : vector<16x16xf32> to vector<3x16xf32>
    %cst_197 = arith.constant dense<0.000000e+00> : vector<8x16xf32>
    %353 = tpu.matmul %351, %352, %cst_197 {dimension_numbers = #tpu.dot_dimension_numbers<[1], [0], [0], [1], [0, 0, 1, 1], [], []>} : vector<8x3xf32>, vector<3x16xf32>, vector<8x16xf32> -> vector<8x16xf32>
    %c0_198 = arith.constant 0 : index
    %c0_199 = arith.constant 0 : index
    %354 = vector.load %arg9[%c0_198, %c0_199] : memref<8x1xf32, #tpu.memory_space<vmem>>, vector<8x1xf32>
    %355 = vector.broadcast %354 : vector<8x1xf32> to vector<8x16xf32>
    %356 = arith.addf %353, %355 : vector<8x16xf32>
    %cst_200 = arith.constant 0.000000e+00 : f32
    %357 = vector.broadcast %cst_200 : f32 to vector<8x16xf32>
    %358 = arith.maximumf %356, %357 : vector<8x16xf32>
    %c0_201 = arith.constant 0 : index
    %c0_202 = arith.constant 0 : index
    %359 = vector.load %arg10[%c0_201, %c0_202] : memref<8x8xf32, #tpu.memory_space<vmem>>, vector<8x8xf32>
    %cst_203 = arith.constant dense<0.000000e+00> : vector<8x16xf32>
    %360 = tpu.matmul %359, %358, %cst_203 {dimension_numbers = #tpu.dot_dimension_numbers<[1], [0], [0], [1], [0, 0, 1, 1], [], []>} : vector<8x8xf32>, vector<8x16xf32>, vector<8x16xf32> -> vector<8x16xf32>
    %c0_204 = arith.constant 0 : index
    %c0_205 = arith.constant 0 : index
    %361 = vector.load %arg11[%c0_204, %c0_205] : memref<8x1xf32, #tpu.memory_space<vmem>>, vector<8x1xf32>
    %362 = vector.broadcast %361 : vector<8x1xf32> to vector<8x16xf32>
    %363 = arith.addf %360, %362 : vector<8x16xf32>
    %cst_206 = arith.constant 0.000000e+00 : f32
    %364 = vector.broadcast %cst_206 : f32 to vector<8x16xf32>
    %365 = arith.maximumf %363, %364 : vector<8x16xf32>
    %c0_207 = arith.constant 0 : index
    %c0_208 = arith.constant 0 : index
    %366 = vector.load %arg12[%c0_207, %c0_208] : memref<16x8xf32, #tpu.memory_space<vmem>>, vector<16x8xf32>
    %cst_209 = arith.constant dense<0.000000e+00> : vector<16x16xf32>
    %367 = tpu.matmul %366, %365, %cst_209 {dimension_numbers = #tpu.dot_dimension_numbers<[1], [0], [0], [1], [0, 0, 1, 1], [], []>} : vector<16x8xf32>, vector<8x16xf32>, vector<16x16xf32> -> vector<16x16xf32>
    %c0_210 = arith.constant 0 : index
    %c0_211 = arith.constant 0 : index
    %368 = vector.load %arg13[%c0_210, %c0_211] : memref<16x1xf32, #tpu.memory_space<vmem>>, vector<16x1xf32>
    %369 = vector.broadcast %368 : vector<16x1xf32> to vector<16x16xf32>
    %370 = arith.addf %367, %369 : vector<16x16xf32>
    %cst_212 = arith.constant 0.000000e+00 : f32
    %371 = vector.broadcast %cst_212 : f32 to vector<16x16xf32>
    %372 = arith.maximumf %370, %371 : vector<16x16xf32>
    %373 = vector.shape_cast %350 : vector<16x16xf32> to vector<16x1x16xf32>
    %374 = vector.shape_cast %372 : vector<16x16xf32> to vector<1x16x16xf32>
    %375 = vector.broadcast %373 : vector<16x1x16xf32> to vector<16x16x16xf32>
    %376 = vector.broadcast %374 : vector<1x16x16xf32> to vector<16x16x16xf32>
    %377 = arith.mulf %375, %376 : vector<16x16x16xf32>
    %378 = arith.addf %333, %377 : vector<16x16x16xf32>
    %379 = vector.shape_cast %378 : vector<16x16x16xf32> to vector<256x16xf32>
    %c0_213 = arith.constant 0 : index
    %c0_214 = arith.constant 0 : index
    %380 = vector.load %arg14[%c0_213, %c0_214] : memref<16x256xf32, #tpu.memory_space<vmem>>, vector<16x256xf32>
    %cst_215 = arith.constant dense<0.000000e+00> : vector<16x16xf32>
    %381 = tpu.matmul %380, %379, %cst_215 {dimension_numbers = #tpu.dot_dimension_numbers<[1], [0], [0], [1], [0, 0, 1, 1], [], []>} : vector<16x256xf32>, vector<256x16xf32>, vector<16x16xf32> -> vector<16x16xf32>
    %c0_216 = arith.constant 0 : index
    %c0_217 = arith.constant 0 : index
    %382 = vector.load %arg15[%c0_216, %c0_217] : memref<16x1xf32, #tpu.memory_space<vmem>>, vector<16x1xf32>
    %383 = vector.broadcast %382 : vector<16x1xf32> to vector<16x16xf32>
    %384 = arith.addf %381, %383 : vector<16x16xf32>
    %c0_218 = arith.constant 0 : index
    %c0_219 = arith.constant 0 : index
    %c0_220 = arith.constant 0 : index
    %385 = vector.load %arg16[%c0_218, %c0_219, %c0_220] : memref<1x16x16xf32, #tpu.memory_space<vmem>>, vector<1x16x16xf32>
    %386 = vector.shape_cast %385 : vector<1x16x16xf32> to vector<16x16xf32>
    %387 = vector.shape_cast %384 : vector<16x16xf32> to vector<1x16x16xf32>
    tpu.vector_store %arg16[%c0_218, %c0_219, %c0_220], %387 {strides = array<i32>} : memref<1x16x16xf32, #tpu.memory_space<vmem>>, vector<1x16x16xf32>,
    return
  }
  func.func @transform_0(%arg0: i32, %arg1: i32) -> (i32, i32, i32) {
    %c0_i32 = arith.constant 0 : i32
    %c0_i32_0 = arith.constant 0 : i32
    %c0_i32_1 = arith.constant 0 : i32
    return %arg0, %c0_i32, %c0_i32_0 : i32, i32, i32
  }
  func.func @transform_1(%arg0: i32, %arg1: i32) -> (i32, i32, i32) {
    %c0_i32 = arith.constant 0 : i32
    %c0_i32_0 = arith.constant 0 : i32
    %c0_i32_1 = arith.constant 0 : i32
    return %arg0, %c0_i32, %c0_i32_0 : i32, i32, i32
  }
  func.func @transform_2(%arg0: i32, %arg1: i32) -> (i32, i32, i32) {
    %c0_i32 = arith.constant 0 : i32
    %c0_i32_0 = arith.constant 0 : i32
    return %arg0, %c0_i32, %arg1 : i32, i32, i32
  }
  func.func @transform_3(%arg0: i32, %arg1: i32) -> (i32, i32, i32) {
    %c0_i32 = arith.constant 0 : i32
    %c0_i32_0 = arith.constant 0 : i32
    %c0_i32_1 = arith.constant 0 : i32
    return %arg0, %c0_i32, %c0_i32_0 : i32, i32, i32
  }
  func.func @transform_4(%arg0: i32, %arg1: i32) -> (i32, i32) {
    %c0_i32 = arith.constant 0 : i32
    %c0_i32_0 = arith.constant 0 : i32
    %c0_i32_1 = arith.constant 0 : i32
    return %c0_i32, %c0_i32_0 : i32, i32
  }
  func.func @transform_5(%arg0: i32, %arg1: i32) -> (i32, i32) {
    %c0_i32 = arith.constant 0 : i32
    %c0_i32_0 = arith.constant 0 : i32
    %c0_i32_1 = arith.constant 0 : i32
    return %c0_i32, %c0_i32_0 : i32, i32
  }
  func.func @transform_6(%arg0: i32, %arg1: i32) -> (i32, i32) {
    %c0_i32 = arith.constant 0 : i32
    %c0_i32_0 = arith.constant 0 : i32
    %c0_i32_1 = arith.constant 0 : i32
    return %c0_i32, %c0_i32_0 : i32, i32
  }
  func.func @transform_7(%arg0: i32, %arg1: i32) -> (i32, i32) {
    %c0_i32 = arith.constant 0 : i32
    %c0_i32_0 = arith.constant 0 : i32
    %c0_i32_1 = arith.constant 0 : i32
    return %c0_i32, %c0_i32_0 : i32, i32
  }
  func.func @transform_8(%arg0: i32, %arg1: i32) -> (i32, i32) {
    %c0_i32 = arith.constant 0 : i32
    %c0_i32_0 = arith.constant 0 : i32
    %c0_i32_1 = arith.constant 0 : i32
    return %c0_i32, %c0_i32_0 : i32, i32
  }
  func.func @transform_9(%arg0: i32, %arg1: i32) -> (i32, i32) {
    %c0_i32 = arith.constant 0 : i32
    %c0_i32_0 = arith.constant 0 : i32
    %c0_i32_1 = arith.constant 0 : i32
    return %c0_i32, %c0_i32_0 : i32, i32
  }
  func.func @transform_10(%arg0: i32, %arg1: i32) -> (i32, i32) {
    %c0_i32 = arith.constant 0 : i32
    %c0_i32_0 = arith.constant 0 : i32
    %c0_i32_1 = arith.constant 0 : i32
    return %c0_i32, %c0_i32_0 : i32, i32
  }
  func.func @transform_11(%arg0: i32, %arg1: i32) -> (i32, i32) {
    %c0_i32 = arith.constant 0 : i32
    %c0_i32_0 = arith.constant 0 : i32
    %c0_i32_1 = arith.constant 0 : i32
    return %c0_i32, %c0_i32_0 : i32, i32
  }
  func.func @transform_12(%arg0: i32, %arg1: i32) -> (i32, i32) {
    %c0_i32 = arith.constant 0 : i32
    %c0_i32_0 = arith.constant 0 : i32
    %c0_i32_1 = arith.constant 0 : i32
    return %c0_i32, %c0_i32_0 : i32, i32
  }
  func.func @transform_13(%arg0: i32, %arg1: i32) -> (i32, i32) {
    %c0_i32 = arith.constant 0 : i32
    %c0_i32_0 = arith.constant 0 : i32
    %c0_i32_1 = arith.constant 0 : i32
    return %c0_i32, %c0_i32_0 : i32, i32
  }
  func.func @transform_14(%arg0: i32, %arg1: i32) -> (i32, i32, i32) {
    %c0_i32 = arith.constant 0 : i32
    %c0_i32_0 = arith.constant 0 : i32
    return %arg0, %c0_i32, %arg1 : i32, i32, i32
  }
}

</mosaic_0001>

<bundles_post_ra>
// kernel: forward.5
= control target key start
LH: loop header
LB: loop body
LE: loop exit
PB: predicated region body
PF: predicated region fallthrough
CT: control target
= control target key end

     0   :  { %s1305_s0 = inlined_call_operand.vmem [shape: f32[2,16,16], index: 0, kind: input, shape index: {}]   ;;  %s1306_s1 = inlined_call_operand.vmem [shape: f32[16,1], index: 1, kind: input, shape index: {}]   ;;  %s1307_s2 = inlined_call_operand.vmem [shape: f32[16,1], index: 2, kind: input, shape index: {}]   ;;  %s1308_s3 = inlined_call_operand.vmem [shape: f32[2,3,16], index: 3, kind: input, shape index: {}]   ;;  %s1309_s4 = inlined_call_operand.vmem [shape: f32[16,16], index: 4, kind: input, shape index: {}]   ;;  %s1310_s5 = inlined_call_operand.vmem [shape: f32[16,1], index: 5, kind: input, shape index: {}]   ;;  %s1311_s6 = inlined_call_operand.vmem [shape: f32[8,16], index: 6, kind: input, shape index: {}]   ;;  %s1312_s7 = inlined_call_operand.vmem [shape: f32[8,1], index: 7, kind: input, shape index: {}]   ;;  %s1313_s8 = inlined_call_operand.vmem [shape: f32[3,8], index: 8, kind: input, shape index: {}]   ;;  %s1314_s9 = inlined_call_operand.vmem [shape: f32[3,1], index: 9, kind: input, shape index: {}]   ;;  %s1315_s10 = inlined_call_operand.hbm [shape: f32[2,8,16], index: 10, kind: output, shape index: {0}]   ;;  %s1316_s11 = inlined_call_operand.vmem [shape: f32[2,3,16], index: 11, kind: output, shape index: {1}]  }
   0x1   :  { %1317 = sst [smem:[#allocation5_spill]] %s1305_s0 }
   0x2   :  { %1318 = sst [smem:[#allocation6_spill]] %s1306_s1 }
   0x3   :  { %1319 = sst [smem:[#allocation7_spill]] %s1307_s2 }
   0x4   :  { %1320 = sst [smem:[#allocation8_spill]] %s1309_s4 }
   0x5   :  { %17 = vsyncpa [#allocation3], 0 }
   0x6   :  { %19 = vsyncpa [#allocation3 + $0x1], 0  ;;  %s1156_s17 = smov 0   ;;  %s1158_s18 = smov 0  }
   0x7   :  { %s1160_s19 = smov 0   ;;  %s1162_s20 = smov 0  }
   0x8   :  { %s1164_s21 = smov 0   ;;  %s1166_s22 = smov 0  }
   0x9 LB: > { %s906_s23 = sadd.s32 4294967295, %s1090_s22   ;;  %s907_s24 = sadd.s32 4294967294, %s1090_s22   ;;  %s1090_s22 = sphi %s1166_s22, %s25_s22   ;;  %s1086_s21 = sphi %s1164_s21, %s1331_s21   ;;  %s1082_s20 = sphi %s1162_s20, %s1330_s20   ;;  %s1078_s19 = sphi %s1160_s19, %s1329_s19   ;;  %s1074_s18 = sphi %s1158_s18, %s1328_s18   ;;  %s1070_s17 = sphi %s1156_s17, %s1327_s17  }
   0xa   : > { %s37_s25 = sadd.s32 1, %s1086_s21  ;;  %s270_s26 = sadd.s32 1, %s1078_s19 }
   0xb   : > { %p39_p0 = scmp.ge.s32.totalorder %s37_s25, 2  ;;  %p280_p1 = scmp.ne.s32.totalorder %s1078_s19, %s1074_s18 }
   0xc   : > { %p281_p2 = scmp.eq.s32.totalorder %s906_s23, 1  ;;  %p286_p3 = scmp.ne.s32.totalorder %s1074_s18, %s1070_s17 }
   0xd   : > { %s1333_s25 = smov (%p39_p0, %s37_s25), 0  ;;  %p287_p5 = scmp.eq.s32.totalorder %s907_s24, 1 }
   0xe   : > { %p1196_p4 = por %p281_p2, %p280_p1  ;;  %s265_s28 = ssub.s32 %s1086_s21, %s1333_s25 }
   0xf   : > { %p910_p6 = scmp.ge.s32.totalorder %s1090_s22, 1  ;;  %p268_p7 = scmp.eq.s32.totalorder %s265_s28, 0 }
  0x10   : > { %p1203_p8 = por %p287_p5, %p286_p3  ;;  %p378_p9 = scmp.lt.s32.totalorder %s1090_s22, 3 }
  0x11   : > { %s1209_s30 = scalar_select %p268_p7, %s1078_s19, %s270_s26  }
  0x12   : > { %p379_p10 = pnand %p910_p6, %p378_p9 }
  0x13   : > { %s1323_s2 = sld [smem:[#allocation7_spill]] (!%p379_p10)  ;;  %p435_p11 = scmp.lt.s32.totalorder (!%p379_p10), %s1082_s20, 1 }
  0x14   : > { %382 = sbr.rel (%p379_p10) target bundleno = 767 (0x2ff), region = 60  ;;  %s1324_s1 = sld [smem:[#allocation6_spill]] (!%p379_p10) }
  0x15   : > { %s1325_s4 = sld [smem:[#allocation8_spill]] (!%p379_p10)  ;;  %s423_s26 = sand.u32 (!%p379_p10), 1, %s1074_s18  }
  0x16   : > { %s1326_s0 = sld [smem:[#allocation5_spill]] (!%p379_p10)  ;;  %s1095_s13 = smov (!%p379_p10), [#allocation2]  }
  0x17   : > { %s1018_s14 = sshll.u32 (!%p379_p10), %s1095_s13, 4  ;;  %s1019_s14 = int_to_ptr.vmem [resolvable:$false] %s1018_s14 }
  0x19   : > { %v474_v0 = vld [vmem:[%s1323_s2 + $0x8] sm:$0xff]  ;;  %v1092_v2 = vmov 0   ;;  %v473_v3 = vld [vmem:[%s1323_s2] sm:$0xff]  ;;  %vm505_vm0 = vcmask 130048   ;;  %s1241_s28 = scalar_select %p435_p11, %s1082_s20, 1  ;;  %v1093_v25 = vmov 0.0  }
  0x1a   : > { %v460_v1 = vld [vmem:[%s1324_s1 + $0x8] sm:$0xff]  ;;  %1013 = vset.pattern.permute.xlu1 %v1092_v2  ;;  %1012 = vset.pattern.permute.xlu0 %v1092_v2  ;;  %v459_v4 = vld [vmem:[%s1324_s1] sm:$0xff]  ;;  %vm1094_vm1 = vmmov 0   ;;  %vm681_vm2 = vcmask 64512   ;;  %s922_s1 = sshll.u32 %s1082_s20, 7  ;;  %s762_s2 = scalar_lea.sflag [#allocation3], %s423_s26 }
  0x1b   : > { %482 = vperm.xlu1 %1013, %v474_v0   ;;  %468 = vperm.xlu0 %1012, %v460_v1   ;;  %v493_v5 = vld [vmem:[%s1310_s5] sm:$0xff]  ;;  %v494_v6 = vld [vmem:[%s1310_s5 + $0x8] sm:$0xff]  ;;  %s925_s12 = sshll.u32 %s1241_s28, 4 }
  0x1c   : > { %v491_v7 = vld [vmem:[%s1325_s4] sm:$0xff]  ;;  %s442_s15 = scalar_lea.vmem %s1326_s0, %s925_s12  ;;  %v492_v24 = vld [vmem:[%s1325_s4 + $0x8] sm:$0xff]  ;;  %942 = vmatprep.subr.mxu1 %v1093_v25  ;;  %946 = vmatprep.mubr.msk.f32.mxu1 %vm1094_vm1, %v1093_v25  ;;  %s911_s12 = sshll.u32 %s423_s26, 3 }
  0x1d   : > { %v675_v8 = vld [vmem:[%s1314_s9] sm:$0x7]  ;;  %939 = vmatprep.mubr.msk.f32.mxu0 %vm505_vm0, %v491_v7  ;;  %v458_v10 = vld [vmem:[%s442_s15 + $0x8] sm:$0xff]  ;;  %s781_s0 = scalar_lea.hbm %s1315_s10, %s922_s1 }
  0x1e   : > { %v592_v9 = vld [vmem:[%s1312_s7] sm:$0xff] }
  0x1f   : > { %477 = vperm.xlu1 %1013, %v473_v3   ;;  %463 = vperm.xlu0 %1012, %v459_v4   ;;  %v457_v14 = vld [vmem:[%s442_s15] sm:$0xff]  ;;  %s425_s15 = scalar_lea.vmem [#allocation2], %s911_s12  ;;  %s1020_s12 = scalar_lea.vmem %s1019_s14, 256 }
  0x20   : > { %v591_v36 = vld [vmem:[%s1311_s6] sm:$0xff]  ;;  %s783_s16 = sshll.u32 %s425_s15, 4  ;;  %s784_s16 = int_to_ptr.vmem [resolvable:$true] %s783_s16 }
  0x21   : > { %v674_v43 = vld [vmem:[%s1313_s8] sm:$0x7]  ;;  %s1014_s4 = scalar_lea.vmem %s784_s16, 128  ;;  %p1021_p1 = scmp.lt.s32.totalorder %s784_s16, %s1019_s14 }
  0x22   : > { %p1015_p12 = scmp.ne.s32.totalorder %s784_s16, %s1014_s4  ;;  %p1022_p2 = scmp.lt.s32.totalorder %s1020_s12, %s1014_s4 }
  0x23   : > { %497 = vperm.xlu1 %1013, %v493_v5   ;;  %502 = vperm.xlu0 %1012, %v494_v6  }
  0x24   : > { %p1016_p13 = pnand %p1015_p12, %p1196_p4  ;;  %p1023_p3 = por %p1022_p2, %p1021_p1 }
  0x26   : > { %p1017_p0 = pneg %p1016_p13 }
  0x27   : > { %678 = vperm.xlu1 %1013, %v675_v8   ;;  %595 = vperm.xlu0 %1012, %v592_v9  }
  0x28   : > { %p1024_p5 = pnand %p1023_p3, %p1017_p0 }
  0x96   : > { %v483_v11 = vpop.permute.xlu1 %482  ;;  %v469_v12 = vpop.permute.xlu0 %468 }
  0x97   : > { %v472_v13 = vmul.f32 %v469_v12, %v458_v10 }
  0x99   : > { %v486_v15 = vadd.f32 %v483_v11, %v472_v13 }
  0x9a   : > { %v464_v16 = vpop.permute.xlu0 %463  ;;  %v478_v19 = vpop.permute.xlu1 %477 }
  0x9b   : > { %v471_v17 = vmul.f32 %v464_v16, %v457_v14  ;;  %v488_v18 = vmul.f32 0.1, %v486_v15 }
  0x9d   : > { %v485_v20 = vadd.f32 %v478_v19, %v471_v17  ;;  %v490_v21 = vmax.f32 %v486_v15, %v488_v18 }
  0x9e   : > { %v503_v26 = vpop.permute.xlu0 %502  ;;  %v498_v29 = vpop.permute.xlu1 %497 }
  0x9f   : > { %v487_v22 = vmul.f32 0.1, %v485_v20  ;;  %935 = vmatprep.subr.mxu0 %v490_v21 }
  0xa0   : > { %936 = vmatpush3.msra.mxu0 %v490_v21 }
  0xa1   : > { %v489_v23 = vmax.f32 %v485_v20, %v487_v22 }
  0xa2   : > { %v596_v37 = vpop.permute.xlu0 %595 }
  0xa3   : > { %937 = vmatprep.subr.mxu0 %v489_v23 }
  0xa4   : > { %938 = vmatpush3.msra.mxu0 %v489_v23 }
  0xa5   : > { %940 = vmatmul.mubr.msk.f32.vlgmr.msra.gmra.mxu0 %vm505_vm0, %v492_v24  ;;  %949 = vmatprep.subr.mxu0 %v1093_v25 }
  0xa6   : > { %951 = vmatprep.mubr.msk.f32.mxu0 %vm1094_vm1, %v1093_v25 }
 0x165   : > { %v941_v27 = vpop.f32.mrf.mxu0 }
 0x166   : > { %v584_v28 = vadd.f32 %v941_v27, %v503_v26 }
 0x167   : > { %v578_v30 = vpop.f32.mrf.mxu0 }
 0x168   : > { %v588_v31 = vmul.f32 0.1, %v584_v28  ;;  %v579_v32 = vadd.f32 %v578_v30, %v498_v29 }
 0x16a   : > { %v587_v33 = vmul.f32 0.1, %v579_v32  ;;  %v590_v34 = vmax.f32 %v584_v28, %v588_v31 }
 0x16c   : > { %v589_v35 = vmax.f32 %v579_v32, %v587_v33  ;;  %943 = vmatpush3.msra.mxu1 %v590_v34 }
 0x16d   : > { %944 = vmatprep.subr.mxu1 %v1093_v25 }
 0x16e   : > { %945 = vmatpush3.msra.mxu1 %v589_v35 }
 0x16f   : > { %947 = vmatmul.mubr.msk.f32.vlgmr.msra.gmra.mxu1 %vm505_vm0, %v591_v36 }
 0x22f   : > { %v667_v38 = vpop.f32.mrf.mxu1 }
 0x230   : > { %v668_v39 = vadd.f32 %v667_v38, %v596_v37 }
 0x231   : > { %v948_v40 = vpop.f32.mrf.mxu1 }
 0x232   : > { %v671_v41 = vmul.f32 0.1, %v668_v39 }
 0x234   : > { %v672_v42 = vmax.f32 %v668_v39, %v671_v41 }
 0x236   : > { %950 = vmatpush3.msra.mxu0 %v672_v42  ;;  %673 = vst.msk [vmem:[%s425_s15] sm:$0xff] %vm505_vm0, %v672_v42 }
 0x237   : > { %952 = vmatmul.mubr.msk.f32.vlgmr.msra.gmra.mxu0 %vm681_vm2, %v674_v43 }
 0x238   : > { %1027 = shalt.err (!%p1024_p5)
}
 0x239   : > { %s1028_s20 = scalar_lea.hbm %s781_s0, 128  ;;  %s1032_s1 = scalar_lea.hbm %s1315_s10, 256 }
 0x23a   : > { %p1029_p6 = scmp.ne.s32.totalorder %s781_s0, %s1028_s20  ;;  %p1033_p10 = scmp.lt.s32.totalorder %s781_s0, %s1315_s10 }
 0x23b   : > { %p1034_p11 = scmp.lt.s32.totalorder %s1032_s1, %s1028_s20 }
 0x23c   : > { %p1030_p7 = pnand %p1029_p6, %p1196_p4 }
 0x23d   : > { %p1035_p12 = por %p1034_p11, %p1033_p10 }
 0x23e   : > { %p1031_p9 = pneg %p1030_p7 }
 0x240   : > { %p1036_p13 = pnand %p1035_p12, %p1031_p9 }
 0x242   : > { %1039 = shalt.err (!%p1036_p13)
}
 0x243   : > { %954 = dma.vmem_to_hbm [thread:$0]  (%p1196_p4), %s784_s16, 128, %s781_s0, %s762_s2   ;;  %v679_v44 = vpop.permute.xlu1 %678  ;;  %vm759_vm3 = vcmask 124928  }
 0x244   : > { %s914_s4 = sshll.u32 %s1241_s28, 2 }
 0x245   : > { %s449_s12 = scalar_lea.vmem %s1308_s3, %s914_s4  ;;  %s456_s15 = scalar_lea.vmem %s1316_s11, %s914_s4 }
 0x246   : > { %v755_v46 = vld [vmem:[%s449_s12] sm:$0x7] }
 0x2f7   : > { %v751_v45 = vpop.f32.mrf.mxu0 }
 0x2f8   : > { %v752_v47 = vadd.f32 %v751_v45, %v679_v44 }
 0x2f9   : > { %v953_v48 = vpop.f32.mrf.mxu0 }
 0x2fa   : > { %v756_v49 = vadd.f32 %v755_v46, %v752_v47 }
 0x2fc   : > { %v920_v50 = vclamps-f32 %v756_v49, 200.0 }
 0x2fe   : > { %760 = vst.msk [vmem:[%s456_s15] sm:$0x7] %vm759_vm3, %v920_v50 }
 0x2ff PF: > { %p960_p4 = scmp.ge.s32.totalorder %s1090_s22, 2  ;;  %s798_s0 = sand.u32 1, %s1070_s17  }
 0x300   : > { %s799_s2 = scalar_lea.sflag [#allocation3], %s798_s0 }
 0x301   : > { %p957_p0 = pnand %p960_p4, %p1203_p8 }
 0x303   : > { %p958_p1 = pneg %p957_p0 }
 0x305   : > { %1065 = dma.done.wait (%p958_p1), %s799_s2, 128  }
 0x306   : > { %1067 = vsyncadd (%p958_p1), %s799_s2, 4294967168  ;;  %s25_s22 = sadd.s32 1, %s1090_s22   ;;  %s1327_s17 = smov %s1074_s18 }
 0x307   : > { %p22_p2 = scmp.ge.s32.totalorder %s25_s22, 4   ;;  %s1328_s18 = smov %s1078_s19 }
 0x308   : > { %s1329_s19 = smov %s1209_s30  ;;  %s1330_s20 = smov %s1086_s21 }
 0x309   : > { %s1331_s21 = smov %s1333_s25  ;;  %24 = sbr.rel (!%p22_p2) target bundleno = 9 (0x9), region = 110 }
 0x30e   :  { %814 = vsyncpa [#allocation3], 1 }
 0x30f   :  { %816 = vsyncpa [#allocation3 + $0x1], 1 }

// kernel: forward.4
= control target key start
LH: loop header
LB: loop body
LE: loop exit
PB: predicated region body
PF: predicated region fallthrough
CT: control target
= control target key end

     0   :  { %s6704_s29 = smov 0   ;;  %s6706_s30 = smov 0   ;;  %s8979_s0 = inlined_call_operand.vmem [shape: f32[2,16,3], index: 0, kind: input, shape index: {}]   ;;  %s8980_s1 = inlined_call_operand.vmem [shape: f32[2,3,16], index: 1, kind: input, shape index: {}, may-alias: {1,2}]   ;;  %s8981_s2 = inlined_call_operand.vmem [shape: f32[2,3,16], index: 2, kind: input, shape index: {}, may-alias: {1,2}]   ;;  %s8982_s3 = inlined_call_operand.vmem [shape: f32[2,16,16], index: 3, kind: input, shape index: {}]   ;;  %s8983_s4 = inlined_call_operand.vmem [shape: f32[16,1], index: 4, kind: input, shape index: {}]   ;;  %s8984_s5 = inlined_call_operand.vmem [shape: f32[16,1], index: 5, kind: input, shape index: {}]   ;;  %s8985_s6 = inlined_call_operand.vmem [shape: f32[8,3], index: 6, kind: input, shape index: {}]   ;;  %s8986_s7 = inlined_call_operand.vmem [shape: f32[8,1], index: 7, kind: input, shape index: {}]   ;;  %s8987_s8 = inlined_call_operand.vmem [shape: f32[8,8], index: 8, kind: input, shape index: {}]   ;;  %s8988_s9 = inlined_call_operand.vmem [shape: f32[8,1], index: 9, kind: input, shape index: {}]   ;;  %s8989_s10 = inlined_call_operand.vmem [shape: f32[16,8], index: 10, kind: input, shape index: {}]   ;;  %s8990_s11 = inlined_call_operand.vmem [shape: f32[16,1], index: 11, kind: input, shape index: {}]   ;;  %s8991_s12 = inlined_call_operand.vmem [shape: f32[16,304], index: 12, kind: input, shape index: {}]   ;;  %s8992_s13 = inlined_call_operand.vmem [shape: f32[16,1], index: 13, kind: input, shape index: {}]   ;;  %s8993_s14 = inlined_call_operand.vmem [shape: f32[2,16,16], index: 14, kind: output, shape index: {}]  }
   0x1   :  { %s6708_s15 = smov 0  }
   0x2 LB: > { %s36_s16 = sadd.s32 1, %s6618_s30  ;;  %p6073_p0 = scmp.ge.s32.totalorder %s6622_s15, 1  ;;  %s6622_s15 = sphi %s6708_s15, %s24_s15   ;;  %s6618_s30 = sphi %s6706_s30, %s9338_s30   ;;  %s6614_s29 = sphi %s6704_s29, %s9337_s29  }
   0x3   : > { %p38_p1 = scmp.ge.s32.totalorder %s36_s16, 2  ;;  %p459_p2 = scmp.lt.s32.totalorder %s6622_s15, 3 }
   0x5   : > { %s9340_s16 = smov (%p38_p1, %s36_s16), 0  ;;  %p460_p3 = pnand %p6073_p0, %p459_p2 }
   0x7   : > { %463 = sbr.rel (%p460_p3) target bundleno = 4094 (0xffe), region = 76 }
   0xc   : > { %p524_p4 = scmp.lt.s32.totalorder %s6614_s29, 1  ;;  %v559_v0 = vld [vmem:[%s8983_s4] sm:$0xff]  ;;  %v6624_v1 = vmov 0   ;;  %vm593_vm0 = vcmask 23552   ;;  %vm607_vm1 = vcmask 1042432   ;;  %v574_v7 = vld [vmem:[%s8984_s5 + $0x8] sm:$0xff]  ;;  %v694_v40 = vlaneseq }
   0xd   : > { %6594 = vset.pattern.permute.xlu1 %v6624_v1  ;;  %6595 = vset.pattern.permute.xlu0 %v6624_v1  ;;  %v573_v2 = vld [vmem:[%s8984_s5] sm:$0xff]  ;;  %v985_v14 = vld [vmem:[%s8990_s11 + $0x8] sm:$0xff]  ;;  %v8994_v19 = vmov 0.0   ;;  %vm6626_vm2 = vmmov 0   ;;  %vm697_vm3 = vcmask 130048  }
   0xe   : > { %s9342_s29 = smov (!%p524_p4, %s6614_s29), 1  ;;  %563 = vperm.xlu1 %6594, %v559_v0   ;;  %v817_v11 = vld [vmem:[%s8986_s7] sm:$0xff]  ;;  %v5783_v17 = vld [vmem:[%s8992_s13 + $0x8] sm:$0xff]  ;;  %6561 = vmatprep.subr.mxu1 %v8994_v19  ;;  %v6802_v43 = vshrl.u32 %v694_v40, 7 }
   0xf   : > { %s6076_s21 = sshll.u32 %s9342_s29, 2  ;;  %s6732_s22 = sshll.u32 %s9342_s29, 4  ;;  %v901_v13 = vld [vmem:[%s8988_s9] sm:$0xff]  ;;  %v560_v18 = vld [vmem:[%s8983_s4 + $0x8] sm:$0xff]  ;;  %6332 = vmatprep.mubr.msk.f32.mxu1 %vm6626_vm2, %v8994_v19 }
  0x10   : > { %s539_s25 = scalar_lea.vmem %s8981_s2, %s6076_s21  ;;  %s528_s28 = scalar_lea.vmem %s8979_s0, %s6732_s22  ;;  %v984_v15 = vld [vmem:[%s8990_s11] sm:$0xff]  ;;  %v6805_v46 = vadd.s32 8, %v6802_v43 }
  0x11   : > { %v6739_v3 = vld [vmem:[%s539_s25] sm:$0x7]  ;;  %v554_v6 = vld [vmem:[%s528_s28 + $0x8] sm:$0xff]  ;;  %s6786_s27 = scalar_lea.vmem %s8982_s3, %s6732_s22  ;;  %s532_s18 = scalar_lea.vmem %s8980_s1, %s6076_s21 }
  0x12   : > { %577 = vperm.xlu1 %6594, %v573_v2   ;;  %v600_v4 = vmul.f32 -2.0, %v6739_v3  ;;  %v553_v5 = vld [vmem:[%s528_s28] sm:$0xff]  ;;  %v592_v9 = vmul.f32 %v554_v6, %v554_v6  ;;  %v558_v48 = vld [vmem:[%s6786_s27 + $0x8] sm:$0xff]  ;;  %s552_s25 = scalar_lea.vmem %s8993_s14, %s6732_s22 }
  0x13   : > { %v591_v8 = vmul.f32 %v553_v5, %v553_v5  ;;  %6319 = vmatprep.mubr.msk.f32.mxu0 %vm593_vm0, %v553_v5  ;;  %v5782_v16 = vld [vmem:[%s8992_s13] sm:$0xff] }
  0x14   : > { %6317 = vmatprep.subr.msk.mxu0 %vm607_vm1, %v600_v4  ;;  %v597_v12 = vsel %vm593_vm0, %v592_v9, 0.0  ;;  %v557_v20 = vld [vmem:[%s6786_s27] sm:$0xff] }
  0x15   : > { %6318 = vmatpush3.msk.msra.mxu0 %vm607_vm1, %v600_v4  ;;  %v594_v10 = vsel %vm593_vm0, %v591_v8, 0.0  ;;  %v555_v27 = vld [vmem:[%s532_s18] sm:$0x7]  ;;  %v6627_v4 = vmov 1.0  }
  0x16   : > { %582 = vperm.xlu1 %6594, %v574_v7   ;;  %6320 = vmatmul.mubr.msk.f32.vlgmr.msra.gmra.mxu0 %vm593_vm0, %v554_v6 }
  0x17   : > { %595 = vadd.xlane.f32.xlu0 %v594_v10  ;;  %6322 = vmatprep.subr.mxu0 %v8994_v19 }
  0x18   : > { %6326 = vmatprep.mubr.msk.f32.mxu0 %vm6626_vm2, %v8994_v19 }
  0x1a   : > { %820 = vperm.xlu1 %6594, %v817_v11  }
  0x1b   : > { %598 = vadd.xlane.f32.xlu0 %v597_v12 }
  0x1e   : > { %904 = vperm.xlu1 %6594, %v901_v13  }
  0x22   : > { %993 = vperm.xlu1 %6594, %v985_v14  }
  0x26   : > { %988 = vperm.xlu1 %6594, %v984_v15  }
  0x2a   : > { %5786 = vperm.xlu1 %6594, %v5782_v16  }
  0x2e   : > { %5791 = vperm.xlu1 %6594, %v5783_v17  }
  0x31   : > { %568 = vperm.xlu0 %6595, %v560_v18  }
  0x89   : > { %v564_v21 = vpop.permute.xlu1 %563 }
  0x8a   : > { %v571_v22 = vmul.f32 %v564_v21, %v557_v20 }
  0x8d   : > { %v578_v23 = vpop.permute.xlu1 %577 }
  0x8e   : > { %v585_v24 = vadd.f32 %v578_v23, %v571_v22 }
  0x90   : > { %v587_v25 = vmul.f32 0.1, %v585_v24 }
  0x91   : > { %v583_v57 = vpop.permute.xlu1 %582 }
  0x92   : > { %v589_v26 = vmax.f32 %v585_v24, %v587_v25 }
  0x94   : > { %v6794_v28 = vrot.slane %v589_v26, 5 }
  0x96   : > { %v6798_v29 = vsel %vm607_vm1, %v555_v27, %v6794_v28 }
  0xa0   : > { %v596_v30 = vpop.xlane.xlu0 %595 }
  0xa4   : > { %v599_v31 = vpop.xlane.xlu0 %598 }
  0xac   : > { %v569_v49 = vpop.permute.xlu0 %568 }
  0xad   : > { %v572_v54 = vmul.f32 %v569_v49, %v558_v48 }
  0xaf   : > { %v586_v58 = vadd.f32 %v583_v57, %v572_v54 }
  0xb1   : > { %v588_v61 = vmul.f32 0.1, %v586_v58 }
  0xb3   : > { %v590_v0 = vmax.f32 %v586_v58, %v588_v61 }
  0xb5   : > { %v6815_v7 = vrot.slane %v590_v0, 5 }
  0xb7   : > { %v6835_v12 = vsel %vm607_vm1, %v6794_v28, %v6815_v7 }
  0xd6   : > { %v6321_v32 = vpop.f32.mrf.mxu0 }
  0xd7   : > { %v683_v33 = vadd.f32 %v6321_v32, %v599_v31 }
  0xd8   : > { %v677_v34 = vpop.f32.mrf.mxu0 }
  0xd9   : > { %v678_v35 = vadd.f32 %v677_v34, %v596_v30  ;;  %v699_v36 = vsel %vm697_vm3, %v683_v33, inf }
  0xdb   : > { %v698_v37 = vsel %vm697_vm3, %v678_v35, inf }
  0xdc   : > { %v700_v38 = vmin.f32 %v698_v37, %v699_v36 }
  0xde   : > { %v701_v39 = vrot.slane %v700_v38, 4 }
  0xe0   : > { %v702_v41 = vmin.f32 %v700_v38, %v701_v39 }
  0xe2   : > { %v703_v42 = vrot.slane %v702_v41, 2 }
  0xe4   : > { %v704_v44 = vmin.f32 %v702_v41, %v703_v42 }
  0xe6   : > { %v705_v45 = vrot.slane %v704_v44, 1 }
  0xe8   : > { %v706_v47 = vmin.f32 %v704_v44, %v705_v45 }
  0xea   : > { %vm707_vm4 = vcmp.eq.f32.partialorder %v678_v35, %v706_v47  ;;  %vm708_vm5 = vcmp.eq.f32.partialorder %v683_v33, %v706_v47 }
  0xeb   : > { %v709_v50 = vsel %vm707_vm4, %v6802_v43, 16  ;;  %v710_v51 = vsel %vm708_vm5, %v6805_v46, 16 }
  0xec   : > { %v711_v52 = vsel %vm697_vm3, %v709_v50, 2147483647  ;;  %v712_v53 = vsel %vm697_vm3, %v710_v51, 2147483647 }
  0xed   : > { %vm713_vm6 = vcmp.lt.s32.totalorder %v711_v52, %v712_v53 }
  0xee   : > { %v714_v55 = vsel %vm713_vm6, %v711_v52, %v712_v53 }
  0xef   : > { %v715_v56 = vrot.slane %v714_v55, 4 }
  0xf1   : > { %vm716_vm7 = vcmp.lt.s32.totalorder %v714_v55, %v715_v56 }
  0xf2   : > { %v717_v59 = vsel %vm716_vm7, %v714_v55, %v715_v56 }
  0xf3   : > { %v718_v60 = vrot.slane %v717_v59, 2 }
  0xf5   : > { %vm719_vm8 = vcmp.lt.s32.totalorder %v717_v59, %v718_v60 }
  0xf6   : > { %v720_v62 = vsel %vm719_vm8, %v717_v59, %v718_v60 }
  0xf7   : > { %v721_v63 = vrot.slane %v720_v62, 1 }
  0xf9   : > { %vm722_vm9 = vcmp.lt.s32.totalorder %v720_v62, %v721_v63 }
  0xfa   : > { %v723_v1 = vsel %vm722_vm9, %v720_v62, %v721_v63 }
  0xfb   : > { %vm724_vm10 = vcmp.eq.s32.totalorder %v709_v50, %v723_v1  ;;  %vm725_vm11 = vcmp.eq.s32.totalorder %v710_v51, %v723_v1 }
  0xfc   : > { %v1373_v2 = vsel %vm724_vm10, 1e+30, %v678_v35  ;;  %6323 = vmatpush3.msk.msra.mxu0 %vm725_vm11, %v6627_v4  ;;  %v1374_v5 = vsel %vm725_vm11, 1e+30, %v683_v33  ;;  %6563 = vmatpush3.msk.msra.mxu1 %vm725_vm11, %v6627_v4 }
  0xfd   : > { %v1375_v6 = vsel %vm697_vm3, %v1373_v2, inf  ;;  %v1376_v8 = vsel %vm697_vm3, %v1374_v5, inf  ;;  %6324 = vmatprep.subr.mxu0 %v8994_v19  ;;  %6562 = vmatprep.subr.mxu1 %v8994_v19 }
  0xfe   : > { %v1377_v9 = vmin.f32 %v1375_v6, %v1376_v8  ;;  %6325 = vmatpush3.msk.msra.mxu0 %vm724_vm10, %v6627_v4  ;;  %6564 = vmatpush3.msk.msra.mxu1 %vm724_vm10, %v6627_v4 }
  0xff   : > { %6327 = vmatmul.mubr.msk.f32.vlgmr.msra.gmra.mxu0 %vm697_vm3, %v6798_v29  ;;  %6333 = vmatmul.mubr.msk.f32.vlgmr.msra.gmra.mxu1 %vm697_vm3, %v6815_v7 }
 0x100   : > { %v1378_v10 = vrot.slane %v1377_v9, 4  ;;  %6329 = vmatprep.mubr.msk.f32.mxu0 %vm6626_vm2, %v8994_v19  ;;  %6350 = vmatprep.subr.mxu1 %v8994_v19 }
 0x101   : > { %6354 = vmatprep.mubr.msk.f32.mxu1 %vm6626_vm2, %v8994_v19  ;;  %6335 = vmatprep.subr.mxu0 %v8994_v19 }
 0x102   : > { %v1379_v11 = vmin.f32 %v1377_v9, %v1378_v10 }
 0x103   : > { %6330 = vmatmul.mubr.msk.f32.gmra.mxu0 %vm697_vm3, %v6835_v12 }
 0x104   : > { %v1380_v13 = vrot.slane %v1379_v11, 2  ;;  %6337 = vmatprep.mubr.msk.f32.mxu0 %vm6626_vm2, %v8994_v19 }
 0x106   : > { %v1381_v14 = vmin.f32 %v1379_v11, %v1380_v13 }
 0x108   : > { %v1382_v15 = vrot.slane %v1381_v14, 1 }
 0x10a   : > { %v1383_v16 = vmin.f32 %v1381_v14, %v1382_v15 }
 0x10c   : > { %vm1384_vm12 = vcmp.eq.f32.partialorder %v1373_v2, %v1383_v16  ;;  %vm1385_vm13 = vcmp.eq.f32.partialorder %v1374_v5, %v1383_v16 }
 0x10d   : > { %v1386_v17 = vsel %vm1384_vm12, %v6802_v43, 16  ;;  %v1387_v18 = vsel %vm1385_vm13, %v6805_v46, 16 }
 0x10e   : > { %v1388_v20 = vsel %vm697_vm3, %v1386_v17, 2147483647  ;;  %v1389_v21 = vsel %vm697_vm3, %v1387_v18, 2147483647 }
 0x10f   : > { %vm1390_vm14 = vcmp.lt.s32.totalorder %v1388_v20, %v1389_v21 }
 0x110   : > { %v1391_v22 = vsel %vm1390_vm14, %v1388_v20, %v1389_v21 }
 0x111   : > { %v1392_v23 = vrot.slane %v1391_v22, 4 }
 0x113   : > { %vm1393_vm15 = vcmp.lt.s32.totalorder %v1391_v22, %v1392_v23 }
 0x114   : > { %v1394_v24 = vsel %vm1393_vm15, %v1391_v22, %v1392_v23 }
 0x115   : > { %v1395_v25 = vrot.slane %v1394_v24, 2 }
 0x117   : > { %vm1396_vm4 = vcmp.lt.s32.totalorder %v1394_v24, %v1395_v25 }
 0x118   : > { %v1397_v26 = vsel %vm1396_vm4, %v1394_v24, %v1395_v25 }
 0x119   : > { %v1398_v27 = vrot.slane %v1397_v26, 1 }
 0x11b   : > { %vm1399_vm5 = vcmp.lt.s32.totalorder %v1397_v26, %v1398_v27 }
 0x11c   : > { %v1400_v28 = vsel %vm1399_vm5, %v1397_v26, %v1398_v27 }
 0x11d   : > { %vm1402_vm6 = vcmp.eq.s32.totalorder %v1387_v18, %v1400_v28  ;;  %vm1401_vm7 = vcmp.eq.s32.totalorder %v1386_v17, %v1400_v28 }
 0x11e   : > { %6351 = vmatpush3.msk.msra.mxu1 %vm1402_vm6, %v6627_v4  ;;  %v2003_v30 = vsel %vm1402_vm6, 1e+30, %v1374_v5  ;;  %v2002_v31 = vsel %vm1401_vm7, 1e+30, %v1373_v2 }
 0x11f   : > { %v2005_v32 = vsel %vm697_vm3, %v2003_v30, inf  ;;  %6352 = vmatprep.subr.mxu1 %v8994_v19  ;;  %v2004_v33 = vsel %vm697_vm3, %v2002_v31, inf }
 0x120   : > { %6353 = vmatpush3.msk.msra.mxu1 %vm1401_vm7, %v6627_v4  ;;  %v2006_v34 = vmin.f32 %v2004_v33, %v2005_v32 }
 0x121   : > { %6355 = vmatmul.mubr.msk.f32.vlgmr.msra.gmra.mxu1 %vm697_vm3, %v6798_v29  ;;  %6378 = vmatprep.subr.mxu1 %v8994_v19 }
 0x122   : > { %v2007_v35 = vrot.slane %v2006_v34, 4  ;;  %6357 = vmatprep.mubr.msk.f32.mxu1 %vm6626_vm2, %v8994_v19 }
 0x124   : > { %v2008_v36 = vmin.f32 %v2006_v34, %v2007_v35 }
 0x125   : > { %6358 = vmatmul.mubr.msk.f32.gmra.mxu1 %vm697_vm3, %v6835_v12 }
 0x126   : > { %v2009_v37 = vrot.slane %v2008_v36, 2  ;;  %6360 = vmatprep.mubr.msk.f32.mxu1 %vm6626_vm2, %v8994_v19 }
 0x128   : > { %v2010_v38 = vmin.f32 %v2008_v36, %v2009_v37 }
 0x129   : > { %6361 = vmatmul.mubr.msk.f32.gmra.mxu1 %vm697_vm3, %v6815_v7 }
 0x12a   : > { %v2011_v39 = vrot.slane %v2010_v38, 1  ;;  %6382 = vmatprep.mubr.msk.f32.mxu1 %vm6626_vm2, %v8994_v19 }
 0x12c   : > { %v2012_v40 = vmin.f32 %v2010_v38, %v2011_v39 }
 0x12e   : > { %vm2013_vm8 = vcmp.eq.f32.partialorder %v2002_v31, %v2012_v40  ;;  %vm2014_vm9 = vcmp.eq.f32.partialorder %v2003_v30, %v2012_v40 }
 0x12f   : > { %v2015_v41 = vsel %vm2013_vm8, %v6802_v43, 16  ;;  %v2016_v42 = vsel %vm2014_vm9, %v6805_v46, 16 }
 0x130   : > { %v2017_v44 = vsel %vm697_vm3, %v2015_v41, 2147483647  ;;  %v2018_v45 = vsel %vm697_vm3, %v2016_v42, 2147483647 }
 0x131   : > { %vm2019_vm10 = vcmp.lt.s32.totalorder %v2017_v44, %v2018_v45 }
 0x132   : > { %v2020_v47 = vsel %vm2019_vm10, %v2017_v44, %v2018_v45 }
 0x133   : > { %v2021_v48 = vrot.slane %v2020_v47, 4 }
 0x135   : > { %vm2022_vm11 = vcmp.lt.s32.totalorder %v2020_v47, %v2021_v48 }
 0x136   : > { %v2023_v49 = vsel %vm2022_vm11, %v2020_v47, %v2021_v48 }
 0x137   : > { %v2024_v50 = vrot.slane %v2023_v49, 2 }
 0x139   : > { %vm2025_vm12 = vcmp.lt.s32.totalorder %v2023_v49, %v2024_v50 }
 0x13a   : > { %v2026_v51 = vsel %vm2025_vm12, %v2023_v49, %v2024_v50 }
 0x13b   : > { %v2027_v52 = vrot.slane %v2026_v51, 1 }
 0x13d   : > { %vm2028_vm13 = vcmp.lt.s32.totalorder %v2026_v51, %v2027_v52 }
 0x13e   : > { %v2029_v53 = vsel %vm2028_vm13, %v2026_v51, %v2027_v52 }
 0x13f   : > { %vm2031_vm14 = vcmp.eq.s32.totalorder %v2016_v42, %v2029_v53  ;;  %vm2030_vm15 = vcmp.eq.s32.totalorder %v2015_v41, %v2029_v53 }
 0x140   : > { %6379 = vmatpush3.msk.msra.mxu1 %vm2031_vm14, %v6627_v4  ;;  %v2632_v54 = vsel %vm2031_vm14, 1e+30, %v2003_v30  ;;  %v2631_v55 = vsel %vm2030_vm15, 1e+30, %v2002_v31 }
 0x141   : > { %v2634_v56 = vsel %vm697_vm3, %v2632_v54, inf  ;;  %6380 = vmatprep.subr.mxu1 %v8994_v19  ;;  %v2633_v57 = vsel %vm697_vm3, %v2631_v55, inf }
 0x142   : > { %6381 = vmatpush3.msk.msra.mxu1 %vm2030_vm15, %v6627_v4  ;;  %v2635_v58 = vmin.f32 %v2633_v57, %v2634_v56 }
 0x143   : > { %6383 = vmatmul.mubr.msk.f32.vlgmr.msra.gmra.mxu1 %vm697_vm3, %v6798_v29  ;;  %6406 = vmatprep.subr.mxu1 %v8994_v19 }
 0x144   : > { %v2636_v59 = vrot.slane %v2635_v58, 4  ;;  %6385 = vmatprep.mubr.msk.f32.mxu1 %vm6626_vm2, %v8994_v19 }
 0x146   : > { %v2637_v60 = vmin.f32 %v2635_v58, %v2636_v59 }
 0x147   : > { %6386 = vmatmul.mubr.msk.f32.gmra.mxu1 %vm697_vm3, %v6835_v12 }
 0x148   : > { %v2638_v61 = vrot.slane %v2637_v60, 2  ;;  %6388 = vmatprep.mubr.msk.f32.mxu1 %vm6626_vm2, %v8994_v19 }
 0x14a   : > { %v2639_v62 = vmin.f32 %v2637_v60, %v2638_v61 }
 0x14b   : > { %6389 = vmatmul.mubr.msk.f32.gmra.mxu1 %vm697_vm3, %v6815_v7 }
 0x14c   : > { %v2640_v63 = vrot.slane %v2639_v62, 1  ;;  %6410 = vmatprep.mubr.msk.f32.mxu1 %vm6626_vm2, %v8994_v19 }
 0x14e   : > { %v2641_v0 = vmin.f32 %v2639_v62, %v2640_v63 }
 0x150   : > { %vm2642_vm4 = vcmp.eq.f32.partialorder %v2631_v55, %v2641_v0  ;;  %vm2643_vm5 = vcmp.eq.f32.partialorder %v2632_v54, %v2641_v0 }
 0x151   : > { %v2644_v1 = vsel %vm2642_vm4, %v6802_v43, 16  ;;  %v2645_v2 = vsel %vm2643_vm5, %v6805_v46, 16 }
 0x152   : > { %v2646_v5 = vsel %vm697_vm3, %v2644_v1, 2147483647  ;;  %v2647_v6 = vsel %vm697_vm3, %v2645_v2, 2147483647 }
 0x153   : > { %vm2648_vm6 = vcmp.lt.s32.totalorder %v2646_v5, %v2647_v6 }
 0x154   : > { %v2649_v8 = vsel %vm2648_vm6, %v2646_v5, %v2647_v6 }
 0x155   : > { %v2650_v9 = vrot.slane %v2649_v8, 4 }
 0x157   : > { %vm2651_vm7 = vcmp.lt.s32.totalorder %v2649_v8, %v2650_v9 }
 0x158   : > { %v2652_v10 = vsel %vm2651_vm7, %v2649_v8, %v2650_v9 }
 0x159   : > { %v2653_v11 = vrot.slane %v2652_v10, 2 }
 0x15b   : > { %vm2654_vm8 = vcmp.lt.s32.totalorder %v2652_v10, %v2653_v11 }
 0x15c   : > { %v2655_v13 = vsel %vm2654_vm8, %v2652_v10, %v2653_v11 }
 0x15d   : > { %v2656_v14 = vrot.slane %v2655_v13, 1 }
 0x15f   : > { %vm2657_vm9 = vcmp.lt.s32.totalorder %v2655_v13, %v2656_v14 }
 0x160   : > { %v2658_v15 = vsel %vm2657_vm9, %v2655_v13, %v2656_v14 }
 0x161   : > { %vm2660_vm10 = vcmp.eq.s32.totalorder %v2645_v2, %v2658_v15  ;;  %vm2659_vm11 = vcmp.eq.s32.totalorder %v2644_v1, %v2658_v15 }
 0x162   : > { %6407 = vmatpush3.msk.msra.mxu1 %vm2660_vm10, %v6627_v4  ;;  %v3261_v16 = vsel %vm2660_vm10, 1e+30, %v2632_v54  ;;  %v3260_v17 = vsel %vm2659_vm11, 1e+30, %v2631_v55 }
 0x163   : > { %v3263_v18 = vsel %vm697_vm3, %v3261_v16, inf  ;;  %6408 = vmatprep.subr.mxu1 %v8994_v19  ;;  %v3262_v20 = vsel %vm697_vm3, %v3260_v17, inf }
 0x164   : > { %6409 = vmatpush3.msk.msra.mxu1 %vm2659_vm11, %v6627_v4  ;;  %v3264_v21 = vmin.f32 %v3262_v20, %v3263_v18 }
 0x165   : > { %6411 = vmatmul.mubr.msk.f32.vlgmr.msra.gmra.mxu1 %vm697_vm3, %v6798_v29  ;;  %6434 = vmatprep.subr.mxu1 %v8994_v19 }
 0x166   : > { %v3265_v22 = vrot.slane %v3264_v21, 4  ;;  %6413 = vmatprep.mubr.msk.f32.mxu1 %vm6626_vm2, %v8994_v19 }
 0x168   : > { %v3266_v23 = vmin.f32 %v3264_v21, %v3265_v22  ;;  %v6957_v22 = vsel %vm607_vm1, %v6739_v3, 0.0 }
 0x169   : > { %6414 = vmatmul.mubr.msk.f32.gmra.mxu1 %vm697_vm3, %v6835_v12  ;;  %9063 = vst [vmem:[#allocation2_spill] sm:$0xff] %v6957_v22 }
 0x16a   : > { %v3267_v24 = vrot.slane %v3266_v23, 2  ;;  %6416 = vmatprep.mubr.msk.f32.mxu1 %vm6626_vm2, %v8994_v19 }
 0x16c   : > { %v3268_v25 = vmin.f32 %v3266_v23, %v3267_v24 }
 0x16d   : > { %6417 = vmatmul.mubr.msk.f32.gmra.mxu1 %vm697_vm3, %v6815_v7 }
 0x16e   : > { %v3269_v26 = vrot.slane %v3268_v25, 1  ;;  %6438 = vmatprep.mubr.msk.f32.mxu1 %vm6626_vm2, %v8994_v19 }
 0x170   : > { %v3270_v27 = vmin.f32 %v3268_v25, %v3269_v26 }
 0x172   : > { %vm3271_vm12 = vcmp.eq.f32.partialorder %v3260_v17, %v3270_v27  ;;  %vm3272_vm13 = vcmp.eq.f32.partialorder %v3261_v16, %v3270_v27  ;;  %v6967_v27 = vld [vmem:[%s8985_s6] sm:$0xff] }
 0x173   : > { %v3273_v28 = vsel %vm3271_vm12, %v6802_v43, 16  ;;  %v3274_v30 = vsel %vm3272_vm13, %v6805_v46, 16  ;;  %9064 = vst [vmem:[#allocation3_spill] sm:$0xff] %v6967_v27 }
 0x174   : > { %v3275_v31 = vsel %vm697_vm3, %v3273_v28, 2147483647  ;;  %v3276_v32 = vsel %vm697_vm3, %v3274_v30, 2147483647 }
 0x175   : > { %vm3277_vm14 = vcmp.lt.s32.totalorder %v3275_v31, %v3276_v32 }
 0x176   : > { %v3278_v33 = vsel %vm3277_vm14, %v3275_v31, %v3276_v32 }
 0x177   : > { %v3279_v34 = vrot.slane %v3278_v33, 4 }
 0x179   : > { %vm3280_vm15 = vcmp.lt.s32.totalorder %v3278_v33, %v3279_v34 }
 0x17a   : > { %v3281_v35 = vsel %vm3280_vm15, %v3278_v33, %v3279_v34 }
 0x17b   : > { %v3282_v36 = vrot.slane %v3281_v35, 2 }
 0x17d   : > { %vm3283_vm4 = vcmp.lt.s32.totalorder %v3281_v35, %v3282_v36 }
 0x17e   : > { %v3284_v37 = vsel %vm3283_vm4, %v3281_v35, %v3282_v36 }
 0x17f   : > { %v3285_v38 = vrot.slane %v3284_v37, 1 }
 0x181   : > { %vm3286_vm5 = vcmp.lt.s32.totalorder %v3284_v37, %v3285_v38 }
 0x182   : > { %v3287_v39 = vsel %vm3286_vm5, %v3284_v37, %v3285_v38 }
 0x183   : > { %vm3289_vm6 = vcmp.eq.s32.totalorder %v3274_v30, %v3287_v39  ;;  %vm3288_vm7 = vcmp.eq.s32.totalorder %v3273_v28, %v3287_v39 }
 0x184   : > { %6435 = vmatpush3.msk.msra.mxu1 %vm3289_vm6, %v6627_v4  ;;  %v3890_v40 = vsel %vm3289_vm6, 1e+30, %v3261_v16  ;;  %v3889_v41 = vsel %vm3288_vm7, 1e+30, %v3260_v17 }
 0x185   : > { %v3892_v42 = vsel %vm697_vm3, %v3890_v40, inf  ;;  %6436 = vmatprep.subr.mxu1 %v8994_v19  ;;  %v3891_v44 = vsel %vm697_vm3, %v3889_v41, inf }
 0x186   : > { %6437 = vmatpush3.msk.msra.mxu1 %vm3288_vm7, %v6627_v4  ;;  %v3893_v45 = vmin.f32 %v3891_v44, %v3892_v42 }
 0x187   : > { %6439 = vmatmul.mubr.msk.f32.vlgmr.msra.gmra.mxu1 %vm697_vm3, %v6798_v29  ;;  %6462 = vmatprep.subr.mxu1 %v8994_v19 }
 0x188   : > { %v3894_v47 = vrot.slane %v3893_v45, 4  ;;  %6441 = vmatprep.mubr.msk.f32.mxu1 %vm6626_vm2, %v8994_v19 }
 0x18a   : > { %v3895_v48 = vmin.f32 %v3893_v45, %v3894_v47 }
 0x18b   : > { %6442 = vmatmul.mubr.msk.f32.gmra.mxu1 %vm697_vm3, %v6835_v12 }
 0x18c   : > { %v3896_v49 = vrot.slane %v3895_v48, 2  ;;  %6444 = vmatprep.mubr.msk.f32.mxu1 %vm6626_vm2, %v8994_v19 }
 0x18e   : > { %v3897_v50 = vmin.f32 %v3895_v48, %v3896_v49 }
 0x18f   : > { %6445 = vmatmul.mubr.msk.f32.gmra.mxu1 %vm697_vm3, %v6815_v7 }
 0x190   : > { %v3898_v51 = vrot.slane %v3897_v50, 1  ;;  %6466 = vmatprep.mubr.msk.f32.mxu1 %vm6626_vm2, %v8994_v19 }
 0x192   : > { %v3899_v52 = vmin.f32 %v3897_v50, %v3898_v51 }
 0x194   : > { %vm3900_vm8 = vcmp.eq.f32.partialorder %v3889_v41, %v3899_v52  ;;  %vm3901_vm9 = vcmp.eq.f32.partialorder %v3890_v40, %v3899_v52 }
 0x195   : > { %v3902_v53 = vsel %vm3900_vm8, %v6802_v43, 16  ;;  %v3903_v54 = vsel %vm3901_vm9, %v6805_v46, 16 }
 0x196   : > { %v3904_v55 = vsel %vm697_vm3, %v3902_v53, 2147483647  ;;  %v3905_v56 = vsel %vm697_vm3, %v3903_v54, 2147483647 }
 0x197   : > { %vm3906_vm10 = vcmp.lt.s32.totalorder %v3904_v55, %v3905_v56 }
 0x198   : > { %v3907_v57 = vsel %vm3906_vm10, %v3904_v55, %v3905_v56 }
 0x199   : > { %v3908_v58 = vrot.slane %v3907_v57, 4 }
 0x19b   : > { %vm3909_vm11 = vcmp.lt.s32.totalorder %v3907_v57, %v3908_v58 }
 0x19c   : > { %v3910_v59 = vsel %vm3909_vm11, %v3907_v57, %v3908_v58 }
 0x19d   : > { %v3911_v60 = vrot.slane %v3910_v59, 2 }
 0x19f   : > { %vm3912_vm12 = vcmp.lt.s32.totalorder %v3910_v59, %v3911_v60 }
 0x1a0   : > { %v3913_v61 = vsel %vm3912_vm12, %v3910_v59, %v3911_v60 }
 0x1a1   : > { %v3914_v62 = vrot.slane %v3913_v61, 1 }
 0x1a3   : > { %vm3915_vm13 = vcmp.lt.s32.totalorder %v3913_v61, %v3914_v62 }
 0x1a4   : > { %v3916_v63 = vsel %vm3915_vm13, %v3913_v61, %v3914_v62 }
 0x1a5   : > { %vm3918_vm14 = vcmp.eq.s32.totalorder %v3903_v54, %v3916_v63  ;;  %vm3917_vm15 = vcmp.eq.s32.totalorder %v3902_v53, %v3916_v63 }
 0x1a6   : > { %6463 = vmatpush3.msk.msra.mxu1 %vm3918_vm14, %v6627_v4  ;;  %v4519_v0 = vsel %vm3918_vm14, 1e+30, %v3890_v40  ;;  %v4518_v1 = vsel %vm3917_vm15, 1e+30, %v3889_v41 }
 0x1a7   : > { %v4521_v2 = vsel %vm697_vm3, %v4519_v0, inf  ;;  %6464 = vmatprep.subr.mxu1 %v8994_v19  ;;  %v4520_v5 = vsel %vm697_vm3, %v4518_v1, inf }
 0x1a8   : > { %6465 = vmatpush3.msk.msra.mxu1 %vm3917_vm15, %v6627_v4  ;;  %v4522_v6 = vmin.f32 %v4520_v5, %v4521_v2 }
 0x1a9   : > { %6467 = vmatmul.mubr.msk.f32.vlgmr.msra.gmra.mxu1 %vm697_vm3, %v6798_v29  ;;  %6490 = vmatprep.subr.mxu1 %v8994_v19 }
 0x1aa   : > { %v4523_v8 = vrot.slane %v4522_v6, 4  ;;  %6469 = vmatprep.mubr.msk.f32.mxu1 %vm6626_vm2, %v8994_v19 }
 0x1ac   : > { %v4524_v9 = vmin.f32 %v4522_v6, %v4523_v8 }
 0x1ad   : > { %6470 = vmatmul.mubr.msk.f32.gmra.mxu1 %vm697_vm3, %v6835_v12 }
 0x1ae   : > { %v4525_v10 = vrot.slane %v4524_v9, 2  ;;  %6472 = vmatprep.mubr.msk.f32.mxu1 %vm6626_vm2, %v8994_v19 }
 0x1b0   : > { %v4526_v11 = vmin.f32 %v4524_v9, %v4525_v10 }
 0x1b1   : > { %6473 = vmatmul.mubr.msk.f32.gmra.mxu1 %vm697_vm3, %v6815_v7 }
 0x1b2   : > { %v4527_v13 = vrot.slane %v4526_v11, 1  ;;  %6494 = vmatprep.mubr.msk.f32.mxu1 %vm6626_vm2, %v8994_v19 }
 0x1b4   : > { %v4528_v14 = vmin.f32 %v4526_v11, %v4527_v13 }
 0x1b6   : > { %vm4529_vm4 = vcmp.eq.f32.partialorder %v4518_v1, %v4528_v14  ;;  %vm4530_vm5 = vcmp.eq.f32.partialorder %v4519_v0, %v4528_v14 }
 0x1b7   : > { %v4531_v15 = vsel %vm4529_vm4, %v6802_v43, 16  ;;  %v4532_v16 = vsel %vm4530_vm5, %v6805_v46, 16 }
 0x1b8   : > { %v4533_v17 = vsel %vm697_vm3, %v4531_v15, 2147483647  ;;  %v4534_v18 = vsel %vm697_vm3, %v4532_v16, 2147483647 }
 0x1b9   : > { %vm4535_vm6 = vcmp.lt.s32.totalorder %v4533_v17, %v4534_v18 }
 0x1ba   : > { %v4536_v20 = vsel %vm4535_vm6, %v4533_v17, %v4534_v18 }
 0x1bb   : > { %v4537_v21 = vrot.slane %v4536_v20, 4 }
 0x1bd   : > { %vm4538_vm7 = vcmp.lt.s32.totalorder %v4536_v20, %v4537_v21 }
 0x1be   : > { %v4539_v25 = vsel %vm4538_vm7, %v4536_v20, %v4537_v21 }
 0x1bf   : > { %v801_v23 = vpop.f32.mrf.mxu0  ;;  %v6959_v24 = vpop.f32.mrf.mxu1  ;;  %v4540_v3 = vrot.slane %v4539_v25, 2 }
 0x1c0   : > { %v6962_v26 = vsub.f32 %v801_v23, %v6957_v22 }
 0x1c1   : > { %v6328_v28 = vpop.f32.mrf.mxu0  ;;  %v6334_v30 = vpop.f32.mrf.mxu1  ;;  %vm4541_vm8 = vcmp.lt.s32.totalorder %v4539_v25, %v4540_v3 }
 0x1c2   : > { %6336 = vmatpush3.msk.msra.mxu0 %vm607_vm1, %v6962_v26  ;;  %v4542_v33 = vsel %vm4541_vm8, %v4539_v25, %v4540_v3  ;;  %v7043_v3 = vpop.permute.xlu1 %820  ;;  %vm907_vm8 = vcmask 64512  }
 0x1c3   : > { %v6971_v31 = vpop.f32.mrf.mxu0  ;;  %6338 = vmatmul.mubr.msk.f32.vlgmr.msra.gmra.mxu0 %vm593_vm0, %v6967_v27  ;;  %6340 = vmatprep.subr.mxu0 %v8994_v19  ;;  %v4543_v34 = vrot.slane %v4542_v33, 1  ;;  %9076 = vst [vmem:[#allocation15_spill] sm:$0xff] %v7043_v3 }
 0x1c4   : > { %6342 = vmatprep.mubr.msk.f32.mxu0 %vm6626_vm2, %v8994_v19 }
 0x1c5   : > { %v6331_v32 = vpop.f32.mrf.mxu0  ;;  %vm4544_vm9 = vcmp.lt.s32.totalorder %v4542_v33, %v4543_v34 }
 0x1c6   : > { %v4545_v35 = vsel %vm4544_vm9, %v4542_v33, %v4543_v34 }
 0x1c7   : > { %vm4547_vm10 = vcmp.eq.s32.totalorder %v4532_v16, %v4545_v35  ;;  %vm4546_vm11 = vcmp.eq.s32.totalorder %v4531_v15, %v4545_v35 }
 0x1c8   : > { %6491 = vmatpush3.msk.msra.mxu1 %vm4547_vm10, %v6627_v4  ;;  %v5148_v36 = vsel %vm4547_vm10, 1e+30, %v4519_v0  ;;  %v5147_v37 = vsel %vm4546_vm11, 1e+30, %v4518_v1 }
 0x1c9   : > { %v5150_v38 = vsel %vm697_vm3, %v5148_v36, inf  ;;  %6492 = vmatprep.subr.mxu1 %v8994_v19  ;;  %v5149_v39 = vsel %vm697_vm3, %v5147_v37, inf }
 0x1ca   : > { %6493 = vmatpush3.msk.msra.mxu1 %vm4546_vm11, %v6627_v4  ;;  %v5151_v40 = vmin.f32 %v5149_v39, %v5150_v38 }
 0x1cb   : > { %6495 = vmatmul.mubr.msk.f32.vlgmr.msra.gmra.mxu1 %vm697_vm3, %v6798_v29  ;;  %6518 = vmatprep.subr.mxu1 %v8994_v19 }
 0x1cc   : > { %v5152_v41 = vrot.slane %v5151_v40, 4  ;;  %6497 = vmatprep.mubr.msk.f32.mxu1 %vm6626_vm2, %v8994_v19 }
 0x1ce   : > { %v5153_v42 = vmin.f32 %v5151_v40, %v5152_v41 }
 0x1cf   : > { %6498 = vmatmul.mubr.msk.f32.gmra.mxu1 %vm697_vm3, %v6835_v12 }
 0x1d0   : > { %v5154_v44 = vrot.slane %v5153_v42, 2  ;;  %6500 = vmatprep.mubr.msk.f32.mxu1 %vm6626_vm2, %v8994_v19 }
 0x1d2   : > { %v5155_v45 = vmin.f32 %v5153_v42, %v5154_v44 }
 0x1d3   : > { %6501 = vmatmul.mubr.msk.f32.gmra.mxu1 %vm697_vm3, %v6815_v7 }
 0x1d4   : > { %v5156_v47 = vrot.slane %v5155_v45, 1  ;;  %6522 = vmatprep.mubr.msk.f32.mxu1 %vm6626_vm2, %v8994_v19 }
 0x1d6   : > { %v5157_v48 = vmin.f32 %v5155_v45, %v5156_v47 }
 0x1d8   : > { %vm5158_vm12 = vcmp.eq.f32.partialorder %v5147_v37, %v5157_v48  ;;  %vm5159_vm13 = vcmp.eq.f32.partialorder %v5148_v36, %v5157_v48  ;;  %v7049_v36 = vld [vmem:[%s8987_s8] sm:$0xff] }
 0x1d9   : > { %v5160_v53 = vsel %vm5158_vm12, %v6802_v43, 16  ;;  %v5161_v54 = vsel %vm5159_vm13, %v6805_v46, 16 }
 0x1da   : > { %v5162_v56 = vsel %vm697_vm3, %v5160_v53, 2147483647  ;;  %v5163_v57 = vsel %vm697_vm3, %v5161_v54, 2147483647 }
 0x1db   : > { %vm5164_vm14 = vcmp.lt.s32.totalorder %v5162_v56, %v5163_v57 }
 0x1dc   : > { %v5165_v59 = vsel %vm5164_vm14, %v5162_v56, %v5163_v57 }
 0x1dd   : > { %v5166_v60 = vrot.slane %v5165_v59, 4 }
 0x1df   : > { %vm5167_vm15 = vcmp.lt.s32.totalorder %v5165_v59, %v5166_v60 }
 0x1e0   : > { %v5168_v61 = vsel %vm5167_vm15, %v5165_v59, %v5166_v60  ;;  %v7078_v60 = vld [vmem:[%s8989_s10 + $0x8] sm:$0xff] }
 0x1e1   : > { %v6996_v49 = vpop.f32.mrf.mxu1  ;;  %v5169_v62 = vrot.slane %v5168_v61, 2  ;;  %9084 = vst [vmem:[#allocation23_spill] sm:$0xff] %v7078_v60 }
 0x1e3   : > { %v6356_v50 = vpop.f32.mrf.mxu1  ;;  %vm5170_vm4 = vcmp.lt.s32.totalorder %v5168_v61, %v5169_v62 }
 0x1e4   : > { %v5171_v63 = vsel %vm5170_vm4, %v5168_v61, %v5169_v62  ;;  %v7082_v61 = vsub.f32 %v6996_v49, %v6957_v22  ;;  %v6628_v49 = vmov 1966171168  }
 0x1e5   : > { %v6998_v51 = vpop.f32.mrf.mxu1  ;;  %v5172_v0 = vrot.slane %v5171_v63, 1  ;;  %v1083_v62 = vunpack.c.l.s4 %v6628_v49 }
 0x1e7   : > { %v6359_v52 = vpop.f32.mrf.mxu1  ;;  %vm5173_vm5 = vcmp.lt.s32.totalorder %v5171_v63, %v5172_v0 }
 0x1e8   : > { %v5174_v1 = vsel %vm5173_vm5, %v5171_v63, %v5172_v0  ;;  %v1084_v63 = vunpack.c.0.s8 %v1083_v62  ;;  %v1081_v0 = vcombine.high %v6962_v26, %v6962_v26 }
 0x1e9   : > { %v7002_v55 = vpop.f32.mrf.mxu1  ;;  %vm5176_vm6 = vcmp.eq.s32.totalorder %v5161_v54, %v5174_v1  ;;  %vm5175_vm7 = vcmp.eq.s32.totalorder %v5160_v53, %v5174_v1  ;;  %v7068_v53 = vld [vmem:[%s8989_s10] sm:$0xff]  ;;  %v7072_v54 = vpop.permute.xlu1 %904 }
 0x1ea   : > { %6519 = vmatpush3.msk.msra.mxu1 %vm5176_vm6, %v6627_v4  ;;  %9083 = vst [vmem:[#allocation22_spill] sm:$0xff] %v7072_v54  ;;  %v7099_v1 = vsub.s32 %v1084_v63, %v6802_v43 }
 0x1eb   : > { %v6362_v58 = vpop.f32.mrf.mxu1  ;;  %6520 = vmatprep.subr.mxu1 %v8994_v19 }
 0x1ec   : > { %6521 = vmatpush3.msk.msra.mxu1 %vm5175_vm7, %v6627_v4  ;;  %9085 = vst [vmem:[#allocation24_spill] sm:$0xff] %v7099_v1 }
 0x1ed   : > { %6523 = vmatmul.mubr.msk.f32.vlgmr.msra.gmra.mxu1 %vm697_vm3, %v6798_v29 }
 0x1ee   : > { %6525 = vmatprep.mubr.msk.f32.mxu1 %vm6626_vm2, %v8994_v19 }
 0x1f1   : > { %6526 = vmatmul.mubr.msk.f32.gmra.mxu1 %vm697_vm3, %v6835_v12 }
 0x1f2   : > { %6528 = vmatprep.mubr.msk.f32.mxu1 %vm6626_vm2, %v8994_v19 }
 0x1f5   : > { %6529 = vmatmul.mubr.msk.f32.gmra.mxu1 %vm697_vm3, %v6815_v7 }
 0x203   : > { %v7013_v46 = vpop.f32.mrf.mxu1 }
 0x205   : > { %v6384_v2 = vpop.f32.mrf.mxu1 }
 0x206   : > { %v1130_v2 = vcombine.high %v6971_v31, %v6971_v31 }
 0x207   : > { %v7019_v5 = vpop.f32.mrf.mxu1 }
 0x208   : > { %9065 = vst [vmem:[#allocation4_spill] sm:$0xff] %v7019_v5 }
 0x209   : > { %v6387_v6 = vpop.f32.mrf.mxu1 }
 0x20a   : > { %v1088_v6 = vrot.slane %v6962_v26, %v7099_v1 }
 0x20b   : > { %v7023_v4 = vpop.f32.mrf.mxu1 }
 0x20c   : > { %9066 = vst [vmem:[#allocation5_spill] sm:$0xff] %v7023_v4 }
 0x20d   : > { %v6390_v29 = vpop.f32.mrf.mxu1 }
 0x20e   : > { %v1095_v29 = vrot.slane %v1081_v0, %v7099_v1 }
 0x225   : > { %v7025_v8 = vpop.f32.mrf.mxu1 }
 0x226   : > { %9067 = vst [vmem:[#allocation6_spill] sm:$0xff] %v7025_v8 }
 0x227   : > { %v6412_v9 = vpop.f32.mrf.mxu1 }
 0x228   : > { %v1185_v9 = vrot.slane %v6959_v24, %v7099_v1  ;;  %v1111_v24 = vrot.slane %v1095_v29, %v7099_v1 }
 0x229   : > { %v7027_v10 = vpop.f32.mrf.mxu1 }
 0x22a   : > { %9068 = vst [vmem:[#allocation7_spill] sm:$0xff] %v7027_v10 }
 0x22b   : > { %v6415_v11 = vpop.f32.mrf.mxu1 }
 0x22c   : > { %v1144_v11 = vrot.slane %v1130_v2, %v7099_v1 }
 0x22d   : > { %v7029_v13 = vpop.f32.mrf.mxu1 }
 0x22e   : > { %9069 = vst [vmem:[#allocation8_spill] sm:$0xff] %v7029_v13 }
 0x22f   : > { %v6418_v12 = vpop.f32.mrf.mxu1 }
 0x230   : > { %v1137_v12 = vrot.slane %v6971_v31, %v7099_v1 }
 0x247   : > { %v7031_v14 = vpop.f32.mrf.mxu1 }
 0x248   : > { %9070 = vst [vmem:[#allocation9_spill] sm:$0xff] %v7031_v14 }
 0x249   : > { %v6440_v15 = vpop.f32.mrf.mxu1 }
 0x24a   : > { %v1096_v15 = vcombine.high %v1088_v6, %v1088_v6 }
 0x24b   : > { %v7033_v16 = vpop.f32.mrf.mxu1 }
 0x24c   : > { %9071 = vst [vmem:[#allocation10_spill] sm:$0xff] %v7033_v16  ;;  %v1118_v26 = vrot.slane %v1096_v15, %v7099_v1 }
 0x24d   : > { %v6443_v17 = vpop.f32.mrf.mxu1 }
 0x24e   : > { %v1097_v17 = vcombine.high %v1095_v29, %v1095_v29 }
 0x24f   : > { %v7035_v18 = vpop.f32.mrf.mxu1 }
 0x250   : > { %9072 = vst [vmem:[#allocation11_spill] sm:$0xff] %v7035_v18 }
 0x251   : > { %v6446_v7 = vpop.f32.mrf.mxu1 }
 0x252   : > { %v1186_v7 = vcombine.high %v1185_v9, %v1185_v9 }
 0x254   : > { %v1200_v31 = vrot.slane %v1186_v7, %v7099_v1 }
 0x269   : > { %v7037_v20 = vpop.f32.mrf.mxu1 }
 0x26a   : > { %9073 = vst [vmem:[#allocation12_spill] sm:$0xff] %v7037_v20 }
 0x26b   : > { %v6468_v21 = vpop.f32.mrf.mxu1 }
 0x26c   : > { %v1193_v21 = vrot.slane %v1185_v9, %v7099_v1 }
 0x26d   : > { %v7039_v23 = vpop.f32.mrf.mxu1 }
 0x26e   : > { %9074 = vst [vmem:[#allocation13_spill] sm:$0xff] %v7039_v23 }
 0x26f   : > { %v6471_v25 = vpop.f32.mrf.mxu1 }
 0x270   : > { %v1146_v25 = vcombine.high %v1144_v11, %v1144_v11 }
 0x271   : > { %v7041_v28 = vpop.f32.mrf.mxu1 }
 0x272   : > { %9075 = vst [vmem:[#allocation14_spill] sm:$0xff] %v7041_v28 }
 0x273   : > { %v6474_v30 = vpop.f32.mrf.mxu1 }
 0x274   : > { %v1104_v30 = vrot.slane %v1088_v6, %v7099_v1 }
 0x283   : > { %v895_v32 = vpop.f32.mrf.mxu0 }
 0x284   : > { %v896_v33 = vadd.f32 %v895_v32, %v7043_v3  ;;  %v1145_v32 = vcombine.high %v1137_v12, %v1137_v12 }
 0x285   : > { %v6339_v34 = vpop.f32.mrf.mxu0 }
 0x286   : > { %v899_v35 = vmax.f32 %v896_v33, 0.0  ;;  %v7115_v33 = vsub.s32 0, %v6802_v43  ;;  %v1125_v34 = vrot.slane %v1097_v17, %v7099_v1  ;;  %v1128_v43 = vcombine.high %v1118_v26, %v1118_v26 }
 0x288   : > { %6341 = vmatpush3.msra.mxu0 %v899_v35  ;;  %9086 = vst [vmem:[#allocation25_spill] sm:$0xff] %v7115_v33  ;;  %v1201_v35 = vcombine.high %v1193_v21, %v1193_v21  ;;  %v7131_v49 = vrot.slane %v1118_v26, %v7115_v33  ;;  %v1273_v62 = vrot.slane %v1200_v31, %v7115_v33 }
 0x289   : > { %6343 = vmatmul.mubr.msk.f32.vlgmr.msra.gmra.mxu0 %vm907_vm8, %v7049_v36  ;;  %v1221_v15 = vrot.slane %v1111_v24, %v7115_v33  ;;  %v1225_v17 = vrot.slane %v1125_v34, %v7115_v33 }
 0x28a   : > { %6347 = vmatprep.mubr.msk.f32.mxu0 %vm907_vm8, %v7068_v53  ;;  %v1277_v63 = vrot.slane %v1201_v35, %v7115_v33 }
 0x28b   : > { %v7053_v37 = vpop.f32.mrf.mxu1 }
 0x28c   : > { %9077 = vst [vmem:[#allocation16_spill] sm:$0xff] %v7053_v37 }
 0x28d   : > { %v6496_v38 = vpop.f32.mrf.mxu1 }
 0x28e   : > { %v1174_v38 = vrot.slane %v1146_v25, %v7099_v1 }
 0x28f   : > { %v7055_v39 = vpop.f32.mrf.mxu1 }
 0x290   : > { %9078 = vst [vmem:[#allocation17_spill] sm:$0xff] %v7055_v39  ;;  %v1178_v0 = vcombine.high %v1174_v38, %v1174_v38 }
 0x291   : > { %v6499_v40 = vpop.f32.mrf.mxu1 }
 0x292   : > { %v7121_v40 = vpop.permute.xlu1 %993 }
 0x293   : > { %v7057_v41 = vpop.f32.mrf.mxu1  ;;  %9087 = vst [vmem:[#allocation26_spill] sm:$0xff] %v7121_v40 }
 0x294   : > { %9079 = vst [vmem:[#allocation18_spill] sm:$0xff] %v7057_v41 }
 0x295   : > { %v6502_v42 = vpop.f32.mrf.mxu1 }
 0x296   : > { %v1126_v42 = vcombine.high %v1104_v30, %v1104_v30 }
 0x298   : > { %v1213_v2 = vrot.slane %v1126_v42, %v7115_v33  ;;  %v1265_v42 = vrot.slane %v1178_v0, %v7115_v33 }
 0x2ad   : > { %v7059_v44 = vpop.f32.mrf.mxu1 }
 0x2ae   : > { %9080 = vst [vmem:[#allocation19_spill] sm:$0xff] %v7059_v44 }
 0x2af   : > { %v6524_v45 = vpop.f32.mrf.mxu1 }
 0x2b0   : > { %v1153_v45 = vrot.slane %v1137_v12, %v7099_v1  ;;  %v1217_v12 = vrot.slane %v1128_v43, %v7115_v33 }
 0x2b1   : > { %v7061_v47 = vpop.f32.mrf.mxu1 }
 0x2b2   : > { %9081 = vst [vmem:[#allocation20_spill] sm:$0xff] %v7061_v47  ;;  %v1175_v6 = vcombine.high %v1153_v45, %v1153_v45 }
 0x2b3   : > { %v6527_v48 = vpop.f32.mrf.mxu1 }
 0x2b4   : > { %v1160_v48 = vrot.slane %v1144_v11, %v7099_v1  ;;  %v1245_v43 = vrot.slane %v1175_v6, %v7115_v33 }
 0x2b5   : > { %v7063_v50 = vpop.f32.mrf.mxu1 }
 0x2b6   : > { %9082 = vst [vmem:[#allocation21_spill] sm:$0xff] %v7063_v50  ;;  %v1176_v29 = vcombine.high %v1160_v48, %v1160_v48  ;;  %v1253_v35 = vrot.slane %v1160_v48, %v7115_v33 }
 0x2b7   : > { %v6530_v52 = vpop.f32.mrf.mxu1 }
 0x2b8   : > { %v1167_v52 = vrot.slane %v1145_v32, %v7099_v1  ;;  %v1237_v32 = vrot.slane %v1153_v45, %v7115_v33 }
 0x2ba   : > { %v1177_v9 = vcombine.high %v1167_v52, %v1167_v52  ;;  %v1241_v26 = vrot.slane %v1167_v52, %v7115_v33 }
 0x349   : > { %v977_v56 = vpop.f32.mrf.mxu0 }
 0x34a   : > { %v978_v57 = vadd.f32 %v977_v56, %v7072_v54  ;;  %v1127_v56 = vcombine.high %v1111_v24, %v1111_v24 }
 0x34b   : > { %v6344_v58 = vpop.f32.mrf.mxu0 }
 0x34c   : > { %v981_v59 = vmax.f32 %v978_v57, 0.0  ;;  %v1129_v57 = vcombine.high %v1125_v34, %v1125_v34  ;;  %v7127_v58 = vrot.slane %v1104_v30, %v7115_v33  ;;  %v1229_v25 = vrot.slane %v1127_v56, %v7115_v33 }
 0x34d   : > { %v1257_v56 = vrot.slane %v1174_v38, %v7115_v33 }
 0x34e   : > { %6345 = vmatprep.subr.mxu0 %v981_v59  ;;  %v1233_v30 = vrot.slane %v1129_v57, %v7115_v33  ;;  %v1261_v57 = vrot.slane %v1176_v29, %v7115_v33 }
 0x34f   : > { %6346 = vmatpush3.msra.mxu0 %v981_v59  ;;  %v1269_v59 = vrot.slane %v1193_v21, %v7115_v33  ;;  %v7140_v21 = vpop.permute.xlu1 %988 }
 0x350   : > { %6348 = vmatmul.mubr.msk.f32.vlgmr.msra.gmra.mxu0 %vm907_vm8, %v7078_v60  ;;  %6363 = vmatprep.subr.mxu0 %v8994_v19  ;;  %9088 = vst [vmem:[#allocation27_spill] sm:$0xff] %v7140_v21 }
 0x351   : > { %6364 = vmatpush3.msk.msra.mxu0 %vm607_vm1, %v7082_v61  ;;  %6365 = vmatprep.mubr.msk.f32.mxu0 %vm6626_vm2, %v8994_v19 }
 0x352   : > { %6368 = vmatprep.subr.mxu0 %v8994_v19 }
 0x354   : > { %6366 = vmatmul.mubr.msk.f32.vlgmr.msra.gmra.mxu0 %vm593_vm0, %v6967_v27 }
 0x355   : > { %6370 = vmatprep.mubr.msk.f32.mxu0 %vm6626_vm2, %v8994_v19 }
 0x410   : > { %v6349_v11 = vpop.f32.mrf.mxu0 }
 0x411   : > { %v1074_v7 = vadd.f32 %v6349_v11, %v7121_v40  ;;  %v1249_v11 = vrot.slane %v1177_v9, %v7115_v33 }
 0x412   : > { %v1068_v31 = vpop.f32.mrf.mxu0 }
 0x413   : > { %v1078_v24 = vmax.f32 %v1074_v7, 0.0  ;;  %v1069_v34 = vadd.f32 %v1068_v31, %v7140_v21 }
 0x414   : > { %v1555_v19 = vpop.f32.mrf.mxu0 }
 0x415   : > { %v1077_v45 = vmax.f32 %v1069_v34, 0.0  ;;  %v1556_v52 = vadd.f32 %v1555_v19, %v7043_v3  ;;  %v7154_v50 = vmul.f32 %v1265_v42, %v1078_v24  ;;  %v7156_v48 = vmul.f32 %v1277_v63, %v1078_v24 }
 0x416   : > { %v6367_v0 = vpop.f32.mrf.mxu0  ;;  %v7158_v7 = vmul.f32 %v1233_v30, %v1078_v24  ;;  %v7160_v31 = vmul.f32 %v1261_v57, %v1078_v24  ;;  %v7162_v6 = vmul.f32 %v1273_v62, %v1078_v24  ;;  %v7164_v9 = vmul.f32 %v1229_v25, %v1078_v24 }
 0x417   : > { %v1559_v38 = vmax.f32 %v1556_v52, 0.0  ;;  %v7166_v47 = vmul.f32 %v1265_v42, %v1077_v45  ;;  %v7168_v29 = vmul.f32 %v1277_v63, %v1077_v45  ;;  %v7170_v34 = vmul.f32 %v1233_v30, %v1077_v45 }
 0x418   : > { %v7172_v19 = vmul.f32 %v1261_v57, %v1077_v45  ;;  %v7174_v41 = vmul.f32 %v1273_v62, %v1077_v45  ;;  %v7176_v0 = vmul.f32 %v1229_v25, %v1077_v45  ;;  %v7178_v39 = vmul.f32 %v1257_v56, %v1078_v24 }
 0x419   : > { %6369 = vmatpush3.msra.mxu0 %v1559_v38  ;;  %v7180_v44 = vmul.f32 %v1269_v59, %v1078_v24  ;;  %v7182_v28 = vmul.f32 %v1225_v17, %v1078_v24  ;;  %v7184_v52 = vmul.f32 %v1257_v56, %v1077_v45  ;;  %v7186_v42 = vmul.f32 %v1269_v59, %v1077_v45 }
 0x41a   : > { %6371 = vmatmul.mubr.msk.f32.vlgmr.msra.gmra.mxu0 %vm907_vm8, %v7049_v36  ;;  %v7190_v63 = vmul.f32 %v1225_v17, %v1077_v45  ;;  %v7192_v62 = vmul.f32 %v1253_v35, %v1078_v24  ;;  %v7194_v25 = vmul.f32 %v1221_v15, %v1078_v24  ;;  %v7196_v30 = vmul.f32 %v1253_v35, %v1077_v45 }
 0x41b   : > { %6375 = vmatprep.mubr.msk.f32.mxu0 %vm907_vm8, %v7068_v53  ;;  %v7200_v57 = vmul.f32 %v1221_v15, %v1077_v45  ;;  %v7202_v56 = vmul.f32 %v1249_v11, %v1078_v24  ;;  %v7204_v59 = vmul.f32 %v1217_v12, %v1078_v24  ;;  %v7206_v38 = vmul.f32 %v1249_v11, %v1077_v45 }
 0x41c   : > { %v7208_v23 = vmul.f32 %v1217_v12, %v1077_v45  ;;  %v7210_v17 = vmul.f32 %v1245_v43, %v1078_v24  ;;  %v7212_v37 = vmul.f32 %v1213_v2, %v1078_v24  ;;  %v7214_v18 = vmul.f32 %v1245_v43, %v1077_v45 }
 0x41d   : > { %v7216_v35 = vmul.f32 %v1213_v2, %v1077_v45  ;;  %v7218_v16 = vmul.f32 %v1241_v26, %v1078_v24  ;;  %v7221_v15 = vmul.f32 %v7131_v49, %v1078_v24  ;;  %v7223_v20 = vmul.f32 %v1241_v26, %v1077_v45 }
 0x41e   : > { %9089 = vst [vmem:[#allocation28_spill] sm:$0xff] %v7214_v18  ;;  %v7226_v11 = vmul.f32 %v7131_v49, %v1077_v45  ;;  %v7228_v12 = vmul.f32 %v1237_v32, %v1078_v24  ;;  %v7231_v13 = vmul.f32 %v7127_v58, %v1078_v24  ;;  %v7233_v10 = vmul.f32 %v1237_v32, %v1077_v45 }
 0x41f   : > { %9090 = vst [vmem:[#allocation29_spill] sm:$0xff] %v7216_v35  ;;  %9091 = vst [vmem:[#allocation30_spill] sm:$0xff] %v7218_v16  ;;  %v7236_v2 = vmul.f32 %v7127_v58, %v1077_v45  ;;  %v7241_v49 = vsub.f32 %v7013_v46, %v6957_v22  ;;  %v9100_v26 = vmov 0.0   ;;  %v1710_v46 = vcombine.high %v7082_v61, %v7082_v61 }
 0x420   : > { %9092 = vst [vmem:[#allocation31_spill] sm:$0xff] %v7221_v15  ;;  %9093 = vst [vmem:[#allocation32_spill] sm:$0xff] %v7223_v20  ;;  %v1766_v24 = vrot.slane %v6998_v51, %v7099_v1 }
 0x421   : > { %9094 = vst [vmem:[#allocation33_spill] sm:$0xff] %v7226_v11  ;;  %9095 = vst [vmem:[#allocation34_spill] sm:$0xff] %v7228_v12 }
 0x422   : > { %9096 = vst [vmem:[#allocation35_spill] sm:$0xff] %v7231_v13  ;;  %9097 = vst [vmem:[#allocation36_spill] sm:$0xff] %v7233_v10 }
 0x423   : > { %9098 = vst [vmem:[#allocation37_spill] sm:$0xff] %v7236_v2  ;;  %9099 = vst [vmem:[#allocation38_spill] sm:$0xff] %v7241_v49 }
 0x4da   : > { %v1626_v43 = vpop.f32.mrf.mxu0 }
 0x4db   : > { %v1627_v14 = vadd.f32 %v1626_v43, %v7072_v54 }
 0x4dc   : > { %v6372_v4 = vpop.f32.mrf.mxu0 }
 0x4dd   : > { %v1630_v5 = vmax.f32 %v1627_v14, 0.0  ;;  %v1759_v4 = vcombine.high %v6998_v51, %v6998_v51  ;;  %v1724_v14 = vrot.slane %v1710_v46, %v7099_v1 }
 0x4df   : > { %6373 = vmatprep.subr.mxu0 %v1630_v5  ;;  %v1773_v32 = vrot.slane %v1759_v4, %v7099_v1  ;;  %v1726_v45 = vcombine.high %v1724_v14, %v1724_v14  ;;  %v1782_v4 = vrot.slane %v1766_v24, %v7099_v1 }
 0x4e0   : > { %6374 = vmatpush3.msra.mxu0 %v1630_v5  ;;  %v1717_v5 = vrot.slane %v7082_v61, %v7099_v1  ;;  %v1814_v61 = vrot.slane %v7002_v55, %v7099_v1 }
 0x4e1   : > { %6376 = vmatmul.mubr.msk.f32.vlgmr.msra.gmra.mxu0 %vm907_vm8, %v7078_v60  ;;  %6391 = vmatprep.subr.mxu0 %v9100_v26  ;;  %v1740_v60 = vrot.slane %v1724_v14, %v7099_v1  ;;  %v1754_v46 = vrot.slane %v1726_v45, %v7099_v1  ;;  %v1804_v45 = vcombine.high %v1782_v4, %v1782_v4 }
 0x4e2   : > { %6392 = vmatpush3.msk.msra.mxu0 %vm607_vm1, %v7241_v49  ;;  %6393 = vmatprep.mubr.msk.f32.mxu0 %vm6626_vm2, %v9100_v26  ;;  %v1725_v58 = vcombine.high %v1717_v5, %v1717_v5  ;;  %v1733_v43 = vrot.slane %v1717_v5, %v7099_v1  ;;  %v1822_v54 = vrot.slane %v1814_v61, %v7099_v1 }
 0x4e3   : > { %6396 = vmatprep.subr.mxu0 %v9100_v26  ;;  %v1789_v5 = vrot.slane %v1773_v32, %v7099_v1  ;;  %v1815_v2 = vcombine.high %v1814_v61, %v1814_v61  ;;  %v1756_v10 = vcombine.high %v1740_v60, %v1740_v60  ;;  %v1758_v55 = vcombine.high %v1754_v46, %v1754_v46 }
 0x4e4   : > { %v1747_v49 = vrot.slane %v1725_v58, %v7099_v1  ;;  %v1755_v8 = vcombine.high %v1733_v43, %v1733_v43  ;;  %v7277_v13 = vrot.slane %v1733_v43, %v7115_v33  ;;  %v1830_v61 = vcombine.high %v1822_v54, %v1822_v54 }
 0x4e5   : > { %6394 = vmatmul.mubr.msk.f32.vlgmr.msra.gmra.mxu0 %vm593_vm0, %v6967_v27  ;;  %v1775_v27 = vcombine.high %v1773_v32, %v1773_v32  ;;  %v7289_v32 = vrot.slane %v1740_v60, %v7115_v33  ;;  %v1854_v12 = vrot.slane %v1754_v46, %v7115_v33  ;;  %v1805_v11 = vcombine.high %v1789_v5, %v1789_v5 }
 0x4e6   : > { %6398 = vmatprep.mubr.msk.f32.mxu0 %vm6626_vm2, %v9100_v26  ;;  %v1774_v26 = vcombine.high %v1766_v24, %v1766_v24  ;;  %v1757_v22 = vcombine.high %v1747_v49, %v1747_v49  ;;  %9101 = vst [vmem:[#allocation39_spill] sm:$0xff] %v7277_v13  ;;  %v7280_v14 = vrot.slane %v1747_v49, %v7115_v33 }
 0x4e7   : > { %v1803_v51 = vrot.slane %v1775_v27, %v7099_v1  ;;  %v7283_v24 = vrot.slane %v1755_v8, %v7115_v33  ;;  %v1829_v13 = vrot.slane %v1815_v2, %v7099_v1  ;;  %v1858_v20 = vrot.slane %v1756_v10, %v7115_v33 }
 0x4e8   : > { %v1796_v58 = vrot.slane %v1774_v26, %v7099_v1  ;;  %v7286_v27 = vrot.slane %v1757_v22, %v7115_v33  ;;  %v1862_v8 = vrot.slane %v1758_v55, %v7115_v33  ;;  %v7296_v15 = vrot.slane %v1782_v4, %v7115_v33 }
 0x4e9   : > { %v1807_v26 = vcombine.high %v1803_v51, %v1803_v51  ;;  %v7303_v16 = vrot.slane %v1804_v45, %v7115_v33  ;;  %v1882_v46 = vrot.slane %v1789_v5, %v7115_v33  ;;  %v1886_v2 = vrot.slane %v1803_v51, %v7115_v33 }
 0x4ea   : > { %v1806_v43 = vcombine.high %v1796_v58, %v1796_v58  ;;  %9102 = vst [vmem:[#allocation40_spill] sm:$0xff] %v7296_v15  ;;  %v7300_v60 = vrot.slane %v1796_v58, %v7115_v33  ;;  %v1906_v55 = vrot.slane %v1830_v61, %v7115_v33  ;;  %v1890_v58 = vrot.slane %v1805_v11, %v7115_v33 }
 0x4eb   : > { %v1894_v10 = vrot.slane %v1807_v26, %v7115_v33  ;;  %v1898_v45 = vrot.slane %v1822_v54, %v7115_v33 }
 0x5a1   : > { %v6377_v49 = vpop.f32.mrf.mxu0 }
 0x5a2   : > { %v1703_v22 = vadd.f32 %v6377_v49, %v7121_v40  ;;  %v1878_v49 = vrot.slane %v1806_v43, %v7115_v33  ;;  %v1902_v40 = vrot.slane %v1829_v13, %v7115_v33 }
 0x5a3   : > { %v1697_v1 = vpop.f32.mrf.mxu0 }
 0x5a4   : > { %v7309_v35 = vmax.f32 %v1703_v22, 0.0  ;;  %v1698_v4 = vadd.f32 %v1697_v1, %v7140_v21 }
 0x5a5   : > { %v2184_v5 = vpop.f32.mrf.mxu0 }
 0x5a6   : > { %v7316_v15 = vmax.f32 %v1698_v4, 0.0  ;;  %v2185_v51 = vadd.f32 %v2184_v5, %v7043_v3  ;;  %v1957_v26 = vmul.f32 %v1894_v10, %v7309_v35  ;;  %v1963_v61 = vmul.f32 %v1906_v55, %v7309_v35 }
 0x5a7   : > { %v6395_v22 = vpop.f32.mrf.mxu0  ;;  %v1941_v1 = vmul.f32 %v1862_v8, %v7309_v35  ;;  %v1955_v43 = vmul.f32 %v1890_v58, %v7309_v35  ;;  %v1961_v11 = vmul.f32 %v1902_v40, %v7309_v35  ;;  %v1939_v54 = vmul.f32 %v1858_v20, %v7309_v35 }
 0x5a8   : > { %v2188_v21 = vmax.f32 %v2185_v51, 0.0  ;;  %v7326_v13 = vadd.f32 %v1957_v26, %v7154_v50  ;;  %v7329_v4 = vadd.f32 %v1963_v61, %v7156_v48  ;;  %v1956_v5 = vmul.f32 %v1894_v10, %v7316_v15 }
 0x5a9   : > { %v7333_v3 = vadd.f32 %v1941_v1, %v7158_v7  ;;  %v1962_v22 = vmul.f32 %v1906_v55, %v7316_v15  ;;  %v1940_v33 = vmul.f32 %v1862_v8, %v7316_v15  ;;  %v7338_v18 = vadd.f32 %v1955_v43, %v7160_v31 }
 0x5aa   : > { %6397 = vmatpush3.msra.mxu0 %v2188_v21  ;;  %v7341_v51 = vadd.f32 %v1956_v5, %v7166_v47  ;;  %v7344_v50 = vadd.f32 %v1961_v11, %v7162_v6  ;;  %v7347_v48 = vadd.f32 %v1939_v54, %v7164_v9  ;;  %v1954_v7 = vmul.f32 %v1890_v58, %v7316_v15  ;;  %v9103_v5 = vld [vmem:[#allocation28_spill] sm:$0xff] }
 0x5ab   : > { %6399 = vmatmul.mubr.msk.f32.vlgmr.msra.gmra.mxu0 %vm907_vm8, %v7049_v36  ;;  %v7353_v8 = vadd.f32 %v1962_v22, %v7168_v29  ;;  %v7356_v31 = vadd.f32 %v1940_v33, %v7170_v34  ;;  %v1960_v47 = vmul.f32 %v1902_v40, %v7316_v15  ;;  %v1938_v21 = vmul.f32 %v1858_v20, %v7316_v15  ;;  %v9105_v22 = vld [vmem:[#allocation29_spill] sm:$0xff] }
 0x5ac   : > { %6403 = vmatprep.mubr.msk.f32.mxu0 %vm907_vm8, %v7068_v53  ;;  %v7363_v6 = vadd.f32 %v1954_v7, %v7172_v19  ;;  %v1953_v9 = vmul.f32 %v1886_v2, %v7309_v35  ;;  %v1959_v10 = vmul.f32 %v1898_v45, %v7309_v35  ;;  %v1937_v29 = vmul.f32 %v1854_v12, %v7309_v35  ;;  %v9107_v7 = vld [vmem:[#allocation30_spill] sm:$0xff] }
 0x5ad   : > { %v7369_v55 = vadd.f32 %v1960_v47, %v7174_v41  ;;  %v7372_v33 = vadd.f32 %v1938_v21, %v7176_v0  ;;  %v1952_v20 = vmul.f32 %v1886_v2, %v7316_v15  ;;  %v1958_v40 = vmul.f32 %v1898_v45, %v7316_v15 }
 0x5ae   : > { %v7377_v34 = vadd.f32 %v1953_v9, %v7178_v39  ;;  %v7380_v19 = vadd.f32 %v1959_v10, %v7180_v44  ;;  %v7383_v58 = vadd.f32 %v1937_v29, %v7182_v28  ;;  %v1936_v26 = vmul.f32 %v1854_v12, %v7316_v15  ;;  %v9111_v9 = vld [vmem:[#allocation32_spill] sm:$0xff] }
 0x5af   : > { %v7387_v41 = vadd.f32 %v1952_v20, %v7184_v52  ;;  %v7390_v0 = vadd.f32 %v1958_v40, %v7186_v42  ;;  %v1951_v2 = vmul.f32 %v1882_v46, %v7309_v35  ;;  %v1935_v39 = vmul.f32 %v7289_v32, %v7309_v35  ;;  %v9114_v20 = vld [vmem:[#allocation39_spill] sm:$0xff] }
 0x5b0   : > { %v7396_v45 = vadd.f32 %v1936_v26, %v7190_v63  ;;  %v1950_v44 = vmul.f32 %v1882_v46, %v7316_v15  ;;  %v1934_v28 = vmul.f32 %v7289_v32, %v7316_v15  ;;  %v1949_v12 = vmul.f32 %v1878_v49, %v7309_v35  ;;  %v9115_v26 = vld [vmem:[#allocation33_spill] sm:$0xff] }
 0x5b1   : > { %v7403_v52 = vadd.f32 %v1951_v2, %v7192_v62  ;;  %v7406_v42 = vadd.f32 %v1935_v39, %v7194_v25  ;;  %v1933_v61 = vmul.f32 %v7286_v27, %v7309_v35  ;;  %v1948_v1 = vmul.f32 %v1878_v49, %v7316_v15 }
 0x5b2   : > { %v7412_v63 = vadd.f32 %v1950_v44, %v7196_v30  ;;  %v7415_v46 = vadd.f32 %v1934_v28, %v7200_v57  ;;  %v7418_v32 = vadd.f32 %v1949_v12, %v7202_v56  ;;  %v1932_v62 = vmul.f32 %v7286_v27, %v7316_v15  ;;  %v9117_v44 = vld [vmem:[#allocation34_spill] sm:$0xff]  ;;  %v9119_v12 = vld [vmem:[#allocation35_spill] sm:$0xff] }
 0x5b3   : > { %v7423_v25 = vadd.f32 %v1933_v61, %v7204_v59  ;;  %v7426_v43 = vadd.f32 %v1948_v1, %v7206_v38  ;;  %v1947_v49 = vmul.f32 %v7303_v16, %v7309_v35  ;;  %v1931_v30 = vmul.f32 %v7283_v24, %v7309_v35  ;;  %v9121_v1 = vld [vmem:[#allocation36_spill] sm:$0xff] }
 0x5b4   : > { %v7433_v57 = vadd.f32 %v1932_v62, %v7208_v23  ;;  %v1946_v56 = vmul.f32 %v7303_v16, %v7316_v15  ;;  %v1930_v27 = vmul.f32 %v7283_v24, %v7316_v15  ;;  %v1945_v59 = vmul.f32 %v7300_v60, %v7309_v35 }
 0x5b5   : > { %v7442_v38 = vadd.f32 %v1947_v49, %v7210_v17  ;;  %v7445_v11 = vadd.f32 %v1931_v30, %v7212_v37  ;;  %v1929_v54 = vmul.f32 %v7280_v14, %v7309_v35  ;;  %v1944_v23 = vmul.f32 %v7300_v60, %v7316_v15  ;;  %v9109_v37 = vld [vmem:[#allocation31_spill] sm:$0xff]  ;;  %v9113_v60 = vld [vmem:[#allocation40_spill] sm:$0xff]  ;;  %v9123_v49 = vld [vmem:[#allocation37_spill] sm:$0xff] }
 0x5b6   : > { %v7452_v16 = vadd.f32 %v1946_v56, %v9103_v5  ;;  %v7455_v24 = vadd.f32 %v1930_v27, %v9105_v22  ;;  %v7458_v47 = vadd.f32 %v1945_v59, %v9107_v7  ;;  %v1928_v17 = vmul.f32 %v7280_v14, %v7316_v15  ;;  %v9125_v56 = vld [vmem:[#allocation22_spill] sm:$0xff]  ;;  %v9129_v22 = vld [vmem:[#allocation23_spill] sm:$0xff] }
 0x5b7   : > { %v7463_v21 = vadd.f32 %v1929_v54, %v9109_v37  ;;  %v7466_v10 = vadd.f32 %v1944_v23, %v9111_v9  ;;  %v1943_v29 = vmul.f32 %v9113_v60, %v7309_v35  ;;  %v1927_v40 = vmul.f32 %v9114_v20, %v7309_v35  ;;  %v9126_v23 = vld [vmem:[#allocation2_spill] sm:$0xff] }
 0x5b8   : > { %9104 = vst [vmem:[#allocation28_spill] sm:$0xff] %v7452_v16  ;;  %9106 = vst [vmem:[#allocation29_spill] sm:$0xff] %v7455_v24  ;;  %v7473_v2 = vadd.f32 %v1928_v17, %v9115_v26  ;;  %v1942_v39 = vmul.f32 %v9113_v60, %v7316_v15  ;;  %v1926_v14 = vmul.f32 %v9114_v20, %v7316_v15  ;;  %v9127_v15 = vld [vmem:[#allocation6_spill] sm:$0xff]  ;;  %v9130_v7 = vmov 0.0   ;;  %v9131_v17 = vld [vmem:[#allocation3_spill] sm:$0xff] }
 0x5b9   : > { %9108 = vst [vmem:[#allocation30_spill] sm:$0xff] %v7458_v47  ;;  %9110 = vst [vmem:[#allocation31_spill] sm:$0xff] %v7463_v21  ;;  %v7480_v28 = vadd.f32 %v1943_v29, %v9117_v44  ;;  %v7483_v61 = vadd.f32 %v1927_v40, %v9119_v12  ;;  %v7494_v5 = vsub.f32 %v9127_v15, %v9126_v23  ;;  %v9132_v37 = vld [vmem:[#allocation38_spill] sm:$0xff]  ;;  %v9133_v60 = vld [vmem:[#allocation24_spill] sm:$0xff] }
 0x5ba   : > { %9112 = vst [vmem:[#allocation32_spill] sm:$0xff] %v7466_v10  ;;  %9116 = vst [vmem:[#allocation40_spill] sm:$0xff] %v7473_v2  ;;  %v7486_v62 = vadd.f32 %v1942_v39, %v9121_v1  ;;  %v7489_v35 = vadd.f32 %v1926_v14, %v9123_v49  ;;  %v2339_v9 = vcombine.high %v9132_v37, %v9132_v37  ;;  %v9134_v20 = vld [vmem:[#allocation4_spill] sm:$0xff]  ;;  %v9136_v23 = vld [vmem:[#allocation25_spill] sm:$0xff] }
 0x5bb   : > { %9118 = vst [vmem:[#allocation39_spill] sm:$0xff] %v7480_v28  ;;  %9120 = vst [vmem:[#allocation33_spill] sm:$0xff] %v7483_v61  ;;  %v2346_v29 = vrot.slane %v9132_v37, %v9133_v60  ;;  %v2388_v40 = vcombine.high %v9134_v20, %v9134_v20  ;;  %v2395_v44 = vrot.slane %v9134_v20, %v9133_v60 }
 0x5bc   : > { %9122 = vst [vmem:[#allocation34_spill] sm:$0xff] %v7486_v62  ;;  %9124 = vst [vmem:[#allocation35_spill] sm:$0xff] %v7489_v35  ;;  %v2353_v26 = vrot.slane %v2339_v9, %v9133_v60 }
 0x5bd   : > { %9128 = vst [vmem:[#allocation36_spill] sm:$0xff] %v7494_v5  ;;  %v2354_v39 = vcombine.high %v2346_v29, %v2346_v29  ;;  %v2402_v14 = vrot.slane %v2388_v40, %v9133_v60  ;;  %v2362_v1 = vrot.slane %v2346_v29, %v9133_v60  ;;  %v2411_v9 = vrot.slane %v2395_v44, %v9133_v60 }
 0x5be   : > { %v2355_v12 = vcombine.high %v2353_v26, %v2353_v26  ;;  %v2369_v15 = vrot.slane %v2353_v26, %v9133_v60 }
 0x5bf   : > { %v2376_v49 = vrot.slane %v2354_v39, %v9133_v60  ;;  %v2384_v37 = vcombine.high %v2362_v1, %v2362_v1  ;;  %v2418_v29 = vrot.slane %v2402_v14, %v9133_v60  ;;  %v7549_v2 = vrot.slane %v2411_v9, %v9136_v23 }
 0x5c1   : > { %v2386_v40 = vcombine.high %v2376_v49, %v2376_v49  ;;  %v7533_v26 = vrot.slane %v2376_v49, %v9136_v23  ;;  %v2434_v62 = vcombine.high %v2418_v29, %v2418_v29  ;;  %9138 = vst [vmem:[#allocation6_spill] sm:$0xff] %v7549_v2 }
 0x66b   : > { %v2255_v30 = vpop.f32.mrf.mxu0 }
 0x66c   : > { %v2256_v27 = vadd.f32 %v2255_v30, %v9125_v56  ;;  %v2404_v30 = vcombine.high %v2402_v14, %v2402_v14  ;;  %v7530_v56 = vrot.slane %v2362_v1, %v9136_v23  ;;  %v7542_v14 = vrot.slane %v2369_v15, %v9136_v23 }
 0x66d   : > { %v6400_v59 = vpop.f32.mrf.mxu0 }
 0x66e   : > { %v2259_v54 = vmax.f32 %v2256_v27, 0.0  ;;  %v9135_v27 = vld [vmem:[#allocation5_spill] sm:$0xff]  ;;  %v2432_v20 = vrot.slane %v2404_v30, %v9133_v60  ;;  %9137 = vst [vmem:[#allocation37_spill] sm:$0xff] %v7530_v56  ;;  %v7539_v30 = vrot.slane %v2386_v40, %v9136_v23  ;;  %v9139_v40 = vld [vmem:[#allocation26_spill] sm:$0xff] }
 0x66f   : > { %v2443_v59 = vrot.slane %v9135_v27, %v9133_v60 }
 0x670   : > { %6401 = vmatprep.subr.mxu0 %v2259_v54 }
 0x671   : > { %6402 = vmatpush3.msra.mxu0 %v2259_v54  ;;  %v2403_v54 = vcombine.high %v2395_v44, %v2395_v44  ;;  %v7536_v44 = vrot.slane %v2384_v37, %v9136_v23 }
 0x672   : > { %6404 = vmatmul.mubr.msk.f32.vlgmr.msra.gmra.mxu0 %vm907_vm8, %v9129_v22  ;;  %6419 = vmatprep.subr.mxu0 %v9130_v7  ;;  %v2385_v22 = vcombine.high %v2369_v15, %v2369_v15 }
 0x673   : > { %6420 = vmatpush3.msk.msra.mxu0 %vm607_vm1, %v7494_v5  ;;  %6421 = vmatprep.mubr.msk.f32.mxu0 %vm6626_vm2, %v9130_v7  ;;  %v2451_v5 = vrot.slane %v2443_v59, %v9133_v60  ;;  %v2425_v39 = vrot.slane %v2403_v54, %v9133_v60  ;;  %v2436_v54 = vcombine.high %v2432_v20, %v2432_v20 }
 0x674   : > { %6424 = vmatprep.subr.mxu0 %v9130_v7  ;;  %v2487_v28 = vrot.slane %v2385_v22, %v9136_v23 }
 0x675   : > { %v2435_v1 = vcombine.high %v2425_v39, %v2425_v39  ;;  %v7553_v15 = vrot.slane %v2425_v39, %v9136_v23  ;;  %v2523_v22 = vrot.slane %v2436_v54, %v9136_v23  ;;  %v2519_v39 = vrot.slane %v2434_v62, %v9136_v23 }
 0x676   : > { %6422 = vmatmul.mubr.msk.f32.vlgmr.msra.gmra.mxu0 %vm593_vm0, %v9131_v17  ;;  %v2383_v17 = vrot.slane %v2355_v12, %v9133_v60  ;;  %v2433_v12 = vcombine.high %v2411_v9, %v2411_v9  ;;  %v9140_v9 = vld [vmem:[#allocation27_spill] sm:$0xff] }
 0x677   : > { %6426 = vmatprep.mubr.msk.f32.mxu0 %vm6626_vm2, %v9130_v7  ;;  %v2444_v7 = vcombine.high %v2443_v59, %v2443_v59  ;;  %v2459_v59 = vcombine.high %v2451_v5, %v2451_v5 }
 0x678   : > { %v2387_v27 = vcombine.high %v2383_v17, %v2383_v17  ;;  %v2483_v35 = vrot.slane %v2383_v17, %v9136_v23  ;;  %v7556_v10 = vrot.slane %v2433_v12, %v9136_v23  ;;  %v2511_v17 = vrot.slane %v2418_v29, %v9136_v23 }
 0x679   : > { %v2458_v61 = vrot.slane %v2444_v7, %v9133_v60  ;;  %v2515_v7 = vrot.slane %v2432_v20, %v9136_v23  ;;  %v2527_v12 = vrot.slane %v2451_v5, %v9136_v23  ;;  %v9141_v20 = vld [vmem:[#allocation15_spill] sm:$0xff] }
 0x67a   : > { %v2491_v37 = vrot.slane %v2387_v27, %v9136_v23  ;;  %v2535_v27 = vrot.slane %v2459_v59, %v9136_v23 }
 0x732   : > { %v6405_v49 = vpop.f32.mrf.mxu0 }
 0x733   : > { %v2332_v56 = vadd.f32 %v6405_v49, %v9139_v40  ;;  %v2507_v49 = vrot.slane %v2435_v1, %v9136_v23  ;;  %v2531_v40 = vrot.slane %v2458_v61, %v9136_v23 }
 0x734   : > { %v2326_v60 = vpop.f32.mrf.mxu0 }
 0x735   : > { %v7562_v21 = vmax.f32 %v2332_v56, 0.0  ;;  %v2327_v2 = vadd.f32 %v2326_v60, %v9140_v9 }
 0x736   : > { %v2813_v29 = vpop.f32.mrf.mxu0 }
 0x737   : > { %v7569_v47 = vmax.f32 %v2327_v2, 0.0  ;;  %v2814_v24 = vadd.f32 %v2813_v29, %v9141_v20  ;;  %v2586_v54 = vmul.f32 %v2523_v22, %v7562_v21  ;;  %v2592_v56 = vmul.f32 %v2535_v27, %v7562_v21 }
 0x738   : > { %v6423_v59 = vpop.f32.mrf.mxu0  ;;  %v2570_v60 = vmul.f32 %v2491_v37, %v7562_v21  ;;  %v2584_v1 = vmul.f32 %v2519_v39, %v7562_v21  ;;  %v2590_v62 = vmul.f32 %v2531_v40, %v7562_v21  ;;  %v2568_v5 = vmul.f32 %v2487_v28, %v7562_v21 }
 0x739   : > { %v2817_v9 = vmax.f32 %v2814_v24, 0.0  ;;  %v7579_v61 = vadd.f32 %v2586_v54, %v7326_v13  ;;  %v7582_v2 = vadd.f32 %v2592_v56, %v7329_v4  ;;  %v2585_v29 = vmul.f32 %v2523_v22, %v7569_v47 }
 0x73a   : > { %v7586_v20 = vadd.f32 %v2570_v60, %v7333_v3  ;;  %v2591_v59 = vmul.f32 %v2535_v27, %v7569_v47  ;;  %v2569_v23 = vmul.f32 %v2491_v37, %v7569_v47  ;;  %v7591_v16 = vadd.f32 %v2584_v1, %v7338_v18 }
 0x73b   : > { %6425 = vmatpush3.msra.mxu0 %v2817_v9  ;;  %v7594_v24 = vadd.f32 %v2585_v29, %v7341_v51  ;;  %v7597_v13 = vadd.f32 %v2590_v62, %v7344_v50  ;;  %v7600_v4 = vadd.f32 %v2568_v5, %v7347_v48  ;;  %v2583_v3 = vmul.f32 %v2519_v39, %v7569_v47  ;;  %v9142_v62 = vld [vmem:[#allocation28_spill] sm:$0xff]  ;;  %v9143_v5 = vld [vmem:[#allocation29_spill] sm:$0xff]  ;;  %v9144_v29 = vld [vmem:[#allocation30_spill] sm:$0xff] }
 0x73c   : > { %6427 = vmatmul.mubr.msk.f32.vlgmr.msra.gmra.mxu0 %vm907_vm8, %v7049_v36  ;;  %v7606_v37 = vadd.f32 %v2591_v59, %v7353_v8  ;;  %v7609_v18 = vadd.f32 %v2569_v23, %v7356_v31  ;;  %v2589_v51 = vmul.f32 %v2531_v40, %v7569_v47  ;;  %v2567_v22 = vmul.f32 %v2487_v28, %v7569_v47 }
 0x73d   : > { %6431 = vmatprep.mubr.msk.f32.mxu0 %vm907_vm8, %v7068_v53  ;;  %v7616_v50 = vadd.f32 %v2583_v3, %v7363_v6  ;;  %v2582_v48 = vmul.f32 %v2515_v7, %v7562_v21  ;;  %v2588_v36 = vmul.f32 %v2527_v12, %v7562_v21  ;;  %v2566_v8 = vmul.f32 %v2483_v35, %v7562_v21 }
 0x73e   : > { %v7622_v27 = vadd.f32 %v2589_v51, %v7369_v55  ;;  %v7625_v31 = vadd.f32 %v2567_v22, %v7372_v33  ;;  %v2581_v28 = vmul.f32 %v2515_v7, %v7569_v47  ;;  %v2587_v23 = vmul.f32 %v2527_v12, %v7569_v47  ;;  %v9148_v51 = vld [vmem:[#allocation32_spill] sm:$0xff] }
 0x73f   : > { %v7630_v53 = vadd.f32 %v2582_v48, %v7377_v34  ;;  %v7633_v6 = vadd.f32 %v2588_v36, %v7380_v19  ;;  %v7636_v40 = vadd.f32 %v2566_v8, %v7383_v58  ;;  %v2565_v9 = vmul.f32 %v2483_v35, %v7569_v47  ;;  %v9151_v36 = vld [vmem:[#allocation37_spill] sm:$0xff] }
 0x740   : > { %v7640_v55 = vadd.f32 %v2581_v28, %v7387_v41  ;;  %v7643_v33 = vadd.f32 %v2587_v23, %v7390_v0  ;;  %v2580_v7 = vmul.f32 %v2511_v17, %v7562_v21  ;;  %v2564_v34 = vmul.f32 %v7542_v14, %v7562_v21  ;;  %v9152_v28 = vld [vmem:[#allocation40_spill] sm:$0xff] }
 0x741   : > { %v7649_v39 = vadd.f32 %v2565_v9, %v7396_v45  ;;  %v2579_v19 = vmul.f32 %v2511_v17, %v7569_v47  ;;  %v2563_v58 = vmul.f32 %v7542_v14, %v7569_v47  ;;  %v2578_v35 = vmul.f32 %v2507_v49, %v7562_v21 }
 0x742   : > { %v7656_v41 = vadd.f32 %v2580_v7, %v7403_v52  ;;  %v7659_v0 = vadd.f32 %v2564_v34, %v7406_v42  ;;  %v2562_v12 = vmul.f32 %v7539_v30, %v7562_v21  ;;  %v2577_v54 = vmul.f32 %v2507_v49, %v7569_v47  ;;  %v9154_v7 = vld [vmem:[#allocation39_spill] sm:$0xff] }
 0x743   : > { %v7665_v45 = vadd.f32 %v2579_v19, %v7412_v63  ;;  %v7668_v17 = vadd.f32 %v2563_v58, %v7415_v46  ;;  %v7671_v14 = vadd.f32 %v2578_v35, %v7418_v32  ;;  %v2561_v52 = vmul.f32 %v7539_v30, %v7569_v47  ;;  %v9156_v19 = vld [vmem:[#allocation33_spill] sm:$0xff]  ;;  %v9158_v35 = vld [vmem:[#allocation34_spill] sm:$0xff] }
 0x744   : > { %v7676_v42 = vadd.f32 %v2562_v12, %v7423_v25  ;;  %v7679_v56 = vadd.f32 %v2577_v54, %v7426_v43  ;;  %v2576_v49 = vmul.f32 %v7556_v10, %v7562_v21  ;;  %v2560_v63 = vmul.f32 %v7536_v44, %v7562_v21  ;;  %v9160_v54 = vld [vmem:[#allocation35_spill] sm:$0xff] }
 0x745   : > { %v7686_v46 = vadd.f32 %v2561_v52, %v7433_v57  ;;  %v2575_v32 = vmul.f32 %v7556_v10, %v7569_v47  ;;  %v2559_v30 = vmul.f32 %v7536_v44, %v7569_v47  ;;  %v2574_v25 = vmul.f32 %v7553_v15, %v7562_v21 }
 0x746   : > { %v7695_v43 = vadd.f32 %v2576_v49, %v7442_v38  ;;  %v7698_v60 = vadd.f32 %v2560_v63, %v7445_v11  ;;  %v2558_v1 = vmul.f32 %v7533_v26, %v7562_v21  ;;  %v2573_v57 = vmul.f32 %v7553_v15, %v7569_v47  ;;  %v9146_v11 = vld [vmem:[#allocation31_spill] sm:$0xff]  ;;  %v9150_v15 = vld [vmem:[#allocation6_spill] sm:$0xff] }
 0x747   : > { %v7705_v10 = vadd.f32 %v2575_v32, %v9142_v62  ;;  %v7708_v44 = vadd.f32 %v2559_v30, %v9143_v5  ;;  %v7711_v59 = vadd.f32 %v2574_v25, %v9144_v29  ;;  %v2557_v38 = vmul.f32 %v7533_v26, %v7569_v47  ;;  %v9162_v49 = vld [vmem:[#allocation22_spill] sm:$0xff]  ;;  %v9169_v29 = vld [vmem:[#allocation36_spill] sm:$0xff] }
 0x748   : > { %v7716_v3 = vadd.f32 %v2558_v1, %v9146_v11  ;;  %v7719_v22 = vadd.f32 %v2573_v57, %v9148_v51  ;;  %v2572_v48 = vmul.f32 %v9150_v15, %v7562_v21  ;;  %v2556_v8 = vmul.f32 %v9151_v36, %v7562_v21  ;;  %v9163_v25 = vld [vmem:[#allocation2_spill] sm:$0xff]  ;;  %v9166_v57 = vld [vmem:[#allocation23_spill] sm:$0xff]  ;;  %v9170_v11 = vld [vmem:[#allocation24_spill] sm:$0xff] }
 0x749   : > { %9145 = vst [vmem:[#allocation3_spill] sm:$0xff] %v7711_v59  ;;  %v7726_v23 = vadd.f32 %v2557_v38, %v9152_v28  ;;  %v2571_v9 = vmul.f32 %v9150_v15, %v7569_v47  ;;  %v2555_v26 = vmul.f32 %v9151_v36, %v7569_v47  ;;  %v9164_v47 = vld [vmem:[#allocation9_spill] sm:$0xff]  ;;  %v9167_v62 = vmov 0.0   ;;  %v7760_v5 = vld [vmem:[%s8985_s6] sm:$0xff]  ;;  %v9171_v15 = vld [vmem:[#allocation7_spill] sm:$0xff] }
 0x74a   : > { %9147 = vst [vmem:[#allocation38_spill] sm:$0xff] %v7716_v3  ;;  %9149 = vst [vmem:[#allocation4_spill] sm:$0xff] %v7719_v22  ;;  %v7733_v34 = vadd.f32 %v2572_v48, %v9154_v7  ;;  %v7736_v58 = vadd.f32 %v2556_v8, %v9156_v19  ;;  %v7747_v1 = vsub.f32 %v9164_v47, %v9163_v25 }
 0x74b   : > { %9153 = vst [vmem:[#allocation5_spill] sm:$0xff] %v7726_v23  ;;  %v7739_v12 = vadd.f32 %v2571_v9, %v9158_v35  ;;  %v7742_v21 = vadd.f32 %v2555_v26, %v9160_v54  ;;  %9168 = vst [vmem:[#allocation6_spill] sm:$0xff] %v7760_v5  ;;  %v2968_v38 = vcombine.high %v9169_v29, %v9169_v29  ;;  %v9172_v54 = vld [vmem:[#allocation8_spill] sm:$0xff] }
 0x74c   : > { %9155 = vst [vmem:[#allocation28_spill] sm:$0xff] %v7733_v34  ;;  %9157 = vst [vmem:[#allocation29_spill] sm:$0xff] %v7736_v58  ;;  %v2975_v51 = vrot.slane %v9169_v29, %v9170_v11  ;;  %v3017_v48 = vcombine.high %v9171_v15, %v9171_v15  ;;  %v3024_v9 = vrot.slane %v9171_v15, %v9170_v11  ;;  %v9176_v58 = vld [vmem:[#allocation26_spill] sm:$0xff] }
 0x74d   : > { %9159 = vst [vmem:[#allocation30_spill] sm:$0xff] %v7739_v12  ;;  %9161 = vst [vmem:[#allocation31_spill] sm:$0xff] %v7742_v21  ;;  %v2982_v36 = vrot.slane %v2968_v38, %v9170_v11 }
 0x74e   : > { %9165 = vst [vmem:[#allocation32_spill] sm:$0xff] %v7747_v1  ;;  %v2983_v8 = vcombine.high %v2975_v51, %v2975_v51  ;;  %v3031_v28 = vrot.slane %v3017_v48, %v9170_v11  ;;  %v2991_v7 = vrot.slane %v2975_v51, %v9170_v11 }
 0x74f   : > { %v2984_v26 = vcombine.high %v2982_v36, %v2982_v36 }
 0x750   : > { %v3005_v19 = vrot.slane %v2983_v8, %v9170_v11  ;;  %v3033_v35 = vcombine.high %v3031_v28, %v3031_v28  ;;  %v3013_v47 = vcombine.high %v2991_v7, %v2991_v7  ;;  %v3047_v51 = vrot.slane %v3031_v28, %v9170_v11 }
 0x752   : > { %v3015_v29 = vcombine.high %v3005_v19, %v3005_v19  ;;  %v3061_v38 = vrot.slane %v3033_v35, %v9170_v11 }
 0x7fc   : > { %v2884_v52 = vpop.f32.mrf.mxu0 }
 0x7fd   : > { %v2885_v63 = vadd.f32 %v2884_v52, %v9162_v49  ;;  %v3072_v52 = vrot.slane %v9172_v54, %v9170_v11 }
 0x7fe   : > { %v6428_v32 = vpop.f32.mrf.mxu0 }
 0x7ff   : > { %v2888_v30 = vmax.f32 %v2885_v63, 0.0  ;;  %v3032_v63 = vcombine.high %v3024_v9, %v3024_v9  ;;  %v2998_v32 = vrot.slane %v2982_v36, %v9170_v11  ;;  %v3080_v15 = vrot.slane %v3072_v52, %v9170_v11 }
 0x800   : > { %v3073_v8 = vcombine.high %v3072_v52, %v3072_v52 }
 0x801   : > { %6429 = vmatprep.subr.mxu0 %v2888_v30  ;;  %v3054_v48 = vrot.slane %v3032_v63, %v9170_v11  ;;  %v3065_v63 = vcombine.high %v3061_v38, %v3061_v38  ;;  %v3088_v52 = vcombine.high %v3080_v15, %v3080_v15 }
 0x802   : > { %6430 = vmatpush3.msra.mxu0 %v2888_v30  ;;  %v3012_v30 = vrot.slane %v2984_v26, %v9170_v11 }
 0x803   : > { %6432 = vmatmul.mubr.msk.f32.vlgmr.msra.gmra.mxu0 %vm907_vm8, %v9166_v57  ;;  %6447 = vmatprep.subr.mxu0 %v9167_v62  ;;  %v3040_v57 = vrot.slane %v3024_v9, %v9170_v11  ;;  %v3064_v49 = vcombine.high %v3054_v48, %v3054_v48 }
 0x804   : > { %6448 = vmatpush3.msk.msra.mxu0 %vm607_vm1, %v7747_v1  ;;  %6449 = vmatprep.mubr.msk.f32.mxu0 %vm6626_vm2, %v9167_v62  ;;  %v3014_v1 = vcombine.high %v2998_v32, %v2998_v32  ;;  %v3016_v54 = vcombine.high %v3012_v30, %v3012_v30 }
 0x805   : > { %6452 = vmatprep.subr.mxu0 %v9167_v62  ;;  %v3062_v26 = vcombine.high %v3040_v57, %v3040_v57 }
 0x807   : > { %6450 = vmatmul.mubr.msk.f32.vlgmr.msra.gmra.mxu0 %vm593_vm0, %v7760_v5  ;;  %v9173_v5 = vld [vmem:[#allocation25_spill] sm:$0xff] }
 0x808   : > { %6454 = vmatprep.mubr.msk.f32.mxu0 %vm6626_vm2, %v9167_v62  ;;  %v7788_v62 = vrot.slane %v2991_v7, %v9173_v5  ;;  %v7791_v36 = vrot.slane %v3005_v19, %v9173_v5  ;;  %v7794_v9 = vrot.slane %v3013_v47, %v9173_v5  ;;  %v7797_v35 = vrot.slane %v3015_v29, %v9173_v5 }
 0x809   : > { %v7800_v28 = vrot.slane %v2998_v32, %v9173_v5  ;;  %v7803_v25 = vrot.slane %v3012_v30, %v9173_v5  ;;  %v3063_v7 = vcombine.high %v3047_v51, %v3047_v51  ;;  %v3087_v19 = vrot.slane %v3073_v8, %v9170_v11 }
 0x80a   : > { %9174 = vst [vmem:[#allocation37_spill] sm:$0xff] %v7788_v62  ;;  %v3116_v47 = vrot.slane %v3014_v1, %v9173_v5  ;;  %v3120_v12 = vrot.slane %v3016_v54, %v9173_v5  ;;  %v7809_v29 = vrot.slane %v3040_v57, %v9173_v5  ;;  %v7813_v34 = vrot.slane %v3054_v48, %v9173_v5  ;;  %v9177_v57 = vld [vmem:[#allocation27_spill] sm:$0xff] }
 0x80b   : > { %v7816_v30 = vrot.slane %v3062_v26, %v9173_v5  ;;  %v3140_v23 = vrot.slane %v3047_v51, %v9173_v5  ;;  %v3144_v8 = vrot.slane %v3061_v38, %v9173_v5  ;;  %v3152_v1 = vrot.slane %v3065_v63, %v9173_v5  ;;  %v9178_v38 = vld [vmem:[#allocation15_spill] sm:$0xff] }
 0x80c   : > { %9175 = vst [vmem:[#allocation40_spill] sm:$0xff] %v7809_v29  ;;  %v3164_v54 = vrot.slane %v3088_v52, %v9173_v5  ;;  %v3148_v48 = vrot.slane %v3063_v7, %v9173_v5  ;;  %v3156_v26 = vrot.slane %v3080_v15, %v9173_v5 }
 0x8c3   : > { %v6433_v21 = vpop.f32.mrf.mxu0 }
 0x8c4   : > { %v2961_v32 = vadd.f32 %v6433_v21, %v9176_v58  ;;  %v3136_v21 = vrot.slane %v3064_v49, %v9173_v5  ;;  %v3160_v58 = vrot.slane %v3087_v19, %v9173_v5 }
 0x8c5   : > { %v2955_v11 = vpop.f32.mrf.mxu0 }
 0x8c6   : > { %v7822_v62 = vmax.f32 %v2961_v32, 0.0  ;;  %v2956_v29 = vadd.f32 %v2955_v11, %v9177_v57 }
 0x8c7   : > { %v3442_v51 = vpop.f32.mrf.mxu0 }
 0x8c8   : > { %v7829_v22 = vmax.f32 %v2956_v29, 0.0  ;;  %v3443_v3 = vadd.f32 %v3442_v51, %v9178_v38  ;;  %v3215_v63 = vmul.f32 %v3152_v1, %v7822_v62  ;;  %v3221_v52 = vmul.f32 %v3164_v54, %v7822_v62 }
 0x8c9   : > { %v6451_v32 = vpop.f32.mrf.mxu0  ;;  %v3199_v11 = vmul.f32 %v3120_v12, %v7822_v62  ;;  %v3213_v49 = vmul.f32 %v3148_v48, %v7822_v62  ;;  %v3219_v7 = vmul.f32 %v3160_v58, %v7822_v62  ;;  %v3197_v15 = vmul.f32 %v3116_v47, %v7822_v62 }
 0x8ca   : > { %v3446_v57 = vmax.f32 %v3443_v3, 0.0  ;;  %v7839_v19 = vadd.f32 %v3215_v63, %v7579_v61  ;;  %v7842_v29 = vadd.f32 %v3221_v52, %v7582_v2  ;;  %v3214_v51 = vmul.f32 %v3152_v1, %v7829_v22  ;;  %v7866_v1 = vld [vmem:[%s8987_s8] sm:$0xff] }
 0x8cb   : > { %v7846_v38 = vadd.f32 %v3199_v11, %v7586_v20  ;;  %v3220_v32 = vmul.f32 %v3164_v54, %v7829_v22  ;;  %v3198_v5 = vmul.f32 %v3120_v12, %v7829_v22  ;;  %v7851_v59 = vadd.f32 %v3213_v49, %v7591_v16  ;;  %v7881_v12 = vld [vmem:[%s8989_s10] sm:$0xff] }
 0x8cc   : > { %6453 = vmatpush3.msra.mxu0 %v3446_v57  ;;  %v7854_v3 = vadd.f32 %v3214_v51, %v7594_v24  ;;  %v7857_v61 = vadd.f32 %v3219_v7, %v7597_v13  ;;  %v7860_v2 = vadd.f32 %v3197_v15, %v7600_v4  ;;  %v3212_v20 = vmul.f32 %v3148_v48, %v7829_v22 }
 0x8cd   : > { %6455 = vmatmul.mubr.msk.f32.vlgmr.msra.gmra.mxu0 %vm907_vm8, %v7866_v1  ;;  %v7871_v16 = vadd.f32 %v3220_v32, %v7606_v37  ;;  %v7874_v24 = vadd.f32 %v3198_v5, %v7609_v18  ;;  %v3218_v13 = vmul.f32 %v3160_v58, %v7829_v22  ;;  %v3196_v4 = vmul.f32 %v3116_v47, %v7829_v22 }
 0x8ce   : > { %6459 = vmatprep.mubr.msk.f32.mxu0 %vm907_vm8, %v7881_v12  ;;  %v7886_v54 = vadd.f32 %v3212_v20, %v7616_v50  ;;  %v3211_v37 = vmul.f32 %v3144_v8, %v7822_v62  ;;  %v3217_v18 = vmul.f32 %v3156_v26, %v7822_v62  ;;  %v3195_v58 = vmul.f32 %v7803_v25, %v7822_v62  ;;  %v9181_v20 = vld [vmem:[#allocation3_spill] sm:$0xff] }
 0x8cf   : > { %v7893_v5 = vadd.f32 %v3218_v13, %v7622_v27  ;;  %v7896_v47 = vadd.f32 %v3196_v4, %v7625_v31  ;;  %v3210_v57 = vmul.f32 %v3144_v8, %v7829_v22  ;;  %v3216_v48 = vmul.f32 %v3156_v26, %v7829_v22 }
 0x8d0   : > { %v7901_v50 = vadd.f32 %v3211_v37, %v7630_v53  ;;  %v7904_v63 = vadd.f32 %v3217_v18, %v7633_v6  ;;  %v7907_v52 = vadd.f32 %v3195_v58, %v7636_v40  ;;  %v3194_v27 = vmul.f32 %v7803_v25, %v7829_v22  ;;  %v9185_v37 = vld [vmem:[#allocation4_spill] sm:$0xff] }
 0x8d1   : > { %v7912_v11 = vadd.f32 %v3210_v57, %v7640_v55  ;;  %v7915_v31 = vadd.f32 %v3216_v48, %v7643_v33  ;;  %v3209_v8 = vmul.f32 %v3140_v23, %v7822_v62  ;;  %v3193_v53 = vmul.f32 %v7800_v28, %v7822_v62 }
 0x8d2   : > { %v7921_v6 = vadd.f32 %v3194_v27, %v7649_v39  ;;  %v3208_v40 = vmul.f32 %v3140_v23, %v7829_v22  ;;  %v3192_v26 = vmul.f32 %v7800_v28, %v7829_v22  ;;  %v3207_v25 = vmul.f32 %v3136_v21, %v7822_v62 }
 0x8d3   : > { %v7928_v55 = vadd.f32 %v3209_v8, %v7656_v41  ;;  %v7931_v33 = vadd.f32 %v3193_v53, %v7659_v0  ;;  %v3191_v49 = vmul.f32 %v7797_v35, %v7822_v62  ;;  %v3206_v7 = vmul.f32 %v3136_v21, %v7829_v22  ;;  %v9191_v8 = vld [vmem:[#allocation28_spill] sm:$0xff] }
 0x8d4   : > { %v7937_v39 = vadd.f32 %v3208_v40, %v7665_v45  ;;  %v7940_v23 = vadd.f32 %v3192_v26, %v7668_v17  ;;  %v7943_v28 = vadd.f32 %v3207_v25, %v7671_v14  ;;  %v3190_v41 = vmul.f32 %v7797_v35, %v7829_v22  ;;  %v9193_v40 = vld [vmem:[#allocation29_spill] sm:$0xff]  ;;  %v9195_v25 = vld [vmem:[#allocation30_spill] sm:$0xff] }
 0x8d5   : > { %v7948_v0 = vadd.f32 %v3191_v49, %v7676_v42  ;;  %v7951_v15 = vadd.f32 %v3206_v7, %v7679_v56  ;;  %v3205_v21 = vmul.f32 %v7816_v30, %v7822_v62  ;;  %v3189_v45 = vmul.f32 %v7794_v9, %v7822_v62  ;;  %v9197_v7 = vld [vmem:[#allocation31_spill] sm:$0xff] }
 0x8d6   : > { %v7958_v17 = vadd.f32 %v3190_v41, %v7686_v46  ;;  %v3204_v14 = vmul.f32 %v7816_v30, %v7829_v22  ;;  %v3188_v35 = vmul.f32 %v7794_v9, %v7829_v22  ;;  %v3203_v42 = vmul.f32 %v7813_v34, %v7822_v62 }
 0x8d7   : > { %v7967_v56 = vadd.f32 %v3205_v21, %v7695_v43  ;;  %v7970_v51 = vadd.f32 %v3189_v45, %v7698_v60  ;;  %v3187_v32 = vmul.f32 %v7791_v36, %v7822_v62  ;;  %v3202_v46 = vmul.f32 %v7813_v34, %v7829_v22  ;;  %v9183_v60 = vld [vmem:[#allocation38_spill] sm:$0xff]  ;;  %v9187_v34 = vld [vmem:[#allocation40_spill] sm:$0xff] }
 0x8d8   : > { %v7977_v30 = vadd.f32 %v3204_v14, %v7705_v10  ;;  %v7980_v9 = vadd.f32 %v3188_v35, %v7708_v44  ;;  %v7983_v13 = vadd.f32 %v3203_v42, %v9181_v20  ;;  %v3186_v43 = vmul.f32 %v7791_v36, %v7829_v22  ;;  %v9188_v10 = vld [vmem:[#allocation37_spill] sm:$0xff]  ;;  %v9199_v21 = vld [vmem:[#allocation22_spill] sm:$0xff] }
 0x8d9   : > { %v7988_v4 = vadd.f32 %v3187_v32, %v9183_v60  ;;  %v7991_v18 = vadd.f32 %v3202_v46, %v9185_v37  ;;  %v3201_v58 = vmul.f32 %v9187_v34, %v7822_v62  ;;  %v3185_v57 = vmul.f32 %v9188_v10, %v7822_v62  ;;  %v9189_v44 = vld [vmem:[#allocation5_spill] sm:$0xff]  ;;  %v9200_v42 = vld [vmem:[#allocation2_spill] sm:$0xff]  ;;  %v8024_v46 = vld [vmem:[%s8989_s10 + $0x8] sm:$0xff] }
 0x8da   : > { %9179 = vst [vmem:[#allocation39_spill] sm:$0xff] %v7977_v30  ;;  %9180 = vst [vmem:[#allocation33_spill] sm:$0xff] %v7980_v9  ;;  %v7998_v48 = vadd.f32 %v3186_v43, %v9189_v44  ;;  %v3200_v27 = vmul.f32 %v9187_v34, %v7829_v22  ;;  %v3184_v36 = vmul.f32 %v9188_v10, %v7829_v22  ;;  %v9201_v22 = vld [vmem:[#allocation12_spill] sm:$0xff]  ;;  %v9204_v20 = vmov 0.0   ;;  %v9205_v43 = vld [vmem:[#allocation6_spill] sm:$0xff] }
 0x8db   : > { %9182 = vst [vmem:[#allocation34_spill] sm:$0xff] %v7983_v13  ;;  %9184 = vst [vmem:[#allocation35_spill] sm:$0xff] %v7988_v4  ;;  %v8005_v53 = vadd.f32 %v3201_v58, %v9191_v8  ;;  %v8008_v26 = vadd.f32 %v3185_v57, %v9193_v40  ;;  %v8019_v32 = vsub.f32 %v9201_v22, %v9200_v42  ;;  %v9206_v60 = vld [vmem:[#allocation32_spill] sm:$0xff]  ;;  %v9208_v10 = vld [vmem:[#allocation10_spill] sm:$0xff] }
 0x8dc   : > { %9186 = vst [vmem:[#allocation9_spill] sm:$0xff] %v7991_v18  ;;  %9190 = vst [vmem:[#allocation23_spill] sm:$0xff] %v7998_v48  ;;  %v8011_v49 = vadd.f32 %v3200_v27, %v9195_v25  ;;  %v8014_v62 = vadd.f32 %v3184_v36, %v9197_v7  ;;  %v3597_v37 = vcombine.high %v9206_v60, %v9206_v60  ;;  %v9207_v34 = vld [vmem:[#allocation24_spill] sm:$0xff]  ;;  %v9210_v42 = vld [vmem:[#allocation25_spill] sm:$0xff] }
 0x8dd   : > { %9192 = vst [vmem:[#allocation36_spill] sm:$0xff] %v8005_v53  ;;  %9194 = vst [vmem:[#allocation7_spill] sm:$0xff] %v8008_v26  ;;  %v3604_v58 = vrot.slane %v9206_v60, %v9207_v34  ;;  %v3646_v57 = vcombine.high %v9208_v10, %v9208_v10  ;;  %v3653_v8 = vrot.slane %v9208_v10, %v9207_v34 }
 0x8de   : > { %9196 = vst [vmem:[#allocation8_spill] sm:$0xff] %v8011_v49  ;;  %9198 = vst [vmem:[#allocation3_spill] sm:$0xff] %v8014_v62  ;;  %v3611_v44 = vrot.slane %v3597_v37, %v9207_v34 }
 0x8df   : > { %9202 = vst [vmem:[#allocation38_spill] sm:$0xff] %v8019_v32  ;;  %9203 = vst [vmem:[#allocation4_spill] sm:$0xff] %v8024_v46  ;;  %v3612_v27 = vcombine.high %v3604_v58, %v3604_v58  ;;  %v3660_v36 = vrot.slane %v3646_v57, %v9207_v34  ;;  %v3620_v25 = vrot.slane %v3604_v58, %v9207_v34 }
 0x8e0   : > { %v3613_v40 = vcombine.high %v3611_v44, %v3611_v44  ;;  %v3627_v22 = vrot.slane %v3611_v44, %v9207_v34  ;;  %v3669_v57 = vrot.slane %v3653_v8, %v9207_v34 }
 0x8e1   : > { %v3634_v7 = vrot.slane %v3612_v27, %v9207_v34  ;;  %v3642_v37 = vcombine.high %v3620_v25, %v3620_v25  ;;  %v3676_v58 = vrot.slane %v3660_v36, %v9207_v34 }
 0x8e2   : > { %v3641_v60 = vrot.slane %v3613_v40, %v9207_v34  ;;  %v3691_v40 = vcombine.high %v3669_v57, %v3669_v57  ;;  %v8079_v48 = vrot.slane %v3669_v57, %v9210_v42  ;;  %v9214_v57 = vld [vmem:[#allocation27_spill] sm:$0xff] }
 0x8e3   : > { %v8063_v44 = vrot.slane %v3634_v7, %v9210_v42  ;;  %v3692_v49 = vcombine.high %v3676_v58, %v3676_v58 }
 0x8e4   : > { %v3741_v62 = vrot.slane %v3641_v60, %v9210_v42  ;;  %9212 = vst [vmem:[#allocation37_spill] sm:$0xff] %v8079_v48  ;;  %v8086_v18 = vrot.slane %v3691_v40, %v9210_v42 }
 0x98d   : > { %v3513_v41 = vpop.f32.mrf.mxu0 }
 0x98e   : > { %v3514_v45 = vadd.f32 %v3513_v41, %v9199_v21  ;;  %v3662_v41 = vcombine.high %v3660_v36, %v3660_v36  ;;  %v8060_v21 = vrot.slane %v3620_v25, %v9210_v42  ;;  %v8072_v36 = vrot.slane %v3627_v22, %v9210_v42 }
 0x98f   : > { %v6456_v14 = vpop.f32.mrf.mxu0 }
 0x990   : > { %v3517_v35 = vmax.f32 %v3514_v45, 0.0  ;;  %v9209_v45 = vld [vmem:[#allocation11_spill] sm:$0xff]  ;;  %v3690_v10 = vrot.slane %v3662_v41, %v9207_v34  ;;  %9211 = vst [vmem:[#allocation40_spill] sm:$0xff] %v8060_v21 }
 0x991   : > { %v3701_v14 = vrot.slane %v9209_v45, %v9207_v34  ;;  %v3645_v45 = vcombine.high %v3641_v60, %v3641_v60  ;;  %v3769_v60 = vrot.slane %v3676_v58, %v9210_v42 }
 0x992   : > { %6457 = vmatprep.subr.mxu0 %v3517_v35 }
 0x993   : > { %6458 = vmatpush3.msra.mxu0 %v3517_v35  ;;  %v3661_v35 = vcombine.high %v3653_v8, %v3653_v8  ;;  %v8066_v8 = vrot.slane %v3642_v37, %v9210_v42  ;;  %v3749_v37 = vrot.slane %v3645_v45, %v9210_v42 }
 0x994   : > { %6460 = vmatmul.mubr.msk.f32.vlgmr.msra.gmra.mxu0 %vm907_vm8, %v8024_v46  ;;  %6475 = vmatprep.subr.mxu0 %v9204_v20  ;;  %v3643_v46 = vcombine.high %v3627_v22, %v3627_v22 }
 0x995   : > { %6476 = vmatpush3.msk.msra.mxu0 %vm607_vm1, %v8019_v32  ;;  %6477 = vmatprep.mubr.msk.f32.mxu0 %vm6626_vm2, %v9204_v20  ;;  %v3644_v32 = vcombine.high %v3634_v7, %v3634_v7  ;;  %v3683_v27 = vrot.slane %v3661_v35, %v9207_v34  ;;  %v3694_v35 = vcombine.high %v3690_v10, %v3690_v10 }
 0x996   : > { %6480 = vmatprep.subr.mxu0 %v9204_v20  ;;  %v3745_v53 = vrot.slane %v3643_v46, %v9210_v42 }
 0x997   : > { %v8069_v41 = vrot.slane %v3644_v32, %v9210_v42  ;;  %v3693_v25 = vcombine.high %v3683_v27, %v3683_v27  ;;  %v9213_v32 = vld [vmem:[#allocation26_spill] sm:$0xff]  ;;  %v8083_v22 = vrot.slane %v3683_v27, %v9210_v42  ;;  %v3781_v46 = vrot.slane %v3694_v35, %v9210_v42 }
 0x998   : > { %6478 = vmatmul.mubr.msk.f32.vlgmr.msra.gmra.mxu0 %vm593_vm0, %v9205_v43  ;;  %v3709_v43 = vrot.slane %v3701_v14, %v9207_v34  ;;  %v3777_v27 = vrot.slane %v3692_v49, %v9210_v42 }
 0x999   : > { %6482 = vmatprep.mubr.msk.f32.mxu0 %vm6626_vm2, %v9204_v20  ;;  %v3702_v20 = vcombine.high %v3701_v14, %v3701_v14 }
 0x99a   : > { %v3717_v14 = vcombine.high %v3709_v43, %v3709_v43  ;;  %v3785_v40 = vrot.slane %v3709_v43, %v9210_v42 }
 0x99b   : > { %v3716_v26 = vrot.slane %v3702_v20, %v9207_v34  ;;  %v3773_v20 = vrot.slane %v3690_v10, %v9210_v42  ;;  %v9215_v10 = vld [vmem:[#allocation15_spill] sm:$0xff] }
 0x99c   : > { %v3793_v45 = vrot.slane %v3717_v14, %v9210_v42 }
 0xa54   : > { %v6461_v7 = vpop.f32.mrf.mxu0 }
 0xa55   : > { %v3590_v21 = vadd.f32 %v6461_v7, %v9213_v32  ;;  %v3765_v7 = vrot.slane %v3693_v25, %v9210_v42  ;;  %v3789_v32 = vrot.slane %v3716_v26, %v9210_v42 }
 0xa56   : > { %v3584_v34 = vpop.f32.mrf.mxu0 }
 0xa57   : > { %v8092_v4 = vmax.f32 %v3590_v21, 0.0  ;;  %v3585_v48 = vadd.f32 %v3584_v34, %v9214_v57 }
 0xa58   : > { %v4071_v58 = vpop.f32.mrf.mxu0 }
 0xa59   : > { %v8099_v13 = vmax.f32 %v3585_v48, 0.0  ;;  %v4072_v9 = vadd.f32 %v4071_v58, %v9215_v10  ;;  %v3844_v35 = vmul.f32 %v3781_v46, %v8092_v4  ;;  %v3850_v21 = vmul.f32 %v3793_v45, %v8092_v4 }
 0xa5a   : > { %v6479_v14 = vpop.f32.mrf.mxu0  ;;  %v3828_v34 = vmul.f32 %v3749_v37, %v8092_v4  ;;  %v3842_v25 = vmul.f32 %v3777_v27, %v8092_v4  ;;  %v3848_v49 = vmul.f32 %v3789_v32, %v8092_v4  ;;  %v3826_v43 = vmul.f32 %v3745_v53, %v8092_v4 }
 0xa5b   : > { %v4075_v57 = vmax.f32 %v4072_v9, 0.0  ;;  %v8109_v26 = vadd.f32 %v3844_v35, %v7839_v19  ;;  %v8112_v48 = vadd.f32 %v3850_v21, %v7842_v29  ;;  %v3843_v58 = vmul.f32 %v3781_v46, %v8099_v13 }
 0xa5c   : > { %v8116_v10 = vadd.f32 %v3828_v34, %v7846_v38  ;;  %v3849_v14 = vmul.f32 %v3793_v45, %v8099_v13  ;;  %v3827_v42 = vmul.f32 %v3749_v37, %v8099_v13  ;;  %v8121_v30 = vadd.f32 %v3842_v25, %v7851_v59 }
 0xa5d   : > { %6481 = vmatpush3.msra.mxu0 %v4075_v57  ;;  %v8124_v9 = vadd.f32 %v3843_v58, %v7854_v3  ;;  %v8127_v19 = vadd.f32 %v3848_v49, %v7857_v61  ;;  %v8130_v29 = vadd.f32 %v3826_v43, %v7860_v2  ;;  %v3841_v38 = vmul.f32 %v3777_v27, %v8099_v13  ;;  %v9216_v58 = vld [vmem:[#allocation39_spill] sm:$0xff] }
 0xa5e   : > { %6483 = vmatmul.mubr.msk.f32.vlgmr.msra.gmra.mxu0 %vm907_vm8, %v7866_v1  ;;  %v8136_v37 = vadd.f32 %v3849_v14, %v7871_v16  ;;  %v8139_v59 = vadd.f32 %v3827_v42, %v7874_v24  ;;  %v3847_v3 = vmul.f32 %v3789_v32, %v8099_v13  ;;  %v3825_v46 = vmul.f32 %v3745_v53, %v8099_v13  ;;  %v9218_v14 = vld [vmem:[#allocation33_spill] sm:$0xff] }
 0xa5f   : > { %6487 = vmatprep.mubr.msk.f32.mxu0 %vm907_vm8, %v7881_v12  ;;  %v8146_v61 = vadd.f32 %v3841_v38, %v7886_v54  ;;  %v3840_v2 = vmul.f32 %v3773_v20, %v8092_v4  ;;  %v3846_v45 = vmul.f32 %v3785_v40, %v8092_v4  ;;  %v3824_v16 = vmul.f32 %v3741_v62, %v8092_v4  ;;  %v9220_v38 = vld [vmem:[#allocation34_spill] sm:$0xff] }
 0xa60   : > { %v8152_v57 = vadd.f32 %v3847_v3, %v7893_v5  ;;  %v8155_v24 = vadd.f32 %v3825_v46, %v7896_v47  ;;  %v3839_v53 = vmul.f32 %v3773_v20, %v8099_v13  ;;  %v3845_v42 = vmul.f32 %v3785_v40, %v8099_v13 }
 0xa61   : > { %v8160_v32 = vadd.f32 %v3840_v2, %v7901_v50  ;;  %v8163_v54 = vadd.f32 %v3846_v45, %v7904_v63  ;;  %v8166_v27 = vadd.f32 %v3824_v16, %v7907_v52  ;;  %v3823_v35 = vmul.f32 %v3741_v62, %v8099_v13  ;;  %v9224_v2 = vld [vmem:[#allocation9_spill] sm:$0xff] }
 0xa62   : > { %v8170_v5 = vadd.f32 %v3839_v53, %v7912_v11  ;;  %v8173_v47 = vadd.f32 %v3845_v42, %v7915_v31  ;;  %v3838_v20 = vmul.f32 %v3769_v60, %v8092_v4  ;;  %v3822_v50 = vmul.f32 %v8072_v36, %v8092_v4  ;;  %v9227_v53 = vld [vmem:[#allocation40_spill] sm:$0xff] }
 0xa63   : > { %v8179_v40 = vadd.f32 %v3823_v35, %v7921_v6  ;;  %v3837_v63 = vmul.f32 %v3769_v60, %v8099_v13  ;;  %v3821_v52 = vmul.f32 %v8072_v36, %v8099_v13  ;;  %v3836_v62 = vmul.f32 %v3765_v7, %v8092_v4  ;;  %v9228_v35 = vld [vmem:[#allocation23_spill] sm:$0xff] }
 0xa64   : > { %v8186_v11 = vadd.f32 %v3838_v20, %v7928_v55  ;;  %v8189_v31 = vadd.f32 %v3822_v50, %v7931_v33  ;;  %v3820_v21 = vmul.f32 %v8069_v41, %v8092_v4  ;;  %v3835_v34 = vmul.f32 %v3765_v7, %v8099_v13 }
 0xa65   : > { %v8195_v6 = vadd.f32 %v3837_v63, %v7937_v39  ;;  %v8198_v60 = vadd.f32 %v3821_v52, %v7940_v23  ;;  %v8201_v36 = vadd.f32 %v3836_v62, %v7943_v28  ;;  %v3819_v55 = vmul.f32 %v8069_v41, %v8099_v13  ;;  %v9230_v63 = vld [vmem:[#allocation36_spill] sm:$0xff]  ;;  %v9232_v62 = vld [vmem:[#allocation7_spill] sm:$0xff] }
 0xa66   : > { %v8206_v33 = vadd.f32 %v3820_v21, %v7948_v0  ;;  %v8209_v25 = vadd.f32 %v3835_v34, %v7951_v15  ;;  %v3834_v7 = vmul.f32 %v8086_v18, %v8092_v4  ;;  %v3818_v39 = vmul.f32 %v8066_v8, %v8092_v4  ;;  %v9234_v34 = vld [vmem:[#allocation8_spill] sm:$0xff] }
 0xa67   : > { %v8216_v23 = vadd.f32 %v3819_v55, %v7958_v17  ;;  %v3833_v28 = vmul.f32 %v8086_v18, %v8099_v13  ;;  %v3817_v41 = vmul.f32 %v8066_v8, %v8099_v13  ;;  %v3832_v0 = vmul.f32 %v8083_v22, %v8092_v4 }
 0xa68   : > { %v8225_v15 = vadd.f32 %v3834_v7, %v7967_v56  ;;  %v8228_v49 = vadd.f32 %v3818_v39, %v7970_v51  ;;  %v3816_v43 = vmul.f32 %v8063_v44, %v8092_v4  ;;  %v3831_v17 = vmul.f32 %v8083_v22, %v8099_v13  ;;  %v9222_v51 = vld [vmem:[#allocation35_spill] sm:$0xff]  ;;  %v9226_v22 = vld [vmem:[#allocation37_spill] sm:$0xff] }
 0xa69   : > { %v8235_v18 = vadd.f32 %v3833_v28, %v9216_v58  ;;  %v8238_v8 = vadd.f32 %v3817_v41, %v9218_v14  ;;  %v8241_v3 = vadd.f32 %v3832_v0, %v9220_v38  ;;  %v3815_v56 = vmul.f32 %v8063_v44, %v8099_v13  ;;  %v9236_v7 = vld [vmem:[#allocation3_spill] sm:$0xff]  ;;  %v9238_v28 = vld [vmem:[#allocation22_spill] sm:$0xff]  ;;  %v9242_v14 = vld [vmem:[#allocation4_spill] sm:$0xff] }
 0xa6a   : > { %v8246_v46 = vadd.f32 %v3816_v43, %v9222_v51  ;;  %v8249_v45 = vadd.f32 %v3831_v17, %v9224_v2  ;;  %v3830_v16 = vmul.f32 %v9226_v22, %v8092_v4  ;;  %v3814_v42 = vmul.f32 %v9227_v53, %v8092_v4  ;;  %v9239_v17 = vld [vmem:[#allocation2_spill] sm:$0xff] }
 0xa6b   : > { %9217 = vst [vmem:[#allocation5_spill] sm:$0xff] %v8235_v18  ;;  %9219 = vst [vmem:[#allocation28_spill] sm:$0xff] %v8238_v8  ;;  %v8256_v20 = vadd.f32 %v3815_v56, %v9228_v35  ;;  %v3829_v50 = vmul.f32 %v9226_v22, %v8099_v13  ;;  %v3813_v44 = vmul.f32 %v9227_v53, %v8099_v13  ;;  %v9240_v13 = vld [vmem:[#allocation16_spill] sm:$0xff]  ;;  %v9243_v38 = vmov 0.0   ;;  %v9244_v56 = vld [vmem:[#allocation6_spill] sm:$0xff] }
 0xa6c   : > { %9221 = vst [vmem:[#allocation29_spill] sm:$0xff] %v8241_v3  ;;  %9223 = vst [vmem:[#allocation30_spill] sm:$0xff] %v8246_v46  ;;  %v8263_v52 = vadd.f32 %v3830_v16, %v9230_v63  ;;  %v8266_v21 = vadd.f32 %v3814_v42, %v9232_v62  ;;  %v8277_v58 = vsub.f32 %v9240_v13, %v9239_v17  ;;  %v9245_v51 = vld [vmem:[#allocation38_spill] sm:$0xff]  ;;  %v9246_v22 = vld [vmem:[#allocation24_spill] sm:$0xff] }
 0xa6d   : > { %9225 = vst [vmem:[#allocation31_spill] sm:$0xff] %v8249_v45  ;;  %9229 = vst [vmem:[#allocation12_spill] sm:$0xff] %v8256_v20  ;;  %v8269_v55 = vadd.f32 %v3829_v50, %v9234_v34  ;;  %v8272_v4 = vadd.f32 %v3813_v44, %v9236_v7  ;;  %v4226_v2 = vcombine.high %v9245_v51, %v9245_v51  ;;  %v9247_v53 = vld [vmem:[#allocation13_spill] sm:$0xff] }
 0xa6e   : > { %9231 = vst [vmem:[#allocation32_spill] sm:$0xff] %v8263_v52  ;;  %9233 = vst [vmem:[#allocation10_spill] sm:$0xff] %v8266_v21  ;;  %v4233_v16 = vrot.slane %v9245_v51, %v9246_v22  ;;  %v4275_v42 = vcombine.high %v9247_v53, %v9247_v53  ;;  %v4282_v63 = vrot.slane %v9247_v53, %v9246_v22  ;;  %v9249_v17 = vld [vmem:[#allocation25_spill] sm:$0xff] }
 0xa6f   : > { %9235 = vst [vmem:[#allocation11_spill] sm:$0xff] %v8269_v55  ;;  %9237 = vst [vmem:[#allocation39_spill] sm:$0xff] %v8272_v4  ;;  %v4240_v35 = vrot.slane %v4226_v2, %v9246_v22 }
 0xa70   : > { %9241 = vst [vmem:[#allocation33_spill] sm:$0xff] %v8277_v58  ;;  %v4241_v50 = vcombine.high %v4233_v16, %v4233_v16  ;;  %v4289_v44 = vrot.slane %v4275_v42, %v9246_v22  ;;  %v4249_v34 = vrot.slane %v4233_v16, %v9246_v22  ;;  %v4298_v42 = vrot.slane %v4282_v63, %v9246_v22 }
 0xa71   : > { %v4242_v62 = vcombine.high %v4240_v35, %v4240_v35  ;;  %v4256_v13 = vrot.slane %v4240_v35, %v9246_v22 }
 0xa72   : > { %v4263_v7 = vrot.slane %v4241_v50, %v9246_v22  ;;  %v4271_v2 = vcombine.high %v4249_v34, %v4249_v34  ;;  %v4305_v16 = vrot.slane %v4289_v44, %v9246_v22  ;;  %v8332_v20 = vrot.slane %v4298_v42, %v9249_v17 }
 0xa73   : > { %v4270_v51 = vrot.slane %v4242_v62, %v9246_v22  ;;  %v4320_v62 = vcombine.high %v4298_v42, %v4298_v42  ;;  %v9253_v42 = vld [vmem:[#allocation27_spill] sm:$0xff] }
 0xa74   : > { %v8316_v35 = vrot.slane %v4263_v7, %v9249_v17  ;;  %v4321_v55 = vcombine.high %v4305_v16, %v4305_v16  ;;  %9251 = vst [vmem:[#allocation35_spill] sm:$0xff] %v8332_v20 }
 0xa75   : > { %v4370_v4 = vrot.slane %v4270_v51, %v9249_v17  ;;  %v8339_v45 = vrot.slane %v4320_v62, %v9249_v17 }
 0xb1e   : > { %v4142_v39 = vpop.f32.mrf.mxu0 }
 0xb1f   : > { %v4143_v41 = vadd.f32 %v4142_v39, %v9238_v28  ;;  %v4291_v39 = vcombine.high %v4289_v44, %v4289_v44  ;;  %v8313_v28 = vrot.slane %v4249_v34, %v9249_v17  ;;  %v8325_v44 = vrot.slane %v4256_v13, %v9249_v17 }
 0xb20   : > { %v6484_v0 = vpop.f32.mrf.mxu0 }
 0xb21   : > { %v4146_v43 = vmax.f32 %v4143_v41, 0.0  ;;  %v9248_v41 = vld [vmem:[#allocation14_spill] sm:$0xff]  ;;  %v4319_v53 = vrot.slane %v4291_v39, %v9246_v22  ;;  %9250 = vst [vmem:[#allocation34_spill] sm:$0xff] %v8313_v28 }
 0xb22   : > { %v4330_v0 = vrot.slane %v9248_v41, %v9246_v22  ;;  %v4274_v41 = vcombine.high %v4270_v51, %v4270_v51  ;;  %v4398_v51 = vrot.slane %v4305_v16, %v9249_v17 }
 0xb23   : > { %6485 = vmatprep.subr.mxu0 %v4146_v43 }
 0xb24   : > { %6486 = vmatpush3.msra.mxu0 %v4146_v43  ;;  %v4290_v43 = vcombine.high %v4282_v63, %v4282_v63  ;;  %v8319_v63 = vrot.slane %v4271_v2, %v9249_v17  ;;  %v4378_v2 = vrot.slane %v4274_v41, %v9249_v17 }
 0xb25   : > { %6488 = vmatmul.mubr.msk.f32.vlgmr.msra.gmra.mxu0 %vm907_vm8, %v9242_v14  ;;  %6503 = vmatprep.subr.mxu0 %v9243_v38  ;;  %v4272_v14 = vcombine.high %v4256_v13, %v4256_v13 }
 0xb26   : > { %6504 = vmatpush3.msk.msra.mxu0 %vm607_vm1, %v8277_v58  ;;  %6505 = vmatprep.mubr.msk.f32.mxu0 %vm6626_vm2, %v9243_v38  ;;  %v4273_v58 = vcombine.high %v4263_v7, %v4263_v7  ;;  %v4312_v50 = vrot.slane %v4290_v43, %v9246_v22  ;;  %v4323_v43 = vcombine.high %v4319_v53, %v4319_v53 }
 0xb27   : > { %6508 = vmatprep.subr.mxu0 %v9243_v38  ;;  %v4374_v52 = vrot.slane %v4272_v14, %v9249_v17 }
 0xb28   : > { %v8322_v39 = vrot.slane %v4273_v58, %v9249_v17  ;;  %v4322_v34 = vcombine.high %v4312_v50, %v4312_v50  ;;  %v9252_v58 = vld [vmem:[#allocation26_spill] sm:$0xff]  ;;  %v8336_v13 = vrot.slane %v4312_v50, %v9249_v17  ;;  %v4410_v14 = vrot.slane %v4323_v43, %v9249_v17 }
 0xb29   : > { %6506 = vmatmul.mubr.msk.f32.vlgmr.msra.gmra.mxu0 %vm593_vm0, %v9244_v56  ;;  %v4338_v56 = vrot.slane %v4330_v0, %v9246_v22  ;;  %v4406_v50 = vrot.slane %v4321_v55, %v9249_v17 }
 0xb2a   : > { %6510 = vmatprep.mubr.msk.f32.mxu0 %vm6626_vm2, %v9243_v38  ;;  %v4331_v38 = vcombine.high %v4330_v0, %v4330_v0 }
 0xb2b   : > { %v4346_v0 = vcombine.high %v4338_v56, %v4338_v56  ;;  %v4414_v62 = vrot.slane %v4338_v56, %v9249_v17 }
 0xb2c   : > { %v4345_v21 = vrot.slane %v4331_v38, %v9246_v22  ;;  %v4402_v38 = vrot.slane %v4319_v53, %v9249_v17  ;;  %v9254_v53 = vld [vmem:[#allocation15_spill] sm:$0xff] }
 0xb2d   : > { %v4422_v41 = vrot.slane %v4346_v0, %v9249_v17 }
 0xbe5   : > { %v6489_v7 = vpop.f32.mrf.mxu0 }
 0xbe6   : > { %v4219_v28 = vadd.f32 %v6489_v7, %v9252_v58  ;;  %v4394_v7 = vrot.slane %v4322_v34, %v9249_v17  ;;  %v4418_v58 = vrot.slane %v4345_v21, %v9249_v17 }
 0xbe7   : > { %v4213_v22 = vpop.f32.mrf.mxu0 }
 0xbe8   : > { %v8345_v46 = vmax.f32 %v4219_v28, 0.0  ;;  %v4214_v20 = vadd.f32 %v4213_v22, %v9253_v42 }
 0xbe9   : > { %v4700_v16 = vpop.f32.mrf.mxu0 }
 0xbea   : > { %v8352_v3 = vmax.f32 %v4214_v20, 0.0  ;;  %v4701_v8 = vadd.f32 %v4700_v16, %v9254_v53  ;;  %v4473_v43 = vmul.f32 %v4410_v14, %v8345_v46  ;;  %v4479_v28 = vmul.f32 %v4422_v41, %v8345_v46 }
 0xbeb   : > { %v6507_v0 = vpop.f32.mrf.mxu0  ;;  %v4457_v22 = vmul.f32 %v4378_v2, %v8345_v46  ;;  %v4471_v34 = vmul.f32 %v4406_v50, %v8345_v46  ;;  %v4477_v55 = vmul.f32 %v4418_v58, %v8345_v46  ;;  %v4455_v56 = vmul.f32 %v4374_v52, %v8345_v46 }
 0xbec   : > { %v4704_v42 = vmax.f32 %v4701_v8, 0.0  ;;  %v8362_v21 = vadd.f32 %v4473_v43, %v8109_v26  ;;  %v8365_v20 = vadd.f32 %v4479_v28, %v8112_v48  ;;  %v4472_v16 = vmul.f32 %v4410_v14, %v8352_v3 }
 0xbed   : > { %v8369_v53 = vadd.f32 %v4457_v22, %v8116_v10  ;;  %v4478_v0 = vmul.f32 %v4422_v41, %v8352_v3  ;;  %v4456_v17 = vmul.f32 %v4378_v2, %v8352_v3  ;;  %v8374_v18 = vadd.f32 %v4471_v34, %v8121_v30 }
 0xbee   : > { %6509 = vmatpush3.msra.mxu0 %v4704_v42  ;;  %v8377_v8 = vadd.f32 %v4472_v16, %v8124_v9  ;;  %v8380_v26 = vadd.f32 %v4477_v55, %v8127_v19  ;;  %v8383_v48 = vadd.f32 %v4455_v56, %v8130_v29  ;;  %v4470_v10 = vmul.f32 %v4406_v50, %v8352_v3  ;;  %v9255_v16 = vld [vmem:[#allocation5_spill] sm:$0xff] }
 0xbef   : > { %6511 = vmatmul.mubr.msk.f32.vlgmr.msra.gmra.mxu0 %vm907_vm8, %v7866_v1  ;;  %v8389_v2 = vadd.f32 %v4478_v0, %v8136_v37  ;;  %v8392_v30 = vadd.f32 %v4456_v17, %v8139_v59  ;;  %v4476_v9 = vmul.f32 %v4418_v58, %v8352_v3  ;;  %v4454_v14 = vmul.f32 %v4374_v52, %v8352_v3  ;;  %v9257_v0 = vld [vmem:[#allocation28_spill] sm:$0xff] }
 0xbf0   : > { %6515 = vmatprep.mubr.msk.f32.mxu0 %vm907_vm8, %v7881_v12  ;;  %v8399_v19 = vadd.f32 %v4470_v10, %v8146_v61  ;;  %v4469_v29 = vmul.f32 %v4402_v38, %v8345_v46  ;;  %v4475_v41 = vmul.f32 %v4414_v62, %v8345_v46  ;;  %v4453_v37 = vmul.f32 %v4370_v4, %v8345_v46  ;;  %v9259_v10 = vld [vmem:[#allocation29_spill] sm:$0xff] }
 0xbf1   : > { %v8405_v42 = vadd.f32 %v4476_v9, %v8152_v57  ;;  %v8408_v59 = vadd.f32 %v4454_v14, %v8155_v24  ;;  %v4468_v52 = vmul.f32 %v4402_v38, %v8352_v3  ;;  %v4474_v17 = vmul.f32 %v4414_v62, %v8352_v3 }
 0xbf2   : > { %v8413_v58 = vadd.f32 %v4469_v29, %v8160_v32  ;;  %v8416_v61 = vadd.f32 %v4475_v41, %v8163_v54  ;;  %v8419_v50 = vadd.f32 %v4453_v37, %v8166_v27  ;;  %v4452_v43 = vmul.f32 %v4370_v4, %v8352_v3  ;;  %v9263_v29 = vld [vmem:[#allocation31_spill] sm:$0xff] }
 0xbf3   : > { %v8423_v57 = vadd.f32 %v4468_v52, %v8170_v5  ;;  %v8426_v24 = vadd.f32 %v4474_v17, %v8173_v47  ;;  %v4467_v38 = vmul.f32 %v4398_v51, %v8345_v46  ;;  %v4451_v32 = vmul.f32 %v8325_v44, %v8345_v46  ;;  %v9266_v52 = vld [vmem:[#allocation34_spill] sm:$0xff] }
 0xbf4   : > { %v8432_v62 = vadd.f32 %v4452_v43, %v8179_v40  ;;  %v4466_v54 = vmul.f32 %v4398_v51, %v8352_v3  ;;  %v4450_v27 = vmul.f32 %v8325_v44, %v8352_v3  ;;  %v4465_v4 = vmul.f32 %v4394_v7, %v8345_v46  ;;  %v9267_v43 = vld [vmem:[#allocation12_spill] sm:$0xff] }
 0xbf5   : > { %v8439_v5 = vadd.f32 %v4467_v38, %v8186_v11  ;;  %v8442_v47 = vadd.f32 %v4451_v32, %v8189_v31  ;;  %v4449_v28 = vmul.f32 %v8322_v39, %v8345_v46  ;;  %v4464_v22 = vmul.f32 %v4394_v7, %v8352_v3 }
 0xbf6   : > { %v8448_v40 = vadd.f32 %v4466_v54, %v8195_v6  ;;  %v8451_v51 = vadd.f32 %v4450_v27, %v8198_v60  ;;  %v8454_v44 = vadd.f32 %v4465_v4, %v8201_v36  ;;  %v4448_v11 = vmul.f32 %v8322_v39, %v8352_v3  ;;  %v9269_v54 = vld [vmem:[#allocation32_spill] sm:$0xff]  ;;  %v9271_v4 = vld [vmem:[#allocation10_spill] sm:$0xff] }
 0xbf7   : > { %v8459_v31 = vadd.f32 %v4449_v28, %v8206_v33  ;;  %v8462_v34 = vadd.f32 %v4464_v22, %v8209_v25  ;;  %v4463_v7 = vmul.f32 %v8339_v45, %v8345_v46  ;;  %v4447_v6 = vmul.f32 %v8319_v63, %v8345_v46  ;;  %v9273_v22 = vld [vmem:[#allocation11_spill] sm:$0xff] }
 0xbf8   : > { %v8469_v60 = vadd.f32 %v4448_v11, %v8216_v23  ;;  %v4462_v36 = vmul.f32 %v8339_v45, %v8352_v3  ;;  %v4446_v39 = vmul.f32 %v8319_v63, %v8352_v3  ;;  %v4461_v33 = vmul.f32 %v8336_v13, %v8345_v46 }
 0xbf9   : > { %v8478_v25 = vadd.f32 %v4463_v7, %v8225_v15  ;;  %v8481_v55 = vadd.f32 %v4447_v6, %v8228_v49  ;;  %v4445_v56 = vmul.f32 %v8316_v35, %v8345_v46  ;;  %v4460_v23 = vmul.f32 %v8336_v13, %v8352_v3  ;;  %v9261_v49 = vld [vmem:[#allocation30_spill] sm:$0xff]  ;;  %v9265_v13 = vld [vmem:[#allocation35_spill] sm:$0xff] }
 0xbfa   : > { %v8488_v45 = vadd.f32 %v4462_v36, %v9255_v16  ;;  %v8491_v63 = vadd.f32 %v4446_v39, %v9257_v0  ;;  %v8494_v9 = vadd.f32 %v4461_v33, %v9259_v10  ;;  %v4444_v15 = vmul.f32 %v8316_v35, %v8352_v3  ;;  %v9275_v7 = vld [vmem:[#allocation39_spill] sm:$0xff]  ;;  %v9277_v36 = vld [vmem:[#allocation22_spill] sm:$0xff]  ;;  %v9281_v0 = vld [vmem:[#allocation4_spill] sm:$0xff] }
 0xbfb   : > { %v8499_v14 = vadd.f32 %v4445_v56, %v9261_v49  ;;  %v8502_v41 = vadd.f32 %v4460_v23, %v9263_v29  ;;  %v4459_v37 = vmul.f32 %v9265_v13, %v8345_v46  ;;  %v4443_v17 = vmul.f32 %v9266_v52, %v8345_v46  ;;  %v9278_v23 = vld [vmem:[#allocation2_spill] sm:$0xff]  ;;  %v9284_v49 = vld [vmem:[#allocation33_spill] sm:$0xff] }
 0xbfc   : > { %9256 = vst [vmem:[#allocation9_spill] sm:$0xff] %v8488_v45  ;;  %9258 = vst [vmem:[#allocation37_spill] sm:$0xff] %v8491_v63  ;;  %v8509_v38 = vadd.f32 %v4444_v15, %v9267_v43  ;;  %v4458_v32 = vmul.f32 %v9265_v13, %v8352_v3  ;;  %v4442_v35 = vmul.f32 %v9266_v52, %v8352_v3  ;;  %v9279_v3 = vld [vmem:[#allocation19_spill] sm:$0xff]  ;;  %v9282_v10 = vmov 0.0   ;;  %v9283_v15 = vld [vmem:[#allocation6_spill] sm:$0xff] }
 0xbfd   : > { %9260 = vst [vmem:[#allocation40_spill] sm:$0xff] %v8494_v9  ;;  %9262 = vst [vmem:[#allocation23_spill] sm:$0xff] %v8499_v14  ;;  %v8516_v27 = vadd.f32 %v4459_v37, %v9269_v54  ;;  %v8519_v28 = vadd.f32 %v4443_v17, %v9271_v4  ;;  %v8530_v16 = vsub.f32 %v9279_v3, %v9278_v23  ;;  %v9285_v13 = vld [vmem:[#allocation24_spill] sm:$0xff]  ;;  %v9286_v52 = vld [vmem:[#allocation17_spill] sm:$0xff] }
 0xbfe   : > { %9264 = vst [vmem:[#allocation36_spill] sm:$0xff] %v8502_v41  ;;  %9268 = vst [vmem:[#allocation7_spill] sm:$0xff] %v8509_v38  ;;  %v8522_v11 = vadd.f32 %v4458_v32, %v9273_v22  ;;  %v8525_v46 = vadd.f32 %v4442_v35, %v9275_v7  ;;  %v4855_v29 = vcombine.high %v9284_v49, %v9284_v49  ;;  %v9291_v38 = vld [vmem:[#allocation26_spill] sm:$0xff] }
 0xbff   : > { %9270 = vst [vmem:[#allocation8_spill] sm:$0xff] %v8516_v27  ;;  %9272 = vst [vmem:[#allocation3_spill] sm:$0xff] %v8519_v28  ;;  %v4862_v37 = vrot.slane %v9284_v49, %v9285_v13  ;;  %v4904_v17 = vcombine.high %v9286_v52, %v9286_v52  ;;  %v4911_v54 = vrot.slane %v9286_v52, %v9285_v13 }
 0xc00   : > { %9274 = vst [vmem:[#allocation16_spill] sm:$0xff] %v8522_v11  ;;  %9276 = vst [vmem:[#allocation38_spill] sm:$0xff] %v8525_v46  ;;  %v4869_v43 = vrot.slane %v4855_v29, %v9285_v13 }
 0xc01   : > { %9280 = vst [vmem:[#allocation13_spill] sm:$0xff] %v8530_v16  ;;  %v4870_v32 = vcombine.high %v4862_v37, %v4862_v37  ;;  %v4918_v35 = vrot.slane %v4904_v17, %v9285_v13  ;;  %v4878_v22 = vrot.slane %v4862_v37, %v9285_v13 }
 0xc02   : > { %v4871_v4 = vcombine.high %v4869_v43, %v4869_v43  ;;  %v4885_v23 = vrot.slane %v4869_v43, %v9285_v13 }
 0xc03   : > { %v4892_v7 = vrot.slane %v4870_v32, %v9285_v13  ;;  %v4934_v37 = vrot.slane %v4918_v35, %v9285_v13 }
 0xc04   : > { %v4899_v3 = vrot.slane %v4871_v4, %v9285_v13 }
 0xc05   : > { %v4902_v49 = vcombine.high %v4892_v7, %v4892_v7 }
 0xc06   : > { %v4903_v43 = vcombine.high %v4899_v3, %v4899_v3 }
 0xcaf   : > { %v4771_v6 = vpop.f32.mrf.mxu0 }
 0xcb0   : > { %v4772_v39 = vadd.f32 %v4771_v6, %v9277_v36  ;;  %v4920_v6 = vcombine.high %v4918_v35, %v4918_v35 }
 0xcb1   : > { %v6512_v33 = vpop.f32.mrf.mxu0 }
 0xcb2   : > { %v4775_v56 = vmax.f32 %v4772_v39, 0.0  ;;  %v9287_v39 = vld [vmem:[#allocation18_spill] sm:$0xff]  ;;  %v4948_v29 = vrot.slane %v4920_v6, %v9285_v13 }
 0xcb3   : > { %v4959_v33 = vrot.slane %v9287_v39, %v9285_v13  ;;  %v9288_v39 = vld [vmem:[#allocation25_spill] sm:$0xff] }
 0xcb4   : > { %6513 = vmatprep.subr.mxu0 %v4775_v56  ;;  %v8569_v4 = vrot.slane %v4892_v7, %v9288_v39  ;;  %v8575_v6 = vrot.slane %v4902_v49, %v9288_v39  ;;  %v8578_v35 = vrot.slane %v4885_v23, %v9288_v39  ;;  %v4999_v46 = vrot.slane %v4899_v3, %v9288_v39 }
 0xcb5   : > { %6514 = vmatpush3.msra.mxu0 %v4775_v56  ;;  %v4919_v56 = vcombine.high %v4911_v54, %v4911_v54  ;;  %v4967_v52 = vrot.slane %v4959_v33, %v9285_v13  ;;  %v4960_v32 = vcombine.high %v4959_v33, %v4959_v33  ;;  %v5027_v49 = vrot.slane %v4934_v37, %v9288_v39 }
 0xcb6   : > { %6516 = vmatmul.mubr.msk.f32.vlgmr.msra.gmra.mxu0 %vm907_vm8, %v9281_v0  ;;  %6531 = vmatprep.subr.mxu0 %v9282_v10  ;;  %v8566_v0 = vrot.slane %v4878_v22, %v9288_v39  ;;  %v5031_v3 = vrot.slane %v4948_v29, %v9288_v39 }
 0xcb7   : > { %6532 = vmatpush3.msk.msra.mxu0 %vm607_vm1, %v8530_v16  ;;  %6533 = vmatprep.mubr.msk.f32.mxu0 %vm6626_vm2, %v9282_v10  ;;  %v4941_v17 = vrot.slane %v4919_v56, %v9285_v13  ;;  %v4901_v16 = vcombine.high %v4885_v23, %v4885_v23  ;;  %v4952_v56 = vcombine.high %v4948_v29, %v4948_v29 }
 0xcb8   : > { %6536 = vmatprep.subr.mxu0 %v9282_v10  ;;  %9289 = vst [vmem:[#allocation14_spill] sm:$0xff] %v8566_v0  ;;  %v4975_v33 = vcombine.high %v4967_v52, %v4967_v52  ;;  %v4974_v28 = vrot.slane %v4960_v32, %v9285_v13  ;;  %v5007_v32 = vrot.slane %v4903_v43, %v9288_v39  ;;  %v9293_v43 = vld [vmem:[#allocation15_spill] sm:$0xff] }
 0xcb9   : > { %v4951_v11 = vcombine.high %v4941_v17, %v4941_v17  ;;  %v5003_v27 = vrot.slane %v4901_v16, %v9288_v39  ;;  %v8589_v23 = vrot.slane %v4941_v17, %v9288_v39 }
 0xcba   : > { %6534 = vmatmul.mubr.msk.f32.vlgmr.msra.gmra.mxu0 %vm593_vm0, %v9283_v15  ;;  %v4927_v15 = vrot.slane %v4911_v54, %v9285_v13  ;;  %v5051_v16 = vrot.slane %v4975_v33, %v9288_v39  ;;  %vm5794_vm0 = vcmask 392192  }
 0xcbb   : > { %6538 = vmatprep.mubr.msk.f32.mxu0 %vm6626_vm2, %v9282_v10  ;;  %v4900_v10 = vcombine.high %v4878_v22, %v4878_v22  ;;  %v4950_v22 = vcombine.high %v4934_v37, %v4934_v37  ;;  %v5039_v37 = vrot.slane %v4952_v56, %v9288_v39 }
 0xcbc   : > { %v4949_v36 = vcombine.high %v4927_v15, %v4927_v15 }
 0xcbd   : > { %v8572_v54 = vrot.slane %v4900_v10, %v9288_v39  ;;  %v8584_v10 = vrot.slane %v4927_v15, %v9288_v39  ;;  %v9292_v15 = vld [vmem:[#allocation27_spill] sm:$0xff]  ;;  %v5035_v17 = vrot.slane %v4950_v22, %v9288_v39 }
 0xcbe   : > { %v8592_v41 = vrot.slane %v4949_v36, %v9288_v39  ;;  %v5043_v36 = vrot.slane %v4967_v52, %v9288_v39 }
 0xcbf   : > { %9290 = vst [vmem:[#allocation5_spill] sm:$0xff] %v8584_v10 }
 0xd76   : > { %v6517_v7 = vpop.f32.mrf.mxu0 }
 0xd77   : > { %v4848_v0 = vadd.f32 %v6517_v7, %v9291_v38  ;;  %v5023_v7 = vrot.slane %v4951_v11, %v9288_v39  ;;  %v5047_v38 = vrot.slane %v4974_v28, %v9288_v39 }
 0xd78   : > { %v4842_v14 = vpop.f32.mrf.mxu0 }
 0xd79   : > { %v8597_v13 = vmax.f32 %v4848_v0, 0.0  ;;  %v4843_v10 = vadd.f32 %v4842_v14, %v9292_v15 }
 0xd7a   : > { %v5329_v29 = vpop.f32.mrf.mxu0 }
 0xd7b   : > { %v8605_v9 = vmax.f32 %v4843_v10, 0.0  ;;  %v5330_v63 = vadd.f32 %v5329_v29, %v9293_v43  ;;  %v5102_v0 = vmul.f32 %v5039_v37, %v8597_v13  ;;  %v5108_v33 = vmul.f32 %v5051_v16, %v8597_v13 }
 0xd7c   : > { %v6535_v14 = vpop.f32.mrf.mxu0  ;;  %v5086_v56 = vmul.f32 %v5007_v32, %v8597_v13  ;;  %v5100_v11 = vmul.f32 %v5035_v17, %v8597_v13  ;;  %v5106_v22 = vmul.f32 %v5047_v38, %v8597_v13  ;;  %v5084_v52 = vmul.f32 %v5003_v27, %v8597_v13 }
 0xd7d   : > { %v5333_v15 = vmax.f32 %v5330_v63, 0.0  ;;  %v8615_v28 = vadd.f32 %v5102_v0, %v8362_v21  ;;  %v8618_v10 = vadd.f32 %v5108_v33, %v8365_v20  ;;  %v5101_v29 = vmul.f32 %v5039_v37, %v8605_v9 }
 0xd7e   : > { %v8622_v43 = vadd.f32 %v5086_v56, %v8369_v53  ;;  %v5107_v14 = vmul.f32 %v5051_v16, %v8605_v9  ;;  %v5085_v39 = vmul.f32 %v5007_v32, %v8605_v9  ;;  %v8627_v45 = vadd.f32 %v5100_v11, %v8374_v18 }
 0xd7f   : > { %6537 = vmatpush3.msra.mxu0 %v5333_v15  ;;  %v8630_v63 = vadd.f32 %v5101_v29, %v8377_v8  ;;  %v8633_v21 = vadd.f32 %v5106_v22, %v8380_v26  ;;  %v8636_v20 = vadd.f32 %v5084_v52, %v8383_v48  ;;  %v5099_v53 = vmul.f32 %v5035_v17, %v8605_v9  ;;  %v9296_v22 = vld [vmem:[#allocation9_spill] sm:$0xff]  ;;  %v9299_v29 = vld [vmem:[#allocation40_spill] sm:$0xff] }
 0xd80   : > { %6539 = vmatmul.mubr.msk.f32.vlgmr.msra.gmra.mxu0 %vm907_vm8, %v7866_v1  ;;  %v8642_v32 = vadd.f32 %v5107_v14, %v8389_v2  ;;  %v8645_v18 = vadd.f32 %v5085_v39, %v8392_v30  ;;  %v5105_v8 = vmul.f32 %v5047_v38, %v8605_v9  ;;  %v5083_v16 = vmul.f32 %v5003_v27, %v8605_v9  ;;  %v9297_v52 = vld [vmem:[#allocation37_spill] sm:$0xff] }
 0xd81   : > { %6543 = vmatprep.mubr.msk.f32.mxu0 %vm907_vm8, %v7881_v12  ;;  %v8652_v26 = vadd.f32 %v5099_v53, %v8399_v19  ;;  %v5098_v48 = vmul.f32 %v5031_v3, %v8597_v13  ;;  %v5104_v1 = vmul.f32 %v5043_v36, %v8597_v13  ;;  %v5082_v2 = vmul.f32 %v4999_v46, %v8597_v13 }
 0xd82   : > { %v8658_v15 = vadd.f32 %v5105_v8, %v8405_v42  ;;  %v8661_v30 = vadd.f32 %v5083_v16, %v8408_v59  ;;  %v5097_v38 = vmul.f32 %v5031_v3, %v8605_v9  ;;  %v5103_v27 = vmul.f32 %v5043_v36, %v8605_v9  ;;  %v9302_v8 = vld [vmem:[#allocation36_spill] sm:$0xff] }
 0xd83   : > { %v8666_v12 = vadd.f32 %v5098_v48, %v8413_v58  ;;  %v8669_v19 = vadd.f32 %v5104_v1, %v8416_v61  ;;  %v8672_v39 = vadd.f32 %v5082_v2, %v8419_v50  ;;  %v5081_v37 = vmul.f32 %v4999_v46, %v8605_v9  ;;  %v9304_v1 = vld [vmem:[#allocation14_spill] sm:$0xff] }
 0xd84   : > { %v8676_v42 = vadd.f32 %v5097_v38, %v8423_v57  ;;  %v8679_v59 = vadd.f32 %v5103_v27, %v8426_v24  ;;  %v5096_v3 = vmul.f32 %v5027_v49, %v8597_v13  ;;  %v5080_v58 = vmul.f32 %v8578_v35, %v8597_v13  ;;  %v9305_v38 = vld [vmem:[#allocation7_spill] sm:$0xff] }
 0xd85   : > { %v8685_v17 = vadd.f32 %v5081_v37, %v8432_v62  ;;  %v5095_v61 = vmul.f32 %v5027_v49, %v8605_v9  ;;  %v5079_v50 = vmul.f32 %v8578_v35, %v8605_v9  ;;  %v5094_v46 = vmul.f32 %v5023_v7, %v8597_v13 }
 0xd86   : > { %v8692_v57 = vadd.f32 %v5096_v3, %v8439_v5  ;;  %v8695_v24 = vadd.f32 %v5080_v58, %v8442_v47  ;;  %v5078_v36 = vmul.f32 %v8575_v6, %v8597_v13  ;;  %v5093_v0 = vmul.f32 %v5023_v7, %v8605_v9  ;;  %v9307_v3 = vld [vmem:[#allocation8_spill] sm:$0xff] }
 0xd87   : > { %v8701_v62 = vadd.f32 %v5095_v61, %v8448_v40  ;;  %v8704_v49 = vadd.f32 %v5079_v50, %v8451_v51  ;;  %v8707_v35 = vadd.f32 %v5094_v46, %v8454_v44  ;;  %v5077_v5 = vmul.f32 %v8575_v6, %v8605_v9  ;;  %v9309_v61 = vld [vmem:[#allocation3_spill] sm:$0xff]  ;;  %v9311_v46 = vld [vmem:[#allocation16_spill] sm:$0xff] }
 0xd88   : > { %v8712_v47 = vadd.f32 %v5078_v36, %v8459_v31  ;;  %v8715_v33 = vadd.f32 %v5093_v0, %v8462_v34  ;;  %v5092_v7 = vmul.f32 %v8592_v41, %v8597_v13  ;;  %v5076_v40 = vmul.f32 %v8572_v54, %v8597_v13  ;;  %v9313_v0 = vld [vmem:[#allocation38_spill] sm:$0xff] }
 0xd89   : > { %v8722_v51 = vadd.f32 %v5077_v5, %v8469_v60  ;;  %v5091_v44 = vmul.f32 %v8592_v41, %v8605_v9  ;;  %v5075_v6 = vmul.f32 %v8572_v54, %v8605_v9  ;;  %v5090_v31 = vmul.f32 %v8589_v23, %v8597_v13 }
 0xd8a   : > { %v8731_v34 = vadd.f32 %v5092_v7, %v8478_v25  ;;  %v8734_v56 = vadd.f32 %v5076_v40, %v8481_v55  ;;  %v5074_v11 = vmul.f32 %v8569_v4, %v8597_v13  ;;  %v5089_v60 = vmul.f32 %v8589_v23, %v8605_v9  ;;  %v9300_v55 = vld [vmem:[#allocation23_spill] sm:$0xff]  ;;  %v9303_v23 = vld [vmem:[#allocation5_spill] sm:$0xff]  ;;  %v9315_v7 = vld [vmem:[#allocation22_spill] sm:$0xff] }
 0xd8b   : > { %9294 = vst [vmem:[#allocation28_spill] sm:$0xff] %v8722_v51  ;;  %v8741_v41 = vadd.f32 %v5091_v44, %v9296_v22  ;;  %v8744_v54 = vadd.f32 %v5075_v6, %v9297_v52  ;;  %v8747_v14 = vadd.f32 %v5090_v31, %v9299_v29  ;;  %v5073_v25 = vmul.f32 %v8569_v4, %v8605_v9  ;;  %v5777_v31 = vld [vmem:[%s8991_s12 + $0x8] sm:$0xff]  ;;  %v9318_v52 = vld [vmem:[#allocation20_spill] sm:$0xff] }
 0xd8c   : > { %9295 = vst [vmem:[#allocation29_spill] sm:$0xff] %v8734_v56  ;;  %v8752_v53 = vadd.f32 %v5074_v11, %v9300_v55  ;;  %v8755_v16 = vadd.f32 %v5089_v60, %v9302_v8  ;;  %v5088_v48 = vmul.f32 %v9303_v23, %v8597_v13  ;;  %v5072_v2 = vmul.f32 %v9304_v1, %v8597_v13  ;;  %v5778_v11 = vld [vmem:[%s8991_s12 + $0x10] sm:$0xff]  ;;  %v9317_v60 = vld [vmem:[#allocation13_spill] sm:$0xff] }
 0xd8d   : > { %9298 = vst [vmem:[#allocation30_spill] sm:$0xff] %v8744_v54  ;;  %v8762_v27 = vadd.f32 %v5073_v25, %v9305_v38  ;;  %v5087_v37 = vmul.f32 %v9303_v23, %v8605_v9  ;;  %v5071_v4 = vmul.f32 %v9304_v1, %v8605_v9  ;;  %v9316_v9 = vld [vmem:[#allocation4_spill] sm:$0xff]  ;;  %5865 = vmatprep.mubr.f32.mxu1 %v5777_v31  ;;  %v9320_v38 = vld [vmem:[#allocation21_spill] sm:$0xff] }
 0xd8e   : > { %9301 = vst [vmem:[#allocation31_spill] sm:$0xff] %v8752_v53  ;;  %v8769_v58 = vadd.f32 %v5088_v48, %v9307_v3  ;;  %v8772_v50 = vadd.f32 %v5072_v2, %v9309_v61  ;;  %v5484_v22 = vcombine.high %v9317_v60, %v9317_v60  ;;  %v5533_v29 = vcombine.high %v9318_v52, %v9318_v52  ;;  %v9319_v25 = vld [vmem:[#allocation24_spill] sm:$0xff]  ;;  %v9324_v53 = vld [vmem:[#allocation27_spill] sm:$0xff] }
 0xd8f   : > { %9306 = vst [vmem:[#allocation35_spill] sm:$0xff] %v8762_v27  ;;  %v8775_v36 = vadd.f32 %v5087_v37, %v9311_v46  ;;  %v8778_v13 = vadd.f32 %v5071_v4, %v9313_v0  ;;  %v5491_v23 = vrot.slane %v9317_v60, %v9319_v25  ;;  %v5540_v1 = vrot.slane %v9318_v52, %v9319_v25 }
 0xd90   : > { %9308 = vst [vmem:[#allocation34_spill] sm:$0xff] %v8769_v58  ;;  %9310 = vst [vmem:[#allocation12_spill] sm:$0xff] %v8772_v50  ;;  %v5498_v55 = vrot.slane %v5484_v22, %v9319_v25  ;;  %v5547_v8 = vrot.slane %v5533_v29, %v9319_v25  ;;  %v5588_v37 = vrot.slane %v9320_v38, %v9319_v25 }
 0xd91   : > { %9312 = vst [vmem:[#allocation32_spill] sm:$0xff] %v8775_v36  ;;  %9314 = vst [vmem:[#allocation10_spill] sm:$0xff] %v8778_v13  ;;  %v5499_v4 = vcombine.high %v5491_v23, %v5491_v23  ;;  %v8803_v3 = vrot.slane %v5491_v23, %v9319_v25  ;;  %v5548_v0 = vcombine.high %v5540_v1, %v5540_v1  ;;  %v9322_v23 = vld [vmem:[#allocation25_spill] sm:$0xff] }
 0xd92   : > { %v5500_v48 = vcombine.high %v5498_v55, %v5498_v55  ;;  %v5549_v2 = vcombine.high %v5547_v8, %v5547_v8  ;;  %v5514_v61 = vrot.slane %v5498_v55, %v9319_v25  ;;  %v8816_v31 = vrot.slane %v5540_v1, %v9319_v25 }
 0xd93   : > { %9321 = vst [vmem:[#allocation11_spill] sm:$0xff] %v8803_v3  ;;  %v8819_v22 = vrot.slane %v5548_v0, %v9319_v25  ;;  %v9323_v0 = vld [vmem:[#allocation26_spill] sm:$0xff] }
 0xd94   : > { %v5528_v46 = vrot.slane %v5500_v48, %v9319_v25  ;;  %v8828_v1 = vrot.slane %v5514_v61, %v9322_v23 }
 0xd96   : > { %v5532_v60 = vcombine.high %v5528_v46, %v5528_v46 }
 0xe40   : > { %v5400_v5 = vpop.f32.mrf.mxu0 }
 0xe41   : > { %v5401_v40 = vadd.f32 %v5400_v5, %v9315_v7  ;;  %v5563_v5 = vrot.slane %v5547_v8, %v9319_v25  ;;  %v5577_v7 = vrot.slane %v5549_v2, %v9319_v25 }
 0xe42   : > { %v6540_v44 = vpop.f32.mrf.mxu0 }
 0xe43   : > { %v5404_v6 = vmax.f32 %v5401_v40, 0.0  ;;  %v5596_v40 = vrot.slane %v5588_v37, %v9319_v25  ;;  %v8811_v44 = vrot.slane %v5499_v4, %v9319_v25  ;;  %v5579_v52 = vcombine.high %v5563_v5, %v5563_v5 }
 0xe44   : > { %v5581_v29 = vcombine.high %v5577_v7, %v5577_v7  ;;  %v8833_v4 = vrot.slane %v5563_v5, %v9322_v23  ;;  %v5660_v8 = vrot.slane %v5577_v7, %v9322_v23 }
 0xe45   : > { %6541 = vmatprep.subr.mxu0 %v5404_v6  ;;  %v5604_v55 = vcombine.high %v5596_v40, %v5596_v40 }
 0xe46   : > { %6542 = vmatpush3.msra.mxu0 %v5404_v6  ;;  %v5529_v6 = vcombine.high %v8803_v3, %v8803_v3  ;;  %v5668_v5 = vrot.slane %v5581_v29, %v9322_v23 }
 0xe47   : > { %6544 = vmatmul.mubr.msk.f32.vlgmr.msra.gmra.mxu0 %vm907_vm8, %v9316_v9  ;;  %v5589_v9 = vcombine.high %v5588_v37, %v5588_v37  ;;  %v5578_v37 = vcombine.high %v8816_v31, %v8816_v31 }
 0xe48   : > { %6558 = vmatprep.mubr.msk.f32.mxu0 %vm5794_vm0, %v5778_v11  ;;  %v5530_v11 = vcombine.high %v5514_v61, %v5514_v61  ;;  %v8824_v48 = vrot.slane %v5529_v6, %v9322_v23  ;;  %v5636_v6 = vrot.slane %v5532_v60, %v9322_v23  ;;  %v5680_v61 = vrot.slane %v5604_v55, %v9322_v23 }
 0xe49   : > { %v5603_v2 = vrot.slane %v5589_v9, %v9319_v25  ;;  %v5664_v25 = vrot.slane %v5579_v52, %v9322_v23  ;;  %v5628_v60 = vrot.slane %v5528_v46, %v9322_v23 }
 0xe4a   : > { %v5632_v9 = vrot.slane %v5530_v11, %v9322_v23 }
 0xf07   : > { %v6545_v38 = vpop.f32.mrf.mxu0 }
 0xf08   : > { %v5477_v13 = vadd.f32 %v6545_v38, %v9323_v0  ;;  %v5672_v38 = vrot.slane %v5596_v40, %v9322_v23  ;;  %v5676_v0 = vrot.slane %v5603_v2, %v9322_v23 }
 0xf09   : > { %v5471_v50 = vpop.f32.mrf.mxu0 }
 0xf0a   : > { %v8842_v27 = vmax.f32 %v5477_v13, 0.0  ;;  %v5472_v54 = vadd.f32 %v5471_v50, %v9324_v53 }
 0xf0c   : > { %v8850_v3 = vmax.f32 %v5472_v54, 0.0  ;;  %v5731_v11 = vmul.f32 %v5668_v5, %v8842_v27  ;;  %v5737_v52 = vmul.f32 %v5680_v61, %v8842_v27  ;;  %v5715_v13 = vmul.f32 %v5636_v6, %v8842_v27 }
 0xf0d   : > { %v5729_v53 = vmul.f32 %v5664_v25, %v8842_v27  ;;  %v5735_v50 = vmul.f32 %v5676_v0, %v8842_v27  ;;  %v5713_v40 = vmul.f32 %v5632_v9, %v8842_v27  ;;  %v5727_v29 = vmul.f32 %v5660_v8, %v8842_v27 }
 0xf0e   : > { %v5769_v7 = vadd.f32 %v5731_v11, %v8615_v28  ;;  %v5775_v46 = vadd.f32 %v5737_v52, %v8618_v10  ;;  %v5753_v54 = vadd.f32 %v5715_v13, %v8622_v43  ;;  %v5730_v55 = vmul.f32 %v5668_v5, %v8850_v3 }
 0xf0f   : > { %v5736_v2 = vmul.f32 %v5680_v61, %v8850_v3  ;;  %v5714_v56 = vmul.f32 %v5636_v6, %v8850_v3  ;;  %v5767_v36 = vadd.f32 %v5729_v53, %v8627_v45  ;;  %v5773_v58 = vadd.f32 %v5735_v50, %v8633_v21 }
 0xf10   : > { %6271 = vmatprep.subr.mxu1 %v5769_v7  ;;  %6546 = vmatprep.subr.mxu0 %v5775_v46  ;;  %v5768_v51 = vadd.f32 %v5730_v55, %v8630_v63  ;;  %v5751_v28 = vadd.f32 %v5713_v40, %v8636_v20  ;;  %v5728_v10 = vmul.f32 %v5664_v25, %v8850_v3 }
 0xf11   : > { %6272 = vmatpush3.msra.mxu1 %v5753_v54  ;;  %6547 = vmatpush3.msra.mxu0 %v5775_v46  ;;  %v5774_v43 = vadd.f32 %v5736_v2, %v8642_v32  ;;  %v5752_v61 = vadd.f32 %v5714_v56, %v8645_v18  ;;  %v5734_v6 = vmul.f32 %v5676_v0, %v8850_v3  ;;  %v9327_v2 = vld [vmem:[#allocation28_spill] sm:$0xff] }
 0xf12   : > { %6273 = vmatprep.subr.mxu1 %v5768_v51  ;;  %v5766_v45 = vadd.f32 %v5728_v10, %v8652_v26  ;;  %v5712_v21 = vmul.f32 %v5632_v9, %v8850_v3  ;;  %v5765_v5 = vadd.f32 %v5727_v29, %v8666_v12  ;;  %v5733_v63 = vmul.f32 %v5672_v38, %v8842_v27  ;;  %v9328_v10 = vld [vmem:[#allocation34_spill] sm:$0xff] }
 0xf13   : > { %6548 = vmatprep.subr.mxu0 %v5774_v43  ;;  %6274 = vmatpush3.msra.mxu1 %v5752_v61  ;;  %v5772_v20 = vadd.f32 %v5734_v6, %v8658_v15  ;;  %v5711_v25 = vmul.f32 %v5628_v60, %v8842_v27  ;;  %v5726_v32 = vmul.f32 %v5660_v8, %v8850_v3 }
 0xf14   : > { %v5648_v18 = vrot.slane %v5578_v37, %v9322_v23  ;;  %6549 = vmatpush3.msra.mxu0 %v5774_v43  ;;  %6275 = vmatprep.subr.mxu1 %v5767_v36  ;;  %v5771_v26 = vadd.f32 %v5733_v63, %v8669_v19  ;;  %v5732_v51 = vmul.f32 %v5672_v38, %v8850_v3 }
 0xf15   : > { %6550 = vmatprep.subr.mxu0 %v5773_v58  ;;  %6276 = vmatpush3.msra.mxu1 %v5751_v28  ;;  %v5750_v12 = vadd.f32 %v5712_v21, %v8661_v30  ;;  %v5764_v56 = vadd.f32 %v5726_v32, %v8676_v42  ;;  %v5710_v15 = vmul.f32 %v5628_v60, %v8850_v3 }
 0xf16   : > { %6551 = vmatpush3.msra.mxu0 %v5773_v58  ;;  %6277 = vmatprep.subr.mxu1 %v5766_v45  ;;  %v5770_v8 = vadd.f32 %v5732_v51, %v8679_v59  ;;  %v5725_v37 = vmul.f32 %v8833_v4, %v8842_v27  ;;  %v9325_v19 = vcombine.high %v8819_v22, %v8819_v22  ;;  %v9331_v45 = vld [vmem:[#allocation11_spill] sm:$0xff] }
 0xf17   : > { %6552 = vmatprep.subr.mxu0 %v5772_v20  ;;  %6278 = vmatpush3.msra.mxu1 %v5750_v12  ;;  %v5749_v30 = vadd.f32 %v5711_v25, %v8672_v39  ;;  %v5709_v42 = vmul.f32 %v8828_v1, %v8842_v27  ;;  %v5724_v58 = vmul.f32 %v8833_v4, %v8850_v3 }
 0xf18   : > { %v5652_v36 = vrot.slane %v9325_v19, %v9322_v23  ;;  %6553 = vmatpush3.msra.mxu0 %v5772_v20  ;;  %6279 = vmatprep.subr.mxu1 %v5765_v5  ;;  %v5763_v59 = vadd.f32 %v5725_v37, %v8692_v57  ;;  %v9326_v38 = vcombine.high %v8811_v44, %v8811_v44  ;;  %v9332_v5 = vld [vmem:[#allocation30_spill] sm:$0xff]  ;;  %v9333_v20 = vld [vmem:[#allocation31_spill] sm:$0xff] }
 0xf19   : > { %6554 = vmatprep.subr.mxu0 %v5771_v26  ;;  %6280 = vmatpush3.msra.mxu1 %v5749_v30  ;;  %v5748_v39 = vadd.f32 %v5710_v15, %v8685_v17  ;;  %v5762_v60 = vadd.f32 %v5724_v58, %v8701_v62  ;;  %v5708_v4 = vmul.f32 %v8828_v1, %v8850_v3 }
 0xf1a   : > { %v5723_v9 = vmul.f32 %v5652_v36, %v8842_v27  ;;  %v5620_v0 = vrot.slane %v9326_v38, %v9322_v23  ;;  %v5644_v11 = vrot.slane %v8819_v22, %v9322_v23  ;;  %6555 = vmatpush3.msra.mxu0 %v5771_v26  ;;  %6281 = vmatprep.subr.mxu1 %v5764_v56  ;;  %v9336_v56 = vld [vmem:[#allocation10_spill] sm:$0xff] }
 0xf1b   : > { %v5722_v52 = vmul.f32 %v5652_v36, %v8850_v3  ;;  %6556 = vmatprep.subr.mxu0 %v5770_v8  ;;  %6282 = vmatpush3.msra.mxu1 %v5748_v39  ;;  %v5747_v13 = vadd.f32 %v5709_v42, %v8695_v24  ;;  %v5721_v62 = vmul.f32 %v5648_v18, %v8842_v27  ;;  %v5787_v36 = vpop.permute.xlu1 %5786 }
 0xf1c   : > { %v5761_v57 = vadd.f32 %v5723_v9, %v8707_v35  ;;  %v5707_v17 = vmul.f32 %v5620_v0, %v8842_v27  ;;  %v5640_v1 = vrot.slane %v8816_v31, %v9322_v23  ;;  %6557 = vmatpush3.msra.mxu0 %v5770_v8  ;;  %6283 = vmatprep.subr.mxu1 %v5763_v59  ;;  %v5776_v8 = vld [vmem:[%s8991_s12] sm:$0xff] }
 0xf1d   : > { %v5760_v22 = vadd.f32 %v5722_v52, %v8715_v33  ;;  %v5720_v53 = vmul.f32 %v5648_v18, %v8850_v3  ;;  %6284 = vmatpush3.msra.mxu1 %v5747_v13  ;;  %v5746_v35 = vadd.f32 %v5708_v4, %v8704_v49  ;;  %v5706_v50 = vmul.f32 %v5620_v0, %v8850_v3  ;;  %v5781_v33 = vld [vmem:[%s8991_s12 + $0x28] sm:$0xff] }
 0xf1e   : > { %v5759_v24 = vadd.f32 %v5721_v62, %v8731_v34  ;;  %v5719_v40 = vmul.f32 %v5644_v11, %v8842_v27  ;;  %6285 = vmatprep.subr.mxu1 %v5762_v60  ;;  %v5718_v31 = vmul.f32 %v5644_v11, %v8850_v3  ;;  %v5745_v7 = vadd.f32 %v5707_v17, %v8712_v47  ;;  %v9334_v18 = vld [vmem:[#allocation35_spill] sm:$0xff] }
 0xf1f   : > { %v5758_v29 = vadd.f32 %v5720_v53, %v8741_v41  ;;  %6286 = vmatpush3.msra.mxu1 %v5746_v35  ;;  %v5705_v49 = vmul.f32 %v8824_v48, %v8842_v27  ;;  %v5717_v34 = vmul.f32 %v5640_v1, %v8842_v27  ;;  %v5612_v54 = vrot.slane %v8811_v44, %v9322_v23  ;;  %v9330_v44 = vld [vmem:[#allocation29_spill] sm:$0xff]  ;;  %v5792_v60 = vpop.permute.xlu1 %5791 }
 0xf20   : > { %v5757_v46 = vadd.f32 %v5719_v40, %v8747_v14  ;;  %6287 = vmatprep.subr.mxu1 %v5761_v57  ;;  %v5756_v41 = vadd.f32 %v5718_v31, %v8755_v16  ;;  %v5716_v55 = vmul.f32 %v5640_v1, %v8850_v3  ;;  %v5744_v28 = vadd.f32 %v5706_v50, %v9327_v2  ;;  %v9329_v14 = vld [vmem:[#allocation32_spill] sm:$0xff] }
 0xf21   : > { %6288 = vmatpush3.msra.mxu1 %v5745_v7  ;;  %v5704_v47 = vmul.f32 %v8824_v48, %v8850_v3  ;;  %v5755_v43 = vadd.f32 %v5717_v34, %v9328_v10  ;;  %6559 = vmatmul.mubr.msk.f32.vlgmr.msra.gmra.mxu0 %vm5794_vm0, %v5781_v33  ;;  %v5743_v6 = vadd.f32 %v5705_v49, %v9330_v44 }
 0xf22   : > { %6289 = vmatprep.subr.mxu1 %v5760_v22  ;;  %v5754_v61 = vadd.f32 %v5716_v55, %v9329_v14  ;;  %v5703_v16 = vmul.f32 %v5612_v54, %v8842_v27  ;;  %v5608_v21 = vrot.slane %v9331_v45, %v9322_v23  ;;  %v5702_v48 = vmul.f32 %v5612_v54, %v8850_v3  ;;  %v9335_v23 = vld [vmem:[#allocation12_spill] sm:$0xff] }
 0xf23   : > { %6290 = vmatpush3.msra.mxu1 %v5744_v28  ;;  %v5742_v63 = vadd.f32 %v5704_v47, %v9332_v5 }
 0xf24   : > { %6291 = vmatprep.subr.mxu1 %v5759_v24  ;;  %v5741_v25 = vadd.f32 %v5703_v16, %v9333_v20  ;;  %v5701_v32 = vmul.f32 %v5608_v21, %v8842_v27  ;;  %v5740_v26 = vadd.f32 %v5702_v48, %v9334_v18  ;;  %v5700_v51 = vmul.f32 %v5608_v21, %v8850_v3  ;;  %v5780_v27 = vld [vmem:[%s8991_s12 + $0x20] sm:$0xff]  ;;  %v5779_v3 = vld [vmem:[%s8991_s12 + $0x18] sm:$0xff] }
 0xf25   : > { %6292 = vmatpush3.msra.mxu1 %v5743_v6 }
 0xf26   : > { %6293 = vmatprep.subr.mxu1 %v5758_v29  ;;  %v5739_v12 = vadd.f32 %v5701_v32, %v9335_v23  ;;  %v5738_v15 = vadd.f32 %v5700_v51, %v9336_v56 }
 0xf27   : > { %6294 = vmatpush3.msra.mxu1 %v5742_v63 }
 0xf28   : > { %6295 = vmatprep.subr.mxu1 %v5757_v46 }
 0xf29   : > { %6296 = vmatpush3.msra.mxu1 %v5741_v25 }
 0xf2a   : > { %6297 = vmatprep.subr.mxu1 %v5756_v41 }
 0xf2b   : > { %6298 = vmatpush3.msra.mxu1 %v5740_v26 }
 0xf2c   : > { %6299 = vmatprep.subr.mxu1 %v5755_v43 }
 0xf2d   : > { %6300 = vmatpush3.msra.mxu1 %v5739_v12 }
 0xf2e   : > { %6301 = vmatprep.subr.mxu1 %v5754_v61 }
 0xf2f   : > { %6302 = vmatpush3.msra.mxu1 %v5738_v15 }
 0xf30   : > { %5866 = vmatmul.mubr.f32.vlgmr.msra.gmra.mxu1 %v5776_v8 }
 0xf31   : > { %5870 = vmatprep.mubr.f32.mxu1 %v5780_v27 }
 0xf34   : > { %5871 = vmatmul.mubr.f32.gmra.mxu1 %v5779_v3 }
 0xfe1   : > { %v6560_v19 = vpop.f32.mrf.mxu0 }
 0xfe3   : > { %v5942_v59 = vpop.f32.mrf.mxu0 }
 0xff0   : > { %v6303_v37 = vpop.f32.mrf.mxu1 }
 0xff2   : > { %v6304_v30 = vpop.f32.mrf.mxu1 }
 0xff3   : > { %v6305_v42 = vadd.f32 %v6304_v30, %v6303_v37 }
 0xff4   : > { %v6306_v58 = vpop.f32.mrf.mxu1 }
 0xff5   : > { %v5868_v9 = vadd.f32 %v6305_v42, %v5787_v36 }
 0xff6   : > { %v6307_v38 = vpop.f32.mrf.mxu1 }
 0xff7   : > { %v6308_v0 = vadd.f32 %v6307_v38, %v6306_v58  ;;  %v5943_v39 = vadd.f32 %v5942_v59, %v5868_v9 }
 0xff9   : > { %v5873_v4 = vadd.f32 %v6308_v0, %v5792_v60  ;;  %5951 = vst.msk [vmem:[%s552_s25] sm:$0xff] %vm697_vm3, %v5943_v39 }
 0xffb   : > { %v5948_v11 = vadd.f32 %v6560_v19, %v5873_v4 }
 0xffd   : > { %5952 = vst.msk [vmem:[%s552_s25 + $0x8] sm:$0xff] %vm697_vm3, %v5948_v11 }
 0xffe PF: > { %s24_s15 = sadd.s32 1, %s6622_s15   ;;  %s9337_s29 = smov %s6618_s30 }
 0xfff   : > { %p21_p5 = scmp.ge.s32.totalorder %s24_s15, 4   ;;  %s9338_s30 = smov %s9340_s16 }
0x1001   :  { %23 = sbr.rel (!%p21_p5) target bundleno = 2 (0x2), region = 115 }

// kernel: forward.3
= control target key start
LH: loop header
LB: loop body
LE: loop exit
PB: predicated region body
PF: predicated region fallthrough
CT: control target
= control target key end

     0   :  { %s6045_s27 = smov 0   ;;  %s6047_s28 = smov 0   ;;  %s8068_s0 = inlined_call_operand.vmem [shape: f32[2,16,3], index: 0, kind: input, shape index: {}]   ;;  %s8069_s1 = inlined_call_operand.vmem [shape: f32[2,3,16], index: 1, kind: input, shape index: {}, may-alias: {1,2}]   ;;  %s8070_s2 = inlined_call_operand.vmem [shape: f32[2,3,16], index: 2, kind: input, shape index: {}, may-alias: {1,2}]   ;;  %s8071_s3 = inlined_call_operand.vmem [shape: f32[2,13,16], index: 3, kind: input, shape index: {}]   ;;  %s8072_s4 = inlined_call_operand.vmem [shape: f32[13,1], index: 4, kind: input, shape index: {}]   ;;  %s8073_s5 = inlined_call_operand.vmem [shape: f32[13,1], index: 5, kind: input, shape index: {}]   ;;  %s8074_s6 = inlined_call_operand.vmem [shape: f32[8,3], index: 6, kind: input, shape index: {}]   ;;  %s8075_s7 = inlined_call_operand.vmem [shape: f32[8,1], index: 7, kind: input, shape index: {}]   ;;  %s8076_s8 = inlined_call_operand.vmem [shape: f32[8,8], index: 8, kind: input, shape index: {}]   ;;  %s8077_s9 = inlined_call_operand.vmem [shape: f32[8,1], index: 9, kind: input, shape index: {}]   ;;  %s8078_s10 = inlined_call_operand.vmem [shape: f32[16,8], index: 10, kind: input, shape index: {}]   ;;  %s8079_s11 = inlined_call_operand.vmem [shape: f32[16,1], index: 11, kind: input, shape index: {}]   ;;  %s8080_s12 = inlined_call_operand.vmem [shape: f32[16,256], index: 12, kind: input, shape index: {}]   ;;  %s8081_s13 = inlined_call_operand.vmem [shape: f32[16,1], index: 13, kind: input, shape index: {}]   ;;  %s8082_s14 = inlined_call_operand.vmem [shape: f32[2,16,16], index: 14, kind: output, shape index: {}]  }
   0x1   :  { %s6049_s29 = smov 0  }
   0x2 LB: > { %s36_s30 = sadd.s32 1, %s5959_s28  ;;  %p5507_p0 = scmp.ge.s32.totalorder %s5963_s29, 1  ;;  %s5963_s29 = sphi %s6049_s29, %s24_s29   ;;  %s5959_s28 = sphi %s6047_s28, %s8376_s28   ;;  %s5955_s27 = sphi %s6045_s27, %s8375_s27  }
   0x3   : > { %p38_p1 = scmp.ge.s32.totalorder %s36_s30, 2  ;;  %p459_p2 = scmp.lt.s32.totalorder %s5963_s29, 3 }
   0x5   : > { %s8378_s30 = smov (%p38_p1, %s36_s30), 0  ;;  %p460_p3 = pnand %p5507_p0, %p459_p2 }
   0x7   : > { %463 = sbr.rel (%p460_p3) target bundleno = 4492 (0x118c), region = 76 }
   0xc   : > { %p524_p4 = scmp.lt.s32.totalorder %s5955_s27, 1  ;;  %vm561_vm0 = vcmask 23552   ;;  %vm575_vm1 = vcmask 1042432   ;;  %vm665_vm2 = vcmask 130048   ;;  %v662_v25 = vlaneseq }
   0xd   : > { %v8089_v44 = vmov 1.0  }
   0xe   : > { %s8380_s27 = smov (!%p524_p4, %s5955_s27), 1  ;;  %v6098_v28 = vshrl.u32 %v662_v25, 7 }
   0xf   : > { %s5510_s15 = sshll.u32 %s8380_s27, 2  ;;  %s6063_s16 = sshll.u32 %s8380_s27, 4 }
  0x10   : > { %s532_s19 = scalar_lea.vmem %s8069_s1, %s5510_s15  ;;  %s539_s4 = scalar_lea.vmem %s8070_s2, %s5510_s15  ;;  %v6101_v31 = vadd.s32 8, %v6098_v28 }
  0x11   : > { %v555_v0 = vld [vmem:[%s532_s19] sm:$0x7]  ;;  %s528_s23 = scalar_lea.vmem %s8068_s0, %s6063_s16  ;;  %s544_s26 = scalar_lea.vmem %s8071_s3, %s6063_s16 }
  0x12   : > { %v6071_v1 = vld [vmem:[%s539_s4] sm:$0x7]  ;;  %v554_v4 = vld [vmem:[%s528_s23 + $0x8] sm:$0xff] }
  0x13   : > { %v568_v2 = vmul.f32 -2.0, %v6071_v1  ;;  %v553_v3 = vld [vmem:[%s528_s23] sm:$0xff]  ;;  %v558_v6 = vld [vmem:[%s544_s26 + $0x8] sm:$0x1f]  ;;  %v560_v9 = vmul.f32 %v554_v4, %v554_v4  ;;  %s552_s23 = scalar_lea.vmem %s8082_s14, %s6063_s16 }
  0x14   : > { %v557_v5 = vld [vmem:[%s544_s26] sm:$0xff]  ;;  %v559_v7 = vmul.f32 %v553_v3, %v553_v3  ;;  %5727 = vmatprep.mubr.msk.f32.mxu0 %vm561_vm0, %v553_v3  ;;  %v657_v10 = vrot.slane %v558_v6, 5 }
  0x15   : > { %v656_v8 = vrot.slane %v557_v5, 5  ;;  %5725 = vmatprep.subr.msk.mxu0 %vm575_vm1, %v568_v2  ;;  %v565_v14 = vsel %vm561_vm0, %v560_v9, 0.0 }
  0x16   : > { %5726 = vmatpush3.msk.msra.mxu0 %vm575_vm1, %v568_v2  ;;  %v562_v12 = vsel %vm561_vm0, %v559_v7, 0.0 }
  0x17   : > { %v6086_v11 = vsel %vm575_vm1, %v555_v0, %v656_v8  ;;  %v6090_v13 = vsel %vm575_vm1, %v656_v8, %v657_v10  ;;  %5728 = vmatmul.mubr.msk.f32.vlgmr.msra.gmra.mxu0 %vm561_vm0, %v554_v4  ;;  %563 = vadd.xlane.f32.xlu0 %v562_v12 }
  0x18   : > { %8180 = vst [vmem:[#allocation2_spill] sm:$0xff] %v6086_v11  ;;  %8181 = vst [vmem:[#allocation3_spill] sm:$0xff] %v6090_v13  ;;  %5734 = vmatprep.mubr.msk.f32.mxu0 %vm665_vm2, %v6086_v11 }
  0x1b   : > { %566 = vadd.xlane.f32.xlu0 %v565_v14 }
  0xa0   : > { %v564_v15 = vpop.xlane.xlu0 %563 }
  0xa4   : > { %v567_v16 = vpop.xlane.xlu0 %566 }
  0xd7   : > { %v5729_v17 = vpop.f32.mrf.mxu0 }
  0xd8   : > { %v651_v18 = vadd.f32 %v5729_v17, %v567_v16 }
  0xd9   : > { %v645_v19 = vpop.f32.mrf.mxu0 }
  0xda   : > { %v646_v20 = vadd.f32 %v645_v19, %v564_v15  ;;  %v667_v21 = vsel %vm665_vm2, %v651_v18, inf }
  0xdc   : > { %v666_v22 = vsel %vm665_vm2, %v646_v20, inf }
  0xdd   : > { %v668_v23 = vmin.f32 %v666_v22, %v667_v21 }
  0xdf   : > { %v669_v24 = vrot.slane %v668_v23, 4 }
  0xe1   : > { %v670_v26 = vmin.f32 %v668_v23, %v669_v24 }
  0xe3   : > { %v671_v27 = vrot.slane %v670_v26, 2 }
  0xe5   : > { %v672_v29 = vmin.f32 %v670_v26, %v671_v27 }
  0xe7   : > { %v673_v30 = vrot.slane %v672_v29, 1 }
  0xe9   : > { %v674_v32 = vmin.f32 %v672_v29, %v673_v30 }
  0xeb   : > { %vm675_vm3 = vcmp.eq.f32.partialorder %v646_v20, %v674_v32  ;;  %vm676_vm4 = vcmp.eq.f32.partialorder %v651_v18, %v674_v32 }
  0xec   : > { %v677_v33 = vsel %vm675_vm3, %v6098_v28, 16  ;;  %v678_v34 = vsel %vm676_vm4, %v6101_v31, 16 }
  0xed   : > { %v679_v35 = vsel %vm665_vm2, %v677_v33, 2147483647  ;;  %v680_v36 = vsel %vm665_vm2, %v678_v34, 2147483647 }
  0xee   : > { %vm681_vm5 = vcmp.lt.s32.totalorder %v679_v35, %v680_v36 }
  0xef   : > { %v682_v37 = vsel %vm681_vm5, %v679_v35, %v680_v36 }
  0xf0   : > { %v683_v38 = vrot.slane %v682_v37, 4 }
  0xf2   : > { %vm684_vm6 = vcmp.lt.s32.totalorder %v682_v37, %v683_v38 }
  0xf3   : > { %v685_v39 = vsel %vm684_vm6, %v682_v37, %v683_v38  ;;  %v8091_v37 = vmov 0.0  }
  0xf4   : > { %v686_v40 = vrot.slane %v685_v39, 2  ;;  %5764 = vmatprep.subr.mxu1 %v8091_v37 }
  0xf6   : > { %vm687_vm7 = vcmp.lt.s32.totalorder %v685_v39, %v686_v40 }
  0xf7   : > { %v688_v41 = vsel %vm687_vm7, %v685_v39, %v686_v40 }
  0xf8   : > { %v689_v42 = vrot.slane %v688_v41, 1 }
  0xfa   : > { %vm690_vm8 = vcmp.lt.s32.totalorder %v688_v41, %v689_v42 }
  0xfb   : > { %v691_v43 = vsel %vm690_vm8, %v688_v41, %v689_v42  ;;  %v778_v42 = vld [vmem:[%s8075_s7] sm:$0xff] }
  0xfc   : > { %vm693_vm9 = vcmp.eq.s32.totalorder %v678_v34, %v691_v43  ;;  %vm692_vm10 = vcmp.eq.s32.totalorder %v677_v33, %v691_v43  ;;  %v5968_v43 = vmov 0  }
  0xfd   : > { %5730 = vmatprep.subr.msk.mxu0 %vm693_vm9, %v8089_v44  ;;  %v1284_v45 = vsel %vm693_vm9, 1e+30, %v651_v18  ;;  %v1283_v46 = vsel %vm692_vm10, 1e+30, %v646_v20  ;;  %5935 = vset.pattern.permute.xlu1 %v5968_v43 }
  0xfe   : > { %v1286_v47 = vsel %vm665_vm2, %v1284_v45, inf  ;;  %5731 = vmatpush3.msk.msra.mxu0 %vm693_vm9, %v8089_v44  ;;  %v1285_v48 = vsel %vm665_vm2, %v1283_v46, inf  ;;  %5936 = vset.pattern.permute.xlu0 %v5968_v43 }
  0xff   : > { %5732 = vmatprep.subr.msk.mxu0 %vm692_vm10, %v8089_v44  ;;  %v1287_v49 = vmin.f32 %v1285_v48, %v1286_v47  ;;  %781 = vperm.xlu1 %5935, %v778_v42  }
 0x100   : > { %5733 = vmatpush3.msk.msra.mxu0 %vm692_vm10, %v8089_v44 }
 0x101   : > { %v1288_v50 = vrot.slane %v1287_v49, 4  ;;  %5735 = vmatmul.mubr.msk.f32.vlgmr.msra.gmra.mxu0 %vm665_vm2, %v6090_v13  ;;  %5737 = vmatprep.subr.mxu0 %v8091_v37 }
 0x103   : > { %v1289_v51 = vmin.f32 %v1287_v49, %v1288_v50  ;;  %v862_v49 = vld [vmem:[%s8077_s9] sm:$0xff] }
 0x104   : > { %865 = vperm.xlu1 %5935, %v862_v49  }
 0x105   : > { %v1290_v52 = vrot.slane %v1289_v51, 2 }
 0x107   : > { %v1291_v53 = vmin.f32 %v1289_v51, %v1290_v52  ;;  %v945_v52 = vld [vmem:[%s8079_s11] sm:$0xff] }
 0x108   : > { %949 = vperm.xlu1 %5935, %v945_v52  }
 0x109   : > { %v1292_v54 = vrot.slane %v1291_v53, 1 }
 0x10b   : > { %v1293_v55 = vmin.f32 %v1291_v53, %v1292_v54 }
 0x10d   : > { %vm1294_vm11 = vcmp.eq.f32.partialorder %v1283_v46, %v1293_v55  ;;  %vm1295_vm12 = vcmp.eq.f32.partialorder %v1284_v45, %v1293_v55  ;;  %v5298_v55 = vld [vmem:[%s8081_s13] sm:$0xff] }
 0x10e   : > { %v6116_v56 = vsel %vm1294_vm11, %v6098_v28, 16  ;;  %v6119_v57 = vsel %vm1295_vm12, %v6101_v31, 16  ;;  %5302 = vperm.xlu1 %5935, %v5298_v55  }
 0x10f   : > { %v1298_v58 = vsel %vm665_vm2, %v6116_v56, 2147483647  ;;  %v1299_v59 = vsel %vm665_vm2, %v6119_v57, 2147483647 }
 0x110   : > { %vm1300_vm13 = vcmp.lt.s32.totalorder %v1298_v58, %v1299_v59 }
 0x111   : > { %v1301_v60 = vsel %vm1300_vm13, %v1298_v58, %v1299_v59 }
 0x112   : > { %v1302_v61 = vrot.slane %v1301_v60, 4 }
 0x114   : > { %vm1303_vm14 = vcmp.lt.s32.totalorder %v1301_v60, %v1302_v61 }
 0x115   : > { %v1304_v62 = vsel %vm1303_vm14, %v1301_v60, %v1302_v61  ;;  %vm5967_vm14 = vmmov 0   ;;  %v5299_v60 = vld [vmem:[%s8081_s13 + $0x8] sm:$0xff] }
 0x116   : > { %v1305_v63 = vrot.slane %v1304_v62, 2  ;;  %5739 = vmatprep.mubr.msk.f32.mxu0 %vm5967_vm14, %v8091_v37  ;;  %5766 = vmatprep.mubr.msk.f32.mxu1 %vm5967_vm14, %v8091_v37 }
 0x117   : > { %5307 = vperm.xlu1 %5935, %v5299_v60  }
 0x118   : > { %vm1306_vm15 = vcmp.lt.s32.totalorder %v1304_v62, %v1305_v63 }
 0x119   : > { %v1307_v0 = vsel %vm1306_vm15, %v1304_v62, %v1305_v63 }
 0x11a   : > { %v1308_v2 = vrot.slane %v1307_v0, 1 }
 0x11c   : > { %vm1309_vm3 = vcmp.lt.s32.totalorder %v1307_v0, %v1308_v2 }
 0x11d   : > { %v6125_v3 = vsel %vm1309_vm3, %v1307_v0, %v1308_v2 }
 0x11e   : > { %vm1312_vm4 = vcmp.eq.s32.totalorder %v6119_v57, %v6125_v3  ;;  %vm1311_vm5 = vcmp.eq.s32.totalorder %v6116_v56, %v6125_v3  ;;  %v5969_v57 = vmov 1966171168  }
 0x11f   : > { %v1857_v4 = vsel %vm1312_vm4, 1e+30, %v1284_v45  ;;  %v1856_v5 = vsel %vm1311_vm5, 1e+30, %v1283_v46 }
 0x120   : > { %v1859_v6 = vsel %vm665_vm2, %v1857_v4, inf  ;;  %v1858_v7 = vsel %vm665_vm2, %v1856_v5, inf }
 0x121   : > { %v1860_v8 = vmin.f32 %v1858_v7, %v1859_v6 }
 0x123   : > { %v1861_v9 = vrot.slane %v1860_v8, 4 }
 0x125   : > { %v1862_v10 = vmin.f32 %v1860_v8, %v1861_v9 }
 0x127   : > { %v1863_v12 = vrot.slane %v1862_v10, 2 }
 0x129   : > { %v1864_v14 = vmin.f32 %v1862_v10, %v1863_v12 }
 0x12b   : > { %v1865_v15 = vrot.slane %v1864_v14, 1 }
 0x12d   : > { %v1866_v16 = vmin.f32 %v1864_v14, %v1865_v15 }
 0x12f   : > { %vm1867_vm6 = vcmp.eq.f32.partialorder %v1856_v5, %v1866_v16  ;;  %vm1868_vm7 = vcmp.eq.f32.partialorder %v1857_v4, %v1866_v16 }
 0x130   : > { %v6140_v17 = vsel %vm1867_vm6, %v6098_v28, 16  ;;  %v6143_v18 = vsel %vm1868_vm7, %v6101_v31, 16 }
 0x131   : > { %v1871_v19 = vsel %vm665_vm2, %v6140_v17, 2147483647  ;;  %v1872_v20 = vsel %vm665_vm2, %v6143_v18, 2147483647 }
 0x132   : > { %vm1873_vm8 = vcmp.lt.s32.totalorder %v1871_v19, %v1872_v20 }
 0x133   : > { %v1874_v21 = vsel %vm1873_vm8, %v1871_v19, %v1872_v20 }
 0x134   : > { %v1875_v22 = vrot.slane %v1874_v21, 4 }
 0x136   : > { %vm1876_vm9 = vcmp.lt.s32.totalorder %v1874_v21, %v1875_v22 }
 0x137   : > { %v1877_v23 = vsel %vm1876_vm9, %v1874_v21, %v1875_v22 }
 0x138   : > { %v1878_v24 = vrot.slane %v1877_v23, 2 }
 0x13a   : > { %vm1879_vm10 = vcmp.lt.s32.totalorder %v1877_v23, %v1878_v24 }
 0x13b   : > { %v1880_v25 = vsel %vm1879_vm10, %v1877_v23, %v1878_v24 }
 0x13c   : > { %v1881_v26 = vrot.slane %v1880_v25, 1 }
 0x13e   : > { %vm1882_vm11 = vcmp.lt.s32.totalorder %v1880_v25, %v1881_v26 }
 0x13f   : > { %v6149_v27 = vsel %vm1882_vm11, %v1880_v25, %v1881_v26 }
 0x140   : > { %vm1885_vm12 = vcmp.eq.s32.totalorder %v6143_v18, %v6149_v27  ;;  %vm1884_vm13 = vcmp.eq.s32.totalorder %v6140_v17, %v6149_v27 }
 0x141   : > { %v2430_v29 = vsel %vm1885_vm12, 1e+30, %v1857_v4  ;;  %v2429_v30 = vsel %vm1884_vm13, 1e+30, %v1856_v5 }
 0x142   : > { %v2432_v32 = vsel %vm665_vm2, %v2430_v29, inf  ;;  %v2431_v33 = vsel %vm665_vm2, %v2429_v30, inf }
 0x143   : > { %v2433_v34 = vmin.f32 %v2431_v33, %v2432_v32 }
 0x145   : > { %v2434_v35 = vrot.slane %v2433_v34, 4 }
 0x147   : > { %v2435_v36 = vmin.f32 %v2433_v34, %v2434_v35 }
 0x149   : > { %v2436_v38 = vrot.slane %v2435_v36, 2 }
 0x14b   : > { %v2437_v39 = vmin.f32 %v2435_v36, %v2436_v38 }
 0x14d   : > { %v2438_v40 = vrot.slane %v2437_v39, 1 }
 0x14f   : > { %v2439_v41 = vmin.f32 %v2437_v39, %v2438_v40 }
 0x151   : > { %vm2440_vm15 = vcmp.eq.f32.partialorder %v2429_v30, %v2439_v41  ;;  %vm2441_vm3 = vcmp.eq.f32.partialorder %v2430_v29, %v2439_v41 }
 0x152   : > { %v6173_v45 = vsel %vm2440_vm15, %v6098_v28, 16  ;;  %v6176_v46 = vsel %vm2441_vm3, %v6101_v31, 16 }
 0x153   : > { %8182 = vst [vmem:[#allocation4_spill] sm:$0xff] %v6173_v45  ;;  %8183 = vst [vmem:[#allocation5_spill] sm:$0xff] %v6176_v46  ;;  %v2444_v47 = vsel %vm665_vm2, %v6173_v45, 2147483647  ;;  %v2445_v48 = vsel %vm665_vm2, %v6176_v46, 2147483647 }
 0x154   : > { %vm2446_vm6 = vcmp.lt.s32.totalorder %v2444_v47, %v2445_v48 }
 0x155   : > { %v2447_v50 = vsel %vm2446_vm6, %v2444_v47, %v2445_v48 }
 0x156   : > { %v2448_v51 = vrot.slane %v2447_v50, 4 }
 0x158   : > { %vm2449_vm7 = vcmp.lt.s32.totalorder %v2447_v50, %v2448_v51 }
 0x159   : > { %v2450_v53 = vsel %vm2449_vm7, %v2447_v50, %v2448_v51 }
 0x15a   : > { %v2451_v54 = vrot.slane %v2450_v53, 2 }
 0x15c   : > { %vm2452_vm8 = vcmp.lt.s32.totalorder %v2450_v53, %v2451_v54 }
 0x15d   : > { %v2453_v58 = vsel %vm2452_vm8, %v2450_v53, %v2451_v54 }
 0x15e   : > { %v2454_v59 = vrot.slane %v2453_v58, 1 }
 0x160   : > { %vm2455_vm9 = vcmp.lt.s32.totalorder %v2453_v58, %v2454_v59 }
 0x161   : > { %v6194_v61 = vsel %vm2455_vm9, %v2453_v58, %v2454_v59 }
 0x162   : > { %8184 = vst [vmem:[#allocation6_spill] sm:$0xff] %v6194_v61  ;;  %vm2458_vm10 = vcmp.eq.s32.totalorder %v6176_v46, %v6194_v61  ;;  %vm2457_vm11 = vcmp.eq.s32.totalorder %v6173_v45, %v6194_v61 }
 0x163   : > { %v3003_v62 = vsel %vm2458_vm10, 1e+30, %v2430_v29  ;;  %v3002_v63 = vsel %vm2457_vm11, 1e+30, %v2429_v30 }
 0x164   : > { %v3005_v0 = vsel %vm665_vm2, %v3003_v62, inf  ;;  %v3004_v2 = vsel %vm665_vm2, %v3002_v63, inf }
 0x165   : > { %v3006_v4 = vmin.f32 %v3004_v2, %v3005_v0 }
 0x167   : > { %v3007_v5 = vrot.slane %v3006_v4, 4 }
 0x169   : > { %v3008_v6 = vmin.f32 %v3006_v4, %v3007_v5 }
 0x16b   : > { %v3009_v7 = vrot.slane %v3008_v6, 2 }
 0x16d   : > { %v3010_v8 = vmin.f32 %v3008_v6, %v3009_v7 }
 0x16f   : > { %v3011_v9 = vrot.slane %v3010_v8, 1 }
 0x171   : > { %v3012_v10 = vmin.f32 %v3010_v8, %v3011_v9 }
 0x173   : > { %vm3013_vm15 = vcmp.eq.f32.partialorder %v3002_v63, %v3012_v10  ;;  %vm3014_vm3 = vcmp.eq.f32.partialorder %v3003_v62, %v3012_v10 }
 0x174   : > { %v6209_v12 = vsel %vm3013_vm15, %v6098_v28, 16  ;;  %v6212_v14 = vsel %vm3014_vm3, %v6101_v31, 16 }
 0x175   : > { %8185 = vst [vmem:[#allocation7_spill] sm:$0xff] %v6209_v12  ;;  %8186 = vst [vmem:[#allocation8_spill] sm:$0xff] %v6212_v14  ;;  %v3017_v15 = vsel %vm665_vm2, %v6209_v12, 2147483647  ;;  %v3018_v16 = vsel %vm665_vm2, %v6212_v14, 2147483647 }
 0x176   : > { %vm3019_vm6 = vcmp.lt.s32.totalorder %v3017_v15, %v3018_v16 }
 0x177   : > { %v3020_v19 = vsel %vm3019_vm6, %v3017_v15, %v3018_v16 }
 0x178   : > { %v3021_v20 = vrot.slane %v3020_v19, 4 }
 0x17a   : > { %vm3022_vm7 = vcmp.lt.s32.totalorder %v3020_v19, %v3021_v20 }
 0x17b   : > { %v3023_v21 = vsel %vm3022_vm7, %v3020_v19, %v3021_v20 }
 0x17c   : > { %v3024_v22 = vrot.slane %v3023_v21, 2 }
 0x17e   : > { %vm3025_vm8 = vcmp.lt.s32.totalorder %v3023_v21, %v3024_v22 }
 0x17f   : > { %v3026_v23 = vsel %vm3025_vm8, %v3023_v21, %v3024_v22  ;;  %v6268_v21 = vsel %vm575_vm1, %v6071_v1, 0.0 }
 0x180   : > { %v3027_v24 = vrot.slane %v3026_v23, 1  ;;  %8193 = vst [vmem:[#allocation15_spill] sm:$0xff] %v6268_v21 }
 0x182   : > { %vm3028_vm9 = vcmp.lt.s32.totalorder %v3026_v23, %v3027_v24 }
 0x183   : > { %v6218_v25 = vsel %vm3028_vm9, %v3026_v23, %v3027_v24 }
 0x184   : > { %8187 = vst [vmem:[#allocation9_spill] sm:$0xff] %v6218_v25  ;;  %vm8084_vm15 = vcmp.eq.s32.totalorder %v6212_v14, %v6218_v25  ;;  %vm8083_vm3 = vcmp.eq.s32.totalorder %v6209_v12, %v6218_v25 }
 0x185   : > { %v3576_v26 = vsel %vm8084_vm15, 1e+30, %v3003_v62  ;;  %v3575_v29 = vsel %vm8083_vm3, 1e+30, %v3002_v63 }
 0x186   : > { %v3578_v30 = vsel %vm665_vm2, %v3576_v26, inf  ;;  %v3577_v32 = vsel %vm665_vm2, %v3575_v29, inf }
 0x187   : > { %v3579_v33 = vmin.f32 %v3577_v32, %v3578_v30 }
 0x189   : > { %v3580_v34 = vrot.slane %v3579_v33, 4 }
 0x18b   : > { %v3581_v35 = vmin.f32 %v3579_v33, %v3580_v34 }
 0x18d   : > { %v3582_v36 = vrot.slane %v3581_v35, 2 }
 0x18f   : > { %v3583_v38 = vmin.f32 %v3581_v35, %v3582_v36 }
 0x191   : > { %v3584_v39 = vrot.slane %v3583_v38, 1 }
 0x193   : > { %v3585_v40 = vmin.f32 %v3583_v38, %v3584_v39 }
 0x195   : > { %vm3586_vm6 = vcmp.eq.f32.partialorder %v3575_v29, %v3585_v40  ;;  %vm3587_vm7 = vcmp.eq.f32.partialorder %v3576_v26, %v3585_v40 }
 0x196   : > { %v6233_v41 = vsel %vm3586_vm6, %v6098_v28, 16  ;;  %v6236_v42 = vsel %vm3587_vm7, %v6101_v31, 16 }
 0x197   : > { %8188 = vst [vmem:[#allocation10_spill] sm:$0xff] %v6233_v41  ;;  %8189 = vst [vmem:[#allocation11_spill] sm:$0xff] %v6236_v42  ;;  %v3590_v43 = vsel %vm665_vm2, %v6233_v41, 2147483647  ;;  %v3591_v47 = vsel %vm665_vm2, %v6236_v42, 2147483647 }
 0x198   : > { %vm3592_vm8 = vcmp.lt.s32.totalorder %v3590_v43, %v3591_v47 }
 0x199   : > { %v3593_v48 = vsel %vm3592_vm8, %v3590_v43, %v3591_v47 }
 0x19a   : > { %v3594_v49 = vrot.slane %v3593_v48, 4 }
 0x19c   : > { %vm3595_vm9 = vcmp.lt.s32.totalorder %v3593_v48, %v3594_v49 }
 0x19d   : > { %v3596_v50 = vsel %vm3595_vm9, %v3593_v48, %v3594_v49 }
 0x19e   : > { %v3597_v51 = vrot.slane %v3596_v50, 2 }
 0x1a0   : > { %vm3598_vm3 = vcmp.lt.s32.totalorder %v3596_v50, %v3597_v51 }
 0x1a1   : > { %v3599_v52 = vsel %vm3598_vm3, %v3596_v50, %v3597_v51 }
 0x1a2   : > { %v3600_v53 = vrot.slane %v3599_v52, 1 }
 0x1a4   : > { %vm3601_vm6 = vcmp.lt.s32.totalorder %v3599_v52, %v3600_v53 }
 0x1a5   : > { %v6242_v54 = vsel %vm3601_vm6, %v3599_v52, %v3600_v53 }
 0x1a6   : > { %8190 = vst [vmem:[#allocation12_spill] sm:$0xff] %v6242_v54  ;;  %vm8088_vm7 = vcmp.eq.s32.totalorder %v6236_v42, %v6242_v54  ;;  %vm8087_vm15 = vcmp.eq.s32.totalorder %v6233_v41, %v6242_v54 }
 0x1a7   : > { %v4149_v55 = vsel %vm8088_vm7, 1e+30, %v3576_v26  ;;  %v4148_v58 = vsel %vm8087_vm15, 1e+30, %v3575_v29  ;;  %v6278_v26 = vld [vmem:[%s8074_s6] sm:$0xff] }
 0x1a8   : > { %v4151_v59 = vsel %vm665_vm2, %v4149_v55, inf  ;;  %v4150_v60 = vsel %vm665_vm2, %v4148_v58, inf  ;;  %8194 = vst [vmem:[#allocation16_spill] sm:$0xff] %v6278_v26 }
 0x1a9   : > { %v4152_v62 = vmin.f32 %v4150_v60, %v4151_v59 }
 0x1ab   : > { %v4153_v63 = vrot.slane %v4152_v62, 4 }
 0x1ad   : > { %v4154_v0 = vmin.f32 %v4152_v62, %v4153_v63 }
 0x1af   : > { %v4155_v2 = vrot.slane %v4154_v0, 2 }
 0x1b1   : > { %v4156_v4 = vmin.f32 %v4154_v0, %v4155_v2 }
 0x1b3   : > { %v4157_v5 = vrot.slane %v4156_v4, 1 }
 0x1b5   : > { %v4158_v6 = vmin.f32 %v4156_v4, %v4157_v5 }
 0x1b7   : > { %vm4159_vm3 = vcmp.eq.f32.partialorder %v4148_v58, %v4158_v6  ;;  %vm4160_vm8 = vcmp.eq.f32.partialorder %v4149_v55, %v4158_v6  ;;  %v6323_v6 = vld [vmem:[%s8076_s8] sm:$0xff] }
 0x1b8   : > { %v6257_v7 = vsel %vm4159_vm3, %v6098_v28, 16  ;;  %v6260_v8 = vsel %vm4160_vm8, %v6101_v31, 16  ;;  %8200 = vst [vmem:[#allocation22_spill] sm:$0xff] %v6323_v6 }
 0x1b9   : > { %8191 = vst [vmem:[#allocation13_spill] sm:$0xff] %v6257_v7  ;;  %8192 = vst [vmem:[#allocation14_spill] sm:$0xff] %v6260_v8  ;;  %v4163_v9 = vsel %vm665_vm2, %v6257_v7, 2147483647  ;;  %v4164_v10 = vsel %vm665_vm2, %v6260_v8, 2147483647 }
 0x1ba   : > { %vm4165_vm9 = vcmp.lt.s32.totalorder %v4163_v9, %v4164_v10 }
 0x1bb   : > { %v4166_v15 = vsel %vm4165_vm9, %v4163_v9, %v4164_v10  ;;  %v6330_v9 = vld [vmem:[%s8078_s10] sm:$0xff]  ;;  %v946_v10 = vld [vmem:[%s8079_s11 + $0x8] sm:$0xff] }
 0x1bc   : > { %v4167_v16 = vrot.slane %v4166_v15, 4  ;;  %8201 = vst [vmem:[#allocation23_spill] sm:$0xff] %v6330_v9  ;;  %954 = vperm.xlu0 %5936, %v946_v10  }
 0x1be   : > { %vm4168_vm6 = vcmp.lt.s32.totalorder %v4166_v15, %v4167_v16 }
 0x1bf   : > { %v4169_v19 = vsel %vm4168_vm6, %v4166_v15, %v4167_v16 }
 0x1c0   : > { %v4170_v20 = vrot.slane %v4169_v19, 2 }
 0x1c1   : > { %v6270_v22 = vpop.f32.mrf.mxu0 }
 0x1c2   : > { %vm4171_vm3 = vcmp.lt.s32.totalorder %v4169_v19, %v4170_v20 }
 0x1c3   : > { %v767_v23 = vpop.f32.mrf.mxu0  ;;  %v4172_v29 = vsel %vm4171_vm3, %v4169_v19, %v4170_v20 }
 0x1c4   : > { %v6273_v24 = vsub.f32 %v767_v23, %v6268_v21  ;;  %v4173_v1 = vrot.slane %v4172_v29, 1 }
 0x1c6   : > { %5738 = vmatpush3.msk.msra.mxu0 %vm575_vm1, %v6273_v24  ;;  %vm4174_vm8 = vcmp.lt.s32.totalorder %v4172_v29, %v4173_v1 }
 0x1c7   : > { %5740 = vmatmul.mubr.msk.f32.vlgmr.msra.gmra.mxu0 %vm561_vm0, %v6278_v26  ;;  %5742 = vmatprep.subr.mxu0 %v8091_v37  ;;  %v6287_v30 = vsel %vm4174_vm8, %v4172_v29, %v4173_v1  ;;  %v6343_v29 = vld [vmem:[%s8078_s10 + $0x8] sm:$0xff]  ;;  %v1043_v1 = vunpack.c.l.s4 %v5969_v57 }
 0x1c8   : > { %5744 = vmatprep.mubr.msk.f32.mxu0 %vm5967_vm14, %v8091_v37  ;;  %8195 = vst [vmem:[#allocation17_spill] sm:$0xff] %v6287_v30  ;;  %vm8086_vm9 = vcmp.eq.s32.totalorder %v6260_v8, %v6287_v30  ;;  %vm8085_vm6 = vcmp.eq.s32.totalorder %v6257_v7, %v6287_v30  ;;  %8203 = vst [vmem:[#allocation25_spill] sm:$0xff] %v6343_v29 }
 0x1c9   : > { %v4722_v32 = vsel %vm8086_vm9, 1e+30, %v4149_v55  ;;  %v4721_v33 = vsel %vm8085_vm6, 1e+30, %v4148_v58 }
 0x1ca   : > { %v4724_v34 = vsel %vm665_vm2, %v4722_v32, inf  ;;  %v4723_v35 = vsel %vm665_vm2, %v4721_v33, inf }
 0x1cb   : > { %v4725_v36 = vmin.f32 %v4723_v35, %v4724_v34  ;;  %v1041_v34 = vcombine.high %v6273_v24, %v6273_v24 }
 0x1cd   : > { %v4726_v38 = vrot.slane %v4725_v36, 4 }
 0x1cf   : > { %v4727_v39 = vmin.f32 %v4725_v36, %v4726_v38 }
 0x1d1   : > { %v4728_v40 = vrot.slane %v4727_v39, 2 }
 0x1d3   : > { %v4729_v43 = vmin.f32 %v4727_v39, %v4728_v40 }
 0x1d5   : > { %v4730_v47 = vrot.slane %v4729_v43, 1 }
 0x1d7   : > { %v4731_v48 = vmin.f32 %v4729_v43, %v4730_v47 }
 0x1d9   : > { %vm4732_vm3 = vcmp.eq.f32.partialorder %v4721_v33, %v4731_v48  ;;  %vm4733_vm8 = vcmp.eq.f32.partialorder %v4722_v32, %v4731_v48  ;;  %v1044_v32 = vunpack.c.0.s8 %v1043_v1  ;;  %v1090_v33 = vcombine.high %v6270_v22, %v6270_v22 }
 0x1da   : > { %v6302_v49 = vsel %vm4732_vm3, %v6098_v28, 16  ;;  %v6305_v50 = vsel %vm4733_vm8, %v6101_v31, 16  ;;  %v6317_v31 = vpop.permute.xlu1 %781 }
 0x1db   : > { %8196 = vst [vmem:[#allocation18_spill] sm:$0xff] %v6302_v49  ;;  %8197 = vst [vmem:[#allocation19_spill] sm:$0xff] %v6305_v50  ;;  %v4736_v51 = vsel %vm665_vm2, %v6302_v49, 2147483647  ;;  %v4737_v52 = vsel %vm665_vm2, %v6305_v50, 2147483647  ;;  %v6375_v56 = vsub.s32 %v1044_v32, %v6098_v28 }
 0x1dc   : > { %vm4738_vm6 = vcmp.lt.s32.totalorder %v4736_v51, %v4737_v52  ;;  %8199 = vst [vmem:[#allocation21_spill] sm:$0xff] %v6317_v31 }
 0x1dd   : > { %v4739_v53 = vsel %vm4738_vm6, %v4736_v51, %v4737_v52  ;;  %8204 = vst [vmem:[#allocation26_spill] sm:$0xff] %v6375_v56  ;;  %v1104_v3 = vrot.slane %v1090_v33, %v6375_v56  ;;  %v1055_v35 = vrot.slane %v1041_v34, %v6375_v56 }
 0x1de   : > { %v4740_v55 = vrot.slane %v4739_v53, 4  ;;  %v6337_v15 = vpop.permute.xlu1 %865 }
 0x1df   : > { %8202 = vst [vmem:[#allocation24_spill] sm:$0xff] %v6337_v15  ;;  %v1106_v36 = vcombine.high %v1104_v3, %v1104_v3  ;;  %v1057_v38 = vcombine.high %v1055_v35, %v1055_v35  ;;  %v1120_v40 = vrot.slane %v1104_v3, %v6375_v56  ;;  %v1071_v43 = vrot.slane %v1055_v35, %v6375_v56 }
 0x1e0   : > { %vm4741_vm9 = vcmp.lt.s32.totalorder %v4739_v53, %v4740_v55 }
 0x1e1   : > { %v4742_v58 = vsel %vm4741_vm9, %v4739_v53, %v4740_v55  ;;  %v1134_v39 = vrot.slane %v1106_v36, %v6375_v56  ;;  %v1085_v47 = vrot.slane %v1057_v38, %v6375_v56  ;;  %v1136_v52 = vcombine.high %v1120_v40, %v1120_v40 }
 0x1e2   : > { %v4743_v59 = vrot.slane %v4742_v58, 2  ;;  %v1087_v53 = vcombine.high %v1071_v43, %v1071_v43 }
 0x1e3   : > { %v1138_v51 = vcombine.high %v1134_v39, %v1134_v39  ;;  %v1089_v55 = vcombine.high %v1085_v47, %v1085_v47 }
 0x1e4   : > { %vm4744_vm15 = vcmp.lt.s32.totalorder %v4742_v58, %v4743_v59 }
 0x1e5   : > { %v4745_v60 = vsel %vm4744_vm15, %v4742_v58, %v4743_v59  ;;  %vm868_vm15 = vcmask 64512   ;;  %v6386_v59 = vsub.s32 0, %v6098_v28 }
 0x1e6   : > { %v4746_v62 = vrot.slane %v4745_v60, 1 }
 0x1e7   : > { %8206 = vst [vmem:[#allocation28_spill] sm:$0xff] %v6386_v59  ;;  %v1194_v28 = vrot.slane %v1134_v39, %v6386_v59  ;;  %v1162_v38 = vrot.slane %v1085_v47, %v6386_v59 }
 0x1e8   : > { %vm4747_vm3 = vcmp.lt.s32.totalorder %v4745_v60, %v4746_v62 }
 0x1e9   : > { %v6311_v63 = vsel %vm4747_vm3, %v4745_v60, %v4746_v62  ;;  %v1097_v60 = vrot.slane %v6270_v22, %v6375_v56  ;;  %v1048_v62 = vrot.slane %v6273_v24, %v6375_v56  ;;  %v1166_v22 = vrot.slane %v1087_v53, %v6386_v59 }
 0x1ea   : > { %8198 = vst [vmem:[#allocation20_spill] sm:$0xff] %v6311_v63  ;;  %vm4750_vm8 = vcmp.eq.s32.totalorder %v6305_v50, %v6311_v63  ;;  %vm4749_vm7 = vcmp.eq.s32.totalorder %v6302_v49, %v6311_v63 }
 0x1eb   : > { %v1056_v57 = vcombine.high %v1048_v62, %v1048_v62  ;;  %v1064_v47 = vrot.slane %v1048_v62, %v6375_v56 }
 0x237   : > { %v6383_v48 = vpop.permute.xlu0 %954 }
 0x238   : > { %8205 = vst [vmem:[#allocation27_spill] sm:$0xff] %v6383_v48 }
 0x287   : > { %v856_v0 = vpop.f32.mrf.mxu0 }
 0x288   : > { %v857_v2 = vadd.f32 %v856_v0, %v6317_v31 }
 0x289   : > { %v5741_v4 = vpop.f32.mrf.mxu0 }
 0x28a   : > { %v860_v5 = vmax.f32 %v857_v2, 0.0  ;;  %v6393_v2 = vpop.permute.xlu1 %949 }
 0x28b   : > { %8207 = vst [vmem:[#allocation29_spill] sm:$0xff] %v6393_v2 }
 0x28c   : > { %5743 = vmatpush3.msra.mxu0 %v860_v5  ;;  %v1202_v5 = vrot.slane %v1138_v51, %v6386_v59 }
 0x28d   : > { %5745 = vmatmul.mubr.msk.f32.vlgmr.msra.gmra.mxu0 %vm868_vm15, %v6323_v6 }
 0x28e   : > { %5749 = vmatprep.mubr.msk.f32.mxu0 %vm868_vm15, %v6330_v9 }
 0x34d   : > { %v938_v16 = vpop.f32.mrf.mxu0 }
 0x34e   : > { %v939_v19 = vadd.f32 %v938_v16, %v6337_v15 }
 0x34f   : > { %v5746_v20 = vpop.f32.mrf.mxu0 }
 0x350   : > { %v942_v23 = vmax.f32 %v939_v19, 0.0  ;;  %v1198_v19 = vrot.slane %v1136_v52, %v6386_v59  ;;  %v1170_v20 = vrot.slane %v1089_v55, %v6386_v59 }
 0x352   : > { %5747 = vmatprep.subr.mxu0 %v942_v23 }
 0x353   : > { %5748 = vmatpush3.msra.mxu0 %v942_v23  ;;  %v1105_v23 = vcombine.high %v1097_v60, %v1097_v60 }
 0x354   : > { %5750 = vmatmul.mubr.msk.f32.vlgmr.msra.gmra.mxu0 %vm868_vm15, %v6343_v29  ;;  %5752 = vmatprep.subr.msk.mxu0 %vm1312_vm4, %v8089_v44 }
 0x355   : > { %5753 = vmatpush3.msk.msra.mxu0 %vm1312_vm4, %v8089_v44  ;;  %5756 = vmatprep.mubr.msk.f32.mxu0 %vm665_vm2, %v6086_v11 }
 0x356   : > { %5754 = vmatprep.subr.msk.mxu0 %vm1311_vm5, %v8089_v44 }
 0x357   : > { %5755 = vmatpush3.msk.msra.mxu0 %vm1311_vm5, %v8089_v44 }
 0x358   : > { %5757 = vmatmul.mubr.msk.f32.vlgmr.msra.gmra.mxu0 %vm665_vm2, %v6090_v13  ;;  %5759 = vmatprep.subr.mxu0 %v8091_v37 }
 0x359   : > { %5761 = vmatprep.mubr.msk.f32.mxu0 %vm5967_vm14, %v8091_v37 }
 0x414   : > { %v5751_v58 = vpop.f32.mrf.mxu0 }
 0x415   : > { %v1035_v0 = vadd.f32 %v5751_v58, %v6383_v48  ;;  %v1127_v58 = vrot.slane %v1105_v23, %v6375_v56 }
 0x416   : > { %v1029_v4 = vpop.f32.mrf.mxu0 }
 0x417   : > { %v6396_v10 = vmax.f32 %v1035_v0, 0.0  ;;  %v1030_v16 = vadd.f32 %v1029_v4, %v6393_v2  ;;  %v1113_v0 = vrot.slane %v1097_v60, %v6375_v56  ;;  %v1078_v4 = vrot.slane %v1056_v57, %v6375_v56 }
 0x418   : > { %v6403_v24 = vpop.f32.mrf.mxu0  ;;  %v1158_v60 = vrot.slane %v1071_v43, %v6386_v59  ;;  %v1142_v43 = vrot.slane %v1064_v47, %v6386_v59 }
 0x419   : > { %v1038_v1 = vmax.f32 %v1030_v16, 0.0  ;;  %v6406_v32 = vmul.f32 %v1202_v5, %v6396_v10  ;;  %v6409_v34 = vmul.f32 %v1170_v20, %v6396_v10  ;;  %v6412_v3 = vmul.f32 %v1198_v19, %v6396_v10 }
 0x41a   : > { %v1381_v33 = vpop.f32.mrf.mxu0  ;;  %v6415_v35 = vmul.f32 %v1166_v22, %v6396_v10  ;;  %v6418_v36 = vmul.f32 %v1194_v28, %v6396_v10  ;;  %v1137_v16 = vcombine.high %v1127_v58, %v1127_v58  ;;  %v1088_v23 = vcombine.high %v1078_v4, %v1078_v4 }
 0x41b   : > { %v6422_v39 = vsub.f32 %v1381_v33, %v6268_v21  ;;  %v6424_v51 = vmul.f32 %v1202_v5, %v1038_v1  ;;  %v6426_v52 = vmul.f32 %v1170_v20, %v1038_v1  ;;  %v6428_v53 = vmul.f32 %v1198_v19, %v1038_v1 }
 0x41c   : > { %v6430_v55 = vmul.f32 %v1166_v22, %v1038_v1  ;;  %v6441_v5 = vmul.f32 %v1162_v38, %v6396_v10  ;;  %v1190_v19 = vrot.slane %v1120_v40, %v6386_v59  ;;  %v1135_v22 = vcombine.high %v1113_v0, %v1113_v0 }
 0x41d   : > { %5760 = vmatpush3.msk.msra.mxu0 %vm575_vm1, %v6422_v39  ;;  %v1086_v20 = vcombine.high %v1064_v47, %v1064_v47  ;;  %v6447_v62 = vmul.f32 %v1194_v28, %v1038_v1  ;;  %v6449_v57 = vmul.f32 %v1162_v38, %v1038_v1  ;;  %v1174_v44 = vrot.slane %v1113_v0, %v6386_v59 }
 0x41e   : > { %5762 = vmatmul.mubr.msk.f32.vlgmr.msra.gmra.mxu0 %vm561_vm0, %v6278_v26  ;;  %v6452_v33 = vmul.f32 %v1190_v19, %v6396_v10  ;;  %v1186_v37 = vrot.slane %v1137_v16, %v6386_v59  ;;  %v6457_v49 = vmul.f32 %v1158_v60, %v6396_v10  ;;  %v1178_v40 = vrot.slane %v1127_v58, %v6386_v59 }
 0x41f   : > { %5771 = vmatprep.mubr.msk.f32.mxu0 %vm868_vm15, %v6330_v9  ;;  %v1182_v63 = vrot.slane %v1135_v22, %v6386_v59  ;;  %v1154_v28 = vrot.slane %v1088_v23, %v6386_v59  ;;  %v1150_v38 = vrot.slane %v1086_v20, %v6386_v59  ;;  %v6464_v50 = vmul.f32 %v1190_v19, %v1038_v1 }
 0x420   : > { %v6466_v7 = vmul.f32 %v1158_v60, %v1038_v1  ;;  %v6469_v0 = vmul.f32 %v1186_v37, %v6396_v10  ;;  %v1146_v16 = vrot.slane %v1078_v4, %v6386_v59  ;;  %v6475_v58 = vmul.f32 %v1186_v37, %v1038_v1 }
 0x421   : > { %v6473_v30 = vmul.f32 %v1154_v28, %v6396_v10  ;;  %v6477_v22 = vmul.f32 %v1154_v28, %v1038_v1  ;;  %v6480_v47 = vmul.f32 %v1182_v63, %v6396_v10  ;;  %v6483_v19 = vmul.f32 %v1150_v38, %v6396_v10 }
 0x422   : > { %v6485_v20 = vmul.f32 %v1182_v63, %v1038_v1  ;;  %v6487_v23 = vmul.f32 %v1150_v38, %v1038_v1  ;;  %v6490_v60 = vmul.f32 %v1178_v40, %v6396_v10  ;;  %v6493_v4 = vmul.f32 %v1146_v16, %v6396_v10 }
 0x423   : > { %v6495_v37 = vmul.f32 %v1178_v40, %v1038_v1  ;;  %v6497_v28 = vmul.f32 %v1146_v16, %v1038_v1  ;;  %v6500_v8 = vmul.f32 %v1174_v44, %v6396_v10  ;;  %v6503_v41 = vmul.f32 %v1142_v43, %v6396_v10 }
 0x424   : > { %v6505_v63 = vmul.f32 %v1174_v44, %v1038_v1  ;;  %v6507_v38 = vmul.f32 %v1142_v43, %v1038_v1  ;;  %v8208_v40 = vmov 0.0   ;;  %v1663_v18 = vcombine.high %v6403_v24, %v6403_v24 }
 0x4de   : > { %v1460_v54 = vpop.f32.mrf.mxu0 }
 0x4df   : > { %v1461_v42 = vadd.f32 %v1460_v54, %v6317_v31 }
 0x4e0   : > { %v5763_v12 = vpop.f32.mrf.mxu0 }
 0x4e1   : > { %v1464_v25 = vmax.f32 %v1461_v42, 0.0  ;;  %v8209_v12 = vmov 1.0   ;;  %v1677_v42 = vrot.slane %v1663_v18, %v6375_v56  ;;  %v1670_v18 = vrot.slane %v6403_v24, %v6375_v56 }
 0x4e3   : > { %5765 = vmatpush3.msra.mxu1 %v1464_v25  ;;  %v1614_v25 = vcombine.high %v6422_v39, %v6422_v39  ;;  %v1679_v17 = vcombine.high %v1677_v42, %v1677_v42 }
 0x4e4   : > { %5767 = vmatmul.mubr.msk.f32.vlgmr.msra.gmra.mxu1 %vm868_vm15, %v6323_v6  ;;  %5786 = vmatprep.subr.mxu1 %v8208_v40  ;;  %v1686_v6 = vrot.slane %v1670_v18, %v6375_v56 }
 0x4e5   : > { %5788 = vmatprep.mubr.msk.f32.mxu1 %vm5967_vm14, %v8208_v40  ;;  %v1628_v54 = vrot.slane %v1614_v25, %v6375_v56  ;;  %v1707_v43 = vrot.slane %v1679_v17, %v6375_v56 }
 0x4e7   : > { %v1630_v27 = vcombine.high %v1628_v54, %v1628_v54 }
 0x5a4   : > { %v1531_v10 = vpop.f32.mrf.mxu1 }
 0x5a5   : > { %v1532_v44 = vadd.f32 %v1531_v10, %v6337_v15  ;;  %v1693_v10 = vrot.slane %v1677_v42, %v6375_v56  ;;  %v1621_v42 = vrot.slane %v6422_v39, %v6375_v56 }
 0x5a6   : > { %v5768_v16 = vpop.f32.mrf.mxu1 }
 0x5a7   : > { %v1535_v1 = vmax.f32 %v1532_v44, 0.0  ;;  %v1644_v44 = vrot.slane %v1628_v54, %v6375_v56  ;;  %v1658_v16 = vrot.slane %v1630_v27, %v6375_v56  ;;  %v1709_v14 = vcombine.high %v1693_v10, %v1693_v10 }
 0x5a8   : > { %v1767_v27 = vrot.slane %v1707_v43, %v6386_v59 }
 0x5a9   : > { %5769 = vmatprep.subr.mxu0 %v1535_v1  ;;  %v1662_v15 = vcombine.high %v1658_v16, %v1658_v16 }
 0x5aa   : > { %5770 = vmatpush3.msra.mxu0 %v1535_v1  ;;  %v1711_v1 = vcombine.high %v1707_v43, %v1707_v43 }
 0x5ab   : > { %5772 = vmatmul.mubr.msk.f32.vlgmr.msra.gmra.mxu0 %vm868_vm15, %v6343_v29  ;;  %5774 = vmatprep.subr.msk.mxu0 %vm1885_vm12, %v8209_v12  ;;  %v1660_v29 = vcombine.high %v1644_v44, %v1644_v44  ;;  %v1743_v24 = vrot.slane %v1662_v15, %v6386_v59 }
 0x5ac   : > { %5775 = vmatpush3.msk.msra.mxu0 %vm1885_vm12, %v8209_v12  ;;  %5778 = vmatprep.mubr.msk.f32.mxu0 %vm665_vm2, %v6086_v11  ;;  %v1775_v45 = vrot.slane %v1711_v1, %v6386_v59  ;;  %v1771_v11 = vrot.slane %v1709_v14, %v6386_v59 }
 0x5ad   : > { %5776 = vmatprep.subr.msk.mxu0 %vm1884_vm13, %v8209_v12  ;;  %v1739_v61 = vrot.slane %v1660_v29, %v6386_v59 }
 0x5ae   : > { %5777 = vmatpush3.msk.msra.mxu0 %vm1884_vm13, %v8209_v12 }
 0x5af   : > { %5779 = vmatmul.mubr.msk.f32.vlgmr.msra.gmra.mxu0 %vm665_vm2, %v6090_v13  ;;  %5781 = vmatprep.subr.mxu0 %v8208_v40 }
 0x5b0   : > { %5783 = vmatprep.mubr.msk.f32.mxu0 %vm5967_vm14, %v8208_v40 }
 0x66b   : > { %v5773_v40 = vpop.f32.mrf.mxu0 }
 0x66c   : > { %v1608_v25 = vadd.f32 %v5773_v40, %v6383_v48  ;;  %v1678_v40 = vcombine.high %v1670_v18, %v1670_v18 }
 0x66d   : > { %v1602_v13 = vpop.f32.mrf.mxu0 }
 0x66e   : > { %v6557_v17 = vmax.f32 %v1608_v25, 0.0  ;;  %v1603_v54 = vadd.f32 %v1602_v13, %v6393_v2  ;;  %v1629_v2 = vcombine.high %v1621_v42, %v1621_v42  ;;  %v1700_v31 = vrot.slane %v1678_v40, %v6375_v56 }
 0x66f   : > { %v6564_v46 = vpop.f32.mrf.mxu0 }
 0x670   : > { %8210 = vst [vmem:[#allocation30_spill] sm:$0xff] %v6564_v46  ;;  %v6566_v48 = vmax.f32 %v1603_v54, 0.0  ;;  %v1823_v1 = vmul.f32 %v1775_v45, %v6557_v17  ;;  %v1807_v25 = vmul.f32 %v1743_v24, %v6557_v17  ;;  %v1821_v13 = vmul.f32 %v1771_v11, %v6557_v17 }
 0x671   : > { %v1954_v39 = vpop.f32.mrf.mxu0  ;;  %v1805_v43 = vmul.f32 %v1739_v61, %v6557_v17  ;;  %v1819_v14 = vmul.f32 %v1767_v27, %v6557_v17  ;;  %v1710_v18 = vcombine.high %v1700_v31, %v1700_v31 }
 0x672   : > { %v6574_v29 = vsub.f32 %v1954_v39, %v6268_v21  ;;  %v6577_v15 = vadd.f32 %v1823_v1, %v6406_v32  ;;  %v6580_v54 = vadd.f32 %v1807_v25, %v6409_v34  ;;  %v1822_v46 = vmul.f32 %v1775_v45, %v6566_v48 }
 0x673   : > { %v1806_v12 = vmul.f32 %v1743_v24, %v6566_v48  ;;  %v1637_v34 = vrot.slane %v1621_v42, %v6375_v56  ;;  %v1651_v45 = vrot.slane %v1629_v2, %v6375_v56  ;;  %v1708_v24 = vcombine.high %v1686_v6, %v1686_v6 }
 0x674   : > { %8211 = vst [vmem:[#allocation31_spill] sm:$0xff] %v6580_v54  ;;  %5782 = vmatpush3.msk.msra.mxu0 %vm575_vm1, %v6574_v29  ;;  %v6591_v32 = vadd.f32 %v1822_v46, %v6424_v51  ;;  %v6601_v39 = vadd.f32 %v1821_v13, %v6412_v3  ;;  %v6604_v25 = vadd.f32 %v1805_v43, %v6415_v35 }
 0x675   : > { %5784 = vmatmul.mubr.msk.f32.vlgmr.msra.gmra.mxu0 %vm561_vm0, %v6278_v26  ;;  %v1659_v1 = vcombine.high %v1637_v34, %v1637_v34  ;;  %v6598_v40 = vadd.f32 %v1806_v12, %v6426_v52  ;;  %v1747_v46 = vrot.slane %v1686_v6, %v6386_v59  ;;  %v1751_v51 = vrot.slane %v1700_v31, %v6386_v59 }
 0x676   : > { %8212 = vst [vmem:[#allocation32_spill] sm:$0xff] %v6591_v32  ;;  %5793 = vmatprep.mubr.msk.f32.mxu0 %vm868_vm15, %v6330_v9  ;;  %v1661_v42 = vcombine.high %v1651_v45, %v1651_v45  ;;  %v1755_v32 = vrot.slane %v1708_v24, %v6386_v59  ;;  %v1759_v2 = vrot.slane %v1710_v18, %v6386_v59 }
 0x677   : > { %v1763_v54 = vrot.slane %v1693_v10, %v6386_v59  ;;  %v1820_v52 = vmul.f32 %v1771_v11, %v6566_v48  ;;  %v1715_v12 = vrot.slane %v1637_v34, %v6386_v59  ;;  %v1719_v3 = vrot.slane %v1651_v45, %v6386_v59 }
 0x678   : > { %v1731_v35 = vrot.slane %v1644_v44, %v6386_v59  ;;  %v1735_v13 = vrot.slane %v1658_v16, %v6386_v59  ;;  %v1723_v6 = vrot.slane %v1659_v1, %v6386_v59  ;;  %v1804_v43 = vmul.f32 %v1739_v61, %v6566_v48 }
 0x679   : > { %v6618_v31 = vadd.f32 %v1820_v52, %v6428_v53  ;;  %v6622_v24 = vadd.f32 %v1819_v14, %v6418_v36  ;;  %v1727_v11 = vrot.slane %v1661_v42, %v6386_v59  ;;  %v1818_v34 = vmul.f32 %v1767_v27, %v6566_v48 }
 0x67a   : > { %v1803_v10 = vmul.f32 %v1735_v13, %v6557_v17  ;;  %v1802_v44 = vmul.f32 %v1735_v13, %v6566_v48  ;;  %v6629_v16 = vadd.f32 %v1804_v43, %v6430_v55  ;;  %v1817_v45 = vmul.f32 %v1763_v54, %v6557_v17 }
 0x67b   : > { %v1801_v53 = vmul.f32 %v1731_v35, %v6557_v17  ;;  %v1816_v61 = vmul.f32 %v1763_v54, %v6566_v48  ;;  %v6638_v14 = vadd.f32 %v1818_v34, %v6447_v62  ;;  %v1800_v27 = vmul.f32 %v1731_v35, %v6566_v48 }
 0x67c   : > { %v6635_v36 = vadd.f32 %v1803_v10, %v6441_v5  ;;  %v6641_v18 = vadd.f32 %v1802_v44, %v6449_v57  ;;  %v6645_v55 = vadd.f32 %v1817_v45, %v6452_v33  ;;  %v1815_v5 = vmul.f32 %v1759_v2, %v6557_v17 }
 0x67d   : > { %v6648_v1 = vadd.f32 %v1801_v53, %v6457_v49  ;;  %v6651_v42 = vadd.f32 %v1816_v61, %v6464_v50  ;;  %v6655_v54 = vadd.f32 %v1800_v27, %v6466_v7  ;;  %v1799_v62 = vmul.f32 %v1727_v11, %v6557_v17  ;;  %v8220_v27 = vld [vmem:[#allocation22_spill] sm:$0xff] }
 0x67e   : > { %v1814_v57 = vmul.f32 %v1759_v2, %v6566_v48  ;;  %v1798_v52 = vmul.f32 %v1727_v11, %v6566_v48  ;;  %v6661_v33 = vadd.f32 %v1815_v5, %v6469_v0  ;;  %v1813_v49 = vmul.f32 %v1755_v32, %v6557_v17 }
 0x67f   : > { %v1797_v35 = vmul.f32 %v1723_v6, %v6557_v17  ;;  %v1812_v50 = vmul.f32 %v1755_v32, %v6566_v48  ;;  %v6667_v13 = vadd.f32 %v1799_v62, %v6473_v30  ;;  %v1796_v2 = vmul.f32 %v1723_v6, %v6566_v48 }
 0x680   : > { %v6670_v7 = vadd.f32 %v1814_v57, %v6475_v58  ;;  %v6673_v43 = vadd.f32 %v1798_v52, %v6477_v22  ;;  %v6677_v0 = vadd.f32 %v1813_v49, %v6480_v47  ;;  %v1811_v30 = vmul.f32 %v1751_v51, %v6557_v17  ;;  %v8228_v57 = vld [vmem:[#allocation24_spill] sm:$0xff] }
 0x681   : > { %v6680_v11 = vadd.f32 %v1797_v35, %v6483_v19  ;;  %v6683_v10 = vadd.f32 %v1812_v50, %v6485_v20  ;;  %v6687_v32 = vadd.f32 %v1796_v2, %v6487_v23  ;;  %v1795_v58 = vmul.f32 %v1719_v3, %v6557_v17 }
 0x682   : > { %v1810_v22 = vmul.f32 %v1751_v51, %v6566_v48  ;;  %v1794_v6 = vmul.f32 %v1719_v3, %v6566_v48  ;;  %v6693_v47 = vadd.f32 %v1811_v30, %v6490_v60  ;;  %v1809_v19 = vmul.f32 %v1747_v46, %v6557_v17 }
 0x683   : > { %v1793_v34 = vmul.f32 %v1715_v12, %v6557_v17  ;;  %v1808_v20 = vmul.f32 %v1747_v46, %v6566_v48  ;;  %v6699_v44 = vadd.f32 %v1795_v58, %v6493_v4  ;;  %v1792_v51 = vmul.f32 %v1715_v12, %v6566_v48  ;;  %v8231_v58 = vld [vmem:[#allocation25_spill] sm:$0xff] }
 0x684   : > { %v6702_v23 = vadd.f32 %v1810_v22, %v6495_v37  ;;  %v6705_v45 = vadd.f32 %v1794_v6, %v6497_v28  ;;  %v6709_v60 = vadd.f32 %v1809_v19, %v6500_v8  ;;  %v8219_v37 = vld [vmem:[#allocation21_spill] sm:$0xff]  ;;  %v8221_v8 = vmov 1.0   ;;  %v8232_v22 = vld [vmem:[#allocation30_spill] sm:$0xff] }
 0x685   : > { %v6712_v3 = vadd.f32 %v1793_v34, %v6503_v41  ;;  %v6715_v17 = vadd.f32 %v1808_v20, %v6505_v63  ;;  %v6718_v4 = vadd.f32 %v1792_v51, %v6507_v38  ;;  %v8224_v41 = vld [vmem:[#allocation2_spill] sm:$0xff]  ;;  %v8226_v38 = vld [vmem:[#allocation3_spill] sm:$0xff]  ;;  %v8227_v5 = vmov 0.0  }
 0x686   : > { %8213 = vst [vmem:[#allocation33_spill] sm:$0xff] %v6702_v23  ;;  %8214 = vst [vmem:[#allocation34_spill] sm:$0xff] %v6705_v45  ;;  %v2236_v6 = vcombine.high %v8232_v22, %v8232_v22  ;;  %v2187_v19 = vcombine.high %v6574_v29, %v6574_v29  ;;  %v2243_v34 = vrot.slane %v8232_v22, %v6375_v56 }
 0x687   : > { %8215 = vst [vmem:[#allocation35_spill] sm:$0xff] %v6709_v60  ;;  %8216 = vst [vmem:[#allocation36_spill] sm:$0xff] %v6712_v3 }
 0x688   : > { %8217 = vst [vmem:[#allocation37_spill] sm:$0xff] %v6715_v17  ;;  %8218 = vst [vmem:[#allocation38_spill] sm:$0xff] %v6718_v4  ;;  %v2250_v20 = vrot.slane %v2236_v6, %v6375_v56  ;;  %v2201_v51 = vrot.slane %v2187_v19, %v6375_v56  ;;  %v2259_v48 = vrot.slane %v2243_v34, %v6375_v56 }
 0x68a   : > { %v2217_v22 = vrot.slane %v2201_v51, %v6375_v56 }
 0x735   : > { %v2033_v46 = vpop.f32.mrf.mxu0 }
 0x736   : > { %v2034_v53 = vadd.f32 %v2033_v46, %v8219_v37  ;;  %v2194_v46 = vrot.slane %v6574_v29, %v6375_v56 }
 0x737   : > { %v5785_v61 = vpop.f32.mrf.mxu0 }
 0x738   : > { %v2037_v28 = vmax.f32 %v2034_v53, 0.0  ;;  %v2251_v53 = vcombine.high %v2243_v34, %v2243_v34  ;;  %v2252_v61 = vcombine.high %v2250_v20, %v2250_v20  ;;  %v2202_v12 = vcombine.high %v2194_v46, %v2194_v46 }
 0x739   : > { %v6782_v34 = vrot.slane %v2259_v48, %v6386_v59 }
 0x73a   : > { %5787 = vmatpush3.msra.mxu1 %v2037_v28  ;;  %v2203_v28 = vcombine.high %v2201_v51, %v2201_v51  ;;  %v2273_v63 = vrot.slane %v2251_v53, %v6375_v56  ;;  %v2224_v29 = vrot.slane %v2202_v12, %v6375_v56 }
 0x73b   : > { %5789 = vmatmul.mubr.msk.f32.vlgmr.msra.gmra.mxu1 %vm868_vm15, %v8220_v27  ;;  %5796 = vmatprep.subr.msk.mxu1 %vm2458_vm10, %v8221_v8 }
 0x73c   : > { %5797 = vmatpush3.msk.msra.mxu1 %vm2458_vm10, %v8221_v8  ;;  %5800 = vmatprep.mubr.msk.f32.mxu1 %vm665_vm2, %v8224_v41  ;;  %v2283_v6 = vcombine.high %v2273_v63, %v2273_v63  ;;  %v6785_v53 = vrot.slane %v2273_v63, %v6386_v59 }
 0x73d   : > { %5798 = vmatprep.subr.msk.mxu1 %vm2457_vm11, %v8221_v8 }
 0x73e   : > { %5799 = vmatpush3.msk.msra.mxu1 %vm2457_vm11, %v8221_v8  ;;  %v6791_v51 = vrot.slane %v2283_v6, %v6386_v59  ;;  %v2304_v6 = vrot.slane %v2217_v22, %v6386_v59 }
 0x73f   : > { %5801 = vmatmul.mubr.msk.f32.vlgmr.msra.gmra.mxu1 %vm665_vm2, %v8226_v38  ;;  %5808 = vmatprep.subr.mxu1 %v8227_v5 }
 0x740   : > { %5810 = vmatprep.mubr.msk.f32.mxu1 %vm5967_vm14, %v8227_v5 }
 0x7fb   : > { %v2104_v62 = vpop.f32.mrf.mxu1 }
 0x7fc   : > { %v2105_v52 = vadd.f32 %v2104_v62, %v8228_v57  ;;  %v2266_v62 = vrot.slane %v2250_v20, %v6375_v56 }
 0x7fd   : > { %v5790_v49 = vpop.f32.mrf.mxu1 }
 0x7fe   : > { %v2108_v35 = vmax.f32 %v2105_v52, 0.0  ;;  %v2280_v52 = vrot.slane %v2252_v61, %v6375_v56  ;;  %v2231_v49 = vrot.slane %v2203_v28, %v6375_v56  ;;  %v2282_v19 = vcombine.high %v2266_v62, %v2266_v62 }
 0x7ff   : > { %v6747_v50 = vpop.f32.mrf.mxu1  ;;  %v2336_v12 = vrot.slane %v2266_v62, %v6386_v59 }
 0x800   : > { %8229 = vst [vmem:[#allocation22_spill] sm:$0xff] %v6747_v50  ;;  %5791 = vmatprep.subr.mxu0 %v2108_v35  ;;  %v2235_v20 = vcombine.high %v2231_v49, %v2231_v49  ;;  %v2233_v50 = vcombine.high %v2217_v22, %v2217_v22  ;;  %v2344_v63 = vrot.slane %v2282_v19, %v6386_v59 }
 0x801   : > { %5792 = vmatpush3.msra.mxu0 %v2108_v35  ;;  %v2527_v2 = vpop.f32.mrf.mxu1  ;;  %v2281_v35 = vcombine.high %v2259_v48, %v2259_v48  ;;  %v8233_v48 = vld [vmem:[#allocation27_spill] sm:$0xff] }
 0x802   : > { %v6750_v30 = vsub.f32 %v2527_v2, %v6268_v21  ;;  %5794 = vmatmul.mubr.msk.f32.vlgmr.msra.gmra.mxu0 %vm868_vm15, %v8231_v58  ;;  %5803 = vmatprep.subr.mxu0 %v8227_v5  ;;  %v2210_v2 = vrot.slane %v2194_v46, %v6375_v56  ;;  %v2234_v46 = vcombine.high %v2224_v29, %v2224_v29 }
 0x803   : > { %5805 = vmatprep.mubr.msk.f32.mxu0 %vm5967_vm14, %v8227_v5  ;;  %v6788_v61 = vrot.slane %v2281_v35, %v6386_v59  ;;  %v2340_v56 = vrot.slane %v2280_v52, %v6386_v59  ;;  %v6802_v21 = vrot.slane %v2224_v29, %v6386_v59  ;;  %v2316_v4 = vrot.slane %v2235_v20, %v6386_v59 }
 0x804   : > { %8230 = vst [vmem:[#allocation5_spill] sm:$0xff] %v6750_v30  ;;  %5804 = vmatpush3.msk.msra.mxu0 %vm575_vm1, %v6750_v30  ;;  %v2284_v30 = vcombine.high %v2280_v52, %v2280_v52  ;;  %v2232_v28 = vcombine.high %v2210_v2, %v2210_v2  ;;  %v6799_v35 = vrot.slane %v2210_v2, %v6386_v59  ;;  %v8234_v52 = vld [vmem:[#allocation29_spill] sm:$0xff] }
 0x805   : > { %v2300_v19 = vrot.slane %v2234_v46, %v6386_v59  ;;  %v2312_v2 = vrot.slane %v2233_v50, %v6386_v59 }
 0x806   : > { %5806 = vmatmul.mubr.msk.f32.vlgmr.msra.gmra.mxu0 %vm561_vm0, %v6278_v26  ;;  %v2348_v58 = vrot.slane %v2284_v30, %v6386_v59  ;;  %v2308_v30 = vrot.slane %v2231_v49, %v6386_v59 }
 0x807   : > { %5815 = vmatprep.mubr.msk.f32.mxu0 %vm868_vm15, %v6330_v9 }
 0x8c2   : > { %v5795_v9 = vpop.f32.mrf.mxu0 }
 0x8c3   : > { %v2181_v26 = vadd.f32 %v5795_v9, %v8233_v48  ;;  %v2296_v9 = vrot.slane %v2232_v28, %v6386_v59 }
 0x8c4   : > { %v2175_v57 = vpop.f32.mrf.mxu0 }
 0x8c5   : > { %v6806_v62 = vmax.f32 %v2181_v26, 0.0  ;;  %v2176_v17 = vadd.f32 %v2175_v57, %v8234_v52 }
 0x8c6   : > { %v2606_v48 = vpop.f32.mrf.mxu0 }
 0x8c7   : > { %v6813_v29 = vmax.f32 %v2176_v17, 0.0  ;;  %v2607_v3 = vadd.f32 %v2606_v48, %v8219_v37  ;;  %v2396_v22 = vmul.f32 %v2348_v58, %v6806_v62  ;;  %v2380_v26 = vmul.f32 %v2316_v4, %v6806_v62  ;;  %v8235_v17 = vld [vmem:[#allocation31_spill] sm:$0xff] }
 0x8c8   : > { %v5807_v20 = vpop.f32.mrf.mxu0  ;;  %v2394_v57 = vmul.f32 %v2344_v63, %v6806_v62  ;;  %v2378_v28 = vmul.f32 %v2312_v2, %v6806_v62  ;;  %v2392_v46 = vmul.f32 %v2340_v56, %v6806_v62  ;;  %v2376_v49 = vmul.f32 %v2308_v30, %v6806_v62 }
 0x8c9   : > { %v2610_v52 = vmax.f32 %v2607_v3, 0.0  ;;  %v6823_v50 = vadd.f32 %v2396_v22, %v6577_v15  ;;  %v6826_v59 = vadd.f32 %v2380_v26, %v8235_v17  ;;  %v2395_v48 = vmul.f32 %v2348_v58, %v6813_v29  ;;  %v8236_v3 = vld [vmem:[#allocation32_spill] sm:$0xff] }
 0x8ca   : > { %v2379_v37 = vmul.f32 %v2316_v4, %v6813_v29  ;;  %v6831_v20 = vadd.f32 %v2394_v57, %v6601_v39  ;;  %v6834_v60 = vadd.f32 %v2378_v28, %v6604_v25  ;;  %v2393_v45 = vmul.f32 %v2344_v63, %v6813_v29  ;;  %v8237_v39 = vld [vmem:[#allocation8_spill] sm:$0xff]  ;;  %v8238_v25 = vld [vmem:[#allocation9_spill] sm:$0xff] }
 0x8cb   : > { %5809 = vmatpush3.msra.mxu1 %v2610_v52  ;;  %v6838_v23 = vadd.f32 %v2395_v48, %v8236_v3  ;;  %v2377_v15 = vmul.f32 %v2312_v2, %v6813_v29  ;;  %v6842_v22 = vadd.f32 %v2392_v46, %v6622_v24  ;;  %v6845_v58 = vadd.f32 %v2376_v49, %v6635_v36 }
 0x8cc   : > { %5811 = vmatmul.mubr.msk.f32.vlgmr.msra.gmra.mxu1 %vm868_vm15, %v8220_v27  ;;  %vm8239_vm4 = vcmp.eq.s32.totalorder %v8237_v39, %v8238_v25  ;;  %v6854_v4 = vadd.f32 %v2379_v37, %v6598_v40  ;;  %v6857_v63 = vadd.f32 %v2393_v45, %v6618_v31  ;;  %v2391_v24 = vmul.f32 %v2340_v56, %v6813_v29  ;;  %v8241_v31 = vld [vmem:[#allocation7_spill] sm:$0xff]  ;;  %v8246_v39 = vld [vmem:[#allocation34_spill] sm:$0xff] }
 0x8cd   : > { %5818 = vmatprep.subr.msk.mxu1 %vm8239_vm4, %v8221_v8  ;;  %vm8240_vm5 = vmmov %vm8239_vm4  ;;  %5822 = vmatprep.mubr.msk.f32.mxu1 %vm665_vm2, %v8224_v41  ;;  %v6867_v36 = vadd.f32 %v2377_v15, %v6629_v16  ;;  %v2375_v52 = vmul.f32 %v2308_v30, %v6813_v29  ;;  %v2390_v40 = vmul.f32 %v2336_v12, %v6806_v62 }
 0x8ce   : > { %5819 = vmatpush3.msk.msra.mxu1 %vm8240_vm5, %v8221_v8  ;;  %vm8242_vm12 = vcmp.eq.s32.totalorder %v8241_v31, %v8238_v25  ;;  %v6876_v56 = vadd.f32 %v2391_v24, %v6638_v14  ;;  %v2374_v45 = vmul.f32 %v2304_v6, %v6806_v62  ;;  %v2389_v37 = vmul.f32 %v2336_v12, %v6813_v29  ;;  %v8248_v25 = vld [vmem:[#allocation35_spill] sm:$0xff]  ;;  %v8250_v24 = vld [vmem:[#allocation36_spill] sm:$0xff]  ;;  %v8254_v31 = vld [vmem:[#allocation38_spill] sm:$0xff] }
 0x8cf   : > { %5820 = vmatprep.subr.msk.mxu1 %vm8242_vm12, %v8221_v8  ;;  %v2373_v2 = vmul.f32 %v2304_v6, %v6813_v29  ;;  %vm8243_vm13 = vmmov %vm8242_vm12  ;;  %v6886_v16 = vadd.f32 %v2375_v52, %v6641_v18  ;;  %v6889_v30 = vadd.f32 %v2390_v40, %v6645_v55  ;;  %v2388_v14 = vmul.f32 %v6791_v51, %v6806_v62  ;;  %v8252_v40 = vld [vmem:[#allocation37_spill] sm:$0xff] }
 0x8d0   : > { %5821 = vmatpush3.msk.msra.mxu1 %vm8243_vm13, %v8221_v8  ;;  %v2372_v26 = vmul.f32 %v2300_v19, %v6806_v62  ;;  %v6898_v12 = vadd.f32 %v2374_v45, %v6648_v1  ;;  %v6901_v6 = vadd.f32 %v2389_v37, %v6651_v42  ;;  %v2387_v28 = vmul.f32 %v6791_v51, %v6813_v29 }
 0x8d1   : > { %5823 = vmatmul.mubr.msk.f32.vlgmr.msra.gmra.mxu1 %vm665_vm2, %v8226_v38  ;;  %5830 = vmatprep.subr.mxu1 %v8227_v5  ;;  %v6904_v18 = vadd.f32 %v2373_v2, %v6655_v54  ;;  %v6909_v55 = vadd.f32 %v2388_v14, %v6661_v33  ;;  %v2371_v1 = vmul.f32 %v2300_v19, %v6813_v29 }
 0x8d2   : > { %5832 = vmatprep.mubr.msk.f32.mxu1 %vm5967_vm14, %v8227_v5  ;;  %v6912_v57 = vadd.f32 %v2372_v26, %v6667_v13  ;;  %v2386_v42 = vmul.f32 %v6788_v61, %v6806_v62  ;;  %v2370_v54 = vmul.f32 %v2296_v9, %v6806_v62  ;;  %v2385_v46 = vmul.f32 %v6788_v61, %v6813_v29 }
 0x8d3   : > { %v2369_v49 = vmul.f32 %v2296_v9, %v6813_v29  ;;  %v6924_v33 = vadd.f32 %v2387_v28, %v6670_v7  ;;  %v6927_v13 = vadd.f32 %v2371_v1, %v6673_v43  ;;  %v2384_v51 = vmul.f32 %v6785_v53, %v6806_v62  ;;  %v8258_v28 = vld [vmem:[#allocation15_spill] sm:$0xff] }
 0x8d4   : > { %v2368_v19 = vmul.f32 %v6802_v21, %v6806_v62  ;;  %v6934_v17 = vadd.f32 %v2386_v42, %v6677_v0  ;;  %v6937_v48 = vadd.f32 %v2370_v54, %v6680_v11  ;;  %v6940_v61 = vadd.f32 %v2385_v46, %v6683_v10  ;;  %v8260_v42 = vld [vmem:[#allocation25_spill] sm:$0xff]  ;;  %v8261_v54 = vld [vmem:[#allocation16_spill] sm:$0xff]  ;;  %v8262_v46 = vld [vmem:[#allocation23_spill] sm:$0xff] }
 0x8d5   : > { %v6943_v7 = vadd.f32 %v2369_v49, %v6687_v32  ;;  %v6946_v43 = vadd.f32 %v2384_v51, %v6693_v47  ;;  %v2383_v3 = vmul.f32 %v6785_v53, %v6813_v29  ;;  %v2367_v0 = vmul.f32 %v6802_v21, %v6813_v29  ;;  %v8263_v49 = vld [vmem:[#allocation22_spill] sm:$0xff] }
 0x8d6   : > { %v6949_v9 = vadd.f32 %v2368_v19, %v6699_v44  ;;  %v2382_v11 = vmul.f32 %v6782_v34, %v6806_v62  ;;  %v2366_v10 = vmul.f32 %v6799_v35, %v6806_v62  ;;  %v2381_v32 = vmul.f32 %v6782_v34, %v6813_v29  ;;  %v8244_v44 = vld [vmem:[#allocation33_spill] sm:$0xff] }
 0x8d7   : > { %v2365_v47 = vmul.f32 %v6799_v35, %v6813_v29  ;;  %v6964_v15 = vadd.f32 %v2383_v3, %v8244_v44  ;;  %v6967_v53 = vadd.f32 %v2367_v0, %v8246_v39  ;;  %v8256_v35 = vld [vmem:[#allocation24_spill] sm:$0xff]  ;;  %v2809_v51 = vcombine.high %v8263_v49, %v8263_v49  ;;  %v8264_v19 = vld [vmem:[#allocation5_spill] sm:$0xff]  ;;  %v8265_v0 = vld [vmem:[#allocation26_spill] sm:$0xff] }
 0x8d8   : > { %v6970_v21 = vadd.f32 %v2382_v11, %v8248_v25  ;;  %v6973_v52 = vadd.f32 %v2366_v10, %v8250_v24  ;;  %v6976_v62 = vadd.f32 %v2381_v32, %v8252_v40  ;;  %v2760_v3 = vcombine.high %v8264_v19, %v8264_v19 }
 0x8d9   : > { %8245 = vst [vmem:[#allocation6_spill] sm:$0xff] %v6964_v15  ;;  %8247 = vst [vmem:[#allocation2_spill] sm:$0xff] %v6967_v53  ;;  %v6979_v34 = vadd.f32 %v2365_v47, %v8254_v31  ;;  %v2816_v11 = vrot.slane %v8263_v49, %v8265_v0  ;;  %v2823_v10 = vrot.slane %v2809_v51, %v8265_v0 }
 0x8da   : > { %8249 = vst [vmem:[#allocation4_spill] sm:$0xff] %v6970_v21  ;;  %8251 = vst [vmem:[#allocation3_spill] sm:$0xff] %v6973_v52  ;;  %v2774_v32 = vrot.slane %v2760_v3, %v8265_v0  ;;  %v2767_v47 = vrot.slane %v8264_v19, %v8265_v0  ;;  %v8266_v19 = vld [vmem:[#allocation28_spill] sm:$0xff]  ;;  %v8269_v21 = vld [vmem:[#allocation21_spill] sm:$0xff] }
 0x8db   : > { %8253 = vst [vmem:[#allocation30_spill] sm:$0xff] %v6976_v62  ;;  %8255 = vst [vmem:[#allocation31_spill] sm:$0xff] %v6979_v34  ;;  %v2824_v44 = vcombine.high %v2816_v11, %v2816_v11  ;;  %v2825_v39 = vcombine.high %v2823_v10, %v2823_v10  ;;  %v2832_v24 = vrot.slane %v2816_v11, %v8265_v0 }
 0x8dc   : > { %v2776_v25 = vcombine.high %v2774_v32, %v2774_v32  ;;  %v2775_v40 = vcombine.high %v2767_v47, %v2767_v47 }
 0x8dd   : > { %v2846_v31 = vrot.slane %v2824_v44, %v8265_v0  ;;  %v7017_v3 = vrot.slane %v2832_v24, %v8266_v19 }
 0x8df   : > { %v7020_v11 = vrot.slane %v2846_v31, %v8266_v19 }
 0x98c   : > { %v2677_v45 = vpop.f32.mrf.mxu1 }
 0x98d   : > { %v2678_v29 = vadd.f32 %v2677_v45, %v8256_v35  ;;  %v2839_v45 = vrot.slane %v2823_v10, %v8265_v0 }
 0x98e   : > { %v5812_v37 = vpop.f32.mrf.mxu1 }
 0x98f   : > { %v2681_v2 = vmax.f32 %v2678_v29, 0.0  ;;  %v2853_v29 = vrot.slane %v2825_v39, %v8265_v0  ;;  %v2804_v37 = vrot.slane %v2776_v25, %v8265_v0  ;;  %v2855_v49 = vcombine.high %v2839_v45, %v2839_v45 }
 0x991   : > { %v6982_v14 = vpop.f32.mrf.mxu1  ;;  %5813 = vmatprep.subr.mxu0 %v2681_v2  ;;  %v2857_v51 = vcombine.high %v2853_v29, %v2853_v29  ;;  %v2808_v10 = vcombine.high %v2804_v37, %v2804_v37 }
 0x992   : > { %8257 = vst [vmem:[#allocation32_spill] sm:$0xff] %v6982_v14  ;;  %5814 = vmatpush3.msra.mxu0 %v2681_v2  ;;  %v2854_v2 = vcombine.high %v2832_v24, %v2832_v24  ;;  %v8267_v24 = vld [vmem:[#allocation27_spill] sm:$0xff] }
 0x993   : > { %v3100_v26 = vpop.f32.mrf.mxu1  ;;  %5816 = vmatmul.mubr.msk.f32.vlgmr.msra.gmra.mxu0 %vm868_vm15, %v8260_v42  ;;  %5825 = vmatprep.subr.mxu0 %v8227_v5  ;;  %v2790_v42 = vrot.slane %v2774_v32, %v8265_v0  ;;  %v2889_v62 = vrot.slane %v2808_v10, %v8266_v19 }
 0x994   : > { %v6985_v1 = vsub.f32 %v3100_v26, %v8258_v28  ;;  %5827 = vmatprep.mubr.msk.f32.mxu0 %vm5967_vm14, %v8227_v5  ;;  %v2783_v26 = vrot.slane %v2767_v47, %v8265_v0  ;;  %v7023_v44 = vrot.slane %v2854_v2, %v8266_v19  ;;  %v2921_v28 = vrot.slane %v2857_v51, %v8266_v19 }
 0x995   : > { %v2806_v25 = vcombine.high %v2790_v42, %v2790_v42  ;;  %v2881_v51 = vrot.slane %v2804_v37, %v8266_v19 }
 0x996   : > { %8259 = vst [vmem:[#allocation8_spill] sm:$0xff] %v6985_v1  ;;  %5826 = vmatpush3.msk.msra.mxu0 %vm575_vm1, %v6985_v1  ;;  %v2805_v39 = vcombine.high %v2783_v26, %v2783_v26  ;;  %v7034_v2 = vrot.slane %v2783_v26, %v8266_v19 }
 0x997   : > { %5828 = vmatmul.mubr.msk.f32.vlgmr.msra.gmra.mxu0 %vm561_vm0, %v8261_v54  ;;  %v2797_v54 = vrot.slane %v2775_v40, %v8265_v0  ;;  %v2909_v40 = vrot.slane %v2839_v45, %v8266_v19  ;;  %v2913_v0 = vrot.slane %v2853_v29, %v8266_v19  ;;  %v8268_v29 = vld [vmem:[#allocation29_spill] sm:$0xff]  ;;  %v2885_v26 = vrot.slane %v2806_v25, %v8266_v19 }
 0x998   : > { %5837 = vmatprep.mubr.msk.f32.mxu0 %vm868_vm15, %v8262_v46  ;;  %v2856_v46 = vcombine.high %v2846_v31, %v2846_v31  ;;  %v2917_v31 = vrot.slane %v2855_v49, %v8266_v19 }
 0x999   : > { %v2807_v47 = vcombine.high %v2797_v54, %v2797_v54  ;;  %v7037_v35 = vrot.slane %v2797_v54, %v8266_v19 }
 0x99a   : > { %v7026_v32 = vrot.slane %v2856_v46, %v8266_v19  ;;  %v2877_v46 = vrot.slane %v2790_v42, %v8266_v19 }
 0x99b   : > { %v2873_v49 = vrot.slane %v2807_v47, %v8266_v19 }
 0xa53   : > { %v5817_v1 = vpop.f32.mrf.mxu0 }
 0xa54   : > { %v2754_v14 = vadd.f32 %v5817_v1, %v8267_v24  ;;  %v2869_v1 = vrot.slane %v2805_v39, %v8266_v19 }
 0xa55   : > { %v2748_v34 = vpop.f32.mrf.mxu0 }
 0xa56   : > { %v7041_v45 = vmax.f32 %v2754_v14, 0.0  ;;  %v2749_v52 = vadd.f32 %v2748_v34, %v8268_v29 }
 0xa57   : > { %v3179_v24 = vpop.f32.mrf.mxu0 }
 0xa58   : > { %v7048_v54 = vmax.f32 %v2749_v52, 0.0  ;;  %v3180_v53 = vadd.f32 %v3179_v24, %v8269_v21  ;;  %v2969_v42 = vmul.f32 %v2921_v28, %v7041_v45  ;;  %v2953_v14 = vmul.f32 %v2889_v62, %v7041_v45 }
 0xa59   : > { %v5829_v10 = vpop.f32.mrf.mxu0  ;;  %v2967_v34 = vmul.f32 %v2917_v31, %v7041_v45  ;;  %v2951_v39 = vmul.f32 %v2885_v26, %v7041_v45  ;;  %v2965_v47 = vmul.f32 %v2913_v0, %v7041_v45  ;;  %v2949_v37 = vmul.f32 %v2881_v51, %v7041_v45 }
 0xa5a   : > { %v3183_v29 = vmax.f32 %v3180_v53, 0.0  ;;  %v7058_v25 = vadd.f32 %v2969_v42, %v6823_v50  ;;  %v7061_v52 = vadd.f32 %v2953_v14, %v6826_v59  ;;  %v2968_v24 = vmul.f32 %v2921_v28, %v7048_v54 }
 0xa5b   : > { %v2952_v21 = vmul.f32 %v2889_v62, %v7048_v54  ;;  %v7066_v10 = vadd.f32 %v2967_v34, %v6831_v20  ;;  %v7069_v19 = vadd.f32 %v2951_v39, %v6834_v60  ;;  %v2966_v15 = vmul.f32 %v2917_v31, %v7048_v54  ;;  %v8270_v60 = vld [vmem:[#allocation11_spill] sm:$0xff]  ;;  %v8271_v20 = vld [vmem:[#allocation12_spill] sm:$0xff] }
 0xa5c   : > { %5831 = vmatpush3.msra.mxu1 %v3183_v29  ;;  %v7073_v53 = vadd.f32 %v2968_v24, %v6838_v23  ;;  %v2950_v50 = vmul.f32 %v2885_v26, %v7048_v54  ;;  %v7077_v59 = vadd.f32 %v2965_v47, %v6842_v22  ;;  %v7080_v28 = vadd.f32 %v2949_v37, %v6845_v58 }
 0xa5d   : > { %5833 = vmatmul.mubr.msk.f32.vlgmr.msra.gmra.mxu1 %vm868_vm15, %v8220_v27  ;;  %vm8272_vm10 = vcmp.eq.s32.totalorder %v8270_v60, %v8271_v20  ;;  %v7089_v62 = vadd.f32 %v2952_v21, %v6854_v4  ;;  %v7092_v23 = vadd.f32 %v2966_v15, %v6857_v63  ;;  %v2964_v22 = vmul.f32 %v2913_v0, %v7048_v54  ;;  %v8274_v63 = vld [vmem:[#allocation10_spill] sm:$0xff]  ;;  %v8280_v60 = vld [vmem:[#allocation4_spill] sm:$0xff] }
 0xa5e   : > { %5840 = vmatprep.subr.msk.mxu1 %vm8272_vm10, %v8221_v8  ;;  %vm8273_vm11 = vmmov %vm8272_vm10  ;;  %5844 = vmatprep.mubr.msk.f32.mxu1 %vm665_vm2, %v8224_v41  ;;  %v7102_v27 = vadd.f32 %v2950_v50, %v6867_v36  ;;  %v2948_v58 = vmul.f32 %v2881_v51, %v7048_v54  ;;  %v2963_v4 = vmul.f32 %v2909_v40, %v7041_v45  ;;  %v8278_v50 = vld [vmem:[#allocation2_spill] sm:$0xff] }
 0xa5f   : > { %5841 = vmatpush3.msk.msra.mxu1 %vm8273_vm11, %v8221_v8  ;;  %vm8275_vm9 = vcmp.eq.s32.totalorder %v8274_v63, %v8271_v20  ;;  %v7111_v15 = vadd.f32 %v2964_v22, %v6876_v56  ;;  %v2947_v21 = vmul.f32 %v2877_v46, %v7041_v45  ;;  %v2962_v0 = vmul.f32 %v2909_v40, %v7048_v54  ;;  %v8282_v20 = vld [vmem:[#allocation3_spill] sm:$0xff] }
 0xa60   : > { %5842 = vmatprep.subr.msk.mxu1 %vm8275_vm9, %v8221_v8  ;;  %v2946_v31 = vmul.f32 %v2877_v46, %v7048_v54  ;;  %vm8276_vm6 = vmmov %vm8275_vm9  ;;  %v7121_v36 = vadd.f32 %v2948_v58, %v6886_v16  ;;  %v7124_v29 = vadd.f32 %v2963_v4, %v6889_v30  ;;  %v2961_v56 = vmul.f32 %v7026_v32, %v7041_v45  ;;  %v8284_v58 = vld [vmem:[#allocation30_spill] sm:$0xff]  ;;  %v8286_v4 = vld [vmem:[#allocation31_spill] sm:$0xff] }
 0xa61   : > { %5843 = vmatpush3.msk.msra.mxu1 %vm8276_vm6, %v8221_v8  ;;  %v2945_v51 = vmul.f32 %v2873_v49, %v7041_v45  ;;  %v7133_v40 = vadd.f32 %v2947_v21, %v6898_v12  ;;  %v7136_v46 = vadd.f32 %v2962_v0, %v6901_v6  ;;  %v2960_v42 = vmul.f32 %v7026_v32, %v7048_v54 }
 0xa62   : > { %5845 = vmatmul.mubr.msk.f32.vlgmr.msra.gmra.mxu1 %vm665_vm2, %v8226_v38  ;;  %5852 = vmatprep.subr.mxu1 %v8227_v5  ;;  %v7139_v16 = vadd.f32 %v2946_v31, %v6904_v18  ;;  %v7144_v30 = vadd.f32 %v2961_v56, %v6909_v55  ;;  %v2944_v12 = vmul.f32 %v2873_v49, %v7048_v54 }
 0xa63   : > { %5854 = vmatprep.mubr.msk.f32.mxu1 %vm5967_vm14, %v8227_v5  ;;  %v7147_v26 = vadd.f32 %v2945_v51, %v6912_v57  ;;  %v2959_v6 = vmul.f32 %v7023_v44, %v7041_v45  ;;  %v2943_v18 = vmul.f32 %v2869_v1, %v7041_v45  ;;  %v2958_v14 = vmul.f32 %v7023_v44, %v7048_v54  ;;  %v8290_v51 = vld [vmem:[#allocation15_spill] sm:$0xff] }
 0xa64   : > { %v2942_v34 = vmul.f32 %v2869_v1, %v7048_v54  ;;  %v7159_v55 = vadd.f32 %v2960_v42, %v6924_v33  ;;  %v7162_v57 = vadd.f32 %v2944_v12, %v6927_v13  ;;  %v2957_v32 = vmul.f32 %v7020_v11, %v7041_v45  ;;  %v7225_v12 = vld [vmem:[%s8078_s10 + $0x8] sm:$0xff] }
 0xa65   : > { %v2941_v49 = vmul.f32 %v7037_v35, %v7041_v45  ;;  %v7169_v39 = vadd.f32 %v2959_v6, %v6934_v17  ;;  %v7172_v47 = vadd.f32 %v2943_v18, %v6937_v48  ;;  %v7175_v44 = vadd.f32 %v2958_v14, %v6940_v61  ;;  %8292 = vst [vmem:[#allocation38_spill] sm:$0xff] %v7225_v12  ;;  %v7237_v6 = vld [vmem:[%s8074_s6] sm:$0xff]  ;;  %v8295_v14 = vld [vmem:[#allocation32_spill] sm:$0xff] }
 0xa66   : > { %v7178_v33 = vadd.f32 %v2942_v34, %v6943_v7  ;;  %v7181_v13 = vadd.f32 %v2957_v32, %v6946_v43  ;;  %v2956_v37 = vmul.f32 %v7020_v11, %v7048_v54  ;;  %v2940_v17 = vmul.f32 %v7037_v35, %v7048_v54  ;;  %8293 = vst [vmem:[#allocation25_spill] sm:$0xff] %v7237_v6  ;;  %v7244_v18 = vld [vmem:[%s8078_s10] sm:$0xff]  ;;  %v8296_v32 = vld [vmem:[#allocation8_spill] sm:$0xff] }
 0xa67   : > { %v7184_v1 = vadd.f32 %v2941_v49, %v6949_v9  ;;  %v2955_v48 = vmul.f32 %v7017_v3, %v7041_v45  ;;  %v2939_v61 = vmul.f32 %v7034_v2, %v7041_v45  ;;  %v2954_v7 = vmul.f32 %v7017_v3, %v7048_v54  ;;  %v8277_v9 = vld [vmem:[#allocation6_spill] sm:$0xff]  ;;  %8294 = vst [vmem:[#allocation16_spill] sm:$0xff] %v7244_v18 }
 0xa68   : > { %v2938_v43 = vmul.f32 %v7034_v2, %v7048_v54  ;;  %v7199_v24 = vadd.f32 %v2956_v37, %v8277_v9  ;;  %v7202_v11 = vadd.f32 %v2940_v17, %v8278_v50  ;;  %v8288_v2 = vld [vmem:[#allocation24_spill] sm:$0xff]  ;;  %v3382_v34 = vcombine.high %v8295_v14, %v8295_v14  ;;  %v8297_v37 = vld [vmem:[#allocation26_spill] sm:$0xff] }
 0xa69   : > { %v7205_v35 = vadd.f32 %v2955_v48, %v8280_v60  ;;  %v7208_v22 = vadd.f32 %v2939_v61, %v8282_v20  ;;  %v7211_v45 = vadd.f32 %v2954_v7, %v8284_v58  ;;  %v3333_v49 = vcombine.high %v8296_v32, %v8296_v32 }
 0xa6a   : > { %8279 = vst [vmem:[#allocation9_spill] sm:$0xff] %v7202_v11  ;;  %v7214_v3 = vadd.f32 %v2938_v43, %v8286_v4  ;;  %v3389_v17 = vrot.slane %v8295_v14, %v8297_v37  ;;  %v3396_v48 = vrot.slane %v3382_v34, %v8297_v37  ;;  %v3340_v7 = vrot.slane %v8296_v32, %v8297_v37 }
 0xa6b   : > { %8281 = vst [vmem:[#allocation7_spill] sm:$0xff] %v7205_v35  ;;  %8283 = vst [vmem:[#allocation33_spill] sm:$0xff] %v7208_v22  ;;  %v3347_v61 = vrot.slane %v3333_v49, %v8297_v37  ;;  %v8301_v22 = vld [vmem:[#allocation21_spill] sm:$0xff] }
 0xa6c   : > { %8285 = vst [vmem:[#allocation34_spill] sm:$0xff] %v7211_v45  ;;  %8287 = vst [vmem:[#allocation35_spill] sm:$0xff] %v7214_v3  ;;  %v3397_v43 = vcombine.high %v3389_v17, %v3389_v17  ;;  %v3398_v9 = vcombine.high %v3396_v48, %v3396_v48  ;;  %v3405_v60 = vrot.slane %v3389_v17, %v8297_v37  ;;  %v8298_v17 = vld [vmem:[#allocation28_spill] sm:$0xff] }
 0xa6d   : > { %v3349_v50 = vcombine.high %v3347_v61, %v3347_v61  ;;  %v3348_v20 = vcombine.high %v3340_v7, %v3340_v7  ;;  %v3412_v4 = vrot.slane %v3396_v48, %v8297_v37 }
 0xa6e   : > { %v3419_v58 = vrot.slane %v3397_v43, %v8297_v37 }
 0xa6f   : > { %v3370_v14 = vrot.slane %v3348_v20, %v8297_v37  ;;  %v3428_v32 = vcombine.high %v3412_v4, %v3412_v4  ;;  %v3482_v20 = vrot.slane %v3412_v4, %v8298_v17 }
 0xa70   : > { %v3429_v34 = vcombine.high %v3419_v58, %v3419_v58  ;;  %v7270_v43 = vrot.slane %v3419_v58, %v8298_v17 }
 0xa71   : > { %v3490_v58 = vrot.slane %v3428_v32, %v8298_v17 }
 0xb1d   : > { %v3250_v63 = vpop.f32.mrf.mxu1 }
 0xb1e   : > { %v3251_v54 = vadd.f32 %v3250_v63, %v8288_v2  ;;  %v3426_v63 = vrot.slane %v3398_v9, %v8297_v37 }
 0xb1f   : > { %v5834_v21 = vpop.f32.mrf.mxu1 }
 0xb20   : > { %v3254_v0 = vmax.f32 %v3251_v54, 0.0  ;;  %v3377_v54 = vrot.slane %v3349_v50, %v8297_v37  ;;  %v3427_v21 = vcombine.high %v3405_v60, %v3405_v60  ;;  %v3430_v49 = vcombine.high %v3426_v63, %v3426_v63 }
 0xb22   : > { %v7217_v31 = vpop.f32.mrf.mxu1  ;;  %5835 = vmatprep.subr.mxu0 %v3254_v0  ;;  %v3381_v48 = vcombine.high %v3377_v54, %v3377_v54  ;;  %v7273_v9 = vrot.slane %v3427_v21, %v8298_v17 }
 0xb23   : > { %8289 = vst [vmem:[#allocation36_spill] sm:$0xff] %v7217_v31  ;;  %5836 = vmatpush3.msra.mxu0 %v3254_v0  ;;  %v3356_v0 = vrot.slane %v3340_v7, %v8297_v37  ;;  %v3380_v7 = vcombine.high %v3370_v14, %v3370_v14 }
 0xb24   : > { %v3673_v56 = vpop.f32.mrf.mxu1  ;;  %5838 = vmatmul.mubr.msk.f32.vlgmr.msra.gmra.mxu0 %vm868_vm15, %v7225_v12  ;;  %5847 = vmatprep.subr.mxu0 %v8227_v5  ;;  %v3494_v12 = vrot.slane %v3430_v49, %v8298_v17  ;;  %v3462_v3 = vrot.slane %v3381_v48, %v8298_v17  ;;  %v3454_v49 = vrot.slane %v3377_v54, %v8298_v17 }
 0xb25   : > { %v7220_v42 = vsub.f32 %v3673_v56, %v8290_v51  ;;  %5849 = vmatprep.mubr.msk.f32.mxu0 %vm5967_vm14, %v8227_v5  ;;  %v3363_v56 = vrot.slane %v3347_v61, %v8297_v37  ;;  %v3378_v50 = vcombine.high %v3356_v0, %v3356_v0  ;;  %v7276_v61 = vrot.slane %v3429_v34, %v8298_v17 }
 0xb26   : > { %v3486_v37 = vrot.slane %v3426_v63, %v8298_v17  ;;  %v7284_v21 = vrot.slane %v3356_v0, %v8298_v17  ;;  %v7287_v51 = vrot.slane %v3370_v14, %v8298_v17  ;;  %v8300_v63 = vld [vmem:[#allocation29_spill] sm:$0xff]  ;;  %v3446_v32 = vrot.slane %v3380_v7, %v8298_v17 }
 0xb27   : > { %8291 = vst [vmem:[#allocation37_spill] sm:$0xff] %v7220_v42  ;;  %5848 = vmatpush3.msk.msra.mxu0 %vm575_vm1, %v7220_v42  ;;  %v7267_v42 = vrot.slane %v3405_v60, %v8298_v17  ;;  %v3379_v31 = vcombine.high %v3363_v56, %v3363_v56  ;;  %v8299_v60 = vld [vmem:[#allocation27_spill] sm:$0xff]  ;;  %v3450_v34 = vrot.slane %v3363_v56, %v8298_v17 }
 0xb28   : > { %5850 = vmatmul.mubr.msk.f32.vlgmr.msra.gmra.mxu0 %vm561_vm0, %v7237_v6 }
 0xb29   : > { %5859 = vmatprep.mubr.msk.f32.mxu0 %vm868_vm15, %v7244_v18  ;;  %v3458_v0 = vrot.slane %v3379_v31, %v8298_v17 }
 0xbe4   : > { %v5839_v18 = vpop.f32.mrf.mxu0 }
 0xbe5   : > { %v3327_v6 = vadd.f32 %v5839_v18, %v8299_v60  ;;  %v3442_v18 = vrot.slane %v3378_v50, %v8298_v17 }
 0xbe6   : > { %v3321_v2 = vpop.f32.mrf.mxu0 }
 0xbe7   : > { %v7291_v4 = vmax.f32 %v3327_v6, 0.0  ;;  %v3322_v45 = vadd.f32 %v3321_v2, %v8300_v63 }
 0xbe8   : > { %v3752_v60 = vpop.f32.mrf.mxu0 }
 0xbe9   : > { %v7298_v14 = vmax.f32 %v3322_v45, 0.0  ;;  %v3753_v35 = vadd.f32 %v3752_v60, %v8301_v22  ;;  %v3542_v56 = vmul.f32 %v3494_v12, %v7291_v4  ;;  %v3526_v6 = vmul.f32 %v3462_v3, %v7291_v4 }
 0xbea   : > { %v5851_v48 = vpop.f32.mrf.mxu0  ;;  %v3540_v2 = vmul.f32 %v3490_v58, %v7291_v4  ;;  %v3524_v50 = vmul.f32 %v3458_v0, %v7291_v4  ;;  %v3538_v7 = vmul.f32 %v3486_v37, %v7291_v4  ;;  %v3522_v54 = vmul.f32 %v3454_v49, %v7291_v4 }
 0xbeb   : > { %v3756_v63 = vmax.f32 %v3753_v35, 0.0  ;;  %v7308_v31 = vadd.f32 %v3542_v56, %v7058_v25  ;;  %v7311_v45 = vadd.f32 %v3526_v6, %v7061_v52  ;;  %v3541_v60 = vmul.f32 %v3494_v12, %v7298_v14 }
 0xbec   : > { %v3525_v22 = vmul.f32 %v3462_v3, %v7298_v14  ;;  %v7316_v48 = vadd.f32 %v3540_v2, %v7066_v10  ;;  %v7319_v17 = vadd.f32 %v3524_v50, %v7069_v19  ;;  %v3539_v11 = vmul.f32 %v3490_v58, %v7298_v14  ;;  %v7335_v10 = vld [vmem:[%s8076_s8] sm:$0xff] }
 0xbed   : > { %5853 = vmatpush3.msra.mxu1 %v3756_v63  ;;  %v7323_v35 = vadd.f32 %v3541_v60, %v7073_v53  ;;  %v3523_v25 = vmul.f32 %v3458_v0, %v7298_v14  ;;  %v7327_v52 = vadd.f32 %v3538_v7, %v7077_v59  ;;  %v7330_v12 = vadd.f32 %v3522_v54, %v7080_v28  ;;  %v8302_v19 = vld [vmem:[#allocation14_spill] sm:$0xff]  ;;  %v8303_v53 = vld [vmem:[#allocation17_spill] sm:$0xff] }
 0xbee   : > { %5855 = vmatmul.mubr.msk.f32.vlgmr.msra.gmra.mxu1 %vm868_vm15, %v7335_v10  ;;  %vm8304_vm3 = vcmp.eq.s32.totalorder %v8302_v19, %v8303_v53  ;;  %v7344_v3 = vadd.f32 %v3525_v22, %v7089_v62  ;;  %v7347_v59 = vadd.f32 %v3539_v11, %v7092_v23  ;;  %v3537_v28 = vmul.f32 %v3486_v37, %v7298_v14  ;;  %v8306_v23 = vld [vmem:[#allocation13_spill] sm:$0xff] }
 0xbef   : > { %5862 = vmatprep.subr.msk.mxu1 %vm8304_vm3, %v8221_v8  ;;  %vm8305_vm4 = vmmov %vm8304_vm3  ;;  %5866 = vmatprep.mubr.msk.f32.mxu1 %vm665_vm2, %v8224_v41  ;;  %v7357_v58 = vadd.f32 %v3523_v25, %v7102_v27  ;;  %v3521_v63 = vmul.f32 %v3454_v49, %v7298_v14  ;;  %v3536_v62 = vmul.f32 %v3482_v20, %v7291_v4  ;;  %v8310_v19 = vld [vmem:[#allocation9_spill] sm:$0xff] }
 0xbf0   : > { %5863 = vmatpush3.msk.msra.mxu1 %vm8305_vm4, %v8221_v8  ;;  %vm8307_vm5 = vcmp.eq.s32.totalorder %v8306_v23, %v8303_v53  ;;  %v7366_v11 = vadd.f32 %v3537_v28, %v7111_v15  ;;  %v3520_v22 = vmul.f32 %v3450_v34, %v7291_v4  ;;  %v3535_v37 = vmul.f32 %v3482_v20, %v7298_v14  ;;  %v8312_v53 = vld [vmem:[#allocation7_spill] sm:$0xff]  ;;  %v8314_v28 = vld [vmem:[#allocation33_spill] sm:$0xff] }
 0xbf1   : > { %5864 = vmatprep.subr.msk.mxu1 %vm8307_vm5, %v8221_v8  ;;  %v3519_v0 = vmul.f32 %v3450_v34, %v7298_v14  ;;  %vm8308_vm12 = vmmov %vm8307_vm5  ;;  %v7376_v27 = vadd.f32 %v3521_v63, %v7121_v36  ;;  %v7379_v49 = vadd.f32 %v3536_v62, %v7124_v29  ;;  %v3534_v15 = vmul.f32 %v7276_v61, %v7291_v4  ;;  %v8316_v62 = vld [vmem:[#allocation34_spill] sm:$0xff]  ;;  %v8318_v23 = vld [vmem:[#allocation35_spill] sm:$0xff] }
 0xbf2   : > { %5865 = vmatpush3.msk.msra.mxu1 %vm8308_vm12, %v8221_v8  ;;  %v3518_v56 = vmul.f32 %v3446_v32, %v7291_v4  ;;  %v7388_v20 = vadd.f32 %v3520_v22, %v7133_v40  ;;  %v7391_v34 = vadd.f32 %v3535_v37, %v7136_v46  ;;  %v3533_v2 = vmul.f32 %v7276_v61, %v7298_v14 }
 0xbf3   : > { %5867 = vmatmul.mubr.msk.f32.vlgmr.msra.gmra.mxu1 %vm665_vm2, %v8226_v38  ;;  %5874 = vmatprep.subr.mxu1 %v8227_v5  ;;  %v7394_v36 = vadd.f32 %v3519_v0, %v7139_v16  ;;  %v7399_v29 = vadd.f32 %v3534_v15, %v7144_v30  ;;  %v3517_v40 = vmul.f32 %v3446_v32, %v7298_v14 }
 0xbf4   : > { %5876 = vmatprep.mubr.msk.f32.mxu1 %vm5967_vm14, %v8227_v5  ;;  %v7402_v6 = vadd.f32 %v3518_v56, %v7147_v26  ;;  %v3532_v46 = vmul.f32 %v7273_v9, %v7291_v4  ;;  %v3516_v16 = vmul.f32 %v3442_v18, %v7291_v4  ;;  %v3531_v50 = vmul.f32 %v7273_v9, %v7298_v14  ;;  %v8322_v56 = vld [vmem:[#allocation15_spill] sm:$0xff] }
 0xbf5   : > { %v3515_v7 = vmul.f32 %v3442_v18, %v7298_v14  ;;  %v7414_v30 = vadd.f32 %v3533_v2, %v7159_v55  ;;  %v7417_v26 = vadd.f32 %v3517_v40, %v7162_v57  ;;  %v3530_v61 = vmul.f32 %v7270_v43, %v7291_v4  ;;  %v8324_v40 = vld [vmem:[#allocation38_spill] sm:$0xff] }
 0xbf6   : > { %v3514_v32 = vmul.f32 %v7287_v51, %v7291_v4  ;;  %v7424_v54 = vadd.f32 %v3532_v46, %v7169_v39  ;;  %v7427_v60 = vadd.f32 %v3516_v16, %v7172_v47  ;;  %v7430_v9 = vadd.f32 %v3531_v50, %v7175_v44  ;;  %v8325_v46 = vld [vmem:[#allocation25_spill] sm:$0xff]  ;;  %v8326_v16 = vld [vmem:[#allocation16_spill] sm:$0xff] }
 0xbf7   : > { %v7433_v55 = vadd.f32 %v3515_v7, %v7178_v33  ;;  %v7436_v57 = vadd.f32 %v3530_v61, %v7181_v13  ;;  %v3529_v25 = vmul.f32 %v7270_v43, %v7298_v14  ;;  %v3513_v39 = vmul.f32 %v7287_v51, %v7298_v14  ;;  %v8327_v50 = vld [vmem:[#allocation36_spill] sm:$0xff]  ;;  %v8328_v61 = vld [vmem:[#allocation37_spill] sm:$0xff] }
 0xbf8   : > { %v7439_v18 = vadd.f32 %v3514_v32, %v7184_v1  ;;  %v3528_v47 = vmul.f32 %v7267_v42, %v7291_v4  ;;  %v3512_v44 = vmul.f32 %v7284_v21, %v7291_v4  ;;  %v3527_v33 = vmul.f32 %v7267_v42, %v7298_v14 }
 0xbf9   : > { %v3511_v13 = vmul.f32 %v7284_v21, %v7298_v14  ;;  %v7454_v1 = vadd.f32 %v3529_v25, %v7199_v24  ;;  %v7457_v43 = vadd.f32 %v3513_v39, %v8310_v19  ;;  %v8320_v21 = vld [vmem:[#allocation24_spill] sm:$0xff]  ;;  %v3955_v7 = vcombine.high %v8327_v50, %v8327_v50  ;;  %v8329_v25 = vld [vmem:[#allocation26_spill] sm:$0xff] }
 0xbfa   : > { %v7460_v51 = vadd.f32 %v3528_v47, %v8312_v53  ;;  %v7463_v63 = vadd.f32 %v3512_v44, %v8314_v28  ;;  %v7466_v4 = vadd.f32 %v3527_v33, %v8316_v62  ;;  %v3906_v32 = vcombine.high %v8328_v61, %v8328_v61 }
 0xbfb   : > { %8309 = vst [vmem:[#allocation23_spill] sm:$0xff] %v7454_v1  ;;  %8311 = vst [vmem:[#allocation22_spill] sm:$0xff] %v7457_v43  ;;  %v7469_v42 = vadd.f32 %v3511_v13, %v8318_v23  ;;  %v3962_v39 = vrot.slane %v8327_v50, %v8329_v25  ;;  %v3969_v47 = vrot.slane %v3955_v7, %v8329_v25 }
 0xbfc   : > { %8313 = vst [vmem:[#allocation5_spill] sm:$0xff] %v7460_v51  ;;  %8315 = vst [vmem:[#allocation11_spill] sm:$0xff] %v7463_v63  ;;  %v3920_v44 = vrot.slane %v3906_v32, %v8329_v25  ;;  %v3913_v33 = vrot.slane %v8328_v61, %v8329_v25  ;;  %v8333_v51 = vld [vmem:[#allocation21_spill] sm:$0xff] }
 0xbfd   : > { %8317 = vst [vmem:[#allocation12_spill] sm:$0xff] %v7466_v4  ;;  %8319 = vst [vmem:[#allocation10_spill] sm:$0xff] %v7469_v42  ;;  %v3970_v13 = vcombine.high %v3962_v39, %v3962_v39  ;;  %v3971_v19 = vcombine.high %v3969_v47, %v3969_v47  ;;  %v3978_v28 = vrot.slane %v3962_v39, %v8329_v25  ;;  %v8330_v39 = vld [vmem:[#allocation28_spill] sm:$0xff] }
 0xbfe   : > { %v3922_v53 = vcombine.high %v3920_v44, %v3920_v44  ;;  %v3921_v62 = vcombine.high %v3913_v33, %v3913_v33  ;;  %v3936_v50 = vrot.slane %v3920_v44, %v8329_v25 }
 0xbff   : > { %v3992_v23 = vrot.slane %v3970_v13, %v8329_v25 }
 0xc00   : > { %v3943_v7 = vrot.slane %v3921_v62, %v8329_v25 }
 0xc01   : > { %v4002_v61 = vcombine.high %v3992_v23, %v3992_v23  ;;  %v7510_v13 = vrot.slane %v3992_v23, %v8330_v39 }
 0xc03   : > { %v7516_v44 = vrot.slane %v4002_v61, %v8330_v39  ;;  %v4023_v61 = vrot.slane %v3936_v50, %v8330_v39 }
 0xcae   : > { %v3823_v22 = vpop.f32.mrf.mxu1 }
 0xcaf   : > { %v3824_v14 = vadd.f32 %v3823_v22, %v8320_v21  ;;  %v3985_v22 = vrot.slane %v3969_v47, %v8329_v25  ;;  %v7527_v21 = vrot.slane %v3943_v7, %v8330_v39 }
 0xcb0   : > { %v5856_v24 = vpop.f32.mrf.mxu1 }
 0xcb1   : > { %v3827_v37 = vmax.f32 %v3824_v14, 0.0  ;;  %v3999_v14 = vrot.slane %v3971_v19, %v8329_v25  ;;  %v3950_v24 = vrot.slane %v3922_v53, %v8329_v25  ;;  %v4001_v32 = vcombine.high %v3985_v22, %v3985_v22 }
 0xcb2   : > { %v4055_v62 = vrot.slane %v3985_v22, %v8330_v39 }
 0xcb3   : > { %v7472_v0 = vpop.f32.mrf.mxu1  ;;  %5857 = vmatprep.subr.mxu0 %v3827_v37  ;;  %v3954_v47 = vcombine.high %v3950_v24, %v3950_v24  ;;  %v4063_v23 = vrot.slane %v4001_v32, %v8330_v39 }
 0xcb4   : > { %8321 = vst [vmem:[#allocation6_spill] sm:$0xff] %v7472_v0  ;;  %5858 = vmatpush3.msra.mxu0 %v3827_v37  ;;  %v4000_v37 = vcombine.high %v3978_v28, %v3978_v28  ;;  %v7507_v0 = vrot.slane %v3978_v28, %v8330_v39  ;;  %v8331_v28 = vld [vmem:[#allocation27_spill] sm:$0xff] }
 0xcb5   : > { %v4246_v15 = vpop.f32.mrf.mxu1  ;;  %5860 = vmatmul.mubr.msk.f32.vlgmr.msra.gmra.mxu0 %vm868_vm15, %v8324_v40  ;;  %5869 = vmatprep.subr.mxu0 %v8227_v5  ;;  %v4035_v4 = vrot.slane %v3954_v47, %v8330_v39 }
 0xcb6   : > { %v7475_v2 = vsub.f32 %v4246_v15, %v8322_v56  ;;  %5871 = vmatprep.mubr.msk.f32.mxu0 %vm5967_vm14, %v8227_v5  ;;  %v3929_v15 = vrot.slane %v3913_v33, %v8329_v25  ;;  %v7513_v19 = vrot.slane %v4000_v37, %v8330_v39  ;;  %v3953_v33 = vcombine.high %v3943_v7, %v3943_v7 }
 0xcb7   : > { %v4059_v25 = vrot.slane %v3999_v14, %v8330_v39 }
 0xcb8   : > { %8323 = vst [vmem:[#allocation2_spill] sm:$0xff] %v7475_v2  ;;  %5870 = vmatpush3.msk.msra.mxu0 %vm575_vm1, %v7475_v2  ;;  %v4003_v2 = vcombine.high %v3999_v14, %v3999_v14  ;;  %v3951_v53 = vcombine.high %v3929_v15, %v3929_v15  ;;  %v7524_v37 = vrot.slane %v3929_v15, %v8330_v39  ;;  %v8332_v14 = vld [vmem:[#allocation29_spill] sm:$0xff] }
 0xcb9   : > { %5872 = vmatmul.mubr.msk.f32.vlgmr.msra.gmra.mxu0 %vm561_vm0, %v8325_v46  ;;  %v4019_v32 = vrot.slane %v3953_v33, %v8330_v39 }
 0xcba   : > { %5881 = vmatprep.mubr.msk.f32.mxu0 %vm868_vm15, %v8326_v16  ;;  %v3952_v16 = vcombine.high %v3936_v50, %v3936_v50  ;;  %v4067_v56 = vrot.slane %v4003_v2, %v8330_v39  ;;  %v4027_v2 = vrot.slane %v3950_v24, %v8330_v39 }
 0xcbc   : > { %v4031_v15 = vrot.slane %v3952_v16, %v8330_v39 }
 0xd75   : > { %v5861_v46 = vpop.f32.mrf.mxu0 }
 0xd76   : > { %v3900_v40 = vadd.f32 %v5861_v46, %v8331_v28  ;;  %v4015_v46 = vrot.slane %v3951_v53, %v8330_v39 }
 0xd77   : > { %v3894_v42 = vpop.f32.mrf.mxu0 }
 0xd78   : > { %v7531_v22 = vmax.f32 %v3900_v40, 0.0  ;;  %v3895_v63 = vadd.f32 %v3894_v42, %v8332_v14 }
 0xd79   : > { %v4325_v28 = vpop.f32.mrf.mxu0 }
 0xd7a   : > { %v7538_v7 = vmax.f32 %v3895_v63, 0.0  ;;  %v4326_v43 = vadd.f32 %v4325_v28, %v8333_v51  ;;  %v4115_v50 = vmul.f32 %v4067_v56, %v7531_v22  ;;  %v4099_v40 = vmul.f32 %v4035_v4, %v7531_v22 }
 0xd7b   : > { %v5873_v47 = vpop.f32.mrf.mxu0  ;;  %v4113_v42 = vmul.f32 %v4063_v23, %v7531_v22  ;;  %v4097_v53 = vmul.f32 %v4031_v15, %v7531_v22  ;;  %v4111_v33 = vmul.f32 %v4059_v25, %v7531_v22  ;;  %v4095_v24 = vmul.f32 %v4027_v2, %v7531_v22 }
 0xd7c   : > { %v4329_v14 = vmax.f32 %v4326_v43, 0.0  ;;  %v7548_v16 = vadd.f32 %v4115_v50, %v7308_v31  ;;  %v7551_v63 = vadd.f32 %v4099_v40, %v7311_v45  ;;  %v4114_v28 = vmul.f32 %v4067_v56, %v7538_v7 }
 0xd7d   : > { %v4098_v51 = vmul.f32 %v4035_v4, %v7538_v7  ;;  %v7556_v47 = vadd.f32 %v4113_v42, %v7316_v48  ;;  %v7559_v39 = vadd.f32 %v4097_v53, %v7319_v17  ;;  %v4112_v1 = vmul.f32 %v4063_v23, %v7538_v7  ;;  %v8341_v48 = vld [vmem:[#allocation12_spill] sm:$0xff] }
 0xd7e   : > { %5875 = vmatpush3.msra.mxu1 %v4329_v14  ;;  %v7563_v43 = vadd.f32 %v4114_v28, %v7323_v35  ;;  %v4096_v31 = vmul.f32 %v4031_v15, %v7538_v7  ;;  %v7567_v45 = vadd.f32 %v4111_v33, %v7327_v52  ;;  %v7570_v56 = vadd.f32 %v4095_v24, %v7330_v12  ;;  %v8338_v24 = vld [vmem:[#allocation22_spill] sm:$0xff]  ;;  %v8339_v28 = vld [vmem:[#allocation5_spill] sm:$0xff] }
 0xd7f   : > { %5877 = vmatmul.mubr.msk.f32.vlgmr.msra.gmra.mxu1 %vm868_vm15, %v7335_v10  ;;  %5884 = vmatprep.subr.msk.mxu1 %vm4750_vm8, %v8221_v8  ;;  %v7579_v4 = vadd.f32 %v4098_v51, %v7344_v3  ;;  %v7582_v35 = vadd.f32 %v4112_v1, %v7347_v59  ;;  %v4110_v52 = vmul.f32 %v4059_v25, %v7538_v7 }
 0xd80   : > { %5885 = vmatpush3.msk.msra.mxu1 %vm4750_vm8, %v8221_v8  ;;  %5888 = vmatprep.mubr.msk.f32.mxu1 %vm665_vm2, %v8224_v41  ;;  %v7592_v12 = vadd.f32 %v4096_v31, %v7357_v58  ;;  %v4094_v23 = vmul.f32 %v4027_v2, %v7538_v7  ;;  %v4109_v3 = vmul.f32 %v4055_v62, %v7531_v22  ;;  %v8340_v31 = vld [vmem:[#allocation11_spill] sm:$0xff] }
 0xd81   : > { %5886 = vmatprep.subr.msk.mxu1 %vm4749_vm7, %v8221_v8  ;;  %v7601_v1 = vadd.f32 %v4110_v52, %v7366_v11  ;;  %v4093_v51 = vmul.f32 %v4023_v61, %v7531_v22  ;;  %v4108_v25 = vmul.f32 %v4055_v62, %v7538_v7  ;;  %v4092_v41 = vmul.f32 %v4023_v61, %v7538_v7  ;;  %v8343_v52 = vld [vmem:[#allocation10_spill] sm:$0xff] }
 0xd82   : > { %5887 = vmatpush3.msk.msra.mxu1 %vm4749_vm7, %v8221_v8  ;;  %v7611_v58 = vadd.f32 %v4094_v23, %v7376_v27  ;;  %v7614_v14 = vadd.f32 %v4109_v3, %v7379_v49  ;;  %v4107_v11 = vmul.f32 %v7516_v44, %v7531_v22  ;;  %v4091_v2 = vmul.f32 %v4019_v32, %v7531_v22 }
 0xd83   : > { %5889 = vmatmul.mubr.msk.f32.vlgmr.msra.gmra.mxu1 %vm665_vm2, %v8226_v38  ;;  %5896 = vmatprep.subr.mxu1 %v8227_v5  ;;  %v7623_v62 = vadd.f32 %v4093_v51, %v7388_v20  ;;  %v7626_v8 = vadd.f32 %v4108_v25, %v7391_v34  ;;  %v7629_v27 = vadd.f32 %v4092_v41, %v7394_v36  ;;  %v8347_v41 = vld [vmem:[#allocation15_spill] sm:$0xff] }
 0xd84   : > { %5898 = vmatprep.mubr.msk.f32.mxu1 %vm5967_vm14, %v8227_v5  ;;  %v7634_v49 = vadd.f32 %v4107_v11, %v7399_v29  ;;  %v7637_v61 = vadd.f32 %v4091_v2, %v7402_v6  ;;  %v4106_v38 = vmul.f32 %v7516_v44, %v7538_v7  ;;  %v4090_v20 = vmul.f32 %v4019_v32, %v7538_v7  ;;  %v8349_v2 = vld [vmem:[#allocation38_spill] sm:$0xff] }
 0xd85   : > { %v4105_v34 = vmul.f32 %v7513_v19, %v7531_v22  ;;  %v4089_v36 = vmul.f32 %v4015_v46, %v7531_v22  ;;  %v4104_v15 = vmul.f32 %v7513_v19, %v7538_v7  ;;  %v4088_v50 = vmul.f32 %v4015_v46, %v7538_v7 }
 0xd86   : > { %v7649_v29 = vadd.f32 %v4106_v38, %v7414_v30  ;;  %v7652_v6 = vadd.f32 %v4090_v20, %v7417_v26  ;;  %v4103_v44 = vmul.f32 %v7510_v13, %v7531_v22  ;;  %v4087_v32 = vmul.f32 %v7527_v21, %v7531_v22  ;;  %v8350_v38 = vld [vmem:[#allocation25_spill] sm:$0xff]  ;;  %v8351_v20 = vld [vmem:[#allocation16_spill] sm:$0xff] }
 0xd87   : > { %v7659_v40 = vadd.f32 %v4105_v34, %v7424_v54  ;;  %v7662_v42 = vadd.f32 %v4089_v36, %v7427_v60  ;;  %v7665_v19 = vadd.f32 %v4104_v15, %v7430_v9  ;;  %v7668_v30 = vadd.f32 %v4088_v50, %v7433_v55  ;;  %v8352_v34 = vld [vmem:[#allocation6_spill] sm:$0xff] }
 0xd88   : > { %v7671_v26 = vadd.f32 %v4103_v44, %v7436_v57  ;;  %v7674_v46 = vadd.f32 %v4087_v32, %v7439_v18  ;;  %v4102_v53 = vmul.f32 %v7510_v13, %v7538_v7  ;;  %v4086_v54 = vmul.f32 %v7527_v21, %v7538_v7  ;;  %v8337_v18 = vld [vmem:[#allocation23_spill] sm:$0xff]  ;;  %v8353_v15 = vld [vmem:[#allocation2_spill] sm:$0xff] }
 0xd89   : > { %v4101_v60 = vmul.f32 %v7507_v0, %v7531_v22  ;;  %v4085_v9 = vmul.f32 %v7524_v37, %v7531_v22  ;;  %v4100_v55 = vmul.f32 %v7507_v0, %v7538_v7  ;;  %v4084_v57 = vmul.f32 %v7524_v37, %v7538_v7  ;;  %v8345_v37 = vld [vmem:[#allocation24_spill] sm:$0xff]  ;;  %v8354_v44 = vld [vmem:[#allocation26_spill] sm:$0xff] }
 0xd8a   : > { %v7689_v33 = vadd.f32 %v4102_v53, %v8337_v18  ;;  %v7692_v13 = vadd.f32 %v4086_v54, %v8338_v24  ;;  %v4528_v36 = vcombine.high %v8352_v34, %v8352_v34  ;;  %v4479_v50 = vcombine.high %v8353_v15, %v8353_v15 }
 0xd8b   : > { %v7695_v21 = vadd.f32 %v4101_v60, %v8339_v28  ;;  %v7698_v17 = vadd.f32 %v4085_v9, %v8340_v31  ;;  %v7701_v22 = vadd.f32 %v4100_v55, %v8341_v48  ;;  %v7704_v0 = vadd.f32 %v4084_v57, %v8343_v52 }
 0xd8c   : > { %v4535_v32 = vrot.slane %v8352_v34, %v8354_v44  ;;  %v4493_v53 = vrot.slane %v4479_v50, %v8354_v44  ;;  %v4486_v54 = vrot.slane %v8353_v15, %v8354_v44 }
 0xd8d   : > { %8342 = vst [vmem:[#allocation4_spill] sm:$0xff] %v7701_v22  ;;  %8344 = vst [vmem:[#allocation3_spill] sm:$0xff] %v7704_v0 }
 0xd8e   : > { %v4543_v60 = vcombine.high %v4535_v32, %v4535_v32  ;;  %v4495_v55 = vcombine.high %v4493_v53, %v4493_v53  ;;  %v4551_v57 = vrot.slane %v4535_v32, %v8354_v44  ;;  %v4494_v18 = vcombine.high %v4486_v54, %v4486_v54 }
 0xd90   : > { %v4565_v24 = vrot.slane %v4543_v60, %v8354_v44  ;;  %v4523_v48 = vrot.slane %v4495_v55, %v8354_v44  ;;  %v4573_v52 = vcombine.high %v4551_v57, %v4551_v57  ;;  %v8356_v55 = vld [vmem:[#allocation27_spill] sm:$0xff] }
 0xe3f   : > { %v4396_v23 = vpop.f32.mrf.mxu1 }
 0xe40   : > { %v4397_v7 = vadd.f32 %v4396_v23, %v8345_v37  ;;  %v4502_v23 = vrot.slane %v4486_v54, %v8354_v44 }
 0xe41   : > { %v5878_v3 = vpop.f32.mrf.mxu1 }
 0xe42   : > { %v4400_v59 = vmax.f32 %v4397_v7, 0.0  ;;  %v4509_v7 = vrot.slane %v4493_v53, %v8354_v44  ;;  %v4516_v3 = vrot.slane %v4494_v18, %v8354_v44  ;;  %v4524_v50 = vcombine.high %v4502_v23, %v4502_v23 }
 0xe43   : > { %v7707_v51 = vpop.f32.mrf.mxu1 }
 0xe44   : > { %8346 = vst [vmem:[#allocation30_spill] sm:$0xff] %v7707_v51  ;;  %5879 = vmatprep.subr.mxu0 %v4400_v59  ;;  %v4525_v32 = vcombine.high %v4509_v7, %v4509_v7 }
 0xe45   : > { %5880 = vmatpush3.msra.mxu0 %v4400_v59  ;;  %v4819_v25 = vpop.f32.mrf.mxu1  ;;  %v4575_v59 = vcombine.high %v4565_v24, %v4565_v24 }
 0xe46   : > { %v7710_v11 = vsub.f32 %v4819_v25, %v8347_v41  ;;  %5882 = vmatmul.mubr.msk.f32.vlgmr.msra.gmra.mxu0 %vm868_vm15, %v8349_v2  ;;  %5891 = vmatprep.subr.mxu0 %v8227_v5 }
 0xe47   : > { %5893 = vmatprep.mubr.msk.f32.mxu0 %vm5967_vm14, %v8227_v5  ;;  %v4542_v5 = vrot.slane %v4528_v36, %v8354_v44  ;;  %v4527_v36 = vcombine.high %v4523_v48, %v4523_v48 }
 0xe48   : > { %8348 = vst [vmem:[#allocation31_spill] sm:$0xff] %v7710_v11  ;;  %5892 = vmatpush3.msk.msra.mxu0 %vm575_vm1, %v7710_v11 }
 0xe49   : > { %v4544_v9 = vcombine.high %v4542_v5, %v4542_v5  ;;  %v4558_v28 = vrot.slane %v4542_v5, %v8354_v44  ;;  %v4526_v5 = vcombine.high %v4516_v3, %v4516_v3 }
 0xe4a   : > { %5894 = vmatmul.mubr.msk.f32.vlgmr.msra.gmra.mxu0 %vm561_vm0, %v8350_v38  ;;  %v8355_v38 = vld [vmem:[#allocation28_spill] sm:$0xff] }
 0xe4b   : > { %5903 = vmatprep.mubr.msk.f32.mxu0 %vm868_vm15, %v8351_v20  ;;  %v4572_v31 = vrot.slane %v4544_v9, %v8354_v44  ;;  %v4574_v25 = vcombine.high %v4558_v28, %v4558_v28  ;;  %v7742_v20 = vrot.slane %v4551_v57, %v8355_v38  ;;  %v7745_v34 = vrot.slane %v4565_v24, %v8355_v38 }
 0xe4c   : > { %v7748_v15 = vrot.slane %v4573_v52, %v8355_v38  ;;  %v4624_v53 = vrot.slane %v4575_v59, %v8355_v38  ;;  %v4628_v60 = vrot.slane %v4558_v28, %v8355_v38  ;;  %v7756_v24 = vrot.slane %v4502_v23, %v8355_v38  ;;  %v8357_v28 = vld [vmem:[#allocation29_spill] sm:$0xff] }
 0xe4d   : > { %v4576_v41 = vcombine.high %v4572_v31, %v4572_v31  ;;  %v4632_v9 = vrot.slane %v4572_v31, %v8355_v38  ;;  %v4636_v18 = vrot.slane %v4574_v25, %v8355_v38  ;;  %v7759_v52 = vrot.slane %v4516_v3, %v8355_v38 }
 0xe4e   : > { %v4596_v51 = vrot.slane %v4509_v7, %v8355_v38  ;;  %v4608_v31 = vrot.slane %v4527_v36, %v8355_v38  ;;  %v4592_v25 = vrot.slane %v4526_v5, %v8355_v38  ;;  %v4600_v23 = vrot.slane %v4523_v48, %v8355_v38 }
 0xe4f   : > { %v4640_v11 = vrot.slane %v4576_v41, %v8355_v38  ;;  %v4604_v3 = vrot.slane %v4525_v32, %v8355_v38  ;;  %v8358_v41 = vld [vmem:[#allocation21_spill] sm:$0xff] }
 0xf06   : > { %v5883_v54 = vpop.f32.mrf.mxu0 }
 0xf07   : > { %v4473_v57 = vadd.f32 %v5883_v54, %v8356_v55  ;;  %v4588_v54 = vrot.slane %v4524_v50, %v8355_v38 }
 0xf08   : > { %v4467_v44 = vpop.f32.mrf.mxu0 }
 0xf09   : > { %v7763_v59 = vmax.f32 %v4473_v57, 0.0  ;;  %v4468_v2 = vadd.f32 %v4467_v44, %v8357_v28 }
 0xf0a   : > { %v4898_v55 = vpop.f32.mrf.mxu0 }
 0xf0b   : > { %v7771_v37 = vmax.f32 %v4468_v2, 0.0  ;;  %v4899_v0 = vadd.f32 %v4898_v55, %v8358_v41  ;;  %v4688_v7 = vmul.f32 %v4640_v11, %v7763_v59  ;;  %v4672_v57 = vmul.f32 %v4608_v31, %v7763_v59 }
 0xf0c   : > { %v5895_v44 = vpop.f32.mrf.mxu0  ;;  %v4686_v36 = vmul.f32 %v4636_v18, %v7763_v59  ;;  %v4670_v50 = vmul.f32 %v4604_v3, %v7763_v59  ;;  %v4684_v5 = vmul.f32 %v4632_v9, %v7763_v59  ;;  %v4668_v48 = vmul.f32 %v4600_v23, %v7763_v59 }
 0xf0d   : > { %v4902_v28 = vmax.f32 %v4899_v0, 0.0  ;;  %v7781_v32 = vadd.f32 %v4688_v7, %v7548_v16  ;;  %v7784_v2 = vadd.f32 %v4672_v57, %v7551_v63  ;;  %v4687_v55 = vmul.f32 %v4640_v11, %v7771_v37 }
 0xf0e   : > { %v4671_v41 = vmul.f32 %v4608_v31, %v7771_v37  ;;  %v7789_v44 = vadd.f32 %v4686_v36, %v7556_v47  ;;  %v7792_v38 = vadd.f32 %v4670_v50, %v7559_v39  ;;  %v4685_v22 = vmul.f32 %v4636_v18, %v7771_v37 }
 0xf0f   : > { %5897 = vmatpush3.msra.mxu1 %v4902_v28  ;;  %v7796_v0 = vadd.f32 %v4687_v55, %v7563_v43  ;;  %v4669_v16 = vmul.f32 %v4604_v3, %v7771_v37  ;;  %v7800_v63 = vadd.f32 %v4684_v5, %v7567_v45  ;;  %v7803_v11 = vadd.f32 %v4668_v48, %v7570_v56  ;;  %v8360_v48 = vld [vmem:[#allocation4_spill] sm:$0xff]  ;;  %v8362_v55 = vld [vmem:[#allocation3_spill] sm:$0xff] }
 0xf10   : > { %5899 = vmatmul.mubr.msk.f32.vlgmr.msra.gmra.mxu1 %vm868_vm15, %v7335_v10  ;;  %v7808_v39 = vadd.f32 %v4671_v41, %v7579_v4  ;;  %v7811_v47 = vadd.f32 %v4685_v22, %v7582_v35  ;;  %v4683_v43 = vmul.f32 %v4632_v9, %v7771_v37  ;;  %v4667_v18 = vmul.f32 %v4600_v23, %v7771_v37  ;;  %v8364_v41 = vld [vmem:[#allocation24_spill] sm:$0xff] }
 0xf11   : > { %v7816_v28 = vadd.f32 %v4669_v16, %v7592_v12  ;;  %v4682_v45 = vmul.f32 %v4628_v60, %v7763_v59  ;;  %v4666_v56 = vmul.f32 %v4596_v51, %v7763_v59  ;;  %v4681_v31 = vmul.f32 %v4628_v60, %v7771_v37 }
 0xf12   : > { %v7822_v10 = vadd.f32 %v4683_v43, %v7601_v1  ;;  %v7825_v4 = vadd.f32 %v4667_v18, %v7611_v58  ;;  %v4665_v35 = vmul.f32 %v4596_v51, %v7771_v37  ;;  %v4680_v22 = vmul.f32 %v4624_v53, %v7763_v59  ;;  %v8367_v18 = vld [vmem:[#allocation31_spill] sm:$0xff] }
 0xf13   : > { %v7830_v9 = vadd.f32 %v4682_v45, %v7614_v14  ;;  %v7833_v12 = vadd.f32 %v4666_v56, %v7623_v62  ;;  %v7836_v23 = vadd.f32 %v4681_v31, %v7626_v8  ;;  %v4664_v60 = vmul.f32 %v4592_v25, %v7763_v59  ;;  %v8368_v56 = vld [vmem:[#allocation26_spill] sm:$0xff] }
 0xf14   : > { %v7840_v1 = vadd.f32 %v4665_v35, %v7629_v27  ;;  %v7843_v58 = vadd.f32 %v4680_v22, %v7634_v49  ;;  %v4679_v51 = vmul.f32 %v4624_v53, %v7771_v37  ;;  %v4663_v3 = vmul.f32 %v4592_v25, %v7771_v37 }
 0xf15   : > { %v7848_v14 = vadd.f32 %v4664_v60, %v7637_v61  ;;  %v4678_v62 = vmul.f32 %v7748_v15, %v7763_v59  ;;  %v4662_v8 = vmul.f32 %v4588_v54, %v7763_v59  ;;  %v4677_v7 = vmul.f32 %v7748_v15, %v7771_v37 }
 0xf16   : > { %v7856_v27 = vadd.f32 %v4679_v51, %v7649_v29  ;;  %v7859_v49 = vadd.f32 %v4663_v3, %v7652_v6  ;;  %v4661_v53 = vmul.f32 %v4588_v54, %v7771_v37  ;;  %v4676_v61 = vmul.f32 %v7745_v34, %v7763_v59 }
 0xf17   : > { %v7865_v25 = vadd.f32 %v4678_v62, %v7659_v40  ;;  %v7868_v57 = vadd.f32 %v4662_v8, %v7662_v42  ;;  %v7871_v36 = vadd.f32 %v4677_v7, %v7665_v19  ;;  %v4660_v29 = vmul.f32 %v7759_v52, %v7763_v59 }
 0xf18   : > { %v7876_v6 = vadd.f32 %v4661_v53, %v7668_v30  ;;  %v7879_v15 = vadd.f32 %v4676_v61, %v7671_v26  ;;  %v4675_v54 = vmul.f32 %v7745_v34, %v7771_v37  ;;  %v4659_v40 = vmul.f32 %v7759_v52, %v7771_v37 }
 0xf19   : > { %v7886_v42 = vadd.f32 %v4660_v29, %v7674_v46  ;;  %v4674_v19 = vmul.f32 %v7742_v20, %v7763_v59  ;;  %v4658_v50 = vmul.f32 %v7756_v24, %v7763_v59  ;;  %v4673_v30 = vmul.f32 %v7742_v20, %v7771_v37 }
 0xf1a   : > { %v7895_v26 = vadd.f32 %v4675_v54, %v7689_v33  ;;  %v7898_v34 = vadd.f32 %v4659_v40, %v7692_v13  ;;  %v4657_v52 = vmul.f32 %v7756_v24, %v7771_v37  ;;  %v8365_v37 = vld [vmem:[#allocation38_spill] sm:$0xff]  ;;  %v5052_v45 = vcombine.high %v8367_v18, %v8367_v18 }
 0xf1b   : > { %v7903_v46 = vadd.f32 %v4674_v19, %v7695_v21  ;;  %v7906_v5 = vadd.f32 %v4658_v50, %v7698_v17  ;;  %v7909_v59 = vadd.f32 %v4673_v30, %v8360_v48  ;;  %v5295_v21 = vld [vmem:[%s8080_s12 + $0x8] sm:$0xff]  ;;  %v8366_v17 = vld [vmem:[#allocation30_spill] sm:$0xff]  ;;  %v5059_v60 = vrot.slane %v8367_v18, %v8368_v56 }
 0xf1c   : > { %v7912_v20 = vadd.f32 %v4657_v52, %v8362_v55  ;;  %5374 = vmatprep.mubr.f32.mxu1 %v5295_v21  ;;  %v5101_v24 = vcombine.high %v8366_v17, %v8366_v17  ;;  %v5108_v31 = vrot.slane %v8366_v17, %v8368_v56  ;;  %v5066_v22 = vrot.slane %v5052_v45, %v8368_v56  ;;  %v8370_v45 = vld [vmem:[#allocation27_spill] sm:$0xff] }
 0xf1d   : > { %8359 = vst [vmem:[#allocation32_spill] sm:$0xff] %v7906_v5  ;;  %8361 = vst [vmem:[#allocation8_spill] sm:$0xff] %v7909_v59  ;;  %v5067_v7 = vcombine.high %v5059_v60, %v5059_v60  ;;  %v5075_v54 = vrot.slane %v5059_v60, %v8368_v56 }
 0xf1e   : > { %8363 = vst [vmem:[#allocation14_spill] sm:$0xff] %v7912_v20  ;;  %v5115_v35 = vrot.slane %v5101_v24, %v8368_v56  ;;  %v5116_v51 = vcombine.high %v5108_v31, %v5108_v31  ;;  %v5068_v62 = vcombine.high %v5066_v22, %v5066_v22  ;;  %v5124_v8 = vrot.slane %v5108_v31, %v8368_v56 }
 0xf1f   : > { %v5082_v50 = vrot.slane %v5066_v22, %v8368_v56  ;;  %v5089_v30 = vrot.slane %v5067_v7, %v8368_v56 }
 0xf20   : > { %v5117_v3 = vcombine.high %v5115_v35, %v5115_v35  ;;  %v5131_v53 = vrot.slane %v5115_v35, %v8368_v56  ;;  %v5138_v61 = vrot.slane %v5116_v51, %v8368_v56  ;;  %v5096_v40 = vrot.slane %v5068_v62, %v8368_v56 }
 0xf21   : > { %v5146_v19 = vcombine.high %v5124_v8, %v5124_v8  ;;  %v5098_v21 = vcombine.high %v5082_v50, %v5082_v50  ;;  %v5099_v17 = vcombine.high %v5089_v30, %v5089_v30 }
 0xf22   : > { %v5145_v29 = vrot.slane %v5117_v3, %v8368_v56  ;;  %v5147_v52 = vcombine.high %v5131_v53, %v5131_v53  ;;  %v5148_v48 = vcombine.high %v5138_v61, %v5138_v61 }
 0xf24   : > { %v5149_v55 = vcombine.high %v5145_v29, %v5145_v29 }
 0xfd0   : > { %v4969_v33 = vpop.f32.mrf.mxu1 }
 0xfd1   : > { %v4970_v16 = vadd.f32 %v4969_v33, %v8364_v41  ;;  %v8369_v33 = vld [vmem:[#allocation28_spill] sm:$0xff] }
 0xfd2   : > { %v5900_v13 = vpop.f32.mrf.mxu1  ;;  %v7939_v41 = vrot.slane %v5124_v8, %v8369_v33  ;;  %v5201_v18 = vrot.slane %v5131_v53, %v8369_v33  ;;  %v5209_v31 = vrot.slane %v5147_v52, %v8369_v33  ;;  %v5205_v35 = vrot.slane %v5145_v29, %v8369_v33  ;;  %v8371_v53 = vld [vmem:[#allocation29_spill] sm:$0xff] }
 0xfd3   : > { %v4973_v43 = vmax.f32 %v4970_v16, 0.0  ;;  %v5097_v16 = vcombine.high %v5075_v54, %v5075_v54  ;;  %v5100_v13 = vcombine.high %v5096_v40, %v5096_v40  ;;  %v7952_v22 = vrot.slane %v5075_v54, %v8369_v33 }
 0xfd4   : > { %v7955_v60 = vrot.slane %v5089_v30, %v8369_v33  ;;  %v5213_v3 = vrot.slane %v5149_v55, %v8369_v33  ;;  %v5197_v62 = vrot.slane %v5148_v48, %v8369_v33  ;;  %v5169_v29 = vrot.slane %v5082_v50, %v8369_v33 }
 0xfd5   : > { %5901 = vmatprep.subr.mxu0 %v4973_v43  ;;  %v5161_v8 = vrot.slane %v5097_v16, %v8369_v33  ;;  %v5177_v54 = vrot.slane %v5098_v21, %v8369_v33  ;;  %v5173_v30 = vrot.slane %v5096_v40, %v8369_v33  ;;  %v5165_v52 = vrot.slane %v5099_v17, %v8369_v33 }
 0xfd6   : > { %5902 = vmatpush3.msra.mxu0 %v4973_v43  ;;  %v7942_v43 = vrot.slane %v5138_v61, %v8369_v33 }
 0xfd7   : > { %5904 = vmatmul.mubr.msk.f32.vlgmr.msra.gmra.mxu0 %vm868_vm15, %v8365_v37  ;;  %v7945_v37 = vrot.slane %v5146_v19, %v8369_v33  ;;  %v5181_v19 = vrot.slane %v5100_v13, %v8369_v33 }
0x1097   : > { %v5905_v24 = vpop.f32.mrf.mxu0 }
0x1098   : > { %v5046_v56 = vadd.f32 %v5905_v24, %v8370_v45 }
0x1099   : > { %v5040_v51 = vpop.f32.mrf.mxu0 }
0x109a   : > { %v7960_v7 = vmax.f32 %v5046_v56, 0.0  ;;  %v5041_v61 = vadd.f32 %v5040_v51, %v8371_v53 }
0x109c   : > { %v7968_v24 = vmax.f32 %v5041_v61, 0.0  ;;  %v5261_v48 = vmul.f32 %v5213_v3, %v7960_v7  ;;  %v5245_v55 = vmul.f32 %v5181_v19, %v7960_v7  ;;  %v5259_v16 = vmul.f32 %v5209_v31, %v7960_v7 }
0x109d   : > { %v5243_v45 = vmul.f32 %v5177_v54, %v7960_v7  ;;  %v5257_v13 = vmul.f32 %v5205_v35, %v7960_v7  ;;  %v5241_v50 = vmul.f32 %v5173_v30, %v7960_v7  ;;  %v5255_v21 = vmul.f32 %v5201_v18, %v7960_v7 }
0x109e   : > { %v5293_v40 = vadd.f32 %v5261_v48, %v7781_v32  ;;  %v5277_v33 = vadd.f32 %v5245_v55, %v7784_v2  ;;  %v5260_v17 = vmul.f32 %v5213_v3, %v7968_v24  ;;  %v5244_v56 = vmul.f32 %v5181_v19, %v7968_v24 }
0x109f   : > { %v5291_v51 = vadd.f32 %v5259_v16, %v7789_v44  ;;  %v5275_v53 = vadd.f32 %v5243_v45, %v7792_v38  ;;  %v5258_v61 = vmul.f32 %v5209_v31, %v7968_v24  ;;  %v5242_v20 = vmul.f32 %v5177_v54, %v7968_v24  ;;  %v8373_v45 = vld [vmem:[#allocation8_spill] sm:$0xff] }
0x10a0   : > { %5687 = vmatprep.subr.mxu1 %v5293_v40  ;;  %v5292_v59 = vadd.f32 %v5260_v17, %v7796_v0  ;;  %v5276_v5 = vadd.f32 %v5244_v56, %v7808_v39  ;;  %v5289_v32 = vadd.f32 %v5257_v13, %v7800_v63  ;;  %v5273_v2 = vadd.f32 %v5241_v50, %v7803_v11 }
0x10a1   : > { %5688 = vmatpush3.msra.mxu1 %v5277_v33  ;;  %v5290_v3 = vadd.f32 %v5258_v61, %v7811_v47  ;;  %v5274_v44 = vadd.f32 %v5242_v20, %v7816_v28  ;;  %v5256_v38 = vmul.f32 %v5205_v35, %v7968_v24  ;;  %v5240_v31 = vmul.f32 %v5173_v30, %v7968_v24 }
0x10a2   : > { %5689 = vmatprep.subr.mxu1 %v5292_v59  ;;  %v5287_v19 = vadd.f32 %v5255_v21, %v7830_v9  ;;  %v5239_v0 = vmul.f32 %v5169_v29, %v7960_v7  ;;  %v5254_v39 = vmul.f32 %v5201_v18, %v7968_v24  ;;  %v5238_v63 = vmul.f32 %v5169_v29, %v7968_v24 }
0x10a3   : > { %5690 = vmatpush3.msra.mxu1 %v5276_v5  ;;  %v5288_v11 = vadd.f32 %v5256_v38, %v7822_v10  ;;  %v5272_v47 = vadd.f32 %v5240_v31, %v7825_v4  ;;  %v5253_v28 = vmul.f32 %v5197_v62, %v7960_v7  ;;  %v5237_v20 = vmul.f32 %v5165_v52, %v7960_v7 }
0x10a4   : > { %5691 = vmatprep.subr.mxu1 %v5291_v51  ;;  %v5271_v59 = vadd.f32 %v5239_v0, %v7833_v12  ;;  %v5286_v9 = vadd.f32 %v5254_v39, %v7836_v23  ;;  %v5270_v35 = vadd.f32 %v5238_v63, %v7840_v1  ;;  %v5252_v18 = vmul.f32 %v5197_v62, %v7968_v24 }
0x10a5   : > { %5692 = vmatpush3.msra.mxu1 %v5275_v53  ;;  %v5285_v5 = vadd.f32 %v5253_v28, %v7843_v58  ;;  %v5269_v10 = vadd.f32 %v5237_v20, %v7848_v14  ;;  %v5236_v4 = vmul.f32 %v5165_v52, %v7968_v24  ;;  %v5251_v29 = vmul.f32 %v7945_v37, %v7960_v7 }
0x10a6   : > { %5693 = vmatprep.subr.mxu1 %v5290_v3  ;;  %v5284_v54 = vadd.f32 %v5252_v18, %v7856_v27  ;;  %v5235_v12 = vmul.f32 %v5161_v8, %v7960_v7  ;;  %v5250_v23 = vmul.f32 %v7945_v37, %v7968_v24  ;;  %v5234_v1 = vmul.f32 %v5161_v8, %v7968_v24 }
0x10a7   : > { %5694 = vmatpush3.msra.mxu1 %v5274_v44  ;;  %v5268_v58 = vadd.f32 %v5236_v4, %v7859_v49  ;;  %v5283_v14 = vadd.f32 %v5251_v29, %v7865_v25  ;;  %v5249_v62 = vmul.f32 %v7942_v43, %v7960_v7  ;;  %v5233_v30 = vmul.f32 %v7955_v60, %v7960_v7 }
0x10a8   : > { %5695 = vmatprep.subr.mxu1 %v5289_v32  ;;  %v5267_v27 = vadd.f32 %v5235_v12, %v7868_v57  ;;  %v5282_v52 = vadd.f32 %v5250_v23, %v7871_v36  ;;  %v5266_v37 = vadd.f32 %v5234_v1, %v7876_v6  ;;  %v5248_v8 = vmul.f32 %v7942_v43, %v7968_v24 }
0x10a9   : > { %5696 = vmatpush3.msra.mxu1 %v5273_v2  ;;  %v5281_v49 = vadd.f32 %v5249_v62, %v7879_v15  ;;  %v5265_v25 = vadd.f32 %v5233_v30, %v7886_v42  ;;  %v5232_v48 = vmul.f32 %v7955_v60, %v7968_v24  ;;  %v5247_v55 = vmul.f32 %v7939_v41, %v7960_v7  ;;  %v8372_v60 = vld [vmem:[#allocation32_spill] sm:$0xff] }
0x10aa   : > { %5697 = vmatprep.subr.mxu1 %v5288_v11  ;;  %v5280_v57 = vadd.f32 %v5248_v8, %v7895_v26  ;;  %v5231_v36 = vmul.f32 %v7952_v22, %v7960_v7  ;;  %v5246_v6 = vmul.f32 %v7939_v41, %v7968_v24  ;;  %v5230_v15 = vmul.f32 %v7952_v22, %v7968_v24  ;;  %v8374_v26 = vld [vmem:[#allocation14_spill] sm:$0xff]  ;;  %v5296_v41 = vld [vmem:[%s8080_s12 + $0x10] sm:$0xff]  ;;  %v5303_v7 = vpop.permute.xlu1 %5302 }
0x10ab   : > { %5698 = vmatpush3.msra.mxu1 %v5272_v47  ;;  %v5264_v42 = vadd.f32 %v5232_v48, %v7898_v34  ;;  %v5279_v43 = vadd.f32 %v5247_v55, %v7903_v46  ;;  %v5294_v34 = vld [vmem:[%s8080_s12] sm:$0xff]  ;;  %v5297_v46 = vld [vmem:[%s8080_s12 + $0x18] sm:$0xff] }
0x10ac   : > { %5699 = vmatprep.subr.mxu1 %v5287_v19  ;;  %v5263_v16 = vadd.f32 %v5231_v36, %v8372_v60  ;;  %v5278_v13 = vadd.f32 %v5246_v6, %v8373_v45  ;;  %v5262_v50 = vadd.f32 %v5230_v15, %v8374_v26 }
0x10ad   : > { %5700 = vmatpush3.msra.mxu1 %v5271_v59 }
0x10ae   : > { %5701 = vmatprep.subr.mxu1 %v5286_v9  ;;  %v5308_v51 = vpop.permute.xlu1 %5307 }
0x10af   : > { %5702 = vmatpush3.msra.mxu1 %v5270_v35 }
0x10b0   : > { %5703 = vmatprep.subr.mxu1 %v5285_v5 }
0x10b1   : > { %5704 = vmatpush3.msra.mxu1 %v5269_v10 }
0x10b2   : > { %5705 = vmatprep.subr.mxu1 %v5284_v54 }
0x10b3   : > { %5706 = vmatpush3.msra.mxu1 %v5268_v58 }
0x10b4   : > { %5707 = vmatprep.subr.mxu1 %v5283_v14 }
0x10b5   : > { %5708 = vmatpush3.msra.mxu1 %v5267_v27 }
0x10b6   : > { %5709 = vmatprep.subr.mxu1 %v5282_v52 }
0x10b7   : > { %5710 = vmatpush3.msra.mxu1 %v5266_v37 }
0x10b8   : > { %5711 = vmatprep.subr.mxu1 %v5281_v49 }
0x10b9   : > { %5712 = vmatpush3.msra.mxu1 %v5265_v25 }
0x10ba   : > { %5713 = vmatprep.subr.mxu1 %v5280_v57 }
0x10bb   : > { %5714 = vmatpush3.msra.mxu1 %v5264_v42 }
0x10bc   : > { %5715 = vmatprep.subr.mxu1 %v5279_v43 }
0x10bd   : > { %5716 = vmatpush3.msra.mxu1 %v5263_v16 }
0x10be   : > { %5717 = vmatprep.subr.mxu1 %v5278_v13 }
0x10bf   : > { %5718 = vmatpush3.msra.mxu1 %v5262_v50 }
0x10c0   : > { %5375 = vmatmul.mubr.f32.vlgmr.msra.gmra.mxu1 %v5294_v34 }
0x10c1   : > { %5379 = vmatprep.mubr.f32.mxu1 %v5297_v46 }
0x10c4   : > { %5380 = vmatmul.mubr.f32.gmra.mxu1 %v5296_v41 }
0x1180   : > { %v5719_v22 = vpop.f32.mrf.mxu1 }
0x1182   : > { %v5720_v24 = vpop.f32.mrf.mxu1 }
0x1183   : > { %v5721_v21 = vadd.f32 %v5720_v24, %v5719_v22 }
0x1184   : > { %v5722_v40 = vpop.f32.mrf.mxu1 }
0x1185   : > { %v5377_v33 = vadd.f32 %v5721_v21, %v5303_v7 }
0x1186   : > { %v5723_v17 = vpop.f32.mrf.mxu1 }
0x1187   : > { %5385 = vst.msk [vmem:[%s552_s23] sm:$0xff] %vm665_vm2, %v5377_v33  ;;  %v5724_v56 = vadd.f32 %v5723_v17, %v5722_v40 }
0x1189   : > { %v5382_v53 = vadd.f32 %v5724_v56, %v5308_v51 }
0x118b   : > { %5386 = vst.msk [vmem:[%s552_s23 + $0x8] sm:$0xff] %vm665_vm2, %v5382_v53 }
0x118c PF: > { %s24_s29 = sadd.s32 1, %s5963_s29   ;;  %s8375_s27 = smov %s5959_s28 }
0x118d   : > { %p21_p5 = scmp.ge.s32.totalorder %s24_s29, 4   ;;  %s8376_s28 = smov %s8378_s30 }
0x118f   :  { %23 = sbr.rel (!%p21_p5) target bundleno = 2 (0x2), region = 115 }

</bundles_post_ra>
